<compile_context>
chip_gen: v5e
topology: v5e:2x2
jax: 0.10.0
libtpu: 0.0.40
codegen_flags: <defaults>
</compile_context>

<pallas_src>
import jax
import jax.numpy as jnp
from jax.experimental import pallas as pl
from jax.experimental.pallas import tpu as pltpu

# ---- constants from the PyTorch module ----
TIMESTEP_F = 2.5            # quantization level (Quantization / Clamp_q_)
TIMESTEP = 2.5
T_REDUCE = 1.0
MAX_1 = T_REDUCE / TIMESTEP  # 0.4
MIN_1 = 0.0
BN_EPS = 1e-5

# cfg['o'] : (out_channels, padding) ; third tuple element is unused by forward
CFG_O = [(128, 1), (128, 1), 'M', (256, 1), (256, 1), 'M',
         (512, 1), (512, 1), 'M', (1024, 0), 'M']


def _round_up(x, m):
    return (x + m - 1) // m * m


# --------------------------------------------------------------------------
# Kernel 1: direct 3x3 conv (+ folded BatchNorm + Clamp_q_), no HBM im2col.
#   Grid: (Cout_tiles, N)   -- Cout outermost so each weight tile is DMA'd once.
#   Per step: one batch element's padded activation (VMEM resident) is dotted
#   against the 9 (Cin, tn) weight taps; the dx shift is applied on the output
#   side so all reshapes keep the sublane dim a multiple of 8.
# --------------------------------------------------------------------------
def _conv3x3_bnq_kernel(x_ref, w_ref, b_ref, o_ref):
    # x_ref: (1, Hp, Wpp, Cin) f32   padded activation, one batch element
    # w_ref: (3, 3, Cin, tn)   bf16  conv weight with BN scale folded in
    # b_ref: (1, tn)           f32   folded conv-bias + BN shift
    # o_ref: (1, Ho, Wo, tn)   f32   quantized activation
    _, Ho, Wo, tn = o_ref.shape
    _, Hp, Wpp, Cin = x_ref.shape

    xv = x_ref[...]                                   # whole block, stays in VMEM
    acc = jnp.zeros((Ho, Wo, tn), jnp.float32)
    for dy in range(3):
        # (Ho, Wpp, Cin) -> (Ho*Wpp, Cin): Wpp % 8 == 0 so this merge is layout-clean.
        lhs = xv[0, dy:dy + Ho, :, :].reshape(Ho * Wpp, Cin).astype(jnp.bfloat16)
        for dx in range(3):
            p = jnp.dot(lhs, w_ref[dy, dx], preferred_element_type=jnp.float32)
            p = p.reshape(Ho, Wpp, tn)
            acc = acc + p[:, dx:dx + Wo, :]           # output-side dx shift

    y = acc + b_ref[...]                              # (1, tn) broadcasts
    y = jnp.clip(y, MIN_1, MAX_1)                     # Clamp_q_: clamp(0, 0.4)
    y = jnp.floor(y * TIMESTEP_F) * (1.0 / TIMESTEP_F)  # Quantization (forward)
    o_ref[...] = y.reshape(1, Ho, Wo, tn)


def conv3x3_bn_clampq(x, w, bias, pad):
    """x: (N,H,W,Cin) f32; w: (3,3,Cin,Cout) bf16 (BN scale folded); bias: (1,Cout) f32."""
    N, H, W, Cin = x.shape
    Cout = w.shape[-1]
    assert w.shape[2] == Cin
    Ho, Wo = H + 2 * pad - 2, W + 2 * pad - 2
    Hp, Wp = H + 2 * pad, W + 2 * pad
    Wpp = _round_up(Wp, 8)                            # keep sublane dim 8-aligned
    xp = jnp.pad(x, ((0, 0), (pad, pad), (pad, pad + Wpp - Wp), (0, 0)))

    tn = min(256, Cout)
    assert Cout % tn == 0
    nj = Cout // tn

    out = pl.pallas_call(
        _conv3x3_bnq_kernel,
        out_shape=jax.ShapeDtypeStruct((N, Ho, Wo, Cout), jnp.float32),
        grid=(nj, N),                                 # Cout tile outer, batch inner
        in_specs=[
            pl.BlockSpec((1, Hp, Wpp, Cin), lambda j, i: (i, 0, 0, 0)),
            pl.BlockSpec((3, 3, Cin, tn), lambda j, i: (0, 0, 0, j)),
            pl.BlockSpec((1, tn), lambda j, i: (0, j)),
        ],
        out_specs=pl.BlockSpec((1, Ho, Wo, tn), lambda j, i: (i, 0, 0, j)),
        compiler_params=pltpu.CompilerParams(
            dimension_semantics=("parallel", "parallel"),
            vmem_limit_bytes=40 * 1024 * 1024,
        ),
    )(xp, w, bias)
    return out


# --------------------------------------------------------------------------
# Kernel 2: AvgPool2d(2,2) + Clamp_q_new_ (triple quantize, channel concat
#           in order (x3, x1, x2)).  Single input, no strided HBM gathers:
#           the wrapper does a free row-major reshape so the 2x2 window
#           reduces via a leading-dim select + two lane slices.
# --------------------------------------------------------------------------
def _pool_quant3_kernel(x_ref, o_ref):
    # x_ref: (1, H2, 2, W2, 2*C) f32 ; o_ref: (1, H2, W2, 3*C) f32
    C = x_ref.shape[-1] // 2
    v = x_ref[...]
    rows = v[:, :, 0, :, :] + v[:, :, 1, :, :]            # sum over the 2 rows
    avg = (rows[..., :C] + rows[..., C:]) * 0.25          # sum over the 2 cols, /4

    ts = TIMESTEP
    x1 = jnp.clip(jnp.floor(avg * ts) * (1.0 / ts), MIN_1, MAX_1)

    c2 = T_REDUCE / (ts + 1.0)
    x2 = jnp.clip(jnp.floor(avg * (ts + 1.0)) * (1.0 / (ts + 1.0)), MIN_1, c2)
    x2 = jnp.where(x2 == jnp.float32(c2), jnp.float32(MAX_1), x2)

    c3 = T_REDUCE / (ts - 1.0)
    x3 = jnp.clip(jnp.floor(avg * (ts - 1.0)) * (1.0 / (ts - 1.0)), MIN_1, c3)
    x3 = jnp.where(x3 == jnp.float32(c3), jnp.float32(MAX_1), x3)

    o_ref[:, :, :, 0:C] = x3
    o_ref[:, :, :, C:2 * C] = x1
    o_ref[:, :, :, 2 * C:3 * C] = x2


def avgpool2_clampq_new(x):
    """x: (N,H,W,C) with even H,W and C % 128 == 0 -> (N, H/2, W/2, 3C)."""
    N, H, W, C = x.shape
    assert H % 2 == 0 and W % 2 == 0 and C % 128 == 0
    H2, W2 = H // 2, W // 2
    xr = x.reshape(N, H2, 2, W2, 2 * C)                   # free (row-major) reshape
    return pl.pallas_call(
        _pool_quant3_kernel,
        out_shape=jax.ShapeDtypeStruct((N, H2, W2, 3 * C), jnp.float32),
        grid=(N,),
        in_specs=[pl.BlockSpec((1, H2, 2, W2, 2 * C), lambda i: (i, 0, 0, 0, 0))],
        out_specs=pl.BlockSpec((1, H2, W2, 3 * C), lambda i: (i, 0, 0, 0)),
        compiler_params=pltpu.CompilerParams(
            dimension_semantics=("parallel",)),
    )(xr)


# --------------------------------------------------------------------------
# Kernel 3: fused final AvgPool2d(2,2) + Clamp_q_new_ + flatten + Linear(3072,10)
#           (classifier output padded to 128 lanes; wrapper slices [:, :10]).
# --------------------------------------------------------------------------
def _pool_quant3_linear_kernel(x_ref, w_ref, b_ref, o_ref):
    # x_ref: (N, 4*C) f32  = conv7 output (N,2,2,C) flattened (free reshape)
    # w_ref: (3, C, NOUT_PAD) f32  classifier weight row groups for (x3, x1, x2)
    # b_ref: (1, NOUT_PAD) f32 ; o_ref: (N, NOUT_PAD) f32
    C = w_ref.shape[1]
    v = x_ref[...]
    rows = v[:, :2 * C] + v[:, 2 * C:]                    # sum over h
    avg = (rows[:, :C] + rows[:, C:]) * 0.25              # sum over w, /4

    ts = TIMESTEP
    x1 = jnp.clip(jnp.floor(avg * ts) * (1.0 / ts), MIN_1, MAX_1)
    c2 = T_REDUCE / (ts + 1.0)
    x2 = jnp.clip(jnp.floor(avg * (ts + 1.0)) * (1.0 / (ts + 1.0)), MIN_1, c2)
    x2 = jnp.where(x2 == jnp.float32(c2), jnp.float32(MAX_1), x2)
    c3 = T_REDUCE / (ts - 1.0)
    x3 = jnp.clip(jnp.floor(avg * (ts - 1.0)) * (1.0 / (ts - 1.0)), MIN_1, c3)
    x3 = jnp.where(x3 == jnp.float32(c3), jnp.float32(MAX_1), x3)

    out = (jnp.dot(x3, w_ref[0], preferred_element_type=jnp.float32)
           + jnp.dot(x1, w_ref[1], preferred_element_type=jnp.float32)
           + jnp.dot(x2, w_ref[2], preferred_element_type=jnp.float32)
           + b_ref[...])
    o_ref[...] = out


def pool_quant_linear(x, w3, b):
    """x: (N,2,2,C) conv7 output; returns (N, NOUT_PAD) padded logits."""
    N, Hh, Ww, C = x.shape
    assert Hh == 2 and Ww == 2 and w3.shape == (3, C, w3.shape[-1])
    xf = x.reshape(N, 4 * C)                              # free (row-major) reshape
    return pl.pallas_call(
        _pool_quant3_linear_kernel,
        out_shape=jax.ShapeDtypeStruct((N, w3.shape[-1]), jnp.float32),
    )(xf, w3, b)


# --------------------------------------------------------------------------
# Parameter init (deterministic, mirrors initialize_weights + PyTorch defaults)
# --------------------------------------------------------------------------
def init_params(key):
    feat_params = []
    in_ch = 18
    for item in CFG_O:
        if item == 'M':
            feat_params.append(('pool', None))
            in_ch *= 3
        else:
            out_ch, pad = item
            key, kw = jax.random.split(key)
            fan_in = in_ch * 9
            # kaiming_normal_(fan_in, relu): std = sqrt(2 / fan_in)
            w = jax.random.normal(kw, (3, 3, in_ch, out_ch), jnp.float32) \
                * jnp.sqrt(2.0 / fan_in)
            conv_b = jnp.zeros((out_ch,), jnp.float32)
            # BatchNorm2d eval-mode defaults: gamma=1, beta=0, mean=0, var=1
            gamma = jnp.ones((out_ch,), jnp.float32)
            beta = jnp.zeros((out_ch,), jnp.float32)
            mean = jnp.zeros((out_ch,), jnp.float32)
            var = jnp.ones((out_ch,), jnp.float32)
            scale = gamma / jnp.sqrt(var + BN_EPS)
            bias = (scale * (conv_b - mean) + beta).reshape(1, out_ch)
            # Fold BN scale into the weight, store bf16 (halves weight HBM traffic;
            # f32 accumulation + f32 epilogue keep clamp/floor decisions in f32).
            # NOTE: PyTorch weights (Cout,Cin,kh,kw) must be permuted to
            # (kh,kw,Cin,Cout) before this fold when importing real checkpoints.
            w_eff = (w * scale.reshape(1, 1, 1, out_ch)).astype(jnp.bfloat16)
            feat_params.append(('conv', (w_eff, bias, pad)))
            in_ch = out_ch

    # classifier5 = nn.Linear(1024*3, 10) -- PyTorch default init (deterministic);
    # pad output dim 10 -> 128 for lane-dense stores, split rows for (x3, x1, x2).
    key, kw, kb = jax.random.split(key, 3)
    bound = 1.0 / (3072.0 ** 0.5)
    lw = jax.random.uniform(kw, (3072, 10), jnp.float32, -bound, bound)
    lb = jax.random.uniform(kb, (10,), jnp.float32, -bound, bound)
    lw_p = jnp.zeros((3072, 128), jnp.float32).at[:, :10].set(lw).reshape(3, 1024, 128)
    lb_p = jnp.zeros((1, 128), jnp.float32).at[0, :10].set(lb)
    return feat_params, (lw_p, lb_p)


# --------------------------------------------------------------------------
# Full forward (matches VGG_o_2.forward)
# --------------------------------------------------------------------------
def vgg_o_2_forward(x_nchw, feat_params, cls_params):
    x = jnp.transpose(x_nchw, (0, 2, 3, 1))  # NCHW -> NHWC
    n_feat = len(feat_params)
    for li, (kind, p) in enumerate(feat_params):
        if kind == 'conv':
            w, bias, pad = p
            x = conv3x3_bn_clampq(x, w, bias, pad)
            # TODO(synk): nn.Dropout2d(0.1) is identity in eval mode (no-op here).
        else:
            if li == n_feat - 1:
                # final AvgPool2d(2,2)+Clamp_q_new_ is fused into the classifier kernel
                continue
            x = avgpool2_clampq_new(x)
    # trailing nn.AvgPool2d(1,1) is identity; spatial is 1x1 after the fused pool,
    # so NHWC/NCHW flatten orders coincide.
    lw, lb = cls_params
    out = pool_quant_linear(x, lw, lb)
    return out[:, :10]


if __name__ == "__main__":
    key = jax.random.PRNGKey(0)
    pkey, xkey = jax.random.split(key)
    feat_params, cls_params = init_params(pkey)
    # VGG_o_2('o') requires in_channels=18 and 32x32 spatial (classifier is 3072->10)
    x = jax.random.normal(xkey, (2, 18, 32, 32), jnp.float32)
    out = vgg_o_2_forward(x, feat_params, cls_params)
    out = jax.block_until_ready(out)
    assert out.shape == (2, 10) and out.dtype == jnp.float32
    print("KERNEL_OK")
</pallas_src>

<mosaic_0001>
module attributes {stable_mosaic.version = 11 : i64} {
  func.func @_conv3x3_bnq_kernel(%arg0: i32, %arg1: i32, %arg2: memref<1x34x40x18xf32, #tpu.memory_space<vmem>>, %arg3: memref<3x3x18x128xbf16, #tpu.memory_space<vmem>>, %arg4: memref<1x128xf32, #tpu.memory_space<vmem>>, %arg5: memref<1x32x32x128xf32, #tpu.memory_space<vmem>>) attributes {dimension_semantics = [#tpu.dimension_semantics<parallel>, #tpu.dimension_semantics<parallel>], iteration_bounds = array<i64: 1, 2>, scalar_prefetch = 0 : i64, scratch_operands = 0 : i64, tpu.core_type = #tpu.core_type<tc>, window_params = [{transform_indices = @transform_0, window_bounds = array<i64: 1, 34, 40, 18>}, {transform_indices = @transform_1, window_bounds = array<i64: 3, 3, 18, 128>}, {transform_indices = @transform_2, window_bounds = array<i64: 1, 128>}, {transform_indices = @transform_3, window_bounds = array<i64: 1, 32, 32, 128>}]} {
    %c0 = arith.constant 0 : index
    %c0_0 = arith.constant 0 : index
    %c0_1 = arith.constant 0 : index
    %c0_2 = arith.constant 0 : index
    %0 = vector.load %arg2[%c0, %c0_0, %c0_1, %c0_2] : memref<1x34x40x18xf32, #tpu.memory_space<vmem>>, vector<1x34x40x18xf32>
    %cst = arith.constant 0.000000e+00 : f32
    %1 = vector.broadcast %cst : f32 to vector<32x32x128xf32>
    %2 = vector.extract_strided_slice %0 {offsets = [0, 0, 0, 0], sizes = [1, 32, 40, 18], strides = [1, 1, 1, 1]} : vector<1x34x40x18xf32> to vector<1x32x40x18xf32>
    %3 = vector.shape_cast %2 : vector<1x32x40x18xf32> to vector<32x40x18xf32>
    %4 = vector.shape_cast %3 : vector<32x40x18xf32> to vector<1280x18xf32>
    %5 = arith.truncf %4 : vector<1280x18xf32> to vector<1280x18xbf16>
    %c0_3 = arith.constant 0 : index
    %c0_4 = arith.constant 0 : index
    %c0_5 = arith.constant 0 : index
    %c0_6 = arith.constant 0 : index
    %6 = vector.load %arg3[%c0_3, %c0_4, %c0_5, %c0_6] : memref<3x3x18x128xbf16, #tpu.memory_space<vmem>>, vector<1x1x18x128xbf16>
    %7 = vector.shape_cast %6 : vector<1x1x18x128xbf16> to vector<18x128xbf16>
    %cst_7 = arith.constant dense<0.000000e+00> : vector<1280x128xf32>
    %8 = tpu.matmul %5, %7, %cst_7 {dimension_numbers = #tpu.dot_dimension_numbers<[1], [0], [0], [1], [0, 0, 1, 1], [], []>} : vector<1280x18xbf16>, vector<18x128xbf16>, vector<1280x128xf32> -> vector<1280x128xf32>
    %9 = vector.shape_cast %8 : vector<1280x128xf32> to vector<32x40x128xf32>
    %10 = vector.extract_strided_slice %9 {offsets = [0, 0, 0], sizes = [32, 32, 128], strides = [1, 1, 1]} : vector<32x40x128xf32> to vector<32x32x128xf32>
    %11 = arith.addf %1, %10 : vector<32x32x128xf32>
    %c0_8 = arith.constant 0 : index
    %c1 = arith.constant 1 : index
    %c0_9 = arith.constant 0 : index
    %c0_10 = arith.constant 0 : index
    %12 = vector.load %arg3[%c0_8, %c1, %c0_9, %c0_10] : memref<3x3x18x128xbf16, #tpu.memory_space<vmem>>, vector<1x1x18x128xbf16>
    %13 = vector.shape_cast %12 : vector<1x1x18x128xbf16> to vector<18x128xbf16>
    %cst_11 = arith.constant dense<0.000000e+00> : vector<1280x128xf32>
    %14 = tpu.matmul %5, %13, %cst_11 {dimension_numbers = #tpu.dot_dimension_numbers<[1], [0], [0], [1], [0, 0, 1, 1], [], []>} : vector<1280x18xbf16>, vector<18x128xbf16>, vector<1280x128xf32> -> vector<1280x128xf32>
    %15 = vector.shape_cast %14 : vector<1280x128xf32> to vector<32x40x128xf32>
    %16 = vector.extract_strided_slice %15 {offsets = [0, 1, 0], sizes = [32, 32, 128], strides = [1, 1, 1]} : vector<32x40x128xf32> to vector<32x32x128xf32>
    %17 = arith.addf %11, %16 : vector<32x32x128xf32>
    %c0_12 = arith.constant 0 : index
    %c2 = arith.constant 2 : index
    %c0_13 = arith.constant 0 : index
    %c0_14 = arith.constant 0 : index
    %18 = vector.load %arg3[%c0_12, %c2, %c0_13, %c0_14] : memref<3x3x18x128xbf16, #tpu.memory_space<vmem>>, vector<1x1x18x128xbf16>
    %19 = vector.shape_cast %18 : vector<1x1x18x128xbf16> to vector<18x128xbf16>
    %cst_15 = arith.constant dense<0.000000e+00> : vector<1280x128xf32>
    %20 = tpu.matmul %5, %19, %cst_15 {dimension_numbers = #tpu.dot_dimension_numbers<[1], [0], [0], [1], [0, 0, 1, 1], [], []>} : vector<1280x18xbf16>, vector<18x128xbf16>, vector<1280x128xf32> -> vector<1280x128xf32>
    %21 = vector.shape_cast %20 : vector<1280x128xf32> to vector<32x40x128xf32>
    %22 = vector.extract_strided_slice %21 {offsets = [0, 2, 0], sizes = [32, 32, 128], strides = [1, 1, 1]} : vector<32x40x128xf32> to vector<32x32x128xf32>
    %23 = arith.addf %17, %22 : vector<32x32x128xf32>
    %24 = vector.extract_strided_slice %0 {offsets = [0, 1, 0, 0], sizes = [1, 32, 40, 18], strides = [1, 1, 1, 1]} : vector<1x34x40x18xf32> to vector<1x32x40x18xf32>
    %25 = vector.shape_cast %24 : vector<1x32x40x18xf32> to vector<32x40x18xf32>
    %26 = vector.shape_cast %25 : vector<32x40x18xf32> to vector<1280x18xf32>
    %27 = arith.truncf %26 : vector<1280x18xf32> to vector<1280x18xbf16>
    %c1_16 = arith.constant 1 : index
    %c0_17 = arith.constant 0 : index
    %c0_18 = arith.constant 0 : index
    %c0_19 = arith.constant 0 : index
    %28 = vector.load %arg3[%c1_16, %c0_17, %c0_18, %c0_19] : memref<3x3x18x128xbf16, #tpu.memory_space<vmem>>, vector<1x1x18x128xbf16>
    %29 = vector.shape_cast %28 : vector<1x1x18x128xbf16> to vector<18x128xbf16>
    %cst_20 = arith.constant dense<0.000000e+00> : vector<1280x128xf32>
    %30 = tpu.matmul %27, %29, %cst_20 {dimension_numbers = #tpu.dot_dimension_numbers<[1], [0], [0], [1], [0, 0, 1, 1], [], []>} : vector<1280x18xbf16>, vector<18x128xbf16>, vector<1280x128xf32> -> vector<1280x128xf32>
    %31 = vector.shape_cast %30 : vector<1280x128xf32> to vector<32x40x128xf32>
    %32 = vector.extract_strided_slice %31 {offsets = [0, 0, 0], sizes = [32, 32, 128], strides = [1, 1, 1]} : vector<32x40x128xf32> to vector<32x32x128xf32>
    %33 = arith.addf %23, %32 : vector<32x32x128xf32>
    %c1_21 = arith.constant 1 : index
    %c1_22 = arith.constant 1 : index
    %c0_23 = arith.constant 0 : index
    %c0_24 = arith.constant 0 : index
    %34 = vector.load %arg3[%c1_21, %c1_22, %c0_23, %c0_24] : memref<3x3x18x128xbf16, #tpu.memory_space<vmem>>, vector<1x1x18x128xbf16>
    %35 = vector.shape_cast %34 : vector<1x1x18x128xbf16> to vector<18x128xbf16>
    %cst_25 = arith.constant dense<0.000000e+00> : vector<1280x128xf32>
    %36 = tpu.matmul %27, %35, %cst_25 {dimension_numbers = #tpu.dot_dimension_numbers<[1], [0], [0], [1], [0, 0, 1, 1], [], []>} : vector<1280x18xbf16>, vector<18x128xbf16>, vector<1280x128xf32> -> vector<1280x128xf32>
    %37 = vector.shape_cast %36 : vector<1280x128xf32> to vector<32x40x128xf32>
    %38 = vector.extract_strided_slice %37 {offsets = [0, 1, 0], sizes = [32, 32, 128], strides = [1, 1, 1]} : vector<32x40x128xf32> to vector<32x32x128xf32>
    %39 = arith.addf %33, %38 : vector<32x32x128xf32>
    %c1_26 = arith.constant 1 : index
    %c2_27 = arith.constant 2 : index
    %c0_28 = arith.constant 0 : index
    %c0_29 = arith.constant 0 : index
    %40 = vector.load %arg3[%c1_26, %c2_27, %c0_28, %c0_29] : memref<3x3x18x128xbf16, #tpu.memory_space<vmem>>, vector<1x1x18x128xbf16>
    %41 = vector.shape_cast %40 : vector<1x1x18x128xbf16> to vector<18x128xbf16>
    %cst_30 = arith.constant dense<0.000000e+00> : vector<1280x128xf32>
    %42 = tpu.matmul %27, %41, %cst_30 {dimension_numbers = #tpu.dot_dimension_numbers<[1], [0], [0], [1], [0, 0, 1, 1], [], []>} : vector<1280x18xbf16>, vector<18x128xbf16>, vector<1280x128xf32> -> vector<1280x128xf32>
    %43 = vector.shape_cast %42 : vector<1280x128xf32> to vector<32x40x128xf32>
    %44 = vector.extract_strided_slice %43 {offsets = [0, 2, 0], sizes = [32, 32, 128], strides = [1, 1, 1]} : vector<32x40x128xf32> to vector<32x32x128xf32>
    %45 = arith.addf %39, %44 : vector<32x32x128xf32>
    %46 = vector.extract_strided_slice %0 {offsets = [0, 2, 0, 0], sizes = [1, 32, 40, 18], strides = [1, 1, 1, 1]} : vector<1x34x40x18xf32> to vector<1x32x40x18xf32>
    %47 = vector.shape_cast %46 : vector<1x32x40x18xf32> to vector<32x40x18xf32>
    %48 = vector.shape_cast %47 : vector<32x40x18xf32> to vector<1280x18xf32>
    %49 = arith.truncf %48 : vector<1280x18xf32> to vector<1280x18xbf16>
    %c2_31 = arith.constant 2 : index
    %c0_32 = arith.constant 0 : index
    %c0_33 = arith.constant 0 : index
    %c0_34 = arith.constant 0 : index
    %50 = vector.load %arg3[%c2_31, %c0_32, %c0_33, %c0_34] : memref<3x3x18x128xbf16, #tpu.memory_space<vmem>>, vector<1x1x18x128xbf16>
    %51 = vector.shape_cast %50 : vector<1x1x18x128xbf16> to vector<18x128xbf16>
    %cst_35 = arith.constant dense<0.000000e+00> : vector<1280x128xf32>
    %52 = tpu.matmul %49, %51, %cst_35 {dimension_numbers = #tpu.dot_dimension_numbers<[1], [0], [0], [1], [0, 0, 1, 1], [], []>} : vector<1280x18xbf16>, vector<18x128xbf16>, vector<1280x128xf32> -> vector<1280x128xf32>
    %53 = vector.shape_cast %52 : vector<1280x128xf32> to vector<32x40x128xf32>
    %54 = vector.extract_strided_slice %53 {offsets = [0, 0, 0], sizes = [32, 32, 128], strides = [1, 1, 1]} : vector<32x40x128xf32> to vector<32x32x128xf32>
    %55 = arith.addf %45, %54 : vector<32x32x128xf32>
    %c2_36 = arith.constant 2 : index
    %c1_37 = arith.constant 1 : index
    %c0_38 = arith.constant 0 : index
    %c0_39 = arith.constant 0 : index
    %56 = vector.load %arg3[%c2_36, %c1_37, %c0_38, %c0_39] : memref<3x3x18x128xbf16, #tpu.memory_space<vmem>>, vector<1x1x18x128xbf16>
    %57 = vector.shape_cast %56 : vector<1x1x18x128xbf16> to vector<18x128xbf16>
    %cst_40 = arith.constant dense<0.000000e+00> : vector<1280x128xf32>
    %58 = tpu.matmul %49, %57, %cst_40 {dimension_numbers = #tpu.dot_dimension_numbers<[1], [0], [0], [1], [0, 0, 1, 1], [], []>} : vector<1280x18xbf16>, vector<18x128xbf16>, vector<1280x128xf32> -> vector<1280x128xf32>
    %59 = vector.shape_cast %58 : vector<1280x128xf32> to vector<32x40x128xf32>
    %60 = vector.extract_strided_slice %59 {offsets = [0, 1, 0], sizes = [32, 32, 128], strides = [1, 1, 1]} : vector<32x40x128xf32> to vector<32x32x128xf32>
    %61 = arith.addf %55, %60 : vector<32x32x128xf32>
    %c2_41 = arith.constant 2 : index
    %c2_42 = arith.constant 2 : index
    %c0_43 = arith.constant 0 : index
    %c0_44 = arith.constant 0 : index
    %62 = vector.load %arg3[%c2_41, %c2_42, %c0_43, %c0_44] : memref<3x3x18x128xbf16, #tpu.memory_space<vmem>>, vector<1x1x18x128xbf16>
    %63 = vector.shape_cast %62 : vector<1x1x18x128xbf16> to vector<18x128xbf16>
    %cst_45 = arith.constant dense<0.000000e+00> : vector<1280x128xf32>
    %64 = tpu.matmul %49, %63, %cst_45 {dimension_numbers = #tpu.dot_dimension_numbers<[1], [0], [0], [1], [0, 0, 1, 1], [], []>} : vector<1280x18xbf16>, vector<18x128xbf16>, vector<1280x128xf32> -> vector<1280x128xf32>
    %65 = vector.shape_cast %64 : vector<1280x128xf32> to vector<32x40x128xf32>
    %66 = vector.extract_strided_slice %65 {offsets = [0, 2, 0], sizes = [32, 32, 128], strides = [1, 1, 1]} : vector<32x40x128xf32> to vector<32x32x128xf32>
    %67 = arith.addf %61, %66 : vector<32x32x128xf32>
    %c0_46 = arith.constant 0 : index
    %c0_47 = arith.constant 0 : index
    %68 = vector.load %arg4[%c0_46, %c0_47] : memref<1x128xf32, #tpu.memory_space<vmem>>, vector<1x128xf32>
    %69 = vector.shape_cast %68 : vector<1x128xf32> to vector<1x1x128xf32>
    %70 = vector.broadcast %69 : vector<1x1x128xf32> to vector<32x32x128xf32>
    %71 = arith.addf %67, %70 : vector<32x32x128xf32>
    %cst_48 = arith.constant 0.000000e+00 : f32
    %cst_49 = arith.constant 4.000000e-01 : f32
    %72 = vector.broadcast %cst_48 : f32 to vector<32x32x128xf32>
    %73 = arith.maximumf %72, %71 : vector<32x32x128xf32>
    %74 = vector.broadcast %cst_49 : f32 to vector<32x32x128xf32>
    %75 = arith.minimumf %74, %73 : vector<32x32x128xf32>
    %cst_50 = arith.constant 2.500000e+00 : f32
    %76 = vector.broadcast %cst_50 : f32 to vector<32x32x128xf32>
    %77 = arith.mulf %75, %76 : vector<32x32x128xf32>
    %78 = math.floor %77 : vector<32x32x128xf32>
    %cst_51 = arith.constant 4.000000e-01 : f32
    %79 = vector.broadcast %cst_51 : f32 to vector<32x32x128xf32>
    %80 = arith.mulf %78, %79 : vector<32x32x128xf32>
    %81 = vector.shape_cast %80 : vector<32x32x128xf32> to vector<1x32x32x128xf32>
    %c0_52 = arith.constant 0 : index
    %c0_53 = arith.constant 0 : index
    %c0_54 = arith.constant 0 : index
    %c0_55 = arith.constant 0 : index
    %82 = vector.load %arg5[%c0_52, %c0_53, %c0_54, %c0_55] : memref<1x32x32x128xf32, #tpu.memory_space<vmem>>, vector<1x32x32x128xf32>
    tpu.vector_store %arg5[%c0_52, %c0_53, %c0_54, %c0_55], %81 {strides = array<i32>} : memref<1x32x32x128xf32, #tpu.memory_space<vmem>>, vector<1x32x32x128xf32>,
    return
  }
  func.func @transform_0(%arg0: i32, %arg1: i32) -> (i32, i32, i32, i32) {
    %c0_i32 = arith.constant 0 : i32
    %c0_i32_0 = arith.constant 0 : i32
    %c0_i32_1 = arith.constant 0 : i32
    %c0_i32_2 = arith.constant 0 : i32
    return %arg1, %c0_i32, %c0_i32_0, %c0_i32_1 : i32, i32, i32, i32
  }
  func.func @transform_1(%arg0: i32, %arg1: i32) -> (i32, i32, i32, i32) {
    %c0_i32 = arith.constant 0 : i32
    %c0_i32_0 = arith.constant 0 : i32
    %c0_i32_1 = arith.constant 0 : i32
    %c0_i32_2 = arith.constant 0 : i32
    return %c0_i32, %c0_i32_0, %c0_i32_1, %arg0 : i32, i32, i32, i32
  }
  func.func @transform_2(%arg0: i32, %arg1: i32) -> (i32, i32) {
    %c0_i32 = arith.constant 0 : i32
    %c0_i32_0 = arith.constant 0 : i32
    return %c0_i32, %arg0 : i32, i32
  }
  func.func @transform_3(%arg0: i32, %arg1: i32) -> (i32, i32, i32, i32) {
    %c0_i32 = arith.constant 0 : i32
    %c0_i32_0 = arith.constant 0 : i32
    %c0_i32_1 = arith.constant 0 : i32
    return %arg1, %c0_i32, %c0_i32_0, %arg0 : i32, i32, i32, i32
  }
}

</mosaic_0001>

<bundles_post_ra>
// kernel: tpu_custom_call.1
= control target key start
LH: loop header
LB: loop body
LE: loop exit
PB: predicated region body
PF: predicated region fallthrough
CT: control target
= control target key end

     0   :  { %8 = vsyncpa [#allocation3], 0  ;;  %s15651_s0 = inlined_call_operand.vmem [shape: f32[2,34,40,18], index: 0, kind: input, shape index: {}]   ;;  %s15652_s1 = inlined_call_operand.vmem [shape: bf16[3,3,18,128], index: 1, kind: input, shape index: {}]   ;;  %s15653_s2 = inlined_call_operand.vmem [shape: f32[1,128], index: 2, kind: input, shape index: {}]   ;;  %s15654_s3 = inlined_call_operand.hbm [shape: f32[2,32,32,128], index: 3, kind: output, shape index: {}]  }
   0x1   :  { %10 = vsyncpa [#allocation3 + $0x1], 0  ;;  %s11503_s12 = smov 0   ;;  %s11505_s13 = smov 0  }
   0x2   :  { %s11507_s14 = smov 0   ;;  %s11509_s15 = smov 0  }
   0x3   :  { %s11511_s16 = smov 0   ;;  %s11513_s17 = smov 0  }
   0x4 LB: > { %s10401_s18 = sadd.s32 4294967295, %s11479_s17   ;;  %s10402_s19 = sadd.s32 4294967294, %s11479_s17   ;;  %s11479_s17 = sphi %s11513_s17, %s16_s17   ;;  %s11475_s16 = sphi %s11511_s16, %s16713_s16   ;;  %s11471_s15 = sphi %s11509_s15, %s16712_s15   ;;  %s11467_s14 = sphi %s11507_s14, %s16711_s14   ;;  %s11463_s13 = sphi %s11505_s13, %s16710_s13   ;;  %s11459_s12 = sphi %s11503_s12, %s16709_s12  }
   0x5   : > { %s25_s20 = sadd.s32 1, %s11475_s16  ;;  %s115_s21 = sadd.s32 1, %s11467_s14 }
   0x6   : > { %p26_p0 = scmp.ge.s32.totalorder %s25_s20, 2  ;;  %p125_p1 = scmp.ne.s32.totalorder %s11467_s14, %s11463_s13 }
   0x7   : > { %p126_p2 = scmp.eq.s32.totalorder %s10401_s18, 1  ;;  %p131_p3 = scmp.ne.s32.totalorder %s11463_s13, %s11459_s12 }
   0x8   : > { %s16715_s20 = smov (%p26_p0, %s25_s20), 0  ;;  %p132_p5 = scmp.eq.s32.totalorder %s10402_s19, 1 }
   0x9   : > { %p11543_p4 = por %p126_p2, %p125_p1  ;;  %s110_s23 = ssub.s32 %s11475_s16, %s16715_s20 }
   0xa   : > { %p10407_p6 = scmp.ge.s32.totalorder %s11479_s17, 1  ;;  %p113_p7 = scmp.eq.s32.totalorder %s110_s23, 0 }
   0xb   : > { %p11550_p8 = por %p132_p5, %p131_p3  ;;  %p171_p9 = scmp.lt.s32.totalorder %s11479_s17, 3 }
   0xc   : > { %s11556_s25 = scalar_select %p113_p7, %s11467_s14, %s115_s21  }
   0xd   : > { %p172_p10 = pnand %p10407_p6, %p171_p9 }
   0xf   : > { %175 = sbr.rel (%p172_p10) target bundleno = 3063 (0xbf7), region = 32 }
  0x14   : > { %v467_v0 = vld [vmem:[%s15652_s1 + $0x8] sm:$0x1]  ;;  %p202_p11 = scmp.lt.s32.totalorder %s11471_s15, 1  ;;  %v10670_v2 = vld [vmem:[%s15652_s1 + $0x2c] sm:$0x1]  ;;  %vm718_vm0 = vcmask 1040384  }
  0x15   : > { %v473_v1 = vunpack.c.l.b16 %v467_v0  ;;  %v10496_v3 = vld [vmem:[%s15652_s1 + $0x14] sm:$0x1]  ;;  %v10757_v4 = vld [vmem:[%s15652_s1 + $0x38] sm:$0x1]  ;;  %v3576_v5 = vunpack.c.l.b16 %v10670_v2  ;;  %v10583_v7 = vld [vmem:[%s15652_s1 + $0x20] sm:$0x1] }
  0x16   : > { %s203_s7 = scalar_select %p202_p11, %s11471_s15, 1  ;;  %v1236_v6 = vunpack.c.l.b16 %v10496_v3  ;;  %v4337_v9 = vunpack.c.l.b16 %v10757_v4  ;;  %v2366_v10 = vunpack.c.l.b16 %v10583_v7  ;;  %v11195_v14 = vld [vmem:[%s15652_s1] sm:$0xff]  ;;  %vm477_vm1 = vcmask 146432  }
  0x17   : > { %v475_v8 = vpack.c.b16 %v473_v1, %v473_v1  ;;  %v3578_v12 = vpack.c.b16 %v3576_v5, %v3576_v5  ;;  %vm1812_vm2 = vcmask 1046528   ;;  %vm2942_vm3 = vcmask 1045504   ;;  %s199_s9 = sand.u32 1, %s11463_s13   ;;  %s11421_s30 = scalar_lea.hbm %s15654_s3, 2048 }
  0x18   : > { %s11211_s10 = smul.u32 1360, %s203_s7  ;;  %v1238_v13 = vpack.c.b16 %v1236_v6, %v1236_v6  ;;  %v4339_v21 = vpack.c.b16 %v4337_v9, %v4337_v9  ;;  %v2368_v22 = vpack.c.b16 %v2366_v10, %v2366_v10  ;;  %s11204_s7 = sshll.u32 %s11471_s15, 10 }
  0x19   : > { %v720_v11 = vsel %vm718_vm0, %v475_v8, 0  ;;  %v3821_v27 = vsel %vm718_vm0, %v3578_v12, 0  ;;  %s10298_s18 = scalar_lea.hbm %s15654_s3, %s11204_s7  ;;  %s10286_s26 = scalar_lea.sflag [#allocation3], %s199_s9 }
  0x1a   : > { %728 = vmatpush.bf16.msra.mxu0 %v720_v11  ;;  %11205 = vmatpush.bf16.msra.mxu1 %v720_v11  ;;  %s11582_s23 = scalar_lea.vmem %s15651_s0, %s11211_s10  ;;  %v1241_v28 = vsel %vm718_vm0, %v1238_v13, 0  ;;  %v4342_v31 = vsel %vm718_vm0, %v4339_v21, 0  ;;  %v2371_v32 = vsel %vm718_vm0, %v2368_v22, 0  ;;  %s10408_s10 = sshll.u32 %s199_s9, 10 }
  0x1b   : > { %11206 = vmatpush.bf16.msra.mxu2 %v720_v11  ;;  %11207 = vmatpush.bf16.msra.mxu3 %v720_v11  ;;  %v215_v15 = vld [vmem:[%s11582_s23] sm:$0xff]  ;;  %v216_v16 = vld [vmem:[%s11582_s23 + $0x8] sm:$0xff]  ;;  %v217_v33 = vld [vmem:[%s11582_s23 + $0x10] sm:$0xff]  ;;  %s14274_s11 = scalar_lea.vmem [#allocation2], %s10408_s10  ;;  %s10301_s21 = sshll.u32 %s10298_s18, 4  ;;  %s10302_s21 = int_to_ptr.hbm [resolvable:$true] %s10301_s21 }
  0x1c   : > { %v255_v17 = vld [vmem:[%s11582_s23 + $0x140] sm:$0xff]  ;;  %v256_v18 = vld [vmem:[%s11582_s23 + $0x148] sm:$0xff]  ;;  %v11590_v23 = vpack.c.bf16 %v216_v16, %v215_v15  ;;  %v218_v34 = vld [vmem:[%s11582_s23 + $0x18] sm:$0xff]  ;;  %s10299_s19 = sshll.u32 %s14274_s11, 4  ;;  %s11415_s15 = sshra.s32 %s10302_s21, 4  ;;  %s10300_s19 = int_to_ptr.vmem [resolvable:$true] %s10299_s19  ;;  %s11416_s15 = int_to_ptr.hbm [resolvable:$true] %s11415_s15 }
  0x1d   : > { %v295_v19 = vld [vmem:[%s11582_s23 + $0x280] sm:$0xff]  ;;  %v296_v20 = vld [vmem:[%s11582_s23 + $0x288] sm:$0xff]  ;;  %v11592_v24 = vpack.c.bf16 %v256_v18, %v255_v17  ;;  %v257_v35 = vld [vmem:[%s11582_s23 + $0x150] sm:$0xff]  ;;  %v11620_v41 = vpack.c.bf16 %v218_v34, %v217_v33  ;;  %s11417_s27 = scalar_lea.hbm %s11416_s15, 1024  ;;  %p11422_p1 = scmp.lt.s32.totalorder %s11416_s15, %s15654_s3 }
  0x1e   : > { %v335_v25 = vld [vmem:[%s11582_s23 + $0x3c0] sm:$0xff]  ;;  %v336_v26 = vld [vmem:[%s11582_s23 + $0x3c8] sm:$0xff]  ;;  %729 = vmatpush.bf16.msra.mxu0 %v11195_v14  ;;  %11208 = vmatpush.bf16.msra.mxu1 %v11195_v14  ;;  %v11598_v29 = vpack.c.bf16 %v296_v20, %v295_v19  ;;  %v258_v36 = vld [vmem:[%s11582_s23 + $0x158] sm:$0xff]  ;;  %p11418_p12 = scmp.ne.s32.totalorder %s11416_s15, %s11417_s27  ;;  %p11423_p2 = scmp.lt.s32.totalorder %s11421_s30, %s11417_s27 }
  0x1f   : > { %15927 = vst [vmem:[#allocation5_spill] sm:$0xff] %v11592_v24  ;;  %v11600_v30 = vpack.c.bf16 %v336_v26, %v335_v25  ;;  %11209 = vmatpush.bf16.msra.mxu2 %v11195_v14  ;;  %11210 = vmatpush.bf16.msra.mxu3 %v11195_v14  ;;  %v297_v37 = vld [vmem:[%s11582_s23 + $0x290] sm:$0xff]  ;;  %v298_v38 = vld [vmem:[%s11582_s23 + $0x298] sm:$0xff]  ;;  %v11622_v42 = vpack.c.bf16 %v258_v36, %v257_v35  ;;  %v220_v45 = vld [vmem:[%s11582_s23 + $0x28] sm:$0xff] }
  0x20   : > { %15928 = vst [vmem:[#allocation6_spill] sm:$0xff] %v11598_v29  ;;  %v337_v39 = vld [vmem:[%s11582_s23 + $0x3d0] sm:$0xff]  ;;  %v338_v40 = vld [vmem:[%s11582_s23 + $0x3d8] sm:$0xff]  ;;  %v11624_v43 = vpack.c.bf16 %v298_v38, %v297_v37  ;;  %v219_v48 = vld [vmem:[%s11582_s23 + $0x20] sm:$0xff]  ;;  %p11419_p13 = pnand %p11418_p12, %p11543_p4  ;;  %p11424_p3 = por %p11423_p2, %p11422_p1 }
  0x21   : > { %15929 = vst [vmem:[#allocation7_spill] sm:$0xff] %v11600_v30  ;;  %10414 = vmatmul.msk.bf16.vlgmr.msra.gmra.mxu0 %vm477_vm1, %v11590_v23  ;;  %10434 = vmatmul.msk.bf16.vlgmr.msra.gmra.mxu1 %vm477_vm1, %v11592_v24  ;;  %v11626_v44 = vpack.c.bf16 %v338_v40, %v337_v39  ;;  %v221_v46 = vld [vmem:[%s11582_s23 + $0x30] sm:$0xff]  ;;  %v259_v49 = vld [vmem:[%s11582_s23 + $0x160] sm:$0xff]  ;;  %v260_v50 = vld [vmem:[%s11582_s23 + $0x168] sm:$0xff]  ;;  %v11647_v55 = vpack.c.bf16 %v220_v45, %v219_v48 }
  0x22   : > { %1249 = vmatpush.bf16.msrb.mxu1 %v1241_v28  ;;  %10454 = vmatmul.msk.bf16.vlgmr.msra.gmra.mxu2 %vm477_vm1, %v11598_v29  ;;  %15930 = vst [vmem:[#allocation8_spill] sm:$0xff] %v11622_v42  ;;  %v11634_v47 = vpack.c.bf16 %v221_v46, %v220_v45  ;;  %v299_v51 = vld [vmem:[%s11582_s23 + $0x2a0] sm:$0xff]  ;;  %v300_v52 = vld [vmem:[%s11582_s23 + $0x2a8] sm:$0xff]  ;;  %v11649_v56 = vpack.c.bf16 %v260_v50, %v259_v49  ;;  %v222_v59 = vld [vmem:[%s11582_s23 + $0x38] sm:$0xff]  ;;  %p11420_p0 = pneg %p11419_p13 }
  0x23   : > { %3829 = vmatpush.bf16.msrb.mxu3 %v3821_v27  ;;  %4350 = vmatpush.bf16.msrb.mxu0 %v4342_v31  ;;  %15931 = vst [vmem:[#allocation9_spill] sm:$0xff] %v11624_v43  ;;  %v339_v53 = vld [vmem:[%s11582_s23 + $0x3e0] sm:$0xff]  ;;  %v340_v54 = vld [vmem:[%s11582_s23 + $0x3e8] sm:$0xff]  ;;  %v11651_v57 = vpack.c.bf16 %v300_v52, %v299_v51  ;;  %v225_v62 = vld [vmem:[%s11582_s23 + $0x50] sm:$0xff]  ;;  %v11677_v7 = vpack.c.bf16 %v222_v59, %v221_v46 }
  0x24   : > { %10474 = vmatmul.msk.bf16.vlgmr.msra.gmra.mxu3 %vm477_vm1, %v11600_v30  ;;  %2379 = vmatpush.bf16.msrb.mxu2 %v2371_v32  ;;  %15932 = vst [vmem:[#allocation10_spill] sm:$0xff] %v11626_v44  ;;  %v11653_v58 = vpack.c.bf16 %v340_v54, %v339_v53  ;;  %v223_v60 = vld [vmem:[%s11582_s23 + $0x40] sm:$0xff]  ;;  %v224_v61 = vld [vmem:[%s11582_s23 + $0x48] sm:$0xff]  ;;  %v261_v1 = vld [vmem:[%s11582_s23 + $0x170] sm:$0xff]  ;;  %p11425_p5 = pnand %p11424_p3, %p11420_p0 }
  0x25   : > { %15933 = vst [vmem:[#allocation11_spill] sm:$0xff] %v11634_v47  ;;  %v11663_v63 = vpack.c.bf16 %v223_v60, %v222_v59  ;;  %v11665_v0 = vpack.c.bf16 %v225_v62, %v224_v61  ;;  %v262_v2 = vld [vmem:[%s11582_s23 + $0x178] sm:$0xff]  ;;  %v301_v3 = vld [vmem:[%s11582_s23 + $0x2b0] sm:$0xff]  ;;  %v263_v11 = vld [vmem:[%s11582_s23 + $0x180] sm:$0xff]  ;;  %v11699_v17 = vpack.c.bf16 %v224_v61, %v223_v60 }
  0x26   : > { %15934 = vst [vmem:[#allocation12_spill] sm:$0xff] %v11649_v56  ;;  %v302_v4 = vld [vmem:[%s11582_s23 + $0x2b8] sm:$0xff]  ;;  %v341_v5 = vld [vmem:[%s11582_s23 + $0x3f0] sm:$0xff]  ;;  %v11679_v8 = vpack.c.bf16 %v262_v2, %v261_v1  ;;  %v264_v12 = vld [vmem:[%s11582_s23 + $0x188] sm:$0xff] }
  0x27   : > { %15935 = vst [vmem:[#allocation13_spill] sm:$0xff] %v11651_v57  ;;  %v342_v6 = vld [vmem:[%s11582_s23 + $0x3f8] sm:$0xff]  ;;  %v11681_v9 = vpack.c.bf16 %v302_v4, %v301_v3  ;;  %v303_v13 = vld [vmem:[%s11582_s23 + $0x2c0] sm:$0xff]  ;;  %v304_v14 = vld [vmem:[%s11582_s23 + $0x2c8] sm:$0xff]  ;;  %v11701_v18 = vpack.c.bf16 %v264_v12, %v263_v11 }
  0x28   : > { %15936 = vst [vmem:[#allocation14_spill] sm:$0xff] %v11653_v58  ;;  %v11683_v10 = vpack.c.bf16 %v342_v6, %v341_v5  ;;  %v343_v15 = vld [vmem:[%s11582_s23 + $0x400] sm:$0xff]  ;;  %v344_v16 = vld [vmem:[%s11582_s23 + $0x408] sm:$0xff]  ;;  %v11703_v19 = vpack.c.bf16 %v304_v14, %v303_v13  ;;  %v11716_v21 = vld [vmem:[%s11582_s23 + $0x58] sm:$0xff] }
  0x29   : > { %15937 = vst [vmem:[#allocation15_spill] sm:$0xff] %v11663_v63  ;;  %v11705_v20 = vpack.c.bf16 %v344_v16, %v343_v15  ;;  %v265_v22 = vld [vmem:[%s11582_s23 + $0x190] sm:$0xff]  ;;  %v266_v25 = vld [vmem:[%s11582_s23 + $0x198] sm:$0xff]  ;;  %v11725_v32 = vpack.c.bf16 %v11716_v21, %v225_v62  ;;  %v11742_v36 = vld [vmem:[%s11582_s23 + $0x60] sm:$0xff] }
  0x2a   : > { %15938 = vst [vmem:[#allocation16_spill] sm:$0xff] %v11665_v0  ;;  %v305_v26 = vld [vmem:[%s11582_s23 + $0x2d0] sm:$0xff]  ;;  %v306_v27 = vld [vmem:[%s11582_s23 + $0x2d8] sm:$0xff]  ;;  %v11727_v33 = vpack.c.bf16 %v266_v25, %v265_v22  ;;  %v11745_v37 = vld [vmem:[%s11582_s23 + $0x68] sm:$0xff] }
  0x2b   : > { %15939 = vst [vmem:[#allocation17_spill] sm:$0xff] %v11679_v8  ;;  %v345_v28 = vld [vmem:[%s11582_s23 + $0x410] sm:$0xff]  ;;  %v346_v31 = vld [vmem:[%s11582_s23 + $0x418] sm:$0xff]  ;;  %v11729_v34 = vpack.c.bf16 %v306_v27, %v305_v26  ;;  %v267_v38 = vld [vmem:[%s11582_s23 + $0x1a0] sm:$0xff]  ;;  %v11755_v49 = vpack.c.bf16 %v11745_v37, %v11742_v36 }
  0x2c   : > { %15940 = vst [vmem:[#allocation18_spill] sm:$0xff] %v11681_v9  ;;  %v11731_v35 = vpack.c.bf16 %v346_v31, %v345_v28  ;;  %v268_v39 = vld [vmem:[%s11582_s23 + $0x1a8] sm:$0xff]  ;;  %v307_v40 = vld [vmem:[%s11582_s23 + $0x2e0] sm:$0xff]  ;;  %v11772_v53 = vld [vmem:[%s11582_s23 + $0x70] sm:$0xff] }
  0x2d   : > { %15941 = vst [vmem:[#allocation19_spill] sm:$0xff] %v11683_v10  ;;  %v308_v45 = vld [vmem:[%s11582_s23 + $0x2e8] sm:$0xff]  ;;  %v347_v46 = vld [vmem:[%s11582_s23 + $0x420] sm:$0xff]  ;;  %v11757_v50 = vpack.c.bf16 %v268_v39, %v267_v38  ;;  %v11775_v54 = vld [vmem:[%s11582_s23 + $0x78] sm:$0xff] }
  0x2e   : > { %15942 = vst [vmem:[#allocation20_spill] sm:$0xff] %v11701_v18  ;;  %v348_v48 = vld [vmem:[%s11582_s23 + $0x428] sm:$0xff]  ;;  %v11759_v51 = vpack.c.bf16 %v308_v45, %v307_v40  ;;  %v269_v59 = vld [vmem:[%s11582_s23 + $0x1b0] sm:$0xff]  ;;  %v270_v60 = vld [vmem:[%s11582_s23 + $0x1b8] sm:$0xff]  ;;  %v11785_v3 = vpack.c.bf16 %v11775_v54, %v11772_v53 }
  0x2f   : > { %15943 = vst [vmem:[#allocation21_spill] sm:$0xff] %v11703_v19  ;;  %v11761_v52 = vpack.c.bf16 %v348_v48, %v347_v46  ;;  %v309_v61 = vld [vmem:[%s11582_s23 + $0x2f0] sm:$0xff]  ;;  %v310_v62 = vld [vmem:[%s11582_s23 + $0x2f8] sm:$0xff]  ;;  %v11787_v4 = vpack.c.bf16 %v270_v60, %v269_v59  ;;  %v11802_v11 = vld [vmem:[%s11582_s23 + $0x80] sm:$0xff] }
  0x30   : > { %15944 = vst [vmem:[#allocation22_spill] sm:$0xff] %v11705_v20  ;;  %v349_v1 = vld [vmem:[%s11582_s23 + $0x430] sm:$0xff]  ;;  %v350_v2 = vld [vmem:[%s11582_s23 + $0x438] sm:$0xff]  ;;  %v11789_v5 = vpack.c.bf16 %v310_v62, %v309_v61  ;;  %v11805_v12 = vld [vmem:[%s11582_s23 + $0x88] sm:$0xff] }
  0x31   : > { %10415 = vmatmul.msk.bf16.gmra.mxu0 %vm477_vm1, %v11620_v41  ;;  %10435 = vmatmul.msk.bf16.gmra.mxu1 %vm477_vm1, %v11622_v42  ;;  %15945 = vst [vmem:[#allocation23_spill] sm:$0xff] %v11725_v32  ;;  %v11791_v6 = vpack.c.bf16 %v350_v2, %v349_v1  ;;  %v271_v13 = vld [vmem:[%s11582_s23 + $0x1c0] sm:$0xff]  ;;  %v272_v14 = vld [vmem:[%s11582_s23 + $0x1c8] sm:$0xff]  ;;  %v11815_v26 = vpack.c.bf16 %v11805_v12, %v11802_v11  ;;  %v11199_v61 = vld [vmem:[%s15652_s1 + $0x30] sm:$0xff] }
  0x32   : > { %10455 = vmatmul.msk.bf16.gmra.mxu2 %vm477_vm1, %v11624_v43  ;;  %15946 = vst [vmem:[#allocation24_spill] sm:$0xff] %v11727_v33  ;;  %v311_v15 = vld [vmem:[%s11582_s23 + $0x300] sm:$0xff]  ;;  %v312_v16 = vld [vmem:[%s11582_s23 + $0x308] sm:$0xff]  ;;  %v11817_v27 = vpack.c.bf16 %v272_v14, %v271_v13  ;;  %v11197_v62 = vld [vmem:[%s15652_s1 + $0x18] sm:$0xff]  ;;  %4351 = vmatpush.bf16.msrb.mxu0 %v11199_v61 }
  0x33   : > { %15947 = vst [vmem:[#allocation25_spill] sm:$0xff] %v11729_v34  ;;  %v351_v22 = vld [vmem:[%s11582_s23 + $0x440] sm:$0xff]  ;;  %v352_v25 = vld [vmem:[%s11582_s23 + $0x448] sm:$0xff]  ;;  %v11823_v38 = vpack.c.bf16 %v312_v16, %v311_v15  ;;  %2380 = vmatpush.bf16.msrb.mxu2 %v11197_v62  ;;  %v11856_v1 = vld [vmem:[%s11582_s23 + $0x90] sm:$0xff] }
  0x34   : > { %10475 = vmatmul.msk.bf16.gmra.mxu3 %vm477_vm1, %v11626_v44  ;;  %15948 = vst [vmem:[#allocation26_spill] sm:$0xff] %v11731_v35  ;;  %v11825_v39 = vpack.c.bf16 %v352_v25, %v351_v22  ;;  %v11198_v40 = vld [vmem:[%s15652_s1 + $0x24] sm:$0xff]  ;;  %v11196_v45 = vld [vmem:[%s15652_s1 + $0xc] sm:$0xff]  ;;  %v11859_v2 = vld [vmem:[%s11582_s23 + $0x98] sm:$0xff] }
  0x35   : > { %15949 = vst [vmem:[#allocation27_spill] sm:$0xff] %v11755_v49  ;;  %3830 = vmatpush.bf16.msrb.mxu3 %v11198_v40  ;;  %1250 = vmatpush.bf16.msrb.mxu1 %v11196_v45  ;;  %v273_v13 = vld [vmem:[%s11582_s23 + $0x1d0] sm:$0xff]  ;;  %v274_v14 = vld [vmem:[%s11582_s23 + $0x1d8] sm:$0xff]  ;;  %v11873_v61 = vpack.c.bf16 %v11859_v2, %v11856_v1  ;;  %v356_v44 = vld [vmem:[%s11582_s23 + $0x468] sm:$0xff] }
  0x36   : > { %15950 = vst [vmem:[#allocation28_spill] sm:$0xff] %v11757_v50  ;;  %v313_v15 = vld [vmem:[%s11582_s23 + $0x310] sm:$0xff]  ;;  %v314_v16 = vld [vmem:[%s11582_s23 + $0x318] sm:$0xff]  ;;  %v11875_v62 = vpack.c.bf16 %v274_v14, %v273_v13  ;;  %v319_v43 = vld [vmem:[%s11582_s23 + $0x340] sm:$0xff] }
  0x37   : > { %15951 = vst [vmem:[#allocation29_spill] sm:$0xff] %v11759_v51  ;;  %v353_v22 = vld [vmem:[%s11582_s23 + $0x450] sm:$0xff]  ;;  %v354_v25 = vld [vmem:[%s11582_s23 + $0x458] sm:$0xff]  ;;  %v320_v29 = vld [vmem:[%s11582_s23 + $0x348] sm:$0xff] }
  0x38   : > { %15952 = vst [vmem:[#allocation30_spill] sm:$0xff] %v11761_v52 }
  0x39   : > { %15953 = vst [vmem:[#allocation31_spill] sm:$0xff] %v11785_v3 }
  0x3a   : > { %15954 = vst [vmem:[#allocation32_spill] sm:$0xff] %v11787_v4 }
  0x3b   : > { %15955 = vst [vmem:[#allocation33_spill] sm:$0xff] %v11789_v5 }
  0x3c   : > { %15956 = vst [vmem:[#allocation34_spill] sm:$0xff] %v11791_v6 }
  0x3d   : > { %15957 = vst [vmem:[#allocation35_spill] sm:$0xff] %v11815_v26 }
  0x3e   : > { %15958 = vst [vmem:[#allocation36_spill] sm:$0xff] %v11817_v27 }
  0x3f   : > { %15960 = vst [vmem:[#allocation38_spill] sm:$0xff] %v11823_v38 }
  0x40   : > { %15961 = vst [vmem:[#allocation39_spill] sm:$0xff] %v11825_v39 }
  0x41   : > { %10416 = vmatmul.msk.bf16.gmra.mxu0 %vm477_vm1, %v11647_v55  ;;  %10436 = vmatmul.msk.bf16.gmra.mxu1 %vm477_vm1, %v11649_v56  ;;  %15967 = vst [vmem:[#allocation45_spill] sm:$0xff] %v11873_v61 }
  0x42   : > { %10456 = vmatmul.msk.bf16.gmra.mxu2 %vm477_vm1, %v11651_v57  ;;  %15968 = vst [vmem:[#allocation46_spill] sm:$0xff] %v11875_v62  ;;  %v280_v57 = vld [vmem:[%s11582_s23 + $0x208] sm:$0xff] }
  0x44   : > { %10476 = vmatmul.msk.bf16.gmra.mxu3 %vm477_vm1, %v11653_v58  ;;  %v355_v58 = vld [vmem:[%s11582_s23 + $0x460] sm:$0xff] }
  0x51   : > { %10417 = vmatmul.msk.bf16.gmra.mxu0 %vm477_vm1, %v11677_v7  ;;  %10437 = vmatmul.msk.bf16.gmra.mxu1 %vm477_vm1, %v11679_v8  ;;  %v366_v8 = vld [vmem:[%s11582_s23 + $0x4b8] sm:$0xff] }
  0x52   : > { %10457 = vmatmul.msk.bf16.gmra.mxu2 %vm477_vm1, %v11681_v9 }
  0x54   : > { %10477 = vmatmul.msk.bf16.gmra.mxu3 %vm477_vm1, %v11683_v10  ;;  %v316_v10 = vld [vmem:[%s11582_s23 + $0x328] sm:$0xff] }
  0x61   : > { %10418 = vmatmul.msk.bf16.gmra.mxu0 %vm477_vm1, %v11699_v17  ;;  %10438 = vmatmul.msk.bf16.gmra.mxu1 %vm477_vm1, %v11701_v18  ;;  %v326_v18 = vld [vmem:[%s11582_s23 + $0x378] sm:$0xff] }
  0x62   : > { %10458 = vmatmul.msk.bf16.gmra.mxu2 %vm477_vm1, %v11703_v19 }
  0x64   : > { %10478 = vmatmul.msk.bf16.gmra.mxu3 %vm477_vm1, %v11705_v20  ;;  %v315_v20 = vld [vmem:[%s11582_s23 + $0x320] sm:$0xff] }
  0x71   : > { %10419 = vmatmul.msk.bf16.gmra.mxu0 %vm477_vm1, %v11725_v32  ;;  %10439 = vmatmul.msk.bf16.gmra.mxu1 %vm477_vm1, %v11727_v33 }
  0x72   : > { %10459 = vmatmul.msk.bf16.gmra.mxu2 %vm477_vm1, %v11729_v34 }
  0x74   : > { %10479 = vmatmul.msk.bf16.gmra.mxu3 %vm477_vm1, %v11731_v35  ;;  %v276_v35 = vld [vmem:[%s11582_s23 + $0x1e8] sm:$0xff] }
  0x81   : > { %10420 = vmatmul.msk.bf16.gmra.mxu0 %vm477_vm1, %v11755_v49  ;;  %10440 = vmatmul.msk.bf16.gmra.mxu1 %vm477_vm1, %v11757_v50 }
  0x82   : > { %10460 = vmatmul.msk.bf16.gmra.mxu2 %vm477_vm1, %v11759_v51  ;;  %v358_v51 = vld [vmem:[%s11582_s23 + $0x478] sm:$0xff] }
  0x84   : > { %10480 = vmatmul.msk.bf16.gmra.mxu3 %vm477_vm1, %v11761_v52  ;;  %v11883_v52 = vpack.c.bf16 %v354_v25, %v353_v22  ;;  %v11902_v22 = vld [vmem:[%s11582_s23 + $0xa0] sm:$0xff]  ;;  %v11905_v25 = vld [vmem:[%s11582_s23 + $0xa8] sm:$0xff] }
  0x86   : > { %15971 = vst [vmem:[#allocation49_spill] sm:$0xff] %v11883_v52 }
  0x91   : > { %10421 = vmatmul.msk.bf16.gmra.mxu0 %vm477_vm1, %v11785_v3  ;;  %10441 = vmatmul.msk.bf16.gmra.mxu1 %vm477_vm1, %v11787_v4 }
  0x92   : > { %10461 = vmatmul.msk.bf16.gmra.mxu2 %vm477_vm1, %v11789_v5  ;;  %v357_v5 = vld [vmem:[%s11582_s23 + $0x470] sm:$0xff] }
  0x94   : > { %10481 = vmatmul.msk.bf16.gmra.mxu3 %vm477_vm1, %v11791_v6  ;;  %v11881_v6 = vpack.c.bf16 %v314_v16, %v313_v15 }
  0x96   : > { %15970 = vst [vmem:[#allocation48_spill] sm:$0xff] %v11881_v6 }
  0x9e   : > { %v11819_v28 = vpop.f32.mrf.mxu0  ;;  %v11821_v31 = vpop.f32.mrf.mxu1 }
  0x9f   : > { %15959 = vst [vmem:[#allocation37_spill] sm:$0xff] %v11821_v31  ;;  %v324_v31 = vld [vmem:[%s11582_s23 + $0x368] sm:$0xff] }
  0xa1   : > { %10422 = vmatmul.msk.bf16.gmra.mxu0 %vm477_vm1, %v11815_v26  ;;  %10442 = vmatmul.msk.bf16.gmra.mxu1 %vm477_vm1, %v11817_v27  ;;  %v364_v27 = vld [vmem:[%s11582_s23 + $0x4a8] sm:$0xff] }
  0xa2   : > { %10462 = vmatmul.msk.bf16.gmra.mxu2 %vm477_vm1, %v11823_v38  ;;  %v318_v38 = vld [vmem:[%s11582_s23 + $0x338] sm:$0xff] }
  0xa4   : > { %10482 = vmatmul.msk.bf16.gmra.mxu3 %vm477_vm1, %v11825_v39 }
  0xa5   : > { %v11841_v46 = vpop.f32.mrf.mxu2 }
  0xa6   : > { %15962 = vst [vmem:[#allocation40_spill] sm:$0xff] %v11841_v46  ;;  %v11845_v59 = vpop.f32.mrf.mxu0  ;;  %v11847_v60 = vpop.f32.mrf.mxu1  ;;  %v11923_v46 = vpack.c.bf16 %v316_v10, %v315_v20 }
  0xa7   : > { %v11843_v48 = vpop.f32.mrf.mxu3  ;;  %15964 = vst [vmem:[#allocation42_spill] sm:$0xff] %v11847_v60  ;;  %v362_v60 = vld [vmem:[%s11582_s23 + $0x498] sm:$0xff] }
  0xa8   : > { %15963 = vst [vmem:[#allocation41_spill] sm:$0xff] %v11843_v48 }
  0xa9   : > { %15978 = vst [vmem:[#allocation56_spill] sm:$0xff] %v11923_v46 }
  0xad   : > { %v11867_v40 = vpop.f32.mrf.mxu2 }
  0xae   : > { %15965 = vst [vmem:[#allocation43_spill] sm:$0xff] %v11867_v40  ;;  %v11877_v48 = vpop.f32.mrf.mxu0  ;;  %v11879_v39 = vpop.f32.mrf.mxu1 }
  0xaf   : > { %v11869_v45 = vpop.f32.mrf.mxu3  ;;  %15969 = vst [vmem:[#allocation47_spill] sm:$0xff] %v11879_v39  ;;  %v361_v39 = vld [vmem:[%s11582_s23 + $0x490] sm:$0xff] }
  0xb0   : > { %15966 = vst [vmem:[#allocation44_spill] sm:$0xff] %v11869_v45  ;;  %v275_v45 = vld [vmem:[%s11582_s23 + $0x1e0] sm:$0xff] }
  0xb1   : > { %10423 = vmatmul.msk.bf16.gmra.mxu0 %vm477_vm1, %v11873_v61  ;;  %10443 = vmatmul.msk.bf16.gmra.mxu1 %vm477_vm1, %v11875_v62 }
  0xb2   : > { %10463 = vmatmul.msk.bf16.gmra.mxu2 %vm477_vm1, %v11881_v6 }
  0xb4   : > { %10483 = vmatmul.msk.bf16.gmra.mxu3 %vm477_vm1, %v11883_v52 }
  0xb5   : > { %v11893_v13 = vpop.f32.mrf.mxu2 }
  0xb6   : > { %15972 = vst [vmem:[#allocation50_spill] sm:$0xff] %v11893_v13  ;;  %v11897_v15 = vpop.f32.mrf.mxu0  ;;  %v11899_v16 = vpop.f32.mrf.mxu1  ;;  %v11921_v13 = vpack.c.bf16 %v276_v35, %v275_v45  ;;  %v278_v45 = vld [vmem:[%s11582_s23 + $0x1f8] sm:$0xff] }
  0xb7   : > { %v11895_v14 = vpop.f32.mrf.mxu3  ;;  %15974 = vst [vmem:[#allocation52_spill] sm:$0xff] %v11899_v16  ;;  %v12011_v16 = vpack.c.bf16 %v320_v29, %v319_v43 }
  0xb8   : > { %15973 = vst [vmem:[#allocation51_spill] sm:$0xff] %v11895_v14  ;;  %v11919_v14 = vpack.c.bf16 %v11905_v25, %v11902_v22 }
  0xb9   : > { %15977 = vst [vmem:[#allocation55_spill] sm:$0xff] %v11921_v13 }
  0xba   : > { %15995 = vst [vmem:[#allocation73_spill] sm:$0xff] %v12011_v16 }
  0xbd   : > { %v11913_v30 = vpop.f32.mrf.mxu2 }
  0xbe   : > { %15975 = vst [vmem:[#allocation53_spill] sm:$0xff] %v11913_v30  ;;  %v741_v40 = vpop.f32.mrf.mxu0  ;;  %v833_v6 = vpop.f32.mrf.mxu1  ;;  %v11925_v30 = vpack.c.bf16 %v356_v44, %v355_v58  ;;  %v11940_v44 = vld [vmem:[%s11582_s23 + $0xb0] sm:$0xff]  ;;  %v11943_v58 = vld [vmem:[%s11582_s23 + $0xb8] sm:$0xff] }
  0xbf   : > { %v11915_v52 = vpop.f32.mrf.mxu3  ;;  %v277_v40 = vld [vmem:[%s11582_s23 + $0x1f0] sm:$0xff] }
  0xc0   : > { %15976 = vst [vmem:[#allocation54_spill] sm:$0xff] %v11915_v52  ;;  %v317_v52 = vld [vmem:[%s11582_s23 + $0x330] sm:$0xff] }
  0xc1   : > { %15979 = vst [vmem:[#allocation57_spill] sm:$0xff] %v11925_v30  ;;  %10424 = vmatmul.msk.bf16.gmra.mxu0 %vm477_vm1, %v11919_v14  ;;  %10444 = vmatmul.msk.bf16.gmra.mxu1 %vm477_vm1, %v11921_v13  ;;  %v11965_v9 = vpack.c.bf16 %v318_v38, %v317_v52  ;;  %v321_v13 = vld [vmem:[%s11582_s23 + $0x350] sm:$0xff] }
  0xc2   : > { %10464 = vmatmul.msk.bf16.gmra.mxu2 %vm477_vm1, %v11923_v46 }
  0xc3   : > { %15985 = vst [vmem:[#allocation63_spill] sm:$0xff] %v11965_v9 }
  0xc4   : > { %10484 = vmatmul.msk.bf16.gmra.mxu3 %vm477_vm1, %v11925_v30 }
  0xc5   : > { %v925_v35 = vpop.f32.mrf.mxu2 }
  0xc6   : > { %v11935_v10 = vpop.f32.mrf.mxu0  ;;  %v11937_v20 = vpop.f32.mrf.mxu1  ;;  %v11957_v35 = vpack.c.bf16 %v11943_v58, %v11940_v44 }
  0xc7   : > { %v1017_v6 = vpop.f32.mrf.mxu3  ;;  %15980 = vst [vmem:[#allocation58_spill] sm:$0xff] %v11937_v20 }
  0xc8   : > { %v11959_v6 = vpack.c.bf16 %v278_v45, %v277_v40  ;;  %v11989_v45 = vld [vmem:[%s11582_s23 + $0xc8] sm:$0xff] }
  0xca   : > { %15983 = vst [vmem:[#allocation61_spill] sm:$0xff] %v11959_v6 }
  0xcd   : > { %v11951_v46 = vpop.f32.mrf.mxu2 }
  0xce   : > { %15981 = vst [vmem:[#allocation59_spill] sm:$0xff] %v11951_v46  ;;  %v11961_v34 = vpop.f32.mrf.mxu0  ;;  %v11963_v19 = vpop.f32.mrf.mxu1  ;;  %v11967_v46 = vpack.c.bf16 %v358_v51, %v357_v5  ;;  %v11986_v5 = vld [vmem:[%s11582_s23 + $0xc0] sm:$0xff] }
  0xcf   : > { %v11953_v30 = vpop.f32.mrf.mxu3  ;;  %15984 = vst [vmem:[#allocation62_spill] sm:$0xff] %v11963_v19  ;;  %v360_v19 = vld [vmem:[%s11582_s23 + $0x488] sm:$0xff] }
  0xd0   : > { %15982 = vst [vmem:[#allocation60_spill] sm:$0xff] %v11953_v30  ;;  %v279_v30 = vld [vmem:[%s11582_s23 + $0x200] sm:$0xff] }
  0xd1   : > { %15986 = vst [vmem:[#allocation64_spill] sm:$0xff] %v11967_v46  ;;  %10425 = vmatmul.msk.bf16.gmra.mxu0 %vm477_vm1, %v11957_v35  ;;  %10445 = vmatmul.msk.bf16.gmra.mxu1 %vm477_vm1, %v11959_v6 }
  0xd2   : > { %10465 = vmatmul.msk.bf16.gmra.mxu2 %vm477_vm1, %v11965_v9  ;;  %v359_v9 = vld [vmem:[%s11582_s23 + $0x480] sm:$0xff] }
  0xd4   : > { %10485 = vmatmul.msk.bf16.gmra.mxu3 %vm477_vm1, %v11967_v46 }
  0xd5   : > { %v11977_v40 = vpop.f32.mrf.mxu2 }
  0xd6   : > { %15987 = vst [vmem:[#allocation65_spill] sm:$0xff] %v11977_v40  ;;  %v11981_v38 = vpop.f32.mrf.mxu0  ;;  %v11983_v51 = vpop.f32.mrf.mxu1  ;;  %v12005_v40 = vpack.c.bf16 %v280_v57, %v279_v30 }
  0xd7   : > { %v11979_v52 = vpop.f32.mrf.mxu3  ;;  %15989 = vst [vmem:[#allocation67_spill] sm:$0xff] %v11983_v51 }
  0xd8   : > { %15988 = vst [vmem:[#allocation66_spill] sm:$0xff] %v11979_v52  ;;  %v12003_v52 = vpack.c.bf16 %v11989_v45, %v11986_v5 }
  0xd9   : > { %15992 = vst [vmem:[#allocation70_spill] sm:$0xff] %v12005_v40 }
  0xdd   : > { %v11997_v20 = vpop.f32.mrf.mxu2 }
  0xde   : > { %15990 = vst [vmem:[#allocation68_spill] sm:$0xff] %v11997_v20  ;;  %v12007_v51 = vpop.f32.mrf.mxu0  ;;  %v12009_v6 = vpop.f32.mrf.mxu1  ;;  %v12013_v20 = vpack.c.bf16 %v360_v19, %v359_v9  ;;  %v12028_v9 = vld [vmem:[%s11582_s23 + $0xd0] sm:$0xff]  ;;  %v12031_v19 = vld [vmem:[%s11582_s23 + $0xd8] sm:$0xff] }
  0xdf   : > { %v11999_v46 = vpop.f32.mrf.mxu3  ;;  %15993 = vst [vmem:[#allocation71_spill] sm:$0xff] %v12007_v51 }
  0xe0   : > { %15991 = vst [vmem:[#allocation69_spill] sm:$0xff] %v11999_v46  ;;  %v281_v46 = vld [vmem:[%s11582_s23 + $0x210] sm:$0xff] }
  0xe1   : > { %15994 = vst [vmem:[#allocation72_spill] sm:$0xff] %v12009_v6  ;;  %10426 = vmatmul.msk.bf16.gmra.mxu0 %vm477_vm1, %v12003_v52  ;;  %10446 = vmatmul.msk.bf16.gmra.mxu1 %vm477_vm1, %v12005_v40  ;;  %v282_v6 = vld [vmem:[%s11582_s23 + $0x218] sm:$0xff] }
  0xe2   : > { %15996 = vst [vmem:[#allocation74_spill] sm:$0xff] %v12013_v20  ;;  %10466 = vmatmul.msk.bf16.gmra.mxu2 %vm477_vm1, %v12011_v16  ;;  %v322_v40 = vld [vmem:[%s11582_s23 + $0x358] sm:$0xff] }
  0xe4   : > { %10486 = vmatmul.msk.bf16.gmra.mxu3 %vm477_vm1, %v12013_v20  ;;  %v12041_v20 = vpack.c.bf16 %v12031_v19, %v12028_v9 }
  0xe5   : > { %v12023_v30 = vpop.f32.mrf.mxu2 }
  0xe6   : > { %15997 = vst [vmem:[#allocation75_spill] sm:$0xff] %v12023_v30  ;;  %v752_v43 = vpop.f32.mrf.mxu0  ;;  %v844_v57 = vpop.f32.mrf.mxu1  ;;  %v12049_v30 = vpack.c.bf16 %v322_v40, %v321_v13  ;;  %v283_v40 = vld [vmem:[%s11582_s23 + $0x220] sm:$0xff] }
  0xe7   : > { %v12025_v29 = vpop.f32.mrf.mxu3  ;;  %15999 = vst [vmem:[#allocation77_spill] sm:$0xff] %v12041_v20  ;;  %v12043_v43 = vpack.c.bf16 %v282_v6, %v281_v46  ;;  %v12073_v6 = vld [vmem:[%s11582_s23 + $0xe8] sm:$0xff] }
  0xe8   : > { %15998 = vst [vmem:[#allocation76_spill] sm:$0xff] %v12025_v29 }
  0xe9   : > { %16000 = vst [vmem:[#allocation78_spill] sm:$0xff] %v12043_v43 }
  0xea   : > { %16003 = vst [vmem:[#allocation81_spill] sm:$0xff] %v12049_v30 }
  0xed   : > { %v936_v16 = vpop.f32.mrf.mxu2 }
  0xee   : > { %v12045_v57 = vpop.f32.mrf.mxu0  ;;  %v12047_v29 = vpop.f32.mrf.mxu1  ;;  %v12051_v16 = vpack.c.bf16 %v362_v60, %v361_v39  ;;  %v12070_v60 = vld [vmem:[%s11582_s23 + $0xe0] sm:$0xff] }
  0xef   : > { %v1028_v62 = vpop.f32.mrf.mxu3  ;;  %16001 = vst [vmem:[#allocation79_spill] sm:$0xff] %v12045_v57 }
  0xf0   : > { %16002 = vst [vmem:[#allocation80_spill] sm:$0xff] %v12047_v29  ;;  %v284_v29 = vld [vmem:[%s11582_s23 + $0x228] sm:$0xff] }
  0xf1   : > { %16004 = vst [vmem:[#allocation82_spill] sm:$0xff] %v12051_v16  ;;  %10427 = vmatmul.msk.bf16.gmra.mxu0 %vm477_vm1, %v12041_v20  ;;  %10447 = vmatmul.msk.bf16.gmra.mxu1 %vm477_vm1, %v12043_v43  ;;  %v323_v43 = vld [vmem:[%s11582_s23 + $0x360] sm:$0xff]  ;;  %v374_v20 = vld [vmem:[%s11582_s23 + $0x4f8] sm:$0xff] }
  0xf2   : > { %10467 = vmatmul.msk.bf16.gmra.mxu2 %vm477_vm1, %v12049_v30  ;;  %v363_v30 = vld [vmem:[%s11582_s23 + $0x4a0] sm:$0xff]  ;;  %v12095_v33 = vpack.c.bf16 %v324_v31, %v323_v43 }
  0xf4   : > { %10487 = vmatmul.msk.bf16.gmra.mxu3 %vm477_vm1, %v12051_v16  ;;  %16015 = vst [vmem:[#allocation93_spill] sm:$0xff] %v12095_v33 }
  0xf5   : > { %v12061_v46 = vpop.f32.mrf.mxu2 }
  0xf6   : > { %16005 = vst [vmem:[#allocation83_spill] sm:$0xff] %v12061_v46  ;;  %v12065_v13 = vpop.f32.mrf.mxu0  ;;  %v12067_v39 = vpop.f32.mrf.mxu1  ;;  %v12089_v46 = vpack.c.bf16 %v284_v29, %v283_v40  ;;  %v12119_v40 = vld [vmem:[%s11582_s23 + $0xf8] sm:$0xff] }
  0xf7   : > { %v12063_v62 = vpop.f32.mrf.mxu3  ;;  %16007 = vst [vmem:[#allocation85_spill] sm:$0xff] %v12065_v13 }
  0xf8   : > { %16006 = vst [vmem:[#allocation84_spill] sm:$0xff] %v12063_v62  ;;  %v12087_v62 = vpack.c.bf16 %v12073_v6, %v12070_v60 }
  0xf9   : > { %16008 = vst [vmem:[#allocation86_spill] sm:$0xff] %v12067_v39 }
  0xfa   : > { %16011 = vst [vmem:[#allocation89_spill] sm:$0xff] %v12087_v62 }
  0xfb   : > { %16012 = vst [vmem:[#allocation90_spill] sm:$0xff] %v12089_v46 }
  0xfd   : > { %v12081_v4 = vpop.f32.mrf.mxu2 }
  0xfe   : > { %16009 = vst [vmem:[#allocation87_spill] sm:$0xff] %v12081_v4  ;;  %v12091_v39 = vpop.f32.mrf.mxu0  ;;  %v12093_v50 = vpop.f32.mrf.mxu1  ;;  %v12097_v4 = vpack.c.bf16 %v364_v27, %v363_v30  ;;  %v12116_v30 = vld [vmem:[%s11582_s23 + $0xf0] sm:$0xff] }
  0xff   : > { %v12083_v16 = vpop.f32.mrf.mxu3  ;;  %16013 = vst [vmem:[#allocation91_spill] sm:$0xff] %v12091_v39 }
 0x100   : > { %16010 = vst [vmem:[#allocation88_spill] sm:$0xff] %v12083_v16  ;;  %v285_v16 = vld [vmem:[%s11582_s23 + $0x230] sm:$0xff] }
 0x101   : > { %16014 = vst [vmem:[#allocation92_spill] sm:$0xff] %v12093_v50  ;;  %10428 = vmatmul.msk.bf16.gmra.mxu0 %vm477_vm1, %v12087_v62  ;;  %10448 = vmatmul.msk.bf16.gmra.mxu1 %vm477_vm1, %v12089_v46  ;;  %v286_v50 = vld [vmem:[%s11582_s23 + $0x238] sm:$0xff]  ;;  %v325_v46 = vld [vmem:[%s11582_s23 + $0x370] sm:$0xff] }
 0x102   : > { %16016 = vst [vmem:[#allocation94_spill] sm:$0xff] %v12097_v4  ;;  %10468 = vmatmul.msk.bf16.gmra.mxu2 %vm477_vm1, %v12095_v33  ;;  %v365_v33 = vld [vmem:[%s11582_s23 + $0x4b0] sm:$0xff]  ;;  %v12137_v24 = vpack.c.bf16 %v326_v18, %v325_v46  ;;  %v287_v46 = vld [vmem:[%s11582_s23 + $0x240] sm:$0xff] }
 0x104   : > { %10488 = vmatmul.msk.bf16.gmra.mxu3 %vm477_vm1, %v12097_v4  ;;  %16025 = vst [vmem:[#allocation103_spill] sm:$0xff] %v12137_v24 }
 0x105   : > { %v12107_v29 = vpop.f32.mrf.mxu2 }
 0x106   : > { %16017 = vst [vmem:[#allocation95_spill] sm:$0xff] %v12107_v29  ;;  %v12111_v43 = vpop.f32.mrf.mxu0  ;;  %v12113_v27 = vpop.f32.mrf.mxu1  ;;  %v12135_v29 = vpack.c.bf16 %v286_v50, %v285_v16 }
 0x107   : > { %v12109_v31 = vpop.f32.mrf.mxu3  ;;  %16019 = vst [vmem:[#allocation97_spill] sm:$0xff] %v12111_v43  ;;  %v367_v43 = vld [vmem:[%s11582_s23 + $0x4c0] sm:$0xff] }
 0x108   : > { %16018 = vst [vmem:[#allocation96_spill] sm:$0xff] %v12109_v31  ;;  %v12133_v31 = vpack.c.bf16 %v12119_v40, %v12116_v30 }
 0x109   : > { %16020 = vst [vmem:[#allocation98_spill] sm:$0xff] %v12113_v27 }
 0x10a   : > { %16023 = vst [vmem:[#allocation101_spill] sm:$0xff] %v12133_v31 }
 0x10b   : > { %16024 = vst [vmem:[#allocation102_spill] sm:$0xff] %v12135_v29 }
 0x10d   : > { %v12127_v56 = vpop.f32.mrf.mxu2 }
 0x10e   : > { %16021 = vst [vmem:[#allocation99_spill] sm:$0xff] %v12127_v56  ;;  %v764_v27 = vpop.f32.mrf.mxu0  ;;  %v856_v42 = vpop.f32.mrf.mxu1  ;;  %v12139_v56 = vpack.c.bf16 %v366_v8, %v365_v33  ;;  %v12154_v8 = vld [vmem:[%s11582_s23 + $0x100] sm:$0xff]  ;;  %v12157_v33 = vld [vmem:[%s11582_s23 + $0x108] sm:$0xff] }
 0x10f   : > { %v12129_v4 = vpop.f32.mrf.mxu3  ;;  %16029 = vst [vmem:[#allocation107_spill] sm:$0xff] %v12157_v33  ;;  %v288_v27 = vld [vmem:[%s11582_s23 + $0x248] sm:$0xff] }
 0x110   : > { %16022 = vst [vmem:[#allocation100_spill] sm:$0xff] %v12129_v4  ;;  %v327_v4 = vld [vmem:[%s11582_s23 + $0x380] sm:$0xff] }
 0x111   : > { %16026 = vst [vmem:[#allocation104_spill] sm:$0xff] %v12139_v56  ;;  %10429 = vmatmul.msk.bf16.gmra.mxu0 %vm477_vm1, %v12133_v31  ;;  %10449 = vmatmul.msk.bf16.gmra.mxu1 %vm477_vm1, %v12135_v29  ;;  %v328_v29 = vld [vmem:[%s11582_s23 + $0x388] sm:$0xff] }
 0x112   : > { %10469 = vmatmul.msk.bf16.gmra.mxu2 %vm477_vm1, %v12137_v24  ;;  %v368_v31 = vld [vmem:[%s11582_s23 + $0x4c8] sm:$0xff]  ;;  %v12179_v39 = vpack.c.bf16 %v328_v29, %v327_v4 }
 0x114   : > { %10489 = vmatmul.msk.bf16.gmra.mxu3 %vm477_vm1, %v12139_v56  ;;  %16036 = vst [vmem:[#allocation114_spill] sm:$0xff] %v12179_v39 }
 0x115   : > { %v948_v42 = vpop.f32.mrf.mxu2 }
 0x116   : > { %v12149_v18 = vpop.f32.mrf.mxu0  ;;  %v12151_v16 = vpop.f32.mrf.mxu1  ;;  %v12171_v42 = vpack.c.bf16 %v12157_v33, %v12154_v8  ;;  %v373_v33 = vld [vmem:[%s11582_s23 + $0x4f0] sm:$0xff] }
 0x117   : > { %v1040_v50 = vpop.f32.mrf.mxu3  ;;  %16027 = vst [vmem:[#allocation105_spill] sm:$0xff] %v12149_v18 }
 0x118   : > { %16028 = vst [vmem:[#allocation106_spill] sm:$0xff] %v12151_v16  ;;  %v12173_v50 = vpack.c.bf16 %v288_v27, %v287_v46  ;;  %v12203_v27 = vld [vmem:[%s11582_s23 + $0x118] sm:$0xff] }
 0x119   : > { %16032 = vst [vmem:[#allocation110_spill] sm:$0xff] %v12171_v42 }
 0x11a   : > { %16033 = vst [vmem:[#allocation111_spill] sm:$0xff] %v12173_v50 }
 0x11b   : > { %16043 = vst [vmem:[#allocation121_spill] sm:$0xff] %v12203_v27 }
 0x11d   : > { %v12165_v24 = vpop.f32.mrf.mxu2 }
 0x11e   : > { %16030 = vst [vmem:[#allocation108_spill] sm:$0xff] %v12165_v24  ;;  %v12175_v16 = vpop.f32.mrf.mxu0  ;;  %v12177_v18 = vpop.f32.mrf.mxu1  ;;  %v12181_v24 = vpack.c.bf16 %v368_v31, %v367_v43  ;;  %v12200_v43 = vld [vmem:[%s11582_s23 + $0x110] sm:$0xff] }
 0x11f   : > { %v12167_v56 = vpop.f32.mrf.mxu3  ;;  %16034 = vst [vmem:[#allocation112_spill] sm:$0xff] %v12175_v16  ;;  %v330_v16 = vld [vmem:[%s11582_s23 + $0x398] sm:$0xff] }
 0x120   : > { %16031 = vst [vmem:[#allocation109_spill] sm:$0xff] %v12167_v56  ;;  %v289_v56 = vld [vmem:[%s11582_s23 + $0x250] sm:$0xff] }
 0x121   : > { %16035 = vst [vmem:[#allocation113_spill] sm:$0xff] %v12177_v18  ;;  %10430 = vmatmul.msk.bf16.gmra.mxu0 %vm477_vm1, %v12171_v42  ;;  %10450 = vmatmul.msk.bf16.gmra.mxu1 %vm477_vm1, %v12173_v50  ;;  %v290_v18 = vld [vmem:[%s11582_s23 + $0x258] sm:$0xff]  ;;  %v329_v50 = vld [vmem:[%s11582_s23 + $0x390] sm:$0xff] }
 0x122   : > { %16037 = vst [vmem:[#allocation115_spill] sm:$0xff] %v12181_v24  ;;  %10470 = vmatmul.msk.bf16.gmra.mxu2 %vm477_vm1, %v12179_v39  ;;  %v369_v39 = vld [vmem:[%s11582_s23 + $0x4d0] sm:$0xff]  ;;  %v370_v42 = vld [vmem:[%s11582_s23 + $0x4d8] sm:$0xff]  ;;  %v12225_v62 = vpack.c.bf16 %v330_v16, %v329_v50  ;;  %v12245_v50 = vld [vmem:[%s11582_s23 + $0x128] sm:$0xff] }
 0x123   : > { %16042 = vst [vmem:[#allocation120_spill] sm:$0xff] %v12200_v43 }
 0x124   : > { %10490 = vmatmul.msk.bf16.gmra.mxu3 %vm477_vm1, %v12181_v24  ;;  %16050 = vst [vmem:[#allocation128_spill] sm:$0xff] %v12225_v62 }
 0x125   : > { %v12191_v46 = vpop.f32.mrf.mxu2  ;;  %16055 = vst [vmem:[#allocation133_spill] sm:$0xff] %v12245_v50 }
 0x126   : > { %16038 = vst [vmem:[#allocation116_spill] sm:$0xff] %v12191_v46  ;;  %v12195_v29 = vpop.f32.mrf.mxu0  ;;  %v12197_v31 = vpop.f32.mrf.mxu1  ;;  %v12219_v46 = vpack.c.bf16 %v290_v18, %v289_v56 }
 0x127   : > { %v12193_v4 = vpop.f32.mrf.mxu3  ;;  %16040 = vst [vmem:[#allocation118_spill] sm:$0xff] %v12195_v29 }
 0x128   : > { %16039 = vst [vmem:[#allocation117_spill] sm:$0xff] %v12193_v4  ;;  %v12217_v4 = vpack.c.bf16 %v12203_v27, %v12200_v43  ;;  %v372_v27 = vld [vmem:[%s11582_s23 + $0x4e8] sm:$0xff] }
 0x129   : > { %16041 = vst [vmem:[#allocation119_spill] sm:$0xff] %v12197_v31 }
 0x12a   : > { %16046 = vst [vmem:[#allocation124_spill] sm:$0xff] %v12217_v4 }
 0x12b   : > { %16047 = vst [vmem:[#allocation125_spill] sm:$0xff] %v12219_v46 }
 0x12d   : > { %v12211_v13 = vpop.f32.mrf.mxu2 }
 0x12e   : > { %16044 = vst [vmem:[#allocation122_spill] sm:$0xff] %v12211_v13  ;;  %v12221_v31 = vpop.f32.mrf.mxu0  ;;  %v12223_v29 = vpop.f32.mrf.mxu1  ;;  %v12227_v13 = vpack.c.bf16 %v370_v42, %v369_v39  ;;  %v12242_v42 = vld [vmem:[%s11582_s23 + $0x120] sm:$0xff] }
 0x12f   : > { %v12213_v24 = vpop.f32.mrf.mxu3  ;;  %16048 = vst [vmem:[#allocation126_spill] sm:$0xff] %v12221_v31  ;;  %v331_v31 = vld [vmem:[%s11582_s23 + $0x3a0] sm:$0xff] }
 0x130   : > { %16045 = vst [vmem:[#allocation123_spill] sm:$0xff] %v12213_v24  ;;  %v291_v24 = vld [vmem:[%s11582_s23 + $0x260] sm:$0xff] }
 0x131   : > { %16049 = vst [vmem:[#allocation127_spill] sm:$0xff] %v12223_v29  ;;  %10431 = vmatmul.msk.bf16.gmra.mxu0 %vm477_vm1, %v12217_v4  ;;  %10451 = vmatmul.msk.bf16.gmra.mxu1 %vm477_vm1, %v12219_v46  ;;  %v292_v29 = vld [vmem:[%s11582_s23 + $0x268] sm:$0xff]  ;;  %v371_v4 = vld [vmem:[%s11582_s23 + $0x4e0] sm:$0xff] }
 0x132   : > { %16051 = vst [vmem:[#allocation129_spill] sm:$0xff] %v12227_v13  ;;  %10471 = vmatmul.msk.bf16.gmra.mxu2 %vm477_vm1, %v12225_v62  ;;  %v332_v46 = vld [vmem:[%s11582_s23 + $0x3a8] sm:$0xff]  ;;  %v12265_v43 = vpack.c.bf16 %v372_v27, %v371_v4 }
 0x133   : > { %16054 = vst [vmem:[#allocation132_spill] sm:$0xff] %v12242_v42 }
 0x134   : > { %10491 = vmatmul.msk.bf16.gmra.mxu3 %vm477_vm1, %v12227_v13  ;;  %v12255_v13 = vpack.c.bf16 %v12245_v50, %v12242_v42  ;;  %16061 = vst [vmem:[#allocation139_spill] sm:$0xff] %v12265_v43  ;;  %v333_v50 = vld [vmem:[%s11582_s23 + $0x3b0] sm:$0xff]  ;;  %v334_v42 = vld [vmem:[%s11582_s23 + $0x3b8] sm:$0xff] }
 0x135   : > { %v12237_v56 = vpop.f32.mrf.mxu2  ;;  %v12325_v51 = vpack.c.bf16 %v334_v42, %v333_v50 }
 0x136   : > { %16052 = vst [vmem:[#allocation130_spill] sm:$0xff] %v12237_v56  ;;  %v775_v16 = vpop.f32.mrf.mxu0  ;;  %v867_v39 = vpop.f32.mrf.mxu1  ;;  %v12257_v56 = vpack.c.bf16 %v292_v29, %v291_v24  ;;  %v11018_v24 = vld [vmem:[%s15652_s1 + $0x5c] sm:$0x1] }
 0x137   : > { %v12239_v18 = vpop.f32.mrf.mxu3  ;;  %16056 = vst [vmem:[#allocation134_spill] sm:$0xff] %v12255_v13 }
 0x138   : > { %16053 = vst [vmem:[#allocation131_spill] sm:$0xff] %v12239_v18  ;;  %v12263_v18 = vpack.c.bf16 %v332_v46, %v331_v31 }
 0x139   : > { %16057 = vst [vmem:[#allocation135_spill] sm:$0xff] %v12257_v56 }
 0x13a   : > { %16060 = vst [vmem:[#allocation138_spill] sm:$0xff] %v12263_v18 }
 0x13b   : > { %16070 = vst [vmem:[#allocation148_spill] sm:$0xff] %v12325_v51 }
 0x13d   : > { %v959_v62 = vpop.f32.mrf.mxu2 }
 0x13e   : > { %v12259_v16 = vpop.f32.mrf.mxu0  ;;  %v12261_v39 = vpop.f32.mrf.mxu1  ;;  %v7136_v62 = vunpack.c.l.b16 %v11018_v24  ;;  %v11105_v24 = vld [vmem:[%s15652_s1 + $0x68] sm:$0x1] }
 0x13f   : > { %v1051_v57 = vpop.f32.mrf.mxu3  ;;  %16058 = vst [vmem:[#allocation136_spill] sm:$0xff] %v12259_v16  ;;  %v293_v16 = vld [vmem:[%s11582_s23 + $0x270] sm:$0xff] }
 0x140   : > { %16059 = vst [vmem:[#allocation137_spill] sm:$0xff] %v12261_v39  ;;  %v10844_v57 = vld [vmem:[%s15652_s1 + $0x44] sm:$0x1]  ;;  %v7138_v31 = vpack.c.b16 %v7136_v62, %v7136_v62  ;;  %v12301_v39 = vld [vmem:[%s11582_s23 + $0x138] sm:$0xff] }
 0x141   : > { %10432 = vmatmul.msk.bf16.gmra.mxu0 %vm477_vm1, %v12255_v13  ;;  %10452 = vmatmul.msk.bf16.gmra.mxu1 %vm477_vm1, %v12257_v56  ;;  %v5466_v46 = vunpack.c.l.b16 %v10844_v57  ;;  %v10931_v57 = vld [vmem:[%s15652_s1 + $0x50] sm:$0x1]  ;;  %v294_v13 = vld [vmem:[%s11582_s23 + $0x278] sm:$0xff] }
 0x142   : > { %10472 = vmatmul.msk.bf16.gmra.mxu2 %vm477_vm1, %v12263_v18  ;;  %v7141_v62 = vsel %vm718_vm0, %v7138_v31, 0 }
 0x143   : > { %v5468_v27 = vpack.c.b16 %v5466_v46, %v5466_v46  ;;  %7149 = vmatpush.bf16.msra.mxu3 %v7141_v62 }
 0x144   : > { %10492 = vmatmul.msk.bf16.gmra.mxu3 %vm477_vm1, %v12265_v43 }
 0x145   : > { %v12281_v4 = vpop.f32.mrf.mxu2  ;;  %v5471_v46 = vsel %vm718_vm0, %v5468_v27, 0 }
 0x146   : > { %16062 = vst [vmem:[#allocation140_spill] sm:$0xff] %v12281_v4  ;;  %v12285_v43 = vpop.f32.mrf.mxu0  ;;  %v12287_v18 = vpop.f32.mrf.mxu1  ;;  %v6600_v4 = vunpack.c.l.b16 %v10931_v57  ;;  %5479 = vmatpush.bf16.msra.mxu1 %v5471_v46 }
 0x147   : > { %v12283_v29 = vpop.f32.mrf.mxu3  ;;  %16064 = vst [vmem:[#allocation142_spill] sm:$0xff] %v12285_v43 }
 0x148   : > { %16063 = vst [vmem:[#allocation141_spill] sm:$0xff] %v12283_v29  ;;  %v8265_v29 = vunpack.c.l.b16 %v11105_v24  ;;  %v6602_v43 = vpack.c.b16 %v6600_v4, %v6600_v4  ;;  %v12319_v4 = vpack.c.bf16 %v294_v13, %v293_v16 }
 0x149   : > { %16065 = vst [vmem:[#allocation143_spill] sm:$0xff] %v12287_v18  ;;  %v12298_v18 = vld [vmem:[%s11582_s23 + $0x130] sm:$0xff] }
 0x14a   : > { %v8267_v56 = vpack.c.b16 %v8265_v29, %v8265_v29  ;;  %v6620_v27 = vsel %vm718_vm0, %v6602_v43, 0  ;;  %v12317_v29 = vpack.c.bf16 %v12301_v39, %v12298_v18  ;;  %16069 = vst [vmem:[#allocation147_spill] sm:$0xff] %v12319_v4 }
 0x14b   : > { %6628 = vmatpush.bf16.msra.mxu2 %v6620_v27 }
 0x14c   : > { %v8270_v31 = vsel %vm718_vm0, %v8267_v56, 0  ;;  %16068 = vst [vmem:[#allocation146_spill] sm:$0xff] %v12317_v29  ;;  %v12327_v56 = vpack.c.bf16 %v374_v20, %v373_v33 }
 0x14d   : > { %8278 = vmatpush.bf16.msra.mxu0 %v8270_v31  ;;  %v12311_v24 = vpop.f32.mrf.mxu2 }
 0x14e   : > { %16066 = vst [vmem:[#allocation144_spill] sm:$0xff] %v12311_v24  ;;  %v12321_v62 = vpop.f32.mrf.mxu0  ;;  %v12323_v46 = vpop.f32.mrf.mxu1 }
 0x14f   : > { %v12313_v57 = vpop.f32.mrf.mxu3  ;;  %16071 = vst [vmem:[#allocation149_spill] sm:$0xff] %v12327_v56 }
 0x150   : > { %16067 = vst [vmem:[#allocation145_spill] sm:$0xff] %v12313_v57 }
 0x151   : > { %10433 = vmatmul.msk.bf16.gmra.mxu0 %vm477_vm1, %v12317_v29  ;;  %10453 = vmatmul.msk.bf16.gmra.mxu1 %vm477_vm1, %v12319_v4 }
 0x152   : > { %10473 = vmatmul.msk.bf16.gmra.mxu2 %vm477_vm1, %v12325_v51  ;;  %v12407_v51 = vpack.c.bf16 %v11742_v36, %v11716_v21 }
 0x154   : > { %10493 = vmatmul.msk.bf16.gmra.mxu3 %vm477_vm1, %v12327_v56  ;;  %16086 = vst [vmem:[#allocation164_spill] sm:$0xff] %v12407_v51 }
 0x155   : > { %v12337_v13 = vpop.f32.mrf.mxu2 }
 0x156   : > { %16072 = vst [vmem:[#allocation150_spill] sm:$0xff] %v12337_v13  ;;  %v12341_v42 = vpop.f32.mrf.mxu0  ;;  %v12343_v20 = vpop.f32.mrf.mxu1 }
 0x157   : > { %v12339_v43 = vpop.f32.mrf.mxu3 }
 0x158   : > { %16073 = vst [vmem:[#allocation151_spill] sm:$0xff] %v12339_v43 }
 0x15d   : > { %v12345_v33 = vpop.f32.mrf.mxu2 }
 0x15e   : > { %16074 = vst [vmem:[#allocation152_spill] sm:$0xff] %v12345_v33  ;;  %v787_v16 = vpop.f32.mrf.mxu0  ;;  %v879_v31 = vpop.f32.mrf.mxu1 }
 0x15f   : > { %v12347_v50 = vpop.f32.mrf.mxu3 }
 0x160   : > { %16075 = vst [vmem:[#allocation153_spill] sm:$0xff] %v12347_v50 }
 0x161   : > { %10501 = vmatmul.msk.bf16.vlgmr.msrb.gmra.mxu1 %vm477_vm1, %v11590_v23  ;;  %10762 = vmatmul.msk.bf16.vlgmr.msrb.gmra.mxu0 %vm477_vm1, %v11634_v47 }
 0x162   : > { %10588 = vmatmul.msk.bf16.vlgmr.msrb.gmra.mxu2 %vm477_vm1, %v11590_v23 }
 0x164   : > { %10675 = vmatmul.msk.bf16.vlgmr.msrb.gmra.mxu3 %vm477_vm1, %v11634_v47 }
 0x165   : > { %v971_v27 = vpop.f32.mrf.mxu2 }
 0x166   : > { %v12357_v57 = vpop.f32.mrf.mxu0  ;;  %v12359_v56 = vpop.f32.mrf.mxu1 }
 0x167   : > { %v1063_v43 = vpop.f32.mrf.mxu3 }
 0x16d   : > { %v12361_v16 = vpop.f32.mrf.mxu2 }
 0x16e   : > { %16076 = vst [vmem:[#allocation154_spill] sm:$0xff] %v12361_v16  ;;  %v12365_v50 = vpop.f32.mrf.mxu0  ;;  %v12367_v33 = vpop.f32.mrf.mxu1 }
 0x16f   : > { %v12363_v31 = vpop.f32.mrf.mxu3 }
 0x170   : > { %16077 = vst [vmem:[#allocation155_spill] sm:$0xff] %v12363_v31 }
 0x171   : > { %10502 = vmatmul.msk.bf16.gmra.mxu1 %vm477_vm1, %v11620_v41  ;;  %10763 = vmatmul.msk.bf16.gmra.mxu0 %vm477_vm1, %v11663_v63 }
 0x172   : > { %10589 = vmatmul.msk.bf16.gmra.mxu2 %vm477_vm1, %v11620_v41 }
 0x174   : > { %10676 = vmatmul.msk.bf16.gmra.mxu3 %vm477_vm1, %v11663_v63 }
 0x175   : > { %v12377_v23 = vpop.f32.mrf.mxu2 }
 0x176   : > { %16078 = vst [vmem:[#allocation156_spill] sm:$0xff] %v12377_v23  ;;  %v12381_v27 = vpop.f32.mrf.mxu0  ;;  %v12383_v31 = vpop.f32.mrf.mxu1 }
 0x177   : > { %v12379_v43 = vpop.f32.mrf.mxu3  ;;  %16080 = vst [vmem:[#allocation158_spill] sm:$0xff] %v12383_v31 }
 0x178   : > { %16079 = vst [vmem:[#allocation157_spill] sm:$0xff] %v12379_v43 }
 0x17d   : > { %v12385_v47 = vpop.f32.mrf.mxu2 }
 0x17e   : > { %16081 = vst [vmem:[#allocation159_spill] sm:$0xff] %v12385_v47  ;;  %v12389_v13 = vpop.f32.mrf.mxu0  ;;  %v12391_v24 = vpop.f32.mrf.mxu1 }
 0x17f   : > { %v12387_v16 = vpop.f32.mrf.mxu3  ;;  %16083 = vst [vmem:[#allocation161_spill] sm:$0xff] %v12391_v24 }
 0x180   : > { %16082 = vst [vmem:[#allocation160_spill] sm:$0xff] %v12387_v16 }
 0x181   : > { %10503 = vmatmul.msk.bf16.gmra.mxu1 %vm477_vm1, %v11647_v55  ;;  %10764 = vmatmul.msk.bf16.gmra.mxu0 %vm477_vm1, %v11665_v0 }
 0x182   : > { %10590 = vmatmul.msk.bf16.gmra.mxu2 %vm477_vm1, %v11647_v55 }
 0x184   : > { %10677 = vmatmul.msk.bf16.gmra.mxu3 %vm477_vm1, %v11665_v0 }
 0x185   : > { %v12401_v41 = vpop.f32.mrf.mxu2 }
 0x186   : > { %16084 = vst [vmem:[#allocation162_spill] sm:$0xff] %v12401_v41  ;;  %v798_v16 = vpop.f32.mrf.mxu0  ;;  %v890_v63 = vpop.f32.mrf.mxu1 }
 0x187   : > { %v12403_v43 = vpop.f32.mrf.mxu3 }
 0x188   : > { %16085 = vst [vmem:[#allocation163_spill] sm:$0xff] %v12403_v43 }
 0x18d   : > { %v982_v47 = vpop.f32.mrf.mxu2 }
 0x18e   : > { %v12409_v24 = vpop.f32.mrf.mxu0  ;;  %v12411_v31 = vpop.f32.mrf.mxu1 }
 0x18f   : > { %v1074_v23 = vpop.f32.mrf.mxu3 }
 0x190   : > { %v12435_v23 = vpack.c.bf16 %v11772_v53, %v11745_v37 }
 0x191   : > { %10504 = vmatmul.msk.bf16.gmra.mxu1 %vm477_vm1, %v11677_v7  ;;  %10765 = vmatmul.msk.bf16.gmra.mxu0 %vm477_vm1, %v12407_v51 }
 0x192   : > { %10591 = vmatmul.msk.bf16.gmra.mxu2 %vm477_vm1, %v11677_v7  ;;  %16092 = vst [vmem:[#allocation170_spill] sm:$0xff] %v12435_v23 }
 0x194   : > { %10678 = vmatmul.msk.bf16.gmra.mxu3 %vm477_vm1, %v12407_v51 }
 0x195   : > { %v12421_v47 = vpop.f32.mrf.mxu2 }
 0x196   : > { %16087 = vst [vmem:[#allocation165_spill] sm:$0xff] %v12421_v47  ;;  %v12425_v63 = vpop.f32.mrf.mxu0  ;;  %v12427_v21 = vpop.f32.mrf.mxu1 }
 0x197   : > { %v12423_v55 = vpop.f32.mrf.mxu3  ;;  %16089 = vst [vmem:[#allocation167_spill] sm:$0xff] %v12427_v21 }
 0x198   : > { %16088 = vst [vmem:[#allocation166_spill] sm:$0xff] %v12423_v55 }
 0x19d   : > { %v12429_v36 = vpop.f32.mrf.mxu2 }
 0x19e   : > { %16090 = vst [vmem:[#allocation168_spill] sm:$0xff] %v12429_v36  ;;  %v12437_v7 = vpop.f32.mrf.mxu0  ;;  %v12439_v43 = vpop.f32.mrf.mxu1  ;;  %v12463_v36 = vpack.c.bf16 %v11802_v11, %v11775_v54 }
 0x19f   : > { %v12431_v16 = vpop.f32.mrf.mxu3  ;;  %16093 = vst [vmem:[#allocation171_spill] sm:$0xff] %v12439_v43 }
 0x1a0   : > { %16091 = vst [vmem:[#allocation169_spill] sm:$0xff] %v12431_v16 }
 0x1a1   : > { %10505 = vmatmul.msk.bf16.gmra.mxu1 %vm477_vm1, %v11699_v17  ;;  %10766 = vmatmul.msk.bf16.gmra.mxu0 %vm477_vm1, %v12435_v23  ;;  %16099 = vst [vmem:[#allocation177_spill] sm:$0xff] %v12463_v36 }
 0x1a2   : > { %10592 = vmatmul.msk.bf16.gmra.mxu2 %vm477_vm1, %v11699_v17 }
 0x1a4   : > { %10679 = vmatmul.msk.bf16.gmra.mxu3 %vm477_vm1, %v12435_v23 }
 0x1a5   : > { %v12449_v16 = vpop.f32.mrf.mxu2 }
 0x1a6   : > { %16094 = vst [vmem:[#allocation172_spill] sm:$0xff] %v12449_v16  ;;  %v12453_v53 = vpop.f32.mrf.mxu0  ;;  %v12455_v55 = vpop.f32.mrf.mxu1 }
 0x1a7   : > { %v12451_v37 = vpop.f32.mrf.mxu3  ;;  %16096 = vst [vmem:[#allocation174_spill] sm:$0xff] %v12455_v55 }
 0x1a8   : > { %16095 = vst [vmem:[#allocation173_spill] sm:$0xff] %v12451_v37 }
 0x1ad   : > { %v12457_v51 = vpop.f32.mrf.mxu2 }
 0x1ae   : > { %16097 = vst [vmem:[#allocation175_spill] sm:$0xff] %v12457_v51  ;;  %v810_v17 = vpop.f32.mrf.mxu0  ;;  %v902_v47 = vpop.f32.mrf.mxu1 }
 0x1af   : > { %v12459_v0 = vpop.f32.mrf.mxu3  ;;  %v12483_v17 = vpack.c.bf16 %v11856_v1, %v11805_v12 }
 0x1b0   : > { %16098 = vst [vmem:[#allocation176_spill] sm:$0xff] %v12459_v0 }
 0x1b1   : > { %10506 = vmatmul.msk.bf16.gmra.mxu1 %vm477_vm1, %v11725_v32  ;;  %10767 = vmatmul.msk.bf16.gmra.mxu0 %vm477_vm1, %v12463_v36  ;;  %16103 = vst [vmem:[#allocation181_spill] sm:$0xff] %v12483_v17 }
 0x1b2   : > { %10593 = vmatmul.msk.bf16.gmra.mxu2 %vm477_vm1, %v11725_v32 }
 0x1b4   : > { %10680 = vmatmul.msk.bf16.gmra.mxu3 %vm477_vm1, %v12463_v36 }
 0x1b5   : > { %v994_v37 = vpop.f32.mrf.mxu2 }
 0x1b6   : > { %v12473_v23 = vpop.f32.mrf.mxu0  ;;  %v12475_v54 = vpop.f32.mrf.mxu1 }
 0x1b7   : > { %v1086_v0 = vpop.f32.mrf.mxu3  ;;  %16100 = vst [vmem:[#allocation178_spill] sm:$0xff] %v12475_v54 }
 0x1bd   : > { %v12477_v11 = vpop.f32.mrf.mxu2 }
 0x1be   : > { %16101 = vst [vmem:[#allocation179_spill] sm:$0xff] %v12477_v11  ;;  %v12485_v51 = vpop.f32.mrf.mxu0  ;;  %v12487_v32 = vpop.f32.mrf.mxu1  ;;  %v12511_v11 = vpack.c.bf16 %v11902_v22, %v11859_v2 }
 0x1bf   : > { %v12479_v47 = vpop.f32.mrf.mxu3  ;;  %16104 = vst [vmem:[#allocation182_spill] sm:$0xff] %v12487_v32 }
 0x1c0   : > { %16102 = vst [vmem:[#allocation180_spill] sm:$0xff] %v12479_v47 }
 0x1c1   : > { %10507 = vmatmul.msk.bf16.gmra.mxu1 %vm477_vm1, %v11755_v49  ;;  %10768 = vmatmul.msk.bf16.gmra.mxu0 %vm477_vm1, %v12483_v17  ;;  %16110 = vst [vmem:[#allocation188_spill] sm:$0xff] %v12511_v11 }
 0x1c2   : > { %10594 = vmatmul.msk.bf16.gmra.mxu2 %vm477_vm1, %v11755_v49 }
 0x1c4   : > { %10681 = vmatmul.msk.bf16.gmra.mxu3 %vm477_vm1, %v12483_v17 }
 0x1c5   : > { %v12497_v0 = vpop.f32.mrf.mxu2 }
 0x1c6   : > { %16105 = vst [vmem:[#allocation183_spill] sm:$0xff] %v12497_v0  ;;  %v12501_v1 = vpop.f32.mrf.mxu0  ;;  %v12503_v37 = vpop.f32.mrf.mxu1  ;;  %v12531_v0 = vpack.c.bf16 %v11940_v44, %v11905_v25 }
 0x1c7   : > { %v12499_v12 = vpop.f32.mrf.mxu3  ;;  %16107 = vst [vmem:[#allocation185_spill] sm:$0xff] %v12503_v37 }
 0x1c8   : > { %16106 = vst [vmem:[#allocation184_spill] sm:$0xff] %v12499_v12 }
 0x1c9   : > { %16114 = vst [vmem:[#allocation192_spill] sm:$0xff] %v12531_v0 }
 0x1cd   : > { %v12505_v47 = vpop.f32.mrf.mxu2 }
 0x1ce   : > { %16108 = vst [vmem:[#allocation186_spill] sm:$0xff] %v12505_v47  ;;  %v12513_v49 = vpop.f32.mrf.mxu0  ;;  %v12515_v16 = vpop.f32.mrf.mxu1 }
 0x1cf   : > { %v12507_v36 = vpop.f32.mrf.mxu3  ;;  %16111 = vst [vmem:[#allocation189_spill] sm:$0xff] %v12515_v16 }
 0x1d0   : > { %16109 = vst [vmem:[#allocation187_spill] sm:$0xff] %v12507_v36 }
 0x1d1   : > { %10508 = vmatmul.msk.bf16.gmra.mxu1 %vm477_vm1, %v11785_v3  ;;  %10769 = vmatmul.msk.bf16.gmra.mxu0 %vm477_vm1, %v12511_v11 }
 0x1d2   : > { %10595 = vmatmul.msk.bf16.gmra.mxu2 %vm477_vm1, %v11785_v3 }
 0x1d4   : > { %10682 = vmatmul.msk.bf16.gmra.mxu3 %vm477_vm1, %v12511_v11 }
 0x1d5   : > { %v12525_v36 = vpop.f32.mrf.mxu2 }
 0x1d6   : > { %16112 = vst [vmem:[#allocation190_spill] sm:$0xff] %v12525_v36  ;;  %v821_v22 = vpop.f32.mrf.mxu0  ;;  %v913_v12 = vpop.f32.mrf.mxu1 }
 0x1d7   : > { %v12527_v2 = vpop.f32.mrf.mxu3 }
 0x1d8   : > { %16113 = vst [vmem:[#allocation191_spill] sm:$0xff] %v12527_v2 }
 0x1dd   : > { %v1005_v17 = vpop.f32.mrf.mxu2 }
 0x1de   : > { %v1252_v41 = vpop.f32.mrf.mxu1  ;;  %v4353_v16 = vpop.f32.mrf.mxu0 }
 0x1df   : > { %v1097_v47 = vpop.f32.mrf.mxu3  ;;  %v4913_v17 = vrot.slane %v4353_v16, 1  ;;  %v1813_v44 = vrot.slane %v1252_v41, 1 }
 0x1e1   : > { %10509 = vmatmul.msk.bf16.gmra.mxu1 %vm477_vm1, %v11815_v26  ;;  %10770 = vmatmul.msk.bf16.gmra.mxu0 %vm477_vm1, %v12531_v0 }
 0x1e2   : > { %10596 = vmatmul.msk.bf16.gmra.mxu2 %vm477_vm1, %v11815_v26 }
 0x1e4   : > { %10683 = vmatmul.msk.bf16.gmra.mxu3 %vm477_vm1, %v12531_v0  ;;  %v12545_v0 = vpack.c.bf16 %v11986_v5, %v11943_v58 }
 0x1e5   : > { %v2382_v47 = vpop.f32.mrf.mxu2 }
 0x1e6   : > { %v1254_v22 = vpop.f32.mrf.mxu1  ;;  %v4355_v25 = vpop.f32.mrf.mxu0  ;;  %v2943_v37 = vrot.slane %v2382_v47, 2  ;;  %16115 = vst [vmem:[#allocation193_spill] sm:$0xff] %v12545_v0 }
 0x1e7   : > { %v3832_v12 = vpop.f32.mrf.mxu3  ;;  %v1814_v2 = vrot.slane %v1254_v22, 1  ;;  %v4914_v11 = vrot.slane %v4355_v25, 1 }
 0x1e9   : > { %v1815_v3 = vsel %vm1812_vm2, %v1813_v44, %v1814_v2  ;;  %v4915_v36 = vsel %vm1812_vm2, %v4913_v17, %v4914_v11 }
 0x1ea   : > { %v2229_v43 = vadd.f32 %v1815_v3, %v11819_v28 }
 0x1ed   : > { %v2384_v32 = vpop.f32.mrf.mxu2 }
 0x1ee   : > { %v2944_v16 = vrot.slane %v2384_v32, 2  ;;  %v1257_v54 = vpop.f32.mrf.mxu1  ;;  %v4358_v55 = vpop.f32.mrf.mxu0 }
 0x1ef   : > { %v3834_v26 = vpop.f32.mrf.mxu3  ;;  %v1816_v41 = vrot.slane %v1257_v54, 1  ;;  %v4916_v22 = vrot.slane %v4358_v55, 1 }
 0x1f0   : > { %v2945_v25 = vsel %vm2942_vm3, %v2943_v37, %v2944_v16 }
 0x1f1   : > { %v3359_v44 = vadd.f32 %v2945_v25, %v2229_v43  ;;  %v1817_v17 = vsel %vm1812_vm2, %v1814_v2, %v1816_v41  ;;  %v4917_v47 = vsel %vm1812_vm2, %v4914_v11, %v4916_v22  ;;  %10510 = vmatmul.msk.bf16.gmra.mxu1 %vm477_vm1, %v11873_v61  ;;  %10771 = vmatmul.msk.bf16.gmra.mxu0 %vm477_vm1, %v12545_v0 }
 0x1f2   : > { %10597 = vmatmul.msk.bf16.gmra.mxu2 %vm477_vm1, %v11873_v61  ;;  %v2230_v54 = vadd.f32 %v1817_v17, %v11845_v59 }
 0x1f3   : > { %v4200_v32 = vadd.f32 %v3832_v12, %v3359_v44 }
 0x1f4   : > { %10684 = vmatmul.msk.bf16.gmra.mxu3 %vm477_vm1, %v12545_v0 }
 0x1f5   : > { %v2387_v3 = vpop.f32.mrf.mxu2  ;;  %v12559_v58 = vadd.f32 %v4915_v36, %v4200_v32  ;;  %v12567_v36 = vpack.c.bf16 %v12028_v9, %v11989_v45 }
 0x1f6   : > { %v2946_v5 = vrot.slane %v2387_v3, 2  ;;  %v1259_v43 = vpop.f32.mrf.mxu1  ;;  %v4360_v55 = vpop.f32.mrf.mxu0 }
 0x1f7   : > { %v3837_v28 = vpop.f32.mrf.mxu3  ;;  %v1818_v11 = vrot.slane %v1259_v43, 1  ;;  %v4918_v37 = vrot.slane %v4360_v55, 1 }
 0x1f8   : > { %v2947_v2 = vsel %vm2942_vm3, %v2944_v16, %v2946_v5 }
 0x1f9   : > { %v3360_v25 = vadd.f32 %v2947_v2, %v2230_v54  ;;  %v1819_v61 = vsel %vm1812_vm2, %v1816_v41, %v1818_v11  ;;  %v4919_v21 = vsel %vm1812_vm2, %v4916_v22, %v4918_v37 }
 0x1fa   : > { %v2231_v43 = vadd.f32 %v1819_v61, %v11877_v48 }
 0x1fb   : > { %v4201_v0 = vadd.f32 %v3834_v26, %v3360_v25 }
 0x1fd   : > { %v2389_v12 = vpop.f32.mrf.mxu2  ;;  %v12569_v32 = vadd.f32 %v4917_v47, %v4201_v0 }
 0x1fe   : > { %v2948_v3 = vrot.slane %v2389_v12, 2  ;;  %v1262_v59 = vpop.f32.mrf.mxu1  ;;  %v4363_v17 = vpop.f32.mrf.mxu0 }
 0x1ff   : > { %v3839_v44 = vpop.f32.mrf.mxu3  ;;  %v1820_v16 = vrot.slane %v1262_v59, 1  ;;  %v4920_v55 = vrot.slane %v4363_v17, 1  ;;  %v12589_v17 = vpack.c.bf16 %v12070_v60, %v12031_v19 }
 0x200   : > { %v2949_v41 = vsel %vm2942_vm3, %v2946_v5, %v2948_v3 }
 0x201   : > { %v3361_v54 = vadd.f32 %v2949_v41, %v2231_v43  ;;  %v1821_v26 = vsel %vm1812_vm2, %v1818_v11, %v1820_v16  ;;  %v4921_v22 = vsel %vm1812_vm2, %v4918_v37, %v4920_v55  ;;  %10511 = vmatmul.msk.bf16.gmra.mxu1 %vm477_vm1, %v11919_v14  ;;  %10772 = vmatmul.msk.bf16.gmra.mxu0 %vm477_vm1, %v12567_v36 }
 0x202   : > { %10598 = vmatmul.msk.bf16.gmra.mxu2 %vm477_vm1, %v11919_v14  ;;  %v2232_v11 = vadd.f32 %v1821_v26, %v11897_v15 }
 0x203   : > { %v4202_v48 = vadd.f32 %v3837_v28, %v3361_v54 }
 0x204   : > { %10685 = vmatmul.msk.bf16.gmra.mxu3 %vm477_vm1, %v12567_v36 }
 0x205   : > { %v2392_v61 = vpop.f32.mrf.mxu2  ;;  %v12583_v9 = vadd.f32 %v4919_v21, %v4202_v48 }
 0x206   : > { %v2950_v0 = vrot.slane %v2392_v61, 2  ;;  %v1264_v47 = vpop.f32.mrf.mxu1  ;;  %v4365_v5 = vpop.f32.mrf.mxu0 }
 0x207   : > { %v3842_v45 = vpop.f32.mrf.mxu3  ;;  %v1822_v16 = vrot.slane %v1264_v47, 1  ;;  %v4922_v55 = vrot.slane %v4365_v5, 1 }
 0x208   : > { %v2951_v37 = vsel %vm2942_vm3, %v2948_v3, %v2950_v0 }
 0x209   : > { %v3362_v2 = vadd.f32 %v2951_v37, %v2232_v11 }
 0x20b   : > { %v4203_v25 = vadd.f32 %v3839_v44, %v3362_v2 }
 0x20d   : > { %v2394_v12 = vpop.f32.mrf.mxu2  ;;  %v12591_v28 = vadd.f32 %v4921_v22, %v4203_v25 }
 0x20e   : > { %v1267_v43 = vpop.f32.mrf.mxu1  ;;  %v4368_v21 = vpop.f32.mrf.mxu0  ;;  %v2952_v44 = vrot.slane %v2394_v12, 2  ;;  %v12609_v12 = vpack.c.bf16 %v12116_v30, %v12073_v6 }
 0x20f   : > { %v3843_v59 = vpop.f32.mrf.mxu3  ;;  %v1823_v41 = vrot.slane %v1267_v43, 1  ;;  %v4923_v54 = vrot.slane %v4368_v21, 1 }
 0x211   : > { %v1824_v15 = vsel %vm1812_vm2, %v1822_v16, %v1823_v41  ;;  %v4924_v3 = vsel %vm1812_vm2, %v4922_v55, %v4923_v54  ;;  %10512 = vmatmul.msk.bf16.gmra.mxu1 %vm477_vm1, %v11957_v35  ;;  %10773 = vmatmul.msk.bf16.gmra.mxu0 %vm477_vm1, %v12589_v17 }
 0x212   : > { %10599 = vmatmul.msk.bf16.gmra.mxu2 %vm477_vm1, %v11957_v35  ;;  %v2233_v61 = vadd.f32 %v1824_v15, %v11935_v10 }
 0x214   : > { %10686 = vmatmul.msk.bf16.gmra.mxu3 %vm477_vm1, %v12589_v17 }
 0x215   : > { %v2397_v19 = vpop.f32.mrf.mxu2 }
 0x216   : > { %v2953_v26 = vrot.slane %v2397_v19, 2  ;;  %v1269_v22 = vpop.f32.mrf.mxu1  ;;  %v4370_v48 = vpop.f32.mrf.mxu0 }
 0x217   : > { %v3846_v60 = vpop.f32.mrf.mxu3  ;;  %v1825_v45 = vrot.slane %v1269_v22, 1  ;;  %v4925_v0 = vrot.slane %v4370_v48, 1 }
 0x218   : > { %v2954_v47 = vsel %vm2942_vm3, %v2952_v44, %v2953_v26 }
 0x219   : > { %v3363_v5 = vadd.f32 %v2954_v47, %v2233_v61  ;;  %v1826_v11 = vsel %vm1812_vm2, %v1823_v41, %v1825_v45  ;;  %v4926_v37 = vsel %vm1812_vm2, %v4923_v54, %v4925_v0 }
 0x21a   : > { %v2234_v15 = vadd.f32 %v1826_v11, %v11961_v34 }
 0x21b   : > { %v4204_v2 = vadd.f32 %v3843_v59, %v3363_v5 }
 0x21d   : > { %v2399_v25 = vpop.f32.mrf.mxu2  ;;  %v12611_v21 = vadd.f32 %v4924_v3, %v4204_v2 }
 0x21e   : > { %v2955_v16 = vrot.slane %v2399_v25, 2  ;;  %v1272_v10 = vpop.f32.mrf.mxu1  ;;  %v4373_v55 = vpop.f32.mrf.mxu0 }
 0x21f   : > { %v3848_v43 = vpop.f32.mrf.mxu3  ;;  %v1827_v19 = vrot.slane %v1272_v10, 1  ;;  %v4927_v44 = vrot.slane %v4373_v55, 1 }
 0x220   : > { %v2956_v41 = vsel %vm2942_vm3, %v2953_v26, %v2955_v16 }
 0x221   : > { %v3364_v22 = vadd.f32 %v2956_v41, %v2234_v15  ;;  %v1828_v59 = vsel %vm1812_vm2, %v1825_v45, %v1827_v19  ;;  %v4928_v54 = vsel %vm1812_vm2, %v4925_v0, %v4927_v44  ;;  %10513 = vmatmul.msk.bf16.gmra.mxu1 %vm477_vm1, %v12003_v52  ;;  %10774 = vmatmul.msk.bf16.gmra.mxu0 %vm477_vm1, %v12609_v12 }
 0x222   : > { %10600 = vmatmul.msk.bf16.gmra.mxu2 %vm477_vm1, %v12003_v52  ;;  %v2235_v45 = vadd.f32 %v1828_v59, %v11981_v38  ;;  %v16118_v59 = vld [vmem:[#allocation71_spill] sm:$0xff] }
 0x223   : > { %v4205_v34 = vadd.f32 %v3846_v60, %v3364_v22 }
 0x224   : > { %10687 = vmatmul.msk.bf16.gmra.mxu3 %vm477_vm1, %v12609_v12 }
 0x225   : > { %v2402_v6 = vpop.f32.mrf.mxu2  ;;  %v12625_v3 = vadd.f32 %v4926_v37, %v4205_v34  ;;  %v12633_v37 = vpack.c.bf16 %v12154_v8, %v12119_v40 }
 0x226   : > { %v2957_v26 = vrot.slane %v2402_v6, 2  ;;  %v1274_v48 = vpop.f32.mrf.mxu1  ;;  %v4375_v61 = vpop.f32.mrf.mxu0 }
 0x227   : > { %v3851_v30 = vpop.f32.mrf.mxu3  ;;  %v1829_v0 = vrot.slane %v1274_v48, 1  ;;  %v4929_v47 = vrot.slane %v4375_v61, 1  ;;  %16116 = vst [vmem:[#allocation194_spill] sm:$0xff] %v12633_v37 }
 0x228   : > { %v2958_v5 = vsel %vm2942_vm3, %v2955_v16, %v2957_v26 }
 0x229   : > { %v3365_v11 = vadd.f32 %v2958_v5, %v2235_v45  ;;  %v1830_v2 = vsel %vm1812_vm2, %v1827_v19, %v1829_v0  ;;  %v4930_v25 = vsel %vm1812_vm2, %v4927_v44, %v4929_v47  ;;  %v16119_v19 = vld [vmem:[#allocation77_spill] sm:$0xff] }
 0x22a   : > { %v2236_v34 = vadd.f32 %v1830_v2, %v16118_v59  ;;  %v16124_v59 = vld [vmem:[#allocation79_spill] sm:$0xff] }
 0x22b   : > { %v4206_v10 = vadd.f32 %v3848_v43, %v3365_v11 }
 0x22d   : > { %v2404_v60 = vpop.f32.mrf.mxu2  ;;  %v12635_v15 = vadd.f32 %v4928_v54, %v4206_v10 }
 0x22e   : > { %v2959_v41 = vrot.slane %v2404_v60, 2  ;;  %v1277_v38 = vpop.f32.mrf.mxu1  ;;  %v4378_v22 = vpop.f32.mrf.mxu0  ;;  %v16121_v60 = vld [vmem:[#allocation107_spill] sm:$0xff] }
 0x22f   : > { %v3853_v55 = vpop.f32.mrf.mxu3  ;;  %16117 = vst [vmem:[#allocation195_spill] sm:$0xff] %v12635_v15  ;;  %v4931_v8 = vrot.slane %v4378_v22, 1  ;;  %v1831_v61 = vrot.slane %v1277_v38, 1  ;;  %v11271_v15 = vld [vmem:[%s11582_s23 + $0x148] sm:$0xff] }
 0x230   : > { %v2960_v16 = vsel %vm2942_vm3, %v2957_v26, %v2959_v41  ;;  %v16122_v55 = vld [vmem:[#allocation120_spill] sm:$0xff] }
 0x231   : > { %v3366_v6 = vadd.f32 %v2960_v16, %v2236_v34  ;;  %10514 = vmatmul.msk.bf16.gmra.mxu1 %vm477_vm1, %v16119_v19  ;;  %10775 = vmatmul.msk.bf16.gmra.mxu0 %vm477_vm1, %v12633_v37 }
 0x232   : > { %10601 = vmatmul.msk.bf16.gmra.mxu2 %vm477_vm1, %v16119_v19 }
 0x233   : > { %v4207_v40 = vadd.f32 %v3851_v30, %v3366_v6  ;;  %v12653_v30 = vpack.c.bf16 %v16122_v55, %v16121_v60  ;;  %v16127_v60 = vld [vmem:[#allocation85_spill] sm:$0xff] }
 0x234   : > { %10688 = vmatmul.msk.bf16.gmra.mxu3 %vm477_vm1, %v12633_v37 }
 0x235   : > { %v2407_v43 = vpop.f32.mrf.mxu2  ;;  %v12647_v54 = vadd.f32 %v4930_v25, %v4207_v40  ;;  %16123 = vst [vmem:[#allocation77_spill] sm:$0xff] %v12653_v30 }
 0x236   : > { %v1279_v26 = vpop.f32.mrf.mxu1  ;;  %v4380_v48 = vpop.f32.mrf.mxu0  ;;  %v2961_v11 = vrot.slane %v2407_v43, 2  ;;  %v16125_v43 = vld [vmem:[#allocation89_spill] sm:$0xff] }
 0x237   : > { %v3855_v44 = vpop.f32.mrf.mxu3  ;;  %16120 = vst [vmem:[#allocation71_spill] sm:$0xff] %v12647_v54  ;;  %v1832_v45 = vrot.slane %v1279_v26, 1  ;;  %v4932_v0 = vrot.slane %v4380_v48, 1  ;;  %v16128_v54 = vld [vmem:[#allocation121_spill] sm:$0xff] }
 0x239   : > { %v1833_v47 = vsel %vm1812_vm2, %v1831_v61, %v1832_v45  ;;  %v4933_v5 = vsel %vm1812_vm2, %v4931_v8, %v4932_v0 }
 0x23a   : > { %v2237_v34 = vadd.f32 %v1833_v47, %v16124_v59 }
 0x23d   : > { %v2409_v2 = vpop.f32.mrf.mxu2 }
 0x23e   : > { %v2962_v41 = vrot.slane %v2409_v2, 2  ;;  %v1282_v22 = vpop.f32.mrf.mxu1  ;;  %v4383_v25 = vpop.f32.mrf.mxu0 }
 0x23f   : > { %v3857_v10 = vpop.f32.mrf.mxu3  ;;  %v1834_v16 = vrot.slane %v1282_v22, 1  ;;  %v4934_v38 = vrot.slane %v4383_v25, 1 }
 0x240   : > { %v2963_v6 = vsel %vm2942_vm3, %v2961_v11, %v2962_v41 }
 0x241   : > { %v3367_v40 = vadd.f32 %v2963_v6, %v2237_v34  ;;  %v1835_v26 = vsel %vm1812_vm2, %v1832_v45, %v1834_v16  ;;  %v4935_v8 = vsel %vm1812_vm2, %v4932_v0, %v4934_v38  ;;  %10515 = vmatmul.msk.bf16.gmra.mxu1 %vm477_vm1, %v16125_v43  ;;  %10776 = vmatmul.msk.bf16.gmra.mxu0 %vm477_vm1, %v12653_v30 }
 0x242   : > { %10602 = vmatmul.msk.bf16.gmra.mxu2 %vm477_vm1, %v16125_v43  ;;  %v2238_v55 = vadd.f32 %v1835_v26, %v16127_v60 }
 0x243   : > { %v4208_v48 = vadd.f32 %v3855_v44, %v3367_v40 }
 0x244   : > { %10689 = vmatmul.msk.bf16.gmra.mxu3 %vm477_vm1, %v12653_v30 }
 0x245   : > { %v2412_v61 = vpop.f32.mrf.mxu2  ;;  %v12667_v11 = vadd.f32 %v4933_v5, %v4208_v48  ;;  %v16129_v5 = vld [vmem:[#allocation132_spill] sm:$0xff] }
 0x246   : > { %v2964_v45 = vrot.slane %v2412_v61, 2  ;;  %v1284_v2 = vpop.f32.mrf.mxu1  ;;  %v4385_v0 = vpop.f32.mrf.mxu0  ;;  %v12675_v48 = vpack.c.bf16 %v16129_v5, %v16128_v54 }
 0x247   : > { %v3860_v47 = vpop.f32.mrf.mxu3  ;;  %16126 = vst [vmem:[#allocation107_spill] sm:$0xff] %v12667_v11  ;;  %v1836_v22 = vrot.slane %v1284_v2, 1  ;;  %v4936_v25 = vrot.slane %v4385_v0, 1  ;;  %v16132_v0 = vld [vmem:[#allocation91_spill] sm:$0xff] }
 0x248   : > { %v2965_v59 = vsel %vm2942_vm3, %v2962_v41, %v2964_v45  ;;  %16130 = vst [vmem:[#allocation120_spill] sm:$0xff] %v12675_v48 }
 0x249   : > { %v3368_v34 = vadd.f32 %v2965_v59, %v2238_v55  ;;  %v1837_v6 = vsel %vm1812_vm2, %v1834_v16, %v1836_v22  ;;  %v4937_v37 = vsel %vm1812_vm2, %v4934_v38, %v4936_v25 }
 0x24a   : > { %v2239_v60 = vadd.f32 %v1837_v6, %v16132_v0 }
 0x24b   : > { %v4209_v30 = vadd.f32 %v3857_v10, %v3368_v34  ;;  %v16133_v34 = vld [vmem:[#allocation101_spill] sm:$0xff] }
 0x24d   : > { %v2414_v44 = vpop.f32.mrf.mxu2  ;;  %v12677_v61 = vadd.f32 %v4935_v8, %v4209_v30 }
 0x24e   : > { %v2966_v11 = vrot.slane %v2414_v44, 2  ;;  %v1287_v26 = vpop.f32.mrf.mxu1  ;;  %v4388_v2 = vpop.f32.mrf.mxu0  ;;  %v16135_v44 = vld [vmem:[#allocation97_spill] sm:$0xff] }
 0x24f   : > { %v3862_v40 = vpop.f32.mrf.mxu3  ;;  %16131 = vst [vmem:[#allocation79_spill] sm:$0xff] %v12677_v61  ;;  %v1838_v41 = vrot.slane %v1287_v26, 1  ;;  %v4938_v55 = vrot.slane %v4388_v2, 1 }
 0x250   : > { %v2967_v16 = vsel %vm2942_vm3, %v2964_v45, %v2966_v11 }
 0x251   : > { %v3369_v59 = vadd.f32 %v2967_v16, %v2239_v60  ;;  %v1839_v10 = vsel %vm1812_vm2, %v1836_v22, %v1838_v41  ;;  %v4939_v38 = vsel %vm1812_vm2, %v4936_v25, %v4938_v55  ;;  %10516 = vmatmul.msk.bf16.gmra.mxu1 %vm477_vm1, %v16133_v34  ;;  %10777 = vmatmul.msk.bf16.gmra.mxu0 %vm477_vm1, %v12675_v48  ;;  %v16136_v55 = vld [vmem:[#allocation133_spill] sm:$0xff] }
 0x252   : > { %10603 = vmatmul.msk.bf16.gmra.mxu2 %vm477_vm1, %v16133_v34  ;;  %v2240_v5 = vadd.f32 %v1839_v10, %v16135_v44  ;;  %v12697_v16 = vpack.c.bf16 %v12298_v18, %v16136_v55 }
 0x253   : > { %v4210_v54 = vadd.f32 %v3860_v47, %v3369_v59 }
 0x254   : > { %10690 = vmatmul.msk.bf16.gmra.mxu3 %vm477_vm1, %v12675_v48  ;;  %16137 = vst [vmem:[#allocation85_spill] sm:$0xff] %v12697_v16 }
 0x255   : > { %v2417_v30 = vpop.f32.mrf.mxu2  ;;  %v12691_v45 = vadd.f32 %v4937_v37, %v4210_v54 }
 0x256   : > { %v2968_v22 = vrot.slane %v2417_v30, 2  ;;  %v1289_v6 = vpop.f32.mrf.mxu1  ;;  %v4390_v25 = vpop.f32.mrf.mxu0 }
 0x257   : > { %v3865_v8 = vpop.f32.mrf.mxu3  ;;  %16134 = vst [vmem:[#allocation89_spill] sm:$0xff] %v12691_v45  ;;  %v1840_v54 = vrot.slane %v1289_v6, 1  ;;  %v4940_v30 = vrot.slane %v4390_v25, 1  ;;  %v11270_v45 = vld [vmem:[%s11582_s23 + $0x140] sm:$0xff] }
 0x258   : > { %v2969_v26 = vsel %vm2942_vm3, %v2966_v11, %v2968_v22  ;;  %v16139_v22 = vld [vmem:[#allocation110_spill] sm:$0xff] }
 0x259   : > { %v3370_v2 = vadd.f32 %v2969_v26, %v2240_v5  ;;  %v16140_v5 = vld [vmem:[#allocation105_spill] sm:$0xff] }
 0x25b   : > { %v4211_v0 = vadd.f32 %v3862_v40, %v3370_v2 }
 0x25d   : > { %v2419_v60 = vpop.f32.mrf.mxu2  ;;  %v12699_v47 = vadd.f32 %v4939_v38, %v4211_v0 }
 0x25e   : > { %v1292_v59 = vpop.f32.mrf.mxu1  ;;  %v4393_v37 = vpop.f32.mrf.mxu0  ;;  %v2970_v38 = vrot.slane %v2419_v60, 2  ;;  %v12717_v60 = vpack.c.bf16 %v11270_v45, %v12301_v39 }
 0x25f   : > { %v3866_v41 = vpop.f32.mrf.mxu3  ;;  %16138 = vst [vmem:[#allocation121_spill] sm:$0xff] %v12699_v47  ;;  %v1841_v8 = vrot.slane %v1292_v59, 1  ;;  %v4941_v48 = vrot.slane %v4393_v37, 1 }
 0x260   : > { %16141 = vst [vmem:[#allocation132_spill] sm:$0xff] %v12717_v60 }
 0x261   : > { %v1842_v10 = vsel %vm1812_vm2, %v1840_v54, %v1841_v8  ;;  %v4942_v11 = vsel %vm1812_vm2, %v4940_v30, %v4941_v48  ;;  %10517 = vmatmul.msk.bf16.gmra.mxu1 %vm477_vm1, %v16139_v22  ;;  %10778 = vmatmul.msk.bf16.gmra.mxu0 %vm477_vm1, %v12697_v16 }
 0x262   : > { %10604 = vmatmul.msk.bf16.gmra.mxu2 %vm477_vm1, %v16139_v22  ;;  %v2241_v26 = vadd.f32 %v1842_v10, %v16140_v5 }
 0x264   : > { %10691 = vmatmul.msk.bf16.gmra.mxu3 %vm477_vm1, %v12697_v16 }
 0x265   : > { %v2422_v18 = vpop.f32.mrf.mxu2 }
 0x266   : > { %v2971_v6 = vrot.slane %v2422_v18, 2  ;;  %v1294_v25 = vpop.f32.mrf.mxu1  ;;  %v4395_v44 = vpop.f32.mrf.mxu0 }
 0x267   : > { %v3869_v40 = vpop.f32.mrf.mxu3  ;;  %v1843_v2 = vrot.slane %v1294_v25, 1  ;;  %v4943_v0 = vrot.slane %v4395_v44, 1  ;;  %v16143_v44 = vld [vmem:[#allocation112_spill] sm:$0xff] }
 0x268   : > { %v2972_v55 = vsel %vm2942_vm3, %v2970_v38, %v2971_v6 }
 0x269   : > { %v3371_v59 = vadd.f32 %v2972_v55, %v2241_v26  ;;  %v1844_v37 = vsel %vm1812_vm2, %v1841_v8, %v1843_v2  ;;  %v4944_v54 = vsel %vm1812_vm2, %v4941_v48, %v4943_v0 }
 0x26a   : > { %v2242_v5 = vadd.f32 %v1844_v37, %v16143_v44  ;;  %v16146_v37 = vld [vmem:[#allocation118_spill] sm:$0xff] }
 0x26b   : > { %v4212_v30 = vadd.f32 %v3866_v41, %v3371_v59  ;;  %v16144_v59 = vld [vmem:[#allocation124_spill] sm:$0xff] }
 0x26d   : > { %v2424_v16 = vpop.f32.mrf.mxu2  ;;  %v12719_v18 = vadd.f32 %v4942_v11, %v4212_v30 }
 0x26e   : > { %v2973_v61 = vrot.slane %v2424_v16, 2  ;;  %v1297_v10 = vpop.f32.mrf.mxu1  ;;  %v4398_v25 = vpop.f32.mrf.mxu0 }
 0x26f   : > { %v3871_v47 = vpop.f32.mrf.mxu3  ;;  %16142 = vst [vmem:[#allocation91_spill] sm:$0xff] %v12719_v18  ;;  %v1845_v38 = vrot.slane %v1297_v10, 1  ;;  %v4945_v26 = vrot.slane %v4398_v25, 1 }
 0x270   : > { %v2974_v8 = vsel %vm2942_vm3, %v2971_v6, %v2973_v61 }
 0x271   : > { %v3372_v55 = vadd.f32 %v2974_v8, %v2242_v5  ;;  %v1846_v48 = vsel %vm1812_vm2, %v1843_v2, %v1845_v38  ;;  %v4946_v41 = vsel %vm1812_vm2, %v4943_v0, %v4945_v26  ;;  %10518 = vmatmul.msk.bf16.gmra.mxu1 %vm477_vm1, %v16144_v59  ;;  %10779 = vmatmul.msk.bf16.gmra.mxu0 %vm477_vm1, %v12717_v60 }
 0x272   : > { %10605 = vmatmul.msk.bf16.gmra.mxu2 %vm477_vm1, %v16144_v59  ;;  %v2243_v30 = vadd.f32 %v1846_v48, %v16146_v37 }
 0x273   : > { %v4213_v39 = vadd.f32 %v3869_v40, %v3372_v55 }
 0x274   : > { %10692 = vmatmul.msk.bf16.gmra.mxu3 %vm477_vm1, %v12717_v60 }
 0x275   : > { %v2427_v45 = vpop.f32.mrf.mxu2  ;;  %v12733_v11 = vadd.f32 %v4944_v54, %v4213_v39  ;;  %v11272_v54 = vld [vmem:[%s11582_s23 + $0x150] sm:$0xff] }
 0x276   : > { %v2975_v6 = vrot.slane %v2427_v45, 2  ;;  %v1299_v2 = vpop.f32.mrf.mxu1  ;;  %v4400_v0 = vpop.f32.mrf.mxu0  ;;  %v12741_v39 = vpack.c.bf16 %v11272_v54, %v11271_v15 }
 0x277   : > { %v3874_v16 = vpop.f32.mrf.mxu3  ;;  %16145 = vst [vmem:[#allocation101_spill] sm:$0xff] %v12733_v11  ;;  %v1847_v10 = vrot.slane %v1299_v2, 1  ;;  %v4947_v25 = vrot.slane %v4400_v0, 1  ;;  %v16149_v0 = vld [vmem:[#allocation126_spill] sm:$0xff] }
 0x278   : > { %v2976_v44 = vsel %vm2942_vm3, %v2973_v61, %v2975_v6  ;;  %16147 = vst [vmem:[#allocation97_spill] sm:$0xff] %v12741_v39 }
 0x279   : > { %v3373_v5 = vadd.f32 %v2976_v44, %v2243_v30  ;;  %v1848_v8 = vsel %vm1812_vm2, %v1845_v38, %v1847_v10  ;;  %v4948_v40 = vsel %vm1812_vm2, %v4945_v26, %v4947_v25  ;;  %v16150_v38 = vld [vmem:[#allocation134_spill] sm:$0xff] }
 0x27a   : > { %v2244_v37 = vadd.f32 %v1848_v8, %v16149_v0  ;;  %v11273_v0 = vld [vmem:[%s11582_s23 + $0x158] sm:$0xff] }
 0x27b   : > { %v4214_v55 = vadd.f32 %v3871_v47, %v3373_v5 }
 0x27d   : > { %v2429_v60 = vpop.f32.mrf.mxu2  ;;  %v12743_v45 = vadd.f32 %v4946_v41, %v4214_v55 }
 0x27e   : > { %v2977_v11 = vrot.slane %v2429_v60, 2  ;;  %v1302_v48 = vpop.f32.mrf.mxu1  ;;  %v4403_v2 = vpop.f32.mrf.mxu0 }
 0x27f   : > { %v3876_v18 = vpop.f32.mrf.mxu3  ;;  %16148 = vst [vmem:[#allocation133_spill] sm:$0xff] %v12743_v45  ;;  %v4949_v47 = vrot.slane %v4403_v2, 1 }
 0x280   : > { %v2978_v61 = vsel %vm2942_vm3, %v2975_v6, %v2977_v11  ;;  %v1849_v6 = vrot.slane %v1302_v48, 1 }
 0x281   : > { %v3374_v30 = vadd.f32 %v2978_v61, %v2244_v37  ;;  %10519 = vmatmul.msk.bf16.gmra.mxu1 %vm477_vm1, %v16150_v38  ;;  %10780 = vmatmul.msk.bf16.gmra.mxu0 %vm477_vm1, %v12741_v39 }
 0x282   : > { %10606 = vmatmul.msk.bf16.gmra.mxu2 %vm477_vm1, %v16150_v38 }
 0x283   : > { %v4215_v15 = vadd.f32 %v3874_v16, %v3374_v30  ;;  %v11274_v16 = vld [vmem:[%s11582_s23 + $0x160] sm:$0xff]  ;;  %v16153_v30 = vld [vmem:[#allocation136_spill] sm:$0xff] }
 0x284   : > { %10693 = vmatmul.msk.bf16.gmra.mxu3 %vm477_vm1, %v12741_v39  ;;  %v12761_v37 = vpack.c.bf16 %v11274_v16, %v11273_v0  ;;  %v16155_v16 = vld [vmem:[#allocation142_spill] sm:$0xff] }
 0x285   : > { %v2432_v60 = vpop.f32.mrf.mxu2  ;;  %v12755_v26 = vadd.f32 %v4948_v40, %v4215_v15 }
 0x286   : > { %v1304_v41 = vpop.f32.mrf.mxu1  ;;  %v4405_v11 = vpop.f32.mrf.mxu0  ;;  %v2979_v8 = vrot.slane %v2432_v60, 2  ;;  %16152 = vst [vmem:[#allocation105_spill] sm:$0xff] %v12761_v37 }
 0x287   : > { %v3878_v18 = vpop.f32.mrf.mxu3  ;;  %16151 = vst [vmem:[#allocation110_spill] sm:$0xff] %v12755_v26  ;;  %v1850_v10 = vrot.slane %v1304_v41, 1  ;;  %v4950_v25 = vrot.slane %v4405_v11, 1 }
 0x289   : > { %v1851_v44 = vsel %vm1812_vm2, %v1849_v6, %v1850_v10  ;;  %v4951_v5 = vsel %vm1812_vm2, %v4949_v47, %v4950_v25 }
 0x28a   : > { %v2245_v15 = vadd.f32 %v1851_v44, %v16153_v30 }
 0x28d   : > { %v2434_v55 = vpop.f32.mrf.mxu2 }
 0x28e   : > { %v2980_v2 = vrot.slane %v2434_v55, 2  ;;  %v1307_v61 = vpop.f32.mrf.mxu1  ;;  %v4408_v40 = vpop.f32.mrf.mxu0 }
 0x28f   : > { %v3880_v54 = vpop.f32.mrf.mxu3  ;;  %v1852_v39 = vrot.slane %v1307_v61, 1  ;;  %v4952_v48 = vrot.slane %v4408_v40, 1 }
 0x290   : > { %v2981_v41 = vsel %vm2942_vm3, %v2979_v8, %v2980_v2 }
 0x291   : > { %v3375_v11 = vadd.f32 %v2981_v41, %v2245_v15  ;;  %v1853_v6 = vsel %vm1812_vm2, %v1850_v10, %v1852_v39  ;;  %v4953_v47 = vsel %vm1812_vm2, %v4950_v25, %v4952_v48  ;;  %10520 = vmatmul.msk.bf16.gmra.mxu1 %vm477_vm1, %v12317_v29  ;;  %10781 = vmatmul.msk.bf16.gmra.mxu0 %vm477_vm1, %v12761_v37 }
 0x292   : > { %10607 = vmatmul.msk.bf16.gmra.mxu2 %vm477_vm1, %v12317_v29  ;;  %v2246_v61 = vadd.f32 %v1853_v6, %v16155_v16  ;;  %v11275_v29 = vld [vmem:[%s11582_s23 + $0x168] sm:$0xff] }
 0x293   : > { %v4216_v60 = vadd.f32 %v3878_v18, %v3375_v11 }
 0x294   : > { %10694 = vmatmul.msk.bf16.gmra.mxu3 %vm477_vm1, %v12761_v37 }
 0x295   : > { %v2437_v44 = vpop.f32.mrf.mxu2  ;;  %v12775_v10 = vadd.f32 %v4951_v5, %v4216_v60  ;;  %v11276_v5 = vld [vmem:[%s11582_s23 + $0x170] sm:$0xff] }
 0x296   : > { %v2982_v25 = vrot.slane %v2437_v44, 2  ;;  %v1309_v55 = vpop.f32.mrf.mxu1  ;;  %v4410_v0 = vpop.f32.mrf.mxu0  ;;  %v12783_v60 = vpack.c.bf16 %v11276_v5, %v11275_v29 }
 0x297   : > { %v3883_v8 = vpop.f32.mrf.mxu3  ;;  %16154 = vst [vmem:[#allocation112_spill] sm:$0xff] %v12775_v10  ;;  %v1854_v40 = vrot.slane %v1309_v55, 1  ;;  %v4954_v30 = vrot.slane %v4410_v0, 1 }
 0x298   : > { %v2983_v15 = vsel %vm2942_vm3, %v2980_v2, %v2982_v25  ;;  %16156 = vst [vmem:[#allocation124_spill] sm:$0xff] %v12783_v60 }
 0x299   : > { %v3376_v41 = vadd.f32 %v2983_v15, %v2246_v61  ;;  %v1855_v26 = vsel %vm1812_vm2, %v1852_v39, %v1854_v40  ;;  %v4955_v18 = vsel %vm1812_vm2, %v4952_v48, %v4954_v30  ;;  %v16157_v15 = vld [vmem:[#allocation5_spill] sm:$0xff] }
 0x29a   : > { %v2247_v0 = vadd.f32 %v1855_v26, %v12321_v62 }
 0x29b   : > { %v4217_v11 = vadd.f32 %v3880_v54, %v3376_v41 }
 0x29d   : > { %v2439_v37 = vpop.f32.mrf.mxu2  ;;  %v12785_v44 = vadd.f32 %v4953_v47, %v4217_v11 }
 0x29e   : > { %v2984_v10 = vrot.slane %v2439_v37, 2  ;;  %v1312_v6 = vpop.f32.mrf.mxu1  ;;  %v4413_v55 = vpop.f32.mrf.mxu0 }
 0x29f   : > { %v3885_v45 = vpop.f32.mrf.mxu3  ;;  %v1856_v2 = vrot.slane %v1312_v6, 1  ;;  %v4956_v16 = vrot.slane %v4413_v55, 1 }
 0x2a0   : > { %v2985_v39 = vsel %vm2942_vm3, %v2982_v25, %v2984_v10 }
 0x2a1   : > { %v3377_v61 = vadd.f32 %v2985_v39, %v2247_v0  ;;  %v1857_v54 = vsel %vm1812_vm2, %v1854_v40, %v1856_v2  ;;  %v4957_v48 = vsel %vm1812_vm2, %v4954_v30, %v4956_v16  ;;  %10521 = vmatmul.msk.bf16.gmra.mxu1 %vm477_vm1, %v16157_v15  ;;  %10782 = vmatmul.msk.bf16.gmra.mxu0 %vm477_vm1, %v12783_v60  ;;  %v11277_v0 = vld [vmem:[%s11582_s23 + $0x178] sm:$0xff]  ;;  %v11278_v2 = vld [vmem:[%s11582_s23 + $0x180] sm:$0xff] }
 0x2a2   : > { %10608 = vmatmul.msk.bf16.gmra.mxu2 %vm477_vm1, %v16157_v15  ;;  %v2248_v30 = vadd.f32 %v1857_v54, %v12341_v42  ;;  %v12805_v16 = vpack.c.bf16 %v11278_v2, %v11277_v0  ;;  %v16161_v54 = vld [vmem:[#allocation8_spill] sm:$0xff] }
 0x2a3   : > { %v4218_v29 = vadd.f32 %v3883_v8, %v3377_v61 }
 0x2a4   : > { %10695 = vmatmul.msk.bf16.gmra.mxu3 %vm477_vm1, %v12783_v60  ;;  %16159 = vst [vmem:[#allocation126_spill] sm:$0xff] %v12805_v16  ;;  %v11280_v60 = vld [vmem:[%s11582_s23 + $0x190] sm:$0xff] }
 0x2a5   : > { %v2442_v62 = vpop.f32.mrf.mxu2  ;;  %v12799_v37 = vadd.f32 %v4955_v18, %v4218_v29 }
 0x2a6   : > { %v2986_v47 = vrot.slane %v2442_v62, 2  ;;  %v1314_v25 = vpop.f32.mrf.mxu1  ;;  %v4415_v40 = vpop.f32.mrf.mxu0 }
 0x2a7   : > { %v3888_v26 = vpop.f32.mrf.mxu3  ;;  %16158 = vst [vmem:[#allocation118_spill] sm:$0xff] %v12799_v37  ;;  %v1858_v61 = vrot.slane %v1314_v25, 1  ;;  %v4958_v29 = vrot.slane %v4415_v40, 1 }
 0x2a8   : > { %v2987_v41 = vsel %vm2942_vm3, %v2984_v10, %v2986_v47 }
 0x2a9   : > { %v3378_v11 = vadd.f32 %v2987_v41, %v2248_v30 }
 0x2ab   : > { %v4219_v5 = vadd.f32 %v3885_v45, %v3378_v11 }
 0x2ad   : > { %v2444_v6 = vpop.f32.mrf.mxu2  ;;  %v12807_v8 = vadd.f32 %v4957_v48, %v4219_v5 }
 0x2ae   : > { %v1317_v39 = vpop.f32.mrf.mxu1  ;;  %v4418_v18 = vpop.f32.mrf.mxu0  ;;  %v2988_v47 = vrot.slane %v2444_v6, 2 }
 0x2af   : > { %v3889_v55 = vpop.f32.mrf.mxu3  ;;  %16160 = vst [vmem:[#allocation134_spill] sm:$0xff] %v12807_v8  ;;  %v1859_v62 = vrot.slane %v1317_v39, 1  ;;  %v4959_v26 = vrot.slane %v4418_v18, 1  ;;  %v11279_v8 = vld [vmem:[%s11582_s23 + $0x188] sm:$0xff] }
 0x2b0   : > { %v12825_v6 = vpack.c.bf16 %v11280_v60, %v11279_v8 }
 0x2b1   : > { %v1860_v42 = vsel %vm1812_vm2, %v1858_v61, %v1859_v62  ;;  %v4960_v10 = vsel %vm1812_vm2, %v4958_v29, %v4959_v26  ;;  %10522 = vmatmul.msk.bf16.gmra.mxu1 %vm477_vm1, %v16161_v54  ;;  %10783 = vmatmul.msk.bf16.gmra.mxu0 %vm477_vm1, %v12805_v16 }
 0x2b2   : > { %10609 = vmatmul.msk.bf16.gmra.mxu2 %vm477_vm1, %v16161_v54  ;;  %v2249_v41 = vadd.f32 %v1860_v42, %v12357_v57  ;;  %16162 = vst [vmem:[#allocation136_spill] sm:$0xff] %v12825_v6 }
 0x2b4   : > { %10696 = vmatmul.msk.bf16.gmra.mxu3 %vm477_vm1, %v12805_v16 }
 0x2b5   : > { %v2447_v45 = vpop.f32.mrf.mxu2 }
 0x2b6   : > { %v2989_v25 = vrot.slane %v2447_v45, 2  ;;  %v1319_v40 = vpop.f32.mrf.mxu1  ;;  %v4420_v30 = vpop.f32.mrf.mxu0 }
 0x2b7   : > { %v3892_v48 = vpop.f32.mrf.mxu3  ;;  %v1861_v11 = vrot.slane %v1319_v40, 1  ;;  %v4961_v5 = vrot.slane %v4420_v30, 1 }
 0x2b8   : > { %v2990_v0 = vsel %vm2942_vm3, %v2988_v47, %v2989_v25 }
 0x2b9   : > { %v3379_v2 = vadd.f32 %v2990_v0, %v2249_v41  ;;  %v1862_v39 = vsel %vm1812_vm2, %v1859_v62, %v1861_v11  ;;  %v4962_v18 = vsel %vm1812_vm2, %v4959_v26, %v4961_v5  ;;  %v16163_v0 = vld [vmem:[#allocation12_spill] sm:$0xff] }
 0x2ba   : > { %v2250_v40 = vadd.f32 %v1862_v39, %v12365_v50 }
 0x2bb   : > { %v4220_v61 = vadd.f32 %v3889_v55, %v3379_v2 }
 0x2bd   : > { %v2449_v29 = vpop.f32.mrf.mxu2  ;;  %v12827_v45 = vadd.f32 %v4960_v10, %v4220_v61 }
 0x2be   : > { %v2991_v37 = vrot.slane %v2449_v29, 2  ;;  %v1322_v57 = vpop.f32.mrf.mxu1  ;;  %v4423_v42 = vpop.f32.mrf.mxu0 }
 0x2bf   : > { %v3894_v16 = vpop.f32.mrf.mxu3  ;;  %v1863_v47 = vrot.slane %v1322_v57, 1  ;;  %v4963_v30 = vrot.slane %v4423_v42, 1 }
 0x2c0   : > { %v2992_v62 = vsel %vm2942_vm3, %v2989_v25, %v2991_v37 }
 0x2c1   : > { %v3380_v41 = vadd.f32 %v2992_v62, %v2250_v40  ;;  %v1864_v55 = vsel %vm1812_vm2, %v1861_v11, %v1863_v47  ;;  %v4964_v26 = vsel %vm1812_vm2, %v4961_v5, %v4963_v30  ;;  %10523 = vmatmul.msk.bf16.gmra.mxu1 %vm477_vm1, %v16163_v0  ;;  %10784 = vmatmul.msk.bf16.gmra.mxu0 %vm477_vm1, %v12825_v6 }
 0x2c2   : > { %10610 = vmatmul.msk.bf16.gmra.mxu2 %vm477_vm1, %v16163_v0  ;;  %v2251_v2 = vadd.f32 %v1864_v55, %v12381_v27 }
 0x2c3   : > { %v4221_v50 = vadd.f32 %v3892_v48, %v3380_v41 }
 0x2c4   : > { %10697 = vmatmul.msk.bf16.gmra.mxu3 %vm477_vm1, %v12825_v6  ;;  %v11281_v6 = vld [vmem:[%s11582_s23 + $0x198] sm:$0xff] }
 0x2c5   : > { %v2452_v60 = vpop.f32.mrf.mxu2  ;;  %v12841_v10 = vadd.f32 %v4962_v18, %v4221_v50  ;;  %v11282_v18 = vld [vmem:[%s11582_s23 + $0x1a0] sm:$0xff] }
 0x2c6   : > { %v2993_v25 = vrot.slane %v2452_v60, 2  ;;  %v1324_v11 = vpop.f32.mrf.mxu1  ;;  %v4425_v5 = vpop.f32.mrf.mxu0  ;;  %v12849_v50 = vpack.c.bf16 %v11282_v18, %v11281_v6 }
 0x2c7   : > { %v3897_v8 = vpop.f32.mrf.mxu3  ;;  %16164 = vst [vmem:[#allocation142_spill] sm:$0xff] %v12841_v10  ;;  %v1865_v39 = vrot.slane %v1324_v11, 1  ;;  %v4965_v61 = vrot.slane %v4425_v5, 1 }
 0x2c8   : > { %v2994_v29 = vsel %vm2942_vm3, %v2991_v37, %v2993_v25  ;;  %16165 = vst [vmem:[#allocation5_spill] sm:$0xff] %v12849_v50 }
 0x2c9   : > { %v3381_v57 = vadd.f32 %v2994_v29, %v2251_v2  ;;  %v1866_v42 = vsel %vm1812_vm2, %v1863_v47, %v1865_v39  ;;  %v4966_v48 = vsel %vm1812_vm2, %v4963_v30, %v4965_v61  ;;  %v16166_v47 = vld [vmem:[#allocation17_spill] sm:$0xff] }
 0x2ca   : > { %v2252_v11 = vadd.f32 %v1866_v42, %v12389_v13 }
 0x2cb   : > { %v4222_v40 = vadd.f32 %v3894_v16, %v3381_v57 }
 0x2cd   : > { %v2454_v62 = vpop.f32.mrf.mxu2  ;;  %v12851_v60 = vadd.f32 %v4964_v26, %v4222_v40 }
 0x2ce   : > { %v2995_v10 = vrot.slane %v2454_v62, 2  ;;  %v1327_v27 = vpop.f32.mrf.mxu1  ;;  %v4428_v55 = vpop.f32.mrf.mxu0 }
 0x2cf   : > { %v3899_v41 = vpop.f32.mrf.mxu3  ;;  %v4967_v6 = vrot.slane %v4428_v55, 1  ;;  %v1867_v2 = vrot.slane %v1327_v27, 1 }
 0x2d0   : > { %v2996_v37 = vsel %vm2942_vm3, %v2993_v25, %v2995_v10  ;;  %v11283_v41 = vld [vmem:[%s11582_s23 + $0x1a8] sm:$0xff] }
 0x2d1   : > { %v3382_v5 = vadd.f32 %v2996_v37, %v2252_v11  ;;  %10524 = vmatmul.msk.bf16.gmra.mxu1 %vm477_vm1, %v16166_v47  ;;  %10785 = vmatmul.msk.bf16.gmra.mxu0 %vm477_vm1, %v12849_v50 }
 0x2d2   : > { %10611 = vmatmul.msk.bf16.gmra.mxu2 %vm477_vm1, %v16166_v47 }
 0x2d3   : > { %v4223_v16 = vadd.f32 %v3897_v8, %v3382_v5  ;;  %v11284_v8 = vld [vmem:[%s11582_s23 + $0x1b0] sm:$0xff] }
 0x2d4   : > { %10698 = vmatmul.msk.bf16.gmra.mxu3 %vm477_vm1, %v12849_v50  ;;  %v12869_v18 = vpack.c.bf16 %v11284_v8, %v11283_v41 }
 0x2d5   : > { %v2457_v13 = vpop.f32.mrf.mxu2  ;;  %v12863_v26 = vadd.f32 %v4966_v48, %v4223_v16 }
 0x2d6   : > { %v1329_v10 = vpop.f32.mrf.mxu1  ;;  %v4430_v25 = vpop.f32.mrf.mxu0  ;;  %v2997_v42 = vrot.slane %v2457_v13, 2  ;;  %16168 = vst [vmem:[#allocation12_spill] sm:$0xff] %v12869_v18  ;;  %v16169_v13 = vld [vmem:[#allocation20_spill] sm:$0xff] }
 0x2d7   : > { %v3901_v30 = vpop.f32.mrf.mxu3  ;;  %16167 = vst [vmem:[#allocation8_spill] sm:$0xff] %v12863_v26  ;;  %v1868_v39 = vrot.slane %v1329_v10, 1  ;;  %v4968_v61 = vrot.slane %v4430_v25, 1  ;;  %v11285_v26 = vld [vmem:[%s11582_s23 + $0x1b8] sm:$0xff] }
 0x2d9   : > { %v1869_v29 = vsel %vm1812_vm2, %v1867_v2, %v1868_v39  ;;  %v4969_v57 = vsel %vm1812_vm2, %v4967_v6, %v4968_v61 }
 0x2da   : > { %v2253_v37 = vadd.f32 %v1869_v29, %v12409_v24 }
 0x2dd   : > { %v2459_v40 = vpop.f32.mrf.mxu2 }
 0x2de   : > { %v2998_v55 = vrot.slane %v2459_v40, 2  ;;  %v1332_v11 = vpop.f32.mrf.mxu1  ;;  %v4433_v48 = vpop.f32.mrf.mxu0 }
 0x2df   : > { %v3903_v62 = vpop.f32.mrf.mxu3  ;;  %v1870_v5 = vrot.slane %v1332_v11, 1  ;;  %v4970_v27 = vrot.slane %v4433_v48, 1 }
 0x2e0   : > { %v2999_v16 = vsel %vm2942_vm3, %v2997_v42, %v2998_v55 }
 0x2e1   : > { %v3383_v10 = vadd.f32 %v2999_v16, %v2253_v37  ;;  %v1871_v25 = vsel %vm1812_vm2, %v1868_v39, %v1870_v5  ;;  %v4971_v6 = vsel %vm1812_vm2, %v4968_v61, %v4970_v27  ;;  %10525 = vmatmul.msk.bf16.gmra.mxu1 %vm477_vm1, %v16169_v13  ;;  %10786 = vmatmul.msk.bf16.gmra.mxu0 %vm477_vm1, %v12869_v18 }
 0x2e2   : > { %10612 = vmatmul.msk.bf16.gmra.mxu2 %vm477_vm1, %v16169_v13  ;;  %v2254_v41 = vadd.f32 %v1871_v25, %v12425_v63 }
 0x2e3   : > { %v4224_v24 = vadd.f32 %v3901_v30, %v3383_v10 }
 0x2e4   : > { %10699 = vmatmul.msk.bf16.gmra.mxu3 %vm477_vm1, %v12869_v18 }
 0x2e5   : > { %v2462_v2 = vpop.f32.mrf.mxu2  ;;  %v12883_v39 = vadd.f32 %v4969_v57, %v4224_v24  ;;  %v11286_v57 = vld [vmem:[%s11582_s23 + $0x1c0] sm:$0xff] }
 0x2e6   : > { %v3000_v61 = vrot.slane %v2462_v2, 2  ;;  %v1334_v42 = vpop.f32.mrf.mxu1  ;;  %v4435_v40 = vpop.f32.mrf.mxu0  ;;  %v12891_v24 = vpack.c.bf16 %v11286_v57, %v11285_v26 }
 0x2e7   : > { %v3906_v29 = vpop.f32.mrf.mxu3  ;;  %16170 = vst [vmem:[#allocation17_spill] sm:$0xff] %v12883_v39  ;;  %v1872_v8 = vrot.slane %v1334_v42, 1  ;;  %v4972_v11 = vrot.slane %v4435_v40, 1 }
 0x2e8   : > { %v3001_v48 = vsel %vm2942_vm3, %v2998_v55, %v3000_v61  ;;  %16171 = vst [vmem:[#allocation20_spill] sm:$0xff] %v12891_v24 }
 0x2e9   : > { %v3384_v37 = vadd.f32 %v3001_v48, %v2254_v41  ;;  %v1873_v16 = vsel %vm1812_vm2, %v1870_v5, %v1872_v8  ;;  %v4973_v30 = vsel %vm1812_vm2, %v4970_v27, %v4972_v11  ;;  %v16172_v48 = vld [vmem:[#allocation24_spill] sm:$0xff] }
 0x2ea   : > { %v2255_v42 = vadd.f32 %v1873_v16, %v12437_v7 }
 0x2eb   : > { %v4225_v10 = vadd.f32 %v3903_v62, %v3384_v37 }
 0x2ed   : > { %v2464_v18 = vpop.f32.mrf.mxu2  ;;  %v12893_v2 = vadd.f32 %v4971_v6, %v4225_v10 }
 0x2ee   : > { %v3002_v39 = vrot.slane %v2464_v18, 2  ;;  %v1337_v63 = vpop.f32.mrf.mxu1  ;;  %v4438_v25 = vpop.f32.mrf.mxu0 }
 0x2ef   : > { %v3908_v50 = vpop.f32.mrf.mxu3  ;;  %v1874_v55 = vrot.slane %v1337_v63, 1  ;;  %v4974_v40 = vrot.slane %v4438_v25, 1 }
 0x2f0   : > { %v3003_v5 = vsel %vm2942_vm3, %v3000_v61, %v3002_v39 }
 0x2f1   : > { %v3385_v41 = vadd.f32 %v3003_v5, %v2255_v42  ;;  %v1875_v62 = vsel %vm1812_vm2, %v1872_v8, %v1874_v55  ;;  %v4975_v27 = vsel %vm1812_vm2, %v4972_v11, %v4974_v40  ;;  %10526 = vmatmul.msk.bf16.gmra.mxu1 %vm477_vm1, %v16172_v48  ;;  %10787 = vmatmul.msk.bf16.gmra.mxu0 %vm477_vm1, %v12891_v24  ;;  %v11287_v42 = vld [vmem:[%s11582_s23 + $0x1c8] sm:$0xff]  ;;  %v11288_v55 = vld [vmem:[%s11582_s23 + $0x1d0] sm:$0xff] }
 0x2f2   : > { %10613 = vmatmul.msk.bf16.gmra.mxu2 %vm477_vm1, %v16172_v48  ;;  %v2256_v37 = vadd.f32 %v1875_v62, %v12453_v53  ;;  %v12913_v40 = vpack.c.bf16 %v11288_v55, %v11287_v42  ;;  %v16176_v62 = vld [vmem:[#allocation28_spill] sm:$0xff] }
 0x2f3   : > { %v4226_v7 = vadd.f32 %v3906_v29, %v3385_v41 }
 0x2f4   : > { %10700 = vmatmul.msk.bf16.gmra.mxu3 %vm477_vm1, %v12891_v24  ;;  %16174 = vst [vmem:[#allocation196_spill] sm:$0xff] %v12913_v40  ;;  %v11290_v24 = vld [vmem:[%s11582_s23 + $0x1e0] sm:$0xff] }
 0x2f5   : > { %v2467_v26 = vpop.f32.mrf.mxu2  ;;  %v12907_v6 = vadd.f32 %v4973_v30, %v4226_v7 }
 0x2f6   : > { %v3004_v61 = vrot.slane %v2467_v26, 2  ;;  %v1339_v8 = vpop.f32.mrf.mxu1  ;;  %v4440_v11 = vpop.f32.mrf.mxu0 }
 0x2f7   : > { %v3911_v18 = vpop.f32.mrf.mxu3  ;;  %16173 = vst [vmem:[#allocation24_spill] sm:$0xff] %v12907_v6  ;;  %v1876_v41 = vrot.slane %v1339_v8, 1  ;;  %v4976_v7 = vrot.slane %v4440_v11, 1 }
 0x2f8   : > { %v3005_v16 = vsel %vm2942_vm3, %v3002_v39, %v3004_v61 }
 0x2f9   : > { %v3386_v10 = vadd.f32 %v3005_v16, %v2256_v37 }
 0x2fb   : > { %v4227_v57 = vadd.f32 %v3908_v50, %v3386_v10 }
 0x2fd   : > { %v2469_v63 = vpop.f32.mrf.mxu2  ;;  %v12915_v29 = vadd.f32 %v4975_v27, %v4227_v57 }
 0x2fe   : > { %v1342_v5 = vpop.f32.mrf.mxu1  ;;  %v4443_v30 = vpop.f32.mrf.mxu0  ;;  %v3006_v61 = vrot.slane %v2469_v63, 2 }
 0x2ff   : > { %v3912_v25 = vpop.f32.mrf.mxu3  ;;  %16175 = vst [vmem:[#allocation197_spill] sm:$0xff] %v12915_v29  ;;  %v1877_v26 = vrot.slane %v1342_v5, 1  ;;  %v4977_v18 = vrot.slane %v4443_v30, 1  ;;  %v11289_v29 = vld [vmem:[%s11582_s23 + $0x1d8] sm:$0xff] }
 0x300   : > { %v12933_v63 = vpack.c.bf16 %v11290_v24, %v11289_v29 }
 0x301   : > { %v1878_v53 = vsel %vm1812_vm2, %v1876_v41, %v1877_v26  ;;  %v4978_v39 = vsel %vm1812_vm2, %v4976_v7, %v4977_v18  ;;  %10527 = vmatmul.msk.bf16.gmra.mxu1 %vm477_vm1, %v16176_v62  ;;  %10788 = vmatmul.msk.bf16.gmra.mxu0 %vm477_vm1, %v12913_v40 }
 0x302   : > { %10614 = vmatmul.msk.bf16.gmra.mxu2 %vm477_vm1, %v16176_v62  ;;  %v2257_v16 = vadd.f32 %v1878_v53, %v12473_v23  ;;  %16177 = vst [vmem:[#allocation28_spill] sm:$0xff] %v12933_v63 }
 0x304   : > { %10701 = vmatmul.msk.bf16.gmra.mxu3 %vm477_vm1, %v12913_v40 }
 0x305   : > { %v2472_v50 = vpop.f32.mrf.mxu2 }
 0x306   : > { %v3007_v8 = vrot.slane %v2472_v50, 2  ;;  %v1344_v11 = vpop.f32.mrf.mxu1  ;;  %v4445_v37 = vpop.f32.mrf.mxu0 }
 0x307   : > { %v3915_v27 = vpop.f32.mrf.mxu3  ;;  %v1879_v10 = vrot.slane %v1344_v11, 1  ;;  %v4979_v57 = vrot.slane %v4445_v37, 1 }
 0x308   : > { %v3008_v42 = vsel %vm2942_vm3, %v3006_v61, %v3007_v8 }
 0x309   : > { %v3387_v55 = vadd.f32 %v3008_v42, %v2257_v16  ;;  %v1880_v5 = vsel %vm1812_vm2, %v1877_v26, %v1879_v10  ;;  %v4980_v30 = vsel %vm1812_vm2, %v4977_v18, %v4979_v57  ;;  %v16179_v42 = vld [vmem:[#allocation32_spill] sm:$0xff] }
 0x30a   : > { %v2258_v11 = vadd.f32 %v1880_v5, %v12485_v51 }
 0x30b   : > { %v4228_v41 = vadd.f32 %v3912_v25, %v3387_v55 }
 0x30d   : > { %v2474_v7 = vpop.f32.mrf.mxu2  ;;  %v12935_v50 = vadd.f32 %v4978_v39, %v4228_v41 }
 0x30e   : > { %v3009_v6 = vrot.slane %v2474_v7, 2  ;;  %v1347_v23 = vpop.f32.mrf.mxu1  ;;  %v4448_v53 = vpop.f32.mrf.mxu0 }
 0x30f   : > { %v3917_v40 = vpop.f32.mrf.mxu3  ;;  %16178 = vst [vmem:[#allocation198_spill] sm:$0xff] %v12935_v50  ;;  %v1881_v61 = vrot.slane %v1347_v23, 1  ;;  %v4981_v37 = vrot.slane %v4448_v53, 1  ;;  %v11295_v50 = vld [vmem:[%s11582_s23 + $0x208] sm:$0xff] }
 0x310   : > { %v3010_v26 = vsel %vm2942_vm3, %v3007_v8, %v3009_v6 }
 0x311   : > { %v3388_v16 = vadd.f32 %v3010_v26, %v2258_v11  ;;  %v1882_v25 = vsel %vm1812_vm2, %v1879_v10, %v1881_v61  ;;  %v4982_v18 = vsel %vm1812_vm2, %v4979_v57, %v4981_v37  ;;  %10528 = vmatmul.msk.bf16.gmra.mxu1 %vm477_vm1, %v16179_v42  ;;  %10789 = vmatmul.msk.bf16.gmra.mxu0 %vm477_vm1, %v12933_v63 }
 0x312   : > { %10615 = vmatmul.msk.bf16.gmra.mxu2 %vm477_vm1, %v16179_v42  ;;  %v2259_v55 = vadd.f32 %v1882_v25, %v12501_v1 }
 0x313   : > { %v4229_v51 = vadd.f32 %v3915_v27, %v3388_v16 }
 0x314   : > { %10702 = vmatmul.msk.bf16.gmra.mxu3 %vm477_vm1, %v12933_v63  ;;  %v11291_v63 = vld [vmem:[%s11582_s23 + $0x1e8] sm:$0xff] }
 0x315   : > { %v2477_v24 = vpop.f32.mrf.mxu2  ;;  %v12949_v39 = vadd.f32 %v4980_v30, %v4229_v51  ;;  %v11292_v30 = vld [vmem:[%s11582_s23 + $0x1f0] sm:$0xff] }
 0x316   : > { %v3011_v8 = vrot.slane %v2477_v24, 2  ;;  %v1349_v10 = vpop.f32.mrf.mxu1  ;;  %v4450_v57 = vpop.f32.mrf.mxu0  ;;  %v12957_v51 = vpack.c.bf16 %v11292_v30, %v11291_v63 }
 0x317   : > { %v3920_v29 = vpop.f32.mrf.mxu3  ;;  %16180 = vst [vmem:[#allocation32_spill] sm:$0xff] %v12949_v39  ;;  %v1883_v5 = vrot.slane %v1349_v10, 1  ;;  %v4983_v41 = vrot.slane %v4450_v57, 1 }
 0x318   : > { %v3012_v7 = vsel %vm2942_vm3, %v3009_v6, %v3011_v8  ;;  %16181 = vst [vmem:[#allocation199_spill] sm:$0xff] %v12957_v51 }
 0x319   : > { %v3389_v23 = vadd.f32 %v3012_v7, %v2259_v55  ;;  %v1884_v53 = vsel %vm1812_vm2, %v1881_v61, %v1883_v5  ;;  %v4984_v27 = vsel %vm1812_vm2, %v4981_v37, %v4983_v41  ;;  %v16183_v61 = vld [vmem:[#allocation36_spill] sm:$0xff] }
 0x31a   : > { %v2260_v10 = vadd.f32 %v1884_v53, %v12513_v49 }
 0x31b   : > { %v4230_v11 = vadd.f32 %v3917_v40, %v3389_v23 }
 0x31d   : > { %v2479_v26 = vpop.f32.mrf.mxu2  ;;  %v12959_v24 = vadd.f32 %v4982_v18, %v4230_v11 }
 0x31e   : > { %v3013_v39 = vrot.slane %v2479_v26, 2  ;;  %v1352_v1 = vpop.f32.mrf.mxu1  ;;  %v4453_v25 = vpop.f32.mrf.mxu0 }
 0x31f   : > { %v3922_v16 = vpop.f32.mrf.mxu3  ;;  %16182 = vst [vmem:[#allocation200_spill] sm:$0xff] %v12959_v24  ;;  %v4985_v63 = vrot.slane %v4453_v25, 1  ;;  %v1885_v55 = vrot.slane %v1352_v1, 1 }
 0x320   : > { %v3014_v6 = vsel %vm2942_vm3, %v3011_v8, %v3013_v39  ;;  %v11293_v16 = vld [vmem:[%s11582_s23 + $0x1f8] sm:$0xff] }
 0x321   : > { %v3390_v57 = vadd.f32 %v3014_v6, %v2260_v10  ;;  %10529 = vmatmul.msk.bf16.gmra.mxu1 %vm477_vm1, %v16183_v61  ;;  %10790 = vmatmul.msk.bf16.gmra.mxu0 %vm477_vm1, %v12957_v51  ;;  %v16186_v6 = vld [vmem:[#allocation37_spill] sm:$0xff] }
 0x322   : > { %10616 = vmatmul.msk.bf16.gmra.mxu2 %vm477_vm1, %v16183_v61 }
 0x323   : > { %v4231_v40 = vadd.f32 %v3920_v29, %v3390_v57  ;;  %v11294_v29 = vld [vmem:[%s11582_s23 + $0x200] sm:$0xff] }
 0x324   : > { %10703 = vmatmul.msk.bf16.gmra.mxu3 %vm477_vm1, %v12957_v51  ;;  %v12977_v30 = vpack.c.bf16 %v11294_v29, %v11293_v16 }
 0x325   : > { %v2482_v49 = vpop.f32.mrf.mxu2  ;;  %v12971_v18 = vadd.f32 %v4984_v27, %v4231_v40 }
 0x326   : > { %v1354_v39 = vpop.f32.mrf.mxu1  ;;  %v4455_v8 = vpop.f32.mrf.mxu0  ;;  %v3015_v53 = vrot.slane %v2482_v49, 2  ;;  %16185 = vst [vmem:[#allocation201_spill] sm:$0xff] %v12977_v30  ;;  %v16187_v49 = vld [vmem:[#allocation46_spill] sm:$0xff] }
 0x327   : > { %v3924_v37 = vpop.f32.mrf.mxu3  ;;  %16184 = vst [vmem:[#allocation36_spill] sm:$0xff] %v12971_v18  ;;  %v1886_v5 = vrot.slane %v1354_v39, 1  ;;  %v4986_v41 = vrot.slane %v4455_v8, 1 }
 0x329   : > { %v1887_v7 = vsel %vm1812_vm2, %v1885_v55, %v1886_v5  ;;  %v4987_v23 = vsel %vm1812_vm2, %v4985_v63, %v4986_v41 }
 0x32a   : > { %v2261_v57 = vadd.f32 %v1887_v7, %v16186_v6 }
 0x32d   : > { %v2484_v11 = vpop.f32.mrf.mxu2 }
 0x32e   : > { %v3016_v25 = vrot.slane %v2484_v11, 2  ;;  %v1357_v10 = vpop.f32.mrf.mxu1  ;;  %v4458_v27 = vpop.f32.mrf.mxu0 }
 0x32f   : > { %v3926_v26 = vpop.f32.mrf.mxu3  ;;  %v1888_v40 = vrot.slane %v1357_v10, 1  ;;  %v4988_v1 = vrot.slane %v4458_v27, 1  ;;  %v16189_v10 = vld [vmem:[#allocation42_spill] sm:$0xff] }
 0x330   : > { %v3017_v39 = vsel %vm2942_vm3, %v3015_v53, %v3016_v25 }
 0x331   : > { %v3391_v8 = vadd.f32 %v3017_v39, %v2261_v57  ;;  %v1889_v55 = vsel %vm1812_vm2, %v1886_v5, %v1888_v40  ;;  %v4989_v63 = vsel %vm1812_vm2, %v4986_v41, %v4988_v1  ;;  %10530 = vmatmul.msk.bf16.gmra.mxu1 %vm477_vm1, %v16187_v49  ;;  %10791 = vmatmul.msk.bf16.gmra.mxu0 %vm477_vm1, %v12977_v30 }
 0x332   : > { %10617 = vmatmul.msk.bf16.gmra.mxu2 %vm477_vm1, %v16187_v49  ;;  %v2262_v27 = vadd.f32 %v1889_v55, %v16189_v10 }
 0x333   : > { %v4232_v7 = vadd.f32 %v3924_v37, %v3391_v8 }
 0x334   : > { %10704 = vmatmul.msk.bf16.gmra.mxu3 %vm477_vm1, %v12977_v30 }
 0x335   : > { %v2487_v11 = vpop.f32.mrf.mxu2  ;;  %v12991_v5 = vadd.f32 %v4987_v23, %v4232_v7  ;;  %v11296_v23 = vld [vmem:[%s11582_s23 + $0x210] sm:$0xff] }
 0x336   : > { %v3018_v41 = vrot.slane %v2487_v11, 2  ;;  %v1359_v16 = vpop.f32.mrf.mxu1  ;;  %v4460_v29 = vpop.f32.mrf.mxu0  ;;  %v12999_v7 = vpack.c.bf16 %v11296_v23, %v11295_v50 }
 0x337   : > { %v3929_v53 = vpop.f32.mrf.mxu3  ;;  %16188 = vst [vmem:[#allocation37_spill] sm:$0xff] %v12991_v5  ;;  %v1890_v6 = vrot.slane %v1359_v16, 1  ;;  %v4990_v57 = vrot.slane %v4460_v29, 1  ;;  %v16192_v29 = vld [vmem:[#allocation47_spill] sm:$0xff] }
 0x338   : > { %v3019_v39 = vsel %vm2942_vm3, %v3016_v25, %v3018_v41  ;;  %16190 = vst [vmem:[#allocation46_spill] sm:$0xff] %v12999_v7 }
 0x339   : > { %v3392_v51 = vadd.f32 %v3019_v39, %v2262_v27  ;;  %v1891_v18 = vsel %vm1812_vm2, %v1888_v40, %v1890_v6  ;;  %v4991_v37 = vsel %vm1812_vm2, %v4988_v1, %v4990_v57  ;;  %v16193_v1 = vld [vmem:[#allocation55_spill] sm:$0xff] }
 0x33a   : > { %v2263_v10 = vadd.f32 %v1891_v18, %v16192_v29 }
 0x33b   : > { %v4233_v8 = vadd.f32 %v3926_v26, %v3392_v51 }
 0x33d   : > { %v2489_v30 = vpop.f32.mrf.mxu2  ;;  %v13001_v11 = vadd.f32 %v4989_v63, %v4233_v8  ;;  %v16195_v8 = vld [vmem:[#allocation52_spill] sm:$0xff] }
 0x33e   : > { %v3020_v5 = vrot.slane %v2489_v30, 2  ;;  %v1362_v55 = vpop.f32.mrf.mxu1  ;;  %v4463_v16 = vpop.f32.mrf.mxu0 }
 0x33f   : > { %v3931_v24 = vpop.f32.mrf.mxu3  ;;  %16191 = vst [vmem:[#allocation42_spill] sm:$0xff] %v13001_v11  ;;  %v1892_v25 = vrot.slane %v1362_v55, 1  ;;  %v4992_v27 = vrot.slane %v4463_v16, 1 }
 0x340   : > { %v3021_v40 = vsel %vm2942_vm3, %v3018_v41, %v3020_v5 }
 0x341   : > { %v3393_v39 = vadd.f32 %v3021_v40, %v2263_v10  ;;  %v1893_v51 = vsel %vm1812_vm2, %v1890_v6, %v1892_v25  ;;  %v4993_v26 = vsel %vm1812_vm2, %v4990_v57, %v4992_v27  ;;  %10531 = vmatmul.msk.bf16.gmra.mxu1 %vm477_vm1, %v16193_v1  ;;  %10792 = vmatmul.msk.bf16.gmra.mxu0 %vm477_vm1, %v12999_v7  ;;  %v11297_v27 = vld [vmem:[%s11582_s23 + $0x218] sm:$0xff]  ;;  %v11298_v40 = vld [vmem:[%s11582_s23 + $0x220] sm:$0xff] }
 0x342   : > { %10618 = vmatmul.msk.bf16.gmra.mxu2 %vm477_vm1, %v16193_v1  ;;  %v2264_v23 = vadd.f32 %v1893_v51, %v16195_v8  ;;  %v13021_v11 = vpack.c.bf16 %v11298_v40, %v11297_v27 }
 0x343   : > { %v4234_v50 = vadd.f32 %v3929_v53, %v3393_v39 }
 0x344   : > { %10705 = vmatmul.msk.bf16.gmra.mxu3 %vm477_vm1, %v12999_v7  ;;  %16196 = vst [vmem:[#allocation52_spill] sm:$0xff] %v13021_v11 }
 0x345   : > { %v2492_v18 = vpop.f32.mrf.mxu2  ;;  %v13015_v63 = vadd.f32 %v4991_v37, %v4234_v50 }
 0x346   : > { %v3022_v41 = vrot.slane %v2492_v18, 2  ;;  %v1364_v6 = vpop.f32.mrf.mxu1  ;;  %v4465_v57 = vpop.f32.mrf.mxu0 }
 0x347   : > { %v3934_v30 = vpop.f32.mrf.mxu3  ;;  %16194 = vst [vmem:[#allocation47_spill] sm:$0xff] %v13015_v63  ;;  %v1894_v50 = vrot.slane %v1364_v6, 1  ;;  %v4994_v18 = vrot.slane %v4465_v57, 1  ;;  %v11299_v63 = vld [vmem:[%s11582_s23 + $0x228] sm:$0xff] }
 0x348   : > { %v3023_v55 = vsel %vm2942_vm3, %v3020_v5, %v3022_v41  ;;  %v16198_v41 = vld [vmem:[#allocation61_spill] sm:$0xff] }
 0x349   : > { %v3394_v16 = vadd.f32 %v3023_v55, %v2264_v23  ;;  %v16199_v55 = vld [vmem:[#allocation58_spill] sm:$0xff] }
 0x34b   : > { %v4235_v29 = vadd.f32 %v3931_v24, %v3394_v16 }
 0x34d   : > { %v2494_v10 = vpop.f32.mrf.mxu2  ;;  %v13023_v53 = vadd.f32 %v4993_v26, %v4235_v29 }
 0x34e   : > { %v1367_v39 = vpop.f32.mrf.mxu1  ;;  %v4468_v37 = vpop.f32.mrf.mxu0  ;;  %v3024_v6 = vrot.slane %v2494_v10, 2 }
 0x34f   : > { %v3935_v25 = vpop.f32.mrf.mxu3  ;;  %16197 = vst [vmem:[#allocation202_spill] sm:$0xff] %v13023_v53  ;;  %v1895_v30 = vrot.slane %v1367_v39, 1  ;;  %v4995_v7 = vrot.slane %v4468_v37, 1 }
 0x351   : > { %v1896_v51 = vsel %vm1812_vm2, %v1894_v50, %v1895_v30  ;;  %v4996_v5 = vsel %vm1812_vm2, %v4994_v18, %v4995_v7  ;;  %10532 = vmatmul.msk.bf16.gmra.mxu1 %vm477_vm1, %v16198_v41  ;;  %10793 = vmatmul.msk.bf16.gmra.mxu0 %vm477_vm1, %v13021_v11 }
 0x352   : > { %10619 = vmatmul.msk.bf16.gmra.mxu2 %vm477_vm1, %v16198_v41  ;;  %v2265_v16 = vadd.f32 %v1896_v51, %v16199_v55  ;;  %v11300_v41 = vld [vmem:[%s11582_s23 + $0x230] sm:$0xff] }
 0x353   : > { %v13041_v10 = vpack.c.bf16 %v11300_v41, %v11299_v63 }
 0x354   : > { %10706 = vmatmul.msk.bf16.gmra.mxu3 %vm477_vm1, %v13021_v11 }
 0x355   : > { %v2497_v24 = vpop.f32.mrf.mxu2  ;;  %16200 = vst [vmem:[#allocation58_spill] sm:$0xff] %v13041_v10 }
 0x356   : > { %v3025_v57 = vrot.slane %v2497_v24, 2  ;;  %v1369_v8 = vpop.f32.mrf.mxu1  ;;  %v4470_v23 = vpop.f32.mrf.mxu0 }
 0x357   : > { %v3938_v26 = vpop.f32.mrf.mxu3  ;;  %v1897_v29 = vrot.slane %v1369_v8, 1  ;;  %v4997_v27 = vrot.slane %v4470_v23, 1  ;;  %v16202_v23 = vld [vmem:[#allocation62_spill] sm:$0xff] }
 0x358   : > { %v3026_v40 = vsel %vm2942_vm3, %v3024_v6, %v3025_v57 }
 0x359   : > { %v3395_v39 = vadd.f32 %v3026_v40, %v2265_v16  ;;  %v1898_v37 = vsel %vm1812_vm2, %v1895_v30, %v1897_v29  ;;  %v4998_v50 = vsel %vm1812_vm2, %v4995_v7, %v4997_v27 }
 0x35a   : > { %v2266_v55 = vadd.f32 %v1898_v37, %v16202_v23  ;;  %v16205_v37 = vld [vmem:[#allocation67_spill] sm:$0xff] }
 0x35b   : > { %v4236_v18 = vadd.f32 %v3935_v25, %v3395_v39  ;;  %v16203_v39 = vld [vmem:[#allocation70_spill] sm:$0xff] }
 0x35d   : > { %v2499_v11 = vpop.f32.mrf.mxu2  ;;  %v13043_v24 = vadd.f32 %v4996_v5, %v4236_v18 }
 0x35e   : > { %v3027_v1 = vrot.slane %v2499_v11, 2  ;;  %v1372_v51 = vpop.f32.mrf.mxu1  ;;  %v4473_v8 = vpop.f32.mrf.mxu0 }
 0x35f   : > { %v3940_v53 = vpop.f32.mrf.mxu3  ;;  %16201 = vst [vmem:[#allocation203_spill] sm:$0xff] %v13043_v24  ;;  %v1899_v6 = vrot.slane %v1372_v51, 1  ;;  %v4999_v16 = vrot.slane %v4473_v8, 1 }
 0x360   : > { %v3028_v30 = vsel %vm2942_vm3, %v3025_v57, %v3027_v1 }
 0x361   : > { %v3396_v40 = vadd.f32 %v3028_v30, %v2266_v55  ;;  %v1900_v7 = vsel %vm1812_vm2, %v1897_v29, %v1899_v6  ;;  %v5000_v25 = vsel %vm1812_vm2, %v4997_v27, %v4999_v16  ;;  %10533 = vmatmul.msk.bf16.gmra.mxu1 %vm477_vm1, %v16203_v39  ;;  %10794 = vmatmul.msk.bf16.gmra.mxu0 %vm477_vm1, %v13041_v10 }
 0x362   : > { %10620 = vmatmul.msk.bf16.gmra.mxu2 %vm477_vm1, %v16203_v39  ;;  %v2267_v18 = vadd.f32 %v1900_v7, %v16205_v37  ;;  %v11301_v39 = vld [vmem:[%s11582_s23 + $0x238] sm:$0xff] }
 0x363   : > { %v4237_v11 = vadd.f32 %v3938_v26, %v3396_v40 }
 0x364   : > { %10707 = vmatmul.msk.bf16.gmra.mxu3 %vm477_vm1, %v13041_v10 }
 0x365   : > { %v2502_v63 = vpop.f32.mrf.mxu2  ;;  %v13057_v41 = vadd.f32 %v4998_v50, %v4237_v11  ;;  %v11302_v50 = vld [vmem:[%s11582_s23 + $0x240] sm:$0xff] }
 0x366   : > { %v3029_v57 = vrot.slane %v2502_v63, 2  ;;  %v1374_v29 = vpop.f32.mrf.mxu1  ;;  %v4475_v27 = vpop.f32.mrf.mxu0  ;;  %v13065_v11 = vpack.c.bf16 %v11302_v50, %v11301_v39 }
 0x367   : > { %v3943_v5 = vpop.f32.mrf.mxu3  ;;  %16204 = vst [vmem:[#allocation62_spill] sm:$0xff] %v13057_v41  ;;  %v1901_v51 = vrot.slane %v1374_v29, 1  ;;  %v5001_v8 = vrot.slane %v4475_v27, 1  ;;  %v16208_v27 = vld [vmem:[#allocation72_spill] sm:$0xff] }
 0x368   : > { %v3030_v23 = vsel %vm2942_vm3, %v3027_v1, %v3029_v57  ;;  %16206 = vst [vmem:[#allocation67_spill] sm:$0xff] %v13065_v11 }
 0x369   : > { %v3397_v55 = vadd.f32 %v3030_v23, %v2267_v18  ;;  %v1902_v30 = vsel %vm1812_vm2, %v1899_v6, %v1901_v51  ;;  %v5002_v26 = vsel %vm1812_vm2, %v4999_v16, %v5001_v8  ;;  %v16209_v6 = vld [vmem:[#allocation78_spill] sm:$0xff] }
 0x36a   : > { %v2268_v37 = vadd.f32 %v1902_v30, %v16208_v27  ;;  %v11303_v27 = vld [vmem:[%s11582_s23 + $0x248] sm:$0xff] }
 0x36b   : > { %v4238_v40 = vadd.f32 %v3940_v53, %v3397_v55 }
 0x36d   : > { %v2504_v10 = vpop.f32.mrf.mxu2  ;;  %v13067_v63 = vadd.f32 %v5000_v25, %v4238_v40 }
 0x36e   : > { %v3031_v41 = vrot.slane %v2504_v10, 2  ;;  %v1377_v7 = vpop.f32.mrf.mxu1  ;;  %v4478_v29 = vpop.f32.mrf.mxu0 }
 0x36f   : > { %v3945_v24 = vpop.f32.mrf.mxu3  ;;  %16207 = vst [vmem:[#allocation204_spill] sm:$0xff] %v13067_v63  ;;  %v5003_v10 = vrot.slane %v4478_v29, 1 }
 0x370   : > { %v3032_v1 = vsel %vm2942_vm3, %v3029_v57, %v3031_v41  ;;  %v1903_v57 = vrot.slane %v1377_v7, 1 }
 0x371   : > { %v3398_v18 = vadd.f32 %v3032_v1, %v2268_v37  ;;  %10534 = vmatmul.msk.bf16.gmra.mxu1 %vm477_vm1, %v16209_v6  ;;  %10795 = vmatmul.msk.bf16.gmra.mxu0 %vm477_vm1, %v13065_v11 }
 0x372   : > { %10621 = vmatmul.msk.bf16.gmra.mxu2 %vm477_vm1, %v16209_v6  ;;  %v11305_v6 = vld [vmem:[%s11582_s23 + $0x258] sm:$0xff] }
 0x373   : > { %v4239_v53 = vadd.f32 %v3943_v5, %v3398_v18  ;;  %v11304_v5 = vld [vmem:[%s11582_s23 + $0x250] sm:$0xff]  ;;  %v16212_v18 = vld [vmem:[#allocation80_spill] sm:$0xff] }
 0x374   : > { %10708 = vmatmul.msk.bf16.gmra.mxu3 %vm477_vm1, %v13065_v11  ;;  %v13085_v37 = vpack.c.bf16 %v11304_v5, %v11303_v27 }
 0x375   : > { %v2507_v24 = vpop.f32.mrf.mxu2  ;;  %v13079_v25 = vadd.f32 %v5002_v26, %v4239_v53 }
 0x376   : > { %v1379_v39 = vpop.f32.mrf.mxu1  ;;  %v4480_v41 = vpop.f32.mrf.mxu0  ;;  %v3033_v30 = vrot.slane %v2507_v24, 2  ;;  %16211 = vst [vmem:[#allocation205_spill] sm:$0xff] %v13085_v37  ;;  %v16213_v24 = vld [vmem:[#allocation90_spill] sm:$0xff] }
 0x377   : > { %v3947_v16 = vpop.f32.mrf.mxu3  ;;  %16210 = vst [vmem:[#allocation72_spill] sm:$0xff] %v13079_v25  ;;  %v1904_v51 = vrot.slane %v1379_v39, 1  ;;  %v5004_v8 = vrot.slane %v4480_v41, 1 }
 0x379   : > { %v1905_v23 = vsel %vm1812_vm2, %v1903_v57, %v1904_v51  ;;  %v5005_v55 = vsel %vm1812_vm2, %v5003_v10, %v5004_v8 }
 0x37a   : > { %v2269_v53 = vadd.f32 %v1905_v23, %v16212_v18 }
 0x37d   : > { %v2509_v40 = vpop.f32.mrf.mxu2 }
 0x37e   : > { %v3034_v29 = vrot.slane %v2509_v40, 2  ;;  %v1382_v1 = vpop.f32.mrf.mxu1  ;;  %v4483_v26 = vpop.f32.mrf.mxu0 }
 0x37f   : > { %v3949_v50 = vpop.f32.mrf.mxu3  ;;  %v1906_v11 = vrot.slane %v1382_v1, 1  ;;  %v5006_v7 = vrot.slane %v4483_v26, 1  ;;  %v16215_v1 = vld [vmem:[#allocation86_spill] sm:$0xff] }
 0x380   : > { %v3035_v39 = vsel %vm2942_vm3, %v3033_v30, %v3034_v29 }
 0x381   : > { %v3399_v41 = vadd.f32 %v3035_v39, %v2269_v53  ;;  %v1907_v57 = vsel %vm1812_vm2, %v1904_v51, %v1906_v11  ;;  %v5007_v10 = vsel %vm1812_vm2, %v5004_v8, %v5006_v7  ;;  %10535 = vmatmul.msk.bf16.gmra.mxu1 %vm477_vm1, %v16213_v24  ;;  %10796 = vmatmul.msk.bf16.gmra.mxu0 %vm477_vm1, %v13085_v37 }
 0x382   : > { %10622 = vmatmul.msk.bf16.gmra.mxu2 %vm477_vm1, %v16213_v24  ;;  %v2270_v26 = vadd.f32 %v1907_v57, %v16215_v1 }
 0x383   : > { %v4240_v23 = vadd.f32 %v3947_v16, %v3399_v41 }
 0x384   : > { %10709 = vmatmul.msk.bf16.gmra.mxu3 %vm477_vm1, %v13085_v37 }
 0x385   : > { %v2512_v40 = vpop.f32.mrf.mxu2  ;;  %v13099_v51 = vadd.f32 %v5005_v55, %v4240_v23  ;;  %v11306_v55 = vld [vmem:[%s11582_s23 + $0x260] sm:$0xff] }
 0x386   : > { %v3036_v8 = vrot.slane %v2512_v40, 2  ;;  %v1384_v27 = vpop.f32.mrf.mxu1  ;;  %v4485_v5 = vpop.f32.mrf.mxu0  ;;  %v13107_v23 = vpack.c.bf16 %v11306_v55, %v11305_v6 }
 0x387   : > { %v3952_v30 = vpop.f32.mrf.mxu3  ;;  %16214 = vst [vmem:[#allocation80_spill] sm:$0xff] %v13099_v51  ;;  %v1908_v18 = vrot.slane %v1384_v27, 1  ;;  %v5008_v53 = vrot.slane %v4485_v5, 1  ;;  %v16218_v5 = vld [vmem:[#allocation92_spill] sm:$0xff] }
 0x388   : > { %v3037_v39 = vsel %vm2942_vm3, %v3034_v29, %v3036_v8  ;;  %16216 = vst [vmem:[#allocation86_spill] sm:$0xff] %v13107_v23 }
 0x389   : > { %v3400_v25 = vadd.f32 %v3037_v39, %v2270_v26  ;;  %v1909_v63 = vsel %vm1812_vm2, %v1906_v11, %v1908_v18  ;;  %v5009_v16 = vsel %vm1812_vm2, %v5006_v7, %v5008_v53  ;;  %v16219_v7 = vld [vmem:[#allocation102_spill] sm:$0xff] }
 0x38a   : > { %v2271_v1 = vadd.f32 %v1909_v63, %v16218_v5 }
 0x38b   : > { %v4241_v41 = vadd.f32 %v3949_v50, %v3400_v25 }
 0x38d   : > { %v2514_v37 = vpop.f32.mrf.mxu2  ;;  %v13109_v40 = vadd.f32 %v5007_v10, %v4241_v41  ;;  %v16221_v41 = vld [vmem:[#allocation98_spill] sm:$0xff] }
 0x38e   : > { %v3038_v51 = vrot.slane %v2514_v37, 2  ;;  %v1387_v57 = vpop.f32.mrf.mxu1  ;;  %v4488_v27 = vpop.f32.mrf.mxu0 }
 0x38f   : > { %v3954_v24 = vpop.f32.mrf.mxu3  ;;  %16217 = vst [vmem:[#allocation206_spill] sm:$0xff] %v13109_v40  ;;  %v1910_v29 = vrot.slane %v1387_v57, 1  ;;  %v5010_v26 = vrot.slane %v4488_v27, 1 }
 0x390   : > { %v3039_v11 = vsel %vm2942_vm3, %v3036_v8, %v3038_v51 }
 0x391   : > { %v3401_v39 = vadd.f32 %v3039_v11, %v2271_v1  ;;  %v1911_v25 = vsel %vm1812_vm2, %v1908_v18, %v1910_v29  ;;  %v5011_v50 = vsel %vm1812_vm2, %v5008_v53, %v5010_v26  ;;  %10536 = vmatmul.msk.bf16.gmra.mxu1 %vm477_vm1, %v16219_v7  ;;  %10797 = vmatmul.msk.bf16.gmra.mxu0 %vm477_vm1, %v13107_v23  ;;  %v11307_v26 = vld [vmem:[%s11582_s23 + $0x268] sm:$0xff]  ;;  %v11308_v11 = vld [vmem:[%s11582_s23 + $0x270] sm:$0xff] }
 0x392   : > { %10623 = vmatmul.msk.bf16.gmra.mxu2 %vm477_vm1, %v16219_v7  ;;  %v2272_v55 = vadd.f32 %v1911_v25, %v16221_v41  ;;  %v13129_v40 = vpack.c.bf16 %v11308_v11, %v11307_v26 }
 0x393   : > { %v4242_v63 = vadd.f32 %v3952_v30, %v3401_v39 }
 0x394   : > { %10710 = vmatmul.msk.bf16.gmra.mxu3 %vm477_vm1, %v13107_v23  ;;  %16222 = vst [vmem:[#allocation98_spill] sm:$0xff] %v13129_v40 }
 0x395   : > { %v2517_v6 = vpop.f32.mrf.mxu2  ;;  %v13123_v10 = vadd.f32 %v5009_v16, %v4242_v63 }
 0x396   : > { %v3040_v8 = vrot.slane %v2517_v6, 2  ;;  %v1389_v18 = vpop.f32.mrf.mxu1  ;;  %v4490_v53 = vpop.f32.mrf.mxu0 }
 0x397   : > { %v3957_v37 = vpop.f32.mrf.mxu3  ;;  %16220 = vst [vmem:[#allocation92_spill] sm:$0xff] %v13123_v10  ;;  %v1912_v63 = vrot.slane %v1389_v18, 1  ;;  %v5012_v6 = vrot.slane %v4490_v53, 1  ;;  %v11309_v10 = vld [vmem:[%s11582_s23 + $0x280] sm:$0xff] }
 0x398   : > { %v3041_v57 = vsel %vm2942_vm3, %v3038_v51, %v3040_v8  ;;  %v16224_v8 = vld [vmem:[#allocation111_spill] sm:$0xff] }
 0x399   : > { %v3402_v27 = vadd.f32 %v3041_v57, %v2272_v55  ;;  %v16225_v57 = vld [vmem:[#allocation106_spill] sm:$0xff] }
 0x39b   : > { %v4243_v5 = vadd.f32 %v3954_v24, %v3402_v27 }
 0x39d   : > { %v2519_v1 = vpop.f32.mrf.mxu2  ;;  %v13131_v30 = vadd.f32 %v5011_v50, %v4243_v5 }
 0x39e   : > { %v1392_v39 = vpop.f32.mrf.mxu1  ;;  %v4493_v16 = vpop.f32.mrf.mxu0  ;;  %v3042_v18 = vrot.slane %v2519_v1, 2 }
 0x39f   : > { %v3958_v29 = vpop.f32.mrf.mxu3  ;;  %16223 = vst [vmem:[#allocation207_spill] sm:$0xff] %v13131_v30  ;;  %v1913_v37 = vrot.slane %v1392_v39, 1  ;;  %v5013_v23 = vrot.slane %v4493_v16, 1 }
 0x3a1   : > { %v1914_v25 = vsel %vm1812_vm2, %v1912_v63, %v1913_v37  ;;  %v5014_v51 = vsel %vm1812_vm2, %v5012_v6, %v5013_v23  ;;  %10537 = vmatmul.msk.bf16.gmra.mxu1 %vm477_vm1, %v16224_v8  ;;  %10798 = vmatmul.msk.bf16.gmra.mxu0 %vm477_vm1, %v13129_v40 }
 0x3a2   : > { %10624 = vmatmul.msk.bf16.gmra.mxu2 %vm477_vm1, %v16224_v8  ;;  %v2273_v27 = vadd.f32 %v1914_v25, %v16225_v57  ;;  %v11310_v8 = vld [vmem:[%s11582_s23 + $0x278] sm:$0xff] }
 0x3a3   : > { %v13149_v1 = vpack.c.bf16 %v11309_v10, %v11310_v8 }
 0x3a4   : > { %10711 = vmatmul.msk.bf16.gmra.mxu3 %vm477_vm1, %v13129_v40 }
 0x3a5   : > { %v2522_v24 = vpop.f32.mrf.mxu2  ;;  %16226 = vst [vmem:[#allocation106_spill] sm:$0xff] %v13149_v1 }
 0x3a6   : > { %v3043_v53 = vrot.slane %v2522_v24, 2  ;;  %v1394_v41 = vpop.f32.mrf.mxu1  ;;  %v4495_v55 = vpop.f32.mrf.mxu0 }
 0x3a7   : > { %v3961_v50 = vpop.f32.mrf.mxu3  ;;  %v1915_v5 = vrot.slane %v1394_v41, 1  ;;  %v5015_v26 = vrot.slane %v4495_v55, 1  ;;  %v16228_v55 = vld [vmem:[#allocation113_spill] sm:$0xff] }
 0x3a8   : > { %v3044_v11 = vsel %vm2942_vm3, %v3042_v18, %v3043_v53 }
 0x3a9   : > { %v3403_v39 = vadd.f32 %v3044_v11, %v2273_v27  ;;  %v1916_v16 = vsel %vm1812_vm2, %v1913_v37, %v1915_v5  ;;  %v5016_v63 = vsel %vm1812_vm2, %v5013_v23, %v5015_v26 }
 0x3aa   : > { %v2274_v57 = vadd.f32 %v1916_v16, %v16228_v55  ;;  %v16231_v16 = vld [vmem:[#allocation119_spill] sm:$0xff] }
 0x3ab   : > { %v4244_v6 = vadd.f32 %v3958_v29, %v3403_v39  ;;  %v16229_v39 = vld [vmem:[#allocation125_spill] sm:$0xff] }
 0x3ad   : > { %v2524_v40 = vpop.f32.mrf.mxu2  ;;  %v13151_v24 = vadd.f32 %v5014_v51, %v4244_v6 }
 0x3ae   : > { %v3045_v7 = vrot.slane %v2524_v40, 2  ;;  %v1397_v25 = vpop.f32.mrf.mxu1  ;;  %v4498_v41 = vpop.f32.mrf.mxu0 }
 0x3af   : > { %v3963_v30 = vpop.f32.mrf.mxu3  ;;  %16227 = vst [vmem:[#allocation208_spill] sm:$0xff] %v13151_v24  ;;  %v1917_v18 = vrot.slane %v1397_v25, 1  ;;  %v5017_v27 = vrot.slane %v4498_v41, 1 }
 0x3b0   : > { %v3046_v37 = vsel %vm2942_vm3, %v3043_v53, %v3045_v7 }
 0x3b1   : > { %v3404_v11 = vadd.f32 %v3046_v37, %v2274_v57  ;;  %v1918_v23 = vsel %vm1812_vm2, %v1915_v5, %v1917_v18  ;;  %v5018_v29 = vsel %vm1812_vm2, %v5015_v26, %v5017_v27  ;;  %10538 = vmatmul.msk.bf16.gmra.mxu1 %vm477_vm1, %v16229_v39  ;;  %10799 = vmatmul.msk.bf16.gmra.mxu0 %vm477_vm1, %v13149_v1 }
 0x3b2   : > { %10625 = vmatmul.msk.bf16.gmra.mxu2 %vm477_vm1, %v16229_v39  ;;  %v2275_v6 = vadd.f32 %v1918_v23, %v16231_v16  ;;  %v11311_v39 = vld [vmem:[%s11582_s23 + $0x288] sm:$0xff] }
 0x3b3   : > { %v4245_v40 = vadd.f32 %v3961_v50, %v3404_v11 }
 0x3b4   : > { %10712 = vmatmul.msk.bf16.gmra.mxu3 %vm477_vm1, %v13149_v1 }
 0x3b5   : > { %v2527_v10 = vpop.f32.mrf.mxu2  ;;  %v13165_v8 = vadd.f32 %v5016_v63, %v4245_v40  ;;  %v11312_v63 = vld [vmem:[%s11582_s23 + $0x290] sm:$0xff] }
 0x3b6   : > { %v3047_v53 = vrot.slane %v2527_v10, 2  ;;  %v1399_v5 = vpop.f32.mrf.mxu1  ;;  %v4500_v26 = vpop.f32.mrf.mxu0  ;;  %v13173_v40 = vpack.c.bf16 %v11312_v63, %v11311_v39  ;;  %v11201_v63 = vld [vmem:[%s15652_s1 + $0x48] sm:$0xff] }
 0x3b7   : > { %v3966_v51 = vpop.f32.mrf.mxu3  ;;  %16230 = vst [vmem:[#allocation113_spill] sm:$0xff] %v13165_v8  ;;  %v1919_v25 = vrot.slane %v1399_v5, 1  ;;  %v5019_v41 = vrot.slane %v4500_v26, 1  ;;  %v16234_v26 = vld [vmem:[#allocation127_spill] sm:$0xff]  ;;  %6629 = vmatpush.bf16.msra.mxu2 %v11201_v63 }
 0x3b8   : > { %v3048_v55 = vsel %vm2942_vm3, %v3045_v7, %v3047_v53  ;;  %16232 = vst [vmem:[#allocation119_spill] sm:$0xff] %v13173_v40 }
 0x3b9   : > { %v3405_v57 = vadd.f32 %v3048_v55, %v2275_v6  ;;  %v1920_v37 = vsel %vm1812_vm2, %v1917_v18, %v1919_v25  ;;  %v5020_v50 = vsel %vm1812_vm2, %v5017_v27, %v5019_v41  ;;  %v16235_v18 = vld [vmem:[#allocation135_spill] sm:$0xff] }
 0x3ba   : > { %v2276_v16 = vadd.f32 %v1920_v37, %v16234_v26 }
 0x3bb   : > { %v4246_v11 = vadd.f32 %v3963_v30, %v3405_v57 }
 0x3bd   : > { %v2529_v1 = vpop.f32.mrf.mxu2  ;;  %v13175_v10 = vadd.f32 %v5018_v29, %v4246_v11  ;;  %v11203_v11 = vld [vmem:[%s15652_s1 + $0x60] sm:$0xff] }
 0x3be   : > { %v3049_v8 = vrot.slane %v2529_v1, 2  ;;  %v1402_v23 = vpop.f32.mrf.mxu1  ;;  %v4503_v5 = vpop.f32.mrf.mxu0  ;;  %v11202_v1 = vld [vmem:[%s15652_s1 + $0x54] sm:$0xff]  ;;  %8279 = vmatpush.bf16.msra.mxu0 %v11203_v11 }
 0x3bf   : > { %v3968_v24 = vpop.f32.mrf.mxu3  ;;  %16233 = vst [vmem:[#allocation209_spill] sm:$0xff] %v13175_v10  ;;  %v5021_v27 = vrot.slane %v4503_v5, 1  ;;  %7150 = vmatpush.bf16.msra.mxu3 %v11202_v1 }
 0x3c0   : > { %v3050_v7 = vsel %vm2942_vm3, %v3047_v53, %v3049_v8  ;;  %v11200_v24 = vld [vmem:[%s15652_s1 + $0x3c] sm:$0xff] }
 0x3c1   : > { %v3406_v6 = vadd.f32 %v3050_v7, %v2276_v16  ;;  %10539 = vmatmul.msk.bf16.gmra.mxu1 %vm477_vm1, %v16235_v18  ;;  %10800 = vmatmul.msk.bf16.gmra.mxu0 %vm477_vm1, %v13173_v40  ;;  %v11313_v16 = vld [vmem:[%s11582_s23 + $0x298] sm:$0xff]  ;;  %v11314_v7 = vld [vmem:[%s11582_s23 + $0x2a0] sm:$0xff] }
 0x3c2   : > { %10626 = vmatmul.msk.bf16.gmra.mxu2 %vm477_vm1, %v16235_v18  ;;  %5480 = vmatpush.bf16.msra.mxu1 %v11200_v24  ;;  %v16238_v24 = vld [vmem:[#allocation137_spill] sm:$0xff] }
 0x3c3   : > { %v4247_v30 = vadd.f32 %v3966_v51, %v3406_v6  ;;  %v1921_v51 = vrot.slane %v1402_v23, 1  ;;  %v13205_v23 = vpack.c.bf16 %v11314_v7, %v11313_v16  ;;  %v16240_v16 = vld [vmem:[#allocation143_spill] sm:$0xff] }
 0x3c4   : > { %10713 = vmatmul.msk.bf16.gmra.mxu3 %vm477_vm1, %v13173_v40 }
 0x3c5   : > { %v2532_v29 = vpop.f32.mrf.mxu2  ;;  %v13193_v8 = vadd.f32 %v5020_v50, %v4247_v30  ;;  %16237 = vst [vmem:[#allocation135_spill] sm:$0xff] %v13205_v23 }
 0x3c6   : > { %v1404_v53 = vpop.f32.mrf.mxu1  ;;  %v4505_v25 = vpop.f32.mrf.mxu0  ;;  %v3051_v5 = vrot.slane %v2532_v29, 2 }
 0x3c7   : > { %v3970_v39 = vpop.f32.mrf.mxu3  ;;  %16236 = vst [vmem:[#allocation127_spill] sm:$0xff] %v13193_v8  ;;  %v1922_v41 = vrot.slane %v1404_v53, 1  ;;  %v5022_v55 = vrot.slane %v4505_v25, 1 }
 0x3c9   : > { %v1923_v57 = vsel %vm1812_vm2, %v1921_v51, %v1922_v41  ;;  %v5023_v37 = vsel %vm1812_vm2, %v5021_v27, %v5022_v55 }
 0x3ca   : > { %v2277_v27 = vadd.f32 %v1923_v57, %v16238_v24 }
 0x3cd   : > { %v2534_v50 = vpop.f32.mrf.mxu2 }
 0x3ce   : > { %v3052_v6 = vrot.slane %v2534_v50, 2  ;;  %v1407_v30 = vpop.f32.mrf.mxu1  ;;  %v4508_v1 = vpop.f32.mrf.mxu0 }
 0x3cf   : > { %v3972_v26 = vpop.f32.mrf.mxu3  ;;  %v1924_v53 = vrot.slane %v1407_v30, 1  ;;  %v5024_v25 = vrot.slane %v4508_v1, 1 }
 0x3d0   : > { %v3053_v51 = vsel %vm2942_vm3, %v3051_v5, %v3052_v6 }
 0x3d1   : > { %v3407_v40 = vadd.f32 %v3053_v51, %v2277_v27  ;;  %v1925_v29 = vsel %vm1812_vm2, %v1922_v41, %v1924_v53  ;;  %v5025_v8 = vsel %vm1812_vm2, %v5022_v55, %v5024_v25  ;;  %10540 = vmatmul.msk.bf16.gmra.mxu1 %vm477_vm1, %v12319_v4  ;;  %10801 = vmatmul.msk.bf16.gmra.mxu0 %vm477_vm1, %v13205_v23 }
 0x3d2   : > { %10627 = vmatmul.msk.bf16.gmra.mxu2 %vm477_vm1, %v12319_v4  ;;  %v2278_v7 = vadd.f32 %v1925_v29, %v16240_v16  ;;  %v11315_v4 = vld [vmem:[%s11582_s23 + $0x2a8] sm:$0xff] }
 0x3d3   : > { %v4248_v57 = vadd.f32 %v3970_v39, %v3407_v40 }
 0x3d4   : > { %10714 = vmatmul.msk.bf16.gmra.mxu3 %vm477_vm1, %v13205_v23 }
 0x3d5   : > { %v2537_v11 = vpop.f32.mrf.mxu2  ;;  %v13219_v41 = vadd.f32 %v5023_v37, %v4248_v57  ;;  %v11316_v37 = vld [vmem:[%s11582_s23 + $0x2b0] sm:$0xff] }
 0x3d6   : > { %v3054_v55 = vrot.slane %v2537_v11, 2  ;;  %v1409_v5 = vpop.f32.mrf.mxu1  ;;  %v4510_v50 = vpop.f32.mrf.mxu0  ;;  %v13227_v57 = vpack.c.bf16 %v11316_v37, %v11315_v4 }
 0x3d7   : > { %v3975_v63 = vpop.f32.mrf.mxu3  ;;  %16239 = vst [vmem:[#allocation137_spill] sm:$0xff] %v13219_v41  ;;  %v1926_v30 = vrot.slane %v1409_v5, 1  ;;  %v5026_v1 = vrot.slane %v4510_v50, 1 }
 0x3d8   : > { %v3055_v24 = vsel %vm2942_vm3, %v3052_v6, %v3054_v55  ;;  %16241 = vst [vmem:[#allocation143_spill] sm:$0xff] %v13227_v57 }
 0x3d9   : > { %v3408_v27 = vadd.f32 %v3055_v24, %v2278_v7  ;;  %v1927_v51 = vsel %vm1812_vm2, %v1924_v53, %v1926_v30  ;;  %v5027_v40 = vsel %vm1812_vm2, %v5024_v25, %v5026_v1  ;;  %v16243_v24 = vld [vmem:[#allocation6_spill] sm:$0xff] }
 0x3da   : > { %v2279_v50 = vadd.f32 %v1927_v51, %v12323_v46 }
 0x3db   : > { %v4249_v39 = vadd.f32 %v3972_v26, %v3408_v27 }
 0x3dd   : > { %v2539_v23 = vpop.f32.mrf.mxu2  ;;  %v13229_v11 = vadd.f32 %v5025_v8, %v4249_v39 }
 0x3de   : > { %v3056_v41 = vrot.slane %v2539_v23, 2  ;;  %v1412_v29 = vpop.f32.mrf.mxu1  ;;  %v4513_v5 = vpop.f32.mrf.mxu0 }
 0x3df   : > { %v3977_v10 = vpop.f32.mrf.mxu3  ;;  %16242 = vst [vmem:[#allocation210_spill] sm:$0xff] %v13229_v11  ;;  %v1928_v6 = vrot.slane %v1412_v29, 1  ;;  %v5028_v16 = vrot.slane %v4513_v5, 1  ;;  %v11325_v11 = vld [vmem:[%s11582_s23 + $0x2f8] sm:$0xff] }
 0x3e0   : > { %v3057_v53 = vsel %vm2942_vm3, %v3054_v55, %v3056_v41 }
 0x3e1   : > { %v3409_v7 = vadd.f32 %v3057_v53, %v2279_v50  ;;  %v1929_v26 = vsel %vm1812_vm2, %v1926_v30, %v1928_v6  ;;  %v5029_v25 = vsel %vm1812_vm2, %v5026_v1, %v5028_v16  ;;  %10541 = vmatmul.msk.bf16.gmra.mxu1 %vm477_vm1, %v16243_v24  ;;  %10802 = vmatmul.msk.bf16.gmra.mxu0 %vm477_vm1, %v13227_v57  ;;  %v11317_v50 = vld [vmem:[%s11582_s23 + $0x2b8] sm:$0xff]  ;;  %v11318_v6 = vld [vmem:[%s11582_s23 + $0x2c0] sm:$0xff] }
 0x3e2   : > { %10628 = vmatmul.msk.bf16.gmra.mxu2 %vm477_vm1, %v16243_v24  ;;  %v2280_v27 = vadd.f32 %v1929_v26, %v12343_v20  ;;  %v13249_v16 = vpack.c.bf16 %v11318_v6, %v11317_v50  ;;  %v16247_v26 = vld [vmem:[#allocation9_spill] sm:$0xff] }
 0x3e3   : > { %v4250_v4 = vadd.f32 %v3975_v63, %v3409_v7 }
 0x3e4   : > { %10715 = vmatmul.msk.bf16.gmra.mxu3 %vm477_vm1, %v13227_v57  ;;  %16245 = vst [vmem:[#allocation211_spill] sm:$0xff] %v13249_v16  ;;  %v11320_v57 = vld [vmem:[%s11582_s23 + $0x2d0] sm:$0xff] }
 0x3e5   : > { %v2542_v46 = vpop.f32.mrf.mxu2  ;;  %v13243_v23 = vadd.f32 %v5027_v40, %v4250_v4 }
 0x3e6   : > { %v3058_v55 = vrot.slane %v2542_v46, 2  ;;  %v1414_v30 = vpop.f32.mrf.mxu1  ;;  %v4515_v1 = vpop.f32.mrf.mxu0 }
 0x3e7   : > { %v3980_v8 = vpop.f32.mrf.mxu3  ;;  %16244 = vst [vmem:[#allocation6_spill] sm:$0xff] %v13243_v23  ;;  %v1930_v7 = vrot.slane %v1414_v30, 1  ;;  %v5030_v4 = vrot.slane %v4515_v1, 1 }
 0x3e8   : > { %v3059_v51 = vsel %vm2942_vm3, %v3056_v41, %v3058_v55 }
 0x3e9   : > { %v3410_v39 = vadd.f32 %v3059_v51, %v2280_v27 }
 0x3eb   : > { %v4251_v37 = vadd.f32 %v3977_v10, %v3410_v39 }
 0x3ed   : > { %v2544_v29 = vpop.f32.mrf.mxu2  ;;  %v13251_v63 = vadd.f32 %v5029_v25, %v4251_v37 }
 0x3ee   : > { %v1417_v53 = vpop.f32.mrf.mxu1  ;;  %v4518_v40 = vpop.f32.mrf.mxu0  ;;  %v3060_v55 = vrot.slane %v2544_v29, 2 }
 0x3ef   : > { %v3981_v5 = vpop.f32.mrf.mxu3  ;;  %16246 = vst [vmem:[#allocation212_spill] sm:$0xff] %v13251_v63  ;;  %v1931_v46 = vrot.slane %v1417_v53, 1  ;;  %v5031_v8 = vrot.slane %v4518_v40, 1  ;;  %v11319_v63 = vld [vmem:[%s11582_s23 + $0x2c8] sm:$0xff] }
 0x3f0   : > { %v13269_v29 = vpack.c.bf16 %v11320_v57, %v11319_v63 }
 0x3f1   : > { %v1932_v20 = vsel %vm1812_vm2, %v1930_v7, %v1931_v46  ;;  %v5032_v41 = vsel %vm1812_vm2, %v5030_v4, %v5031_v8  ;;  %10542 = vmatmul.msk.bf16.gmra.mxu1 %vm477_vm1, %v16247_v26  ;;  %10803 = vmatmul.msk.bf16.gmra.mxu0 %vm477_vm1, %v13249_v16 }
 0x3f2   : > { %10629 = vmatmul.msk.bf16.gmra.mxu2 %vm477_vm1, %v16247_v26  ;;  %v2281_v51 = vadd.f32 %v1932_v20, %v12359_v56  ;;  %16248 = vst [vmem:[#allocation9_spill] sm:$0xff] %v13269_v29 }
 0x3f4   : > { %10716 = vmatmul.msk.bf16.gmra.mxu3 %vm477_vm1, %v13249_v16 }
 0x3f5   : > { %v2547_v10 = vpop.f32.mrf.mxu2 }
 0x3f6   : > { %v3061_v30 = vrot.slane %v2547_v10, 2  ;;  %v1419_v1 = vpop.f32.mrf.mxu1  ;;  %v4520_v27 = vpop.f32.mrf.mxu0 }
 0x3f7   : > { %v3984_v25 = vpop.f32.mrf.mxu3  ;;  %v1933_v39 = vrot.slane %v1419_v1, 1  ;;  %v5033_v37 = vrot.slane %v4520_v27, 1 }
 0x3f8   : > { %v3062_v50 = vsel %vm2942_vm3, %v3060_v55, %v3061_v30 }
 0x3f9   : > { %v3411_v6 = vadd.f32 %v3062_v50, %v2281_v51  ;;  %v1934_v53 = vsel %vm1812_vm2, %v1931_v46, %v1933_v39  ;;  %v5034_v40 = vsel %vm1812_vm2, %v5031_v8, %v5033_v37  ;;  %v16250_v50 = vld [vmem:[#allocation13_spill] sm:$0xff] }
 0x3fa   : > { %v2282_v1 = vadd.f32 %v1934_v53, %v12367_v33 }
 0x3fb   : > { %v4252_v7 = vadd.f32 %v3981_v5, %v3411_v6  ;;  %v16252_v6 = vld [vmem:[#allocation158_spill] sm:$0xff] }
 0x3fd   : > { %v2549_v4 = vpop.f32.mrf.mxu2  ;;  %v13271_v10 = vadd.f32 %v5032_v41, %v4252_v7 }
 0x3fe   : > { %v3063_v23 = vrot.slane %v2549_v4, 2  ;;  %v1422_v56 = vpop.f32.mrf.mxu1  ;;  %v4523_v20 = vpop.f32.mrf.mxu0 }
 0x3ff   : > { %v3986_v16 = vpop.f32.mrf.mxu3  ;;  %16249 = vst [vmem:[#allocation213_spill] sm:$0xff] %v13271_v10  ;;  %v1935_v55 = vrot.slane %v1422_v56, 1  ;;  %v5035_v27 = vrot.slane %v4523_v20, 1  ;;  %v11321_v10 = vld [vmem:[%s11582_s23 + $0x2d8] sm:$0xff] }
 0x400   : > { %v3064_v46 = vsel %vm2942_vm3, %v3061_v30, %v3063_v23 }
 0x401   : > { %v3412_v51 = vadd.f32 %v3064_v46, %v2282_v1  ;;  %v1936_v5 = vsel %vm1812_vm2, %v1933_v39, %v1935_v55  ;;  %v5036_v8 = vsel %vm1812_vm2, %v5033_v37, %v5035_v27  ;;  %10543 = vmatmul.msk.bf16.gmra.mxu1 %vm477_vm1, %v16250_v50  ;;  %10804 = vmatmul.msk.bf16.gmra.mxu0 %vm477_vm1, %v13269_v29 }
 0x402   : > { %10630 = vmatmul.msk.bf16.gmra.mxu2 %vm477_vm1, %v16250_v50  ;;  %v2283_v53 = vadd.f32 %v1936_v5, %v16252_v6 }
 0x403   : > { %v4253_v33 = vadd.f32 %v3984_v25, %v3412_v51 }
 0x404   : > { %10717 = vmatmul.msk.bf16.gmra.mxu3 %vm477_vm1, %v13269_v29 }
 0x405   : > { %v2552_v57 = vpop.f32.mrf.mxu2  ;;  %v13285_v41 = vadd.f32 %v5034_v40, %v4253_v33  ;;  %v11322_v40 = vld [vmem:[%s11582_s23 + $0x2e0] sm:$0xff] }
 0x406   : > { %v3065_v30 = vrot.slane %v2552_v57, 2  ;;  %v1424_v39 = vpop.f32.mrf.mxu1  ;;  %v4525_v37 = vpop.f32.mrf.mxu0  ;;  %v13293_v33 = vpack.c.bf16 %v11322_v40, %v11321_v10 }
 0x407   : > { %v3989_v63 = vpop.f32.mrf.mxu3  ;;  %16251 = vst [vmem:[#allocation13_spill] sm:$0xff] %v13285_v41  ;;  %v1937_v7 = vrot.slane %v1424_v39, 1  ;;  %v5037_v4 = vrot.slane %v4525_v37, 1  ;;  %v16255_v37 = vld [vmem:[#allocation161_spill] sm:$0xff] }
 0x408   : > { %v3066_v56 = vsel %vm2942_vm3, %v3063_v23, %v3065_v30  ;;  %16253 = vst [vmem:[#allocation158_spill] sm:$0xff] %v13293_v33 }
 0x409   : > { %v3413_v20 = vadd.f32 %v3066_v56, %v2283_v53  ;;  %v1938_v1 = vsel %vm1812_vm2, %v1935_v55, %v1937_v7  ;;  %v5038_v25 = vsel %vm1812_vm2, %v5035_v27, %v5037_v4  ;;  %v16256_v55 = vld [vmem:[#allocation18_spill] sm:$0xff] }
 0x40a   : > { %v2284_v6 = vadd.f32 %v1938_v1, %v16255_v37  ;;  %v11323_v37 = vld [vmem:[%s11582_s23 + $0x2e8] sm:$0xff] }
 0x40b   : > { %v4254_v46 = vadd.f32 %v3986_v16, %v3413_v20 }
 0x40d   : > { %v2554_v51 = vpop.f32.mrf.mxu2  ;;  %v13295_v57 = vadd.f32 %v5036_v8, %v4254_v46 }
 0x40e   : > { %v3067_v41 = vrot.slane %v2554_v51, 2  ;;  %v1427_v5 = vpop.f32.mrf.mxu1  ;;  %v4528_v39 = vpop.f32.mrf.mxu0 }
 0x40f   : > { %v3991_v29 = vpop.f32.mrf.mxu3  ;;  %16254 = vst [vmem:[#allocation214_spill] sm:$0xff] %v13295_v57  ;;  %v1939_v7 = vrot.slane %v1427_v5, 1 }
 0x410   : > { %v3068_v23 = vsel %vm2942_vm3, %v3065_v30, %v3067_v41  ;;  %v5039_v29 = vrot.slane %v4528_v39, 1 }
 0x411   : > { %v3414_v53 = vadd.f32 %v3068_v23, %v2284_v6  ;;  %10544 = vmatmul.msk.bf16.gmra.mxu1 %vm477_vm1, %v16256_v55  ;;  %10805 = vmatmul.msk.bf16.gmra.mxu0 %vm477_vm1, %v13293_v33 }
 0x412   : > { %10631 = vmatmul.msk.bf16.gmra.mxu2 %vm477_vm1, %v16256_v55 }
 0x413   : > { %v4255_v16 = vadd.f32 %v3989_v63, %v3414_v53  ;;  %v11324_v63 = vld [vmem:[%s11582_s23 + $0x2f0] sm:$0xff] }
 0x414   : > { %10718 = vmatmul.msk.bf16.gmra.mxu3 %vm477_vm1, %v13293_v33  ;;  %v13313_v6 = vpack.c.bf16 %v11324_v63, %v11323_v37  ;;  %v16261_v63 = vld [vmem:[#allocation167_spill] sm:$0xff] }
 0x415   : > { %v2557_v10 = vpop.f32.mrf.mxu2  ;;  %v13307_v8 = vadd.f32 %v5038_v25, %v4255_v16 }
 0x416   : > { %v1429_v41 = vpop.f32.mrf.mxu1  ;;  %v4530_v30 = vpop.f32.mrf.mxu0  ;;  %v3069_v46 = vrot.slane %v2557_v10, 2  ;;  %16258 = vst [vmem:[#allocation18_spill] sm:$0xff] %v13313_v6  ;;  %v16259_v10 = vld [vmem:[#allocation21_spill] sm:$0xff] }
 0x417   : > { %v3993_v27 = vpop.f32.mrf.mxu3  ;;  %16257 = vst [vmem:[#allocation161_spill] sm:$0xff] %v13307_v8  ;;  %v1940_v4 = vrot.slane %v1429_v41, 1  ;;  %v5040_v56 = vrot.slane %v4530_v30, 1 }
 0x419   : > { %v1941_v20 = vsel %vm1812_vm2, %v1939_v7, %v1940_v4  ;;  %v5041_v1 = vsel %vm1812_vm2, %v5039_v29, %v5040_v56 }
 0x41a   : > { %v2285_v53 = vadd.f32 %v1941_v20, %v12411_v31 }
 0x41d   : > { %v2559_v51 = vpop.f32.mrf.mxu2 }
 0x41e   : > { %v3070_v39 = vrot.slane %v2559_v51, 2  ;;  %v1432_v23 = vpop.f32.mrf.mxu1  ;;  %v4533_v25 = vpop.f32.mrf.mxu0 }
 0x41f   : > { %v3995_v40 = vpop.f32.mrf.mxu3  ;;  %v1942_v16 = vrot.slane %v1432_v23, 1  ;;  %v5042_v5 = vrot.slane %v4533_v25, 1 }
 0x420   : > { %v3071_v41 = vsel %vm2942_vm3, %v3069_v46, %v3070_v39 }
 0x421   : > { %v3415_v30 = vadd.f32 %v3071_v41, %v2285_v53  ;;  %v1943_v7 = vsel %vm1812_vm2, %v1940_v4, %v1942_v16  ;;  %v5043_v29 = vsel %vm1812_vm2, %v5040_v56, %v5042_v5  ;;  %10545 = vmatmul.msk.bf16.gmra.mxu1 %vm477_vm1, %v16259_v10  ;;  %10806 = vmatmul.msk.bf16.gmra.mxu0 %vm477_vm1, %v13313_v6 }
 0x422   : > { %10632 = vmatmul.msk.bf16.gmra.mxu2 %vm477_vm1, %v16259_v10  ;;  %v2286_v23 = vadd.f32 %v1943_v7, %v16261_v63 }
 0x423   : > { %v4256_v31 = vadd.f32 %v3993_v27, %v3415_v30 }
 0x424   : > { %10719 = vmatmul.msk.bf16.gmra.mxu3 %vm477_vm1, %v13313_v6 }
 0x425   : > { %v2562_v20 = vpop.f32.mrf.mxu2  ;;  %v13327_v4 = vadd.f32 %v5041_v1, %v4256_v31  ;;  %v11326_v1 = vld [vmem:[%s11582_s23 + $0x300] sm:$0xff] }
 0x426   : > { %v3072_v56 = vrot.slane %v2562_v20, 2  ;;  %v1434_v51 = vpop.f32.mrf.mxu1  ;;  %v4535_v37 = vpop.f32.mrf.mxu0  ;;  %v13335_v31 = vpack.c.bf16 %v11326_v1, %v11325_v11 }
 0x427   : > { %v3998_v46 = vpop.f32.mrf.mxu3  ;;  %16260 = vst [vmem:[#allocation215_spill] sm:$0xff] %v13327_v4  ;;  %v1944_v25 = vrot.slane %v1434_v51, 1  ;;  %v5044_v53 = vrot.slane %v4535_v37, 1  ;;  %v16264_v37 = vld [vmem:[#allocation171_spill] sm:$0xff] }
 0x428   : > { %v3073_v41 = vsel %vm2942_vm3, %v3070_v39, %v3072_v56  ;;  %16262 = vst [vmem:[#allocation167_spill] sm:$0xff] %v13335_v31 }
 0x429   : > { %v3416_v33 = vadd.f32 %v3073_v41, %v2286_v23  ;;  %v1945_v8 = vsel %vm1812_vm2, %v1942_v16, %v1944_v25  ;;  %v5045_v27 = vsel %vm1812_vm2, %v5042_v5, %v5044_v53  ;;  %v16265_v5 = vld [vmem:[#allocation25_spill] sm:$0xff] }
 0x42a   : > { %v2287_v63 = vadd.f32 %v1945_v8, %v16264_v37 }
 0x42b   : > { %v4257_v30 = vadd.f32 %v3995_v40, %v3416_v33 }
 0x42d   : > { %v2564_v6 = vpop.f32.mrf.mxu2  ;;  %v13337_v20 = vadd.f32 %v5043_v29, %v4257_v30  ;;  %v16267_v30 = vld [vmem:[#allocation174_spill] sm:$0xff] }
 0x42e   : > { %v3074_v4 = vrot.slane %v2564_v6, 2  ;;  %v1437_v7 = vpop.f32.mrf.mxu1  ;;  %v4538_v51 = vpop.f32.mrf.mxu0 }
 0x42f   : > { %v4000_v57 = vpop.f32.mrf.mxu3  ;;  %16263 = vst [vmem:[#allocation216_spill] sm:$0xff] %v13337_v20  ;;  %v1946_v39 = vrot.slane %v1437_v7, 1  ;;  %v5046_v23 = vrot.slane %v4538_v51, 1 }
 0x430   : > { %v3075_v16 = vsel %vm2942_vm3, %v3072_v56, %v3074_v4 }
 0x431   : > { %v3417_v41 = vadd.f32 %v3075_v16, %v2287_v63  ;;  %v1947_v33 = vsel %vm1812_vm2, %v1944_v25, %v1946_v39  ;;  %v5047_v40 = vsel %vm1812_vm2, %v5044_v53, %v5046_v23  ;;  %10546 = vmatmul.msk.bf16.gmra.mxu1 %vm477_vm1, %v16265_v5  ;;  %10807 = vmatmul.msk.bf16.gmra.mxu0 %vm477_vm1, %v13335_v31  ;;  %v11327_v23 = vld [vmem:[%s11582_s23 + $0x308] sm:$0xff]  ;;  %v11328_v16 = vld [vmem:[%s11582_s23 + $0x310] sm:$0xff] }
 0x432   : > { %10633 = vmatmul.msk.bf16.gmra.mxu2 %vm477_vm1, %v16265_v5  ;;  %v2288_v1 = vadd.f32 %v1947_v33, %v16267_v30  ;;  %v13357_v20 = vpack.c.bf16 %v11328_v16, %v11327_v23 }
 0x433   : > { %v4258_v11 = vadd.f32 %v3998_v46, %v3417_v41 }
 0x434   : > { %10720 = vmatmul.msk.bf16.gmra.mxu3 %vm477_vm1, %v13335_v31  ;;  %16268 = vst [vmem:[#allocation174_spill] sm:$0xff] %v13357_v20 }
 0x435   : > { %v2567_v8 = vpop.f32.mrf.mxu2  ;;  %v13351_v29 = vadd.f32 %v5045_v27, %v4258_v11 }
 0x436   : > { %v3076_v56 = vrot.slane %v2567_v8, 2  ;;  %v1439_v25 = vpop.f32.mrf.mxu1  ;;  %v4540_v53 = vpop.f32.mrf.mxu0 }
 0x437   : > { %v4003_v6 = vpop.f32.mrf.mxu3  ;;  %16266 = vst [vmem:[#allocation171_spill] sm:$0xff] %v13351_v29  ;;  %v1948_v11 = vrot.slane %v1439_v25, 1  ;;  %v5048_v8 = vrot.slane %v4540_v53, 1  ;;  %v11329_v29 = vld [vmem:[%s11582_s23 + $0x318] sm:$0xff] }
 0x438   : > { %v3077_v7 = vsel %vm2942_vm3, %v3074_v4, %v3076_v56  ;;  %v16270_v56 = vld [vmem:[#allocation29_spill] sm:$0xff] }
 0x439   : > { %v3418_v51 = vadd.f32 %v3077_v7, %v2288_v1  ;;  %v16271_v7 = vld [vmem:[#allocation178_spill] sm:$0xff] }
 0x43b   : > { %v4259_v37 = vadd.f32 %v4000_v57, %v3418_v51 }
 0x43d   : > { %v2569_v63 = vpop.f32.mrf.mxu2  ;;  %v13359_v46 = vadd.f32 %v5047_v40, %v4259_v37 }
 0x43e   : > { %v1442_v41 = vpop.f32.mrf.mxu1  ;;  %v4543_v27 = vpop.f32.mrf.mxu0  ;;  %v3078_v25 = vrot.slane %v2569_v63, 2 }
 0x43f   : > { %v4004_v39 = vpop.f32.mrf.mxu3  ;;  %16269 = vst [vmem:[#allocation217_spill] sm:$0xff] %v13359_v46  ;;  %v1949_v6 = vrot.slane %v1442_v41, 1  ;;  %v5049_v31 = vrot.slane %v4543_v27, 1 }
 0x441   : > { %v1950_v33 = vsel %vm1812_vm2, %v1948_v11, %v1949_v6  ;;  %v5050_v4 = vsel %vm1812_vm2, %v5048_v8, %v5049_v31  ;;  %10547 = vmatmul.msk.bf16.gmra.mxu1 %vm477_vm1, %v16270_v56  ;;  %10808 = vmatmul.msk.bf16.gmra.mxu0 %vm477_vm1, %v13357_v20 }
 0x442   : > { %10634 = vmatmul.msk.bf16.gmra.mxu2 %vm477_vm1, %v16270_v56  ;;  %v2289_v51 = vadd.f32 %v1950_v33, %v16271_v7  ;;  %v11330_v56 = vld [vmem:[%s11582_s23 + $0x320] sm:$0xff] }
 0x443   : > { %v13377_v63 = vpack.c.bf16 %v11330_v56, %v11329_v29 }
 0x444   : > { %10721 = vmatmul.msk.bf16.gmra.mxu3 %vm477_vm1, %v13357_v20 }
 0x445   : > { %v2572_v57 = vpop.f32.mrf.mxu2  ;;  %16272 = vst [vmem:[#allocation178_spill] sm:$0xff] %v13377_v63 }
 0x446   : > { %v3079_v53 = vrot.slane %v2572_v57, 2  ;;  %v1444_v30 = vpop.f32.mrf.mxu1  ;;  %v4545_v1 = vpop.f32.mrf.mxu0 }
 0x447   : > { %v4007_v40 = vpop.f32.mrf.mxu3  ;;  %v1951_v37 = vrot.slane %v1444_v30, 1  ;;  %v5051_v23 = vrot.slane %v4545_v1, 1  ;;  %v16274_v1 = vld [vmem:[#allocation182_spill] sm:$0xff] }
 0x448   : > { %v3080_v16 = vsel %vm2942_vm3, %v3078_v25, %v3079_v53 }
 0x449   : > { %v3419_v41 = vadd.f32 %v3080_v16, %v2289_v51  ;;  %v1952_v27 = vsel %vm1812_vm2, %v1949_v6, %v1951_v37  ;;  %v5052_v11 = vsel %vm1812_vm2, %v5049_v31, %v5051_v23 }
 0x44a   : > { %v2290_v7 = vadd.f32 %v1952_v27, %v16274_v1  ;;  %v16277_v27 = vld [vmem:[#allocation185_spill] sm:$0xff] }
 0x44b   : > { %v4260_v8 = vadd.f32 %v4004_v39, %v3419_v41  ;;  %v16275_v41 = vld [vmem:[#allocation33_spill] sm:$0xff] }
 0x44d   : > { %v2574_v20 = vpop.f32.mrf.mxu2  ;;  %v13379_v57 = vadd.f32 %v5050_v4, %v4260_v8 }
 0x44e   : > { %v3081_v5 = vrot.slane %v2574_v20, 2  ;;  %v1447_v33 = vpop.f32.mrf.mxu1  ;;  %v4548_v30 = vpop.f32.mrf.mxu0 }
 0x44f   : > { %v4009_v46 = vpop.f32.mrf.mxu3  ;;  %16273 = vst [vmem:[#allocation218_spill] sm:$0xff] %v13379_v57  ;;  %v1953_v25 = vrot.slane %v1447_v33, 1  ;;  %v5053_v51 = vrot.slane %v4548_v30, 1 }
 0x450   : > { %v3082_v6 = vsel %vm2942_vm3, %v3079_v53, %v3081_v5 }
 0x451   : > { %v3420_v16 = vadd.f32 %v3082_v6, %v2290_v7  ;;  %v1954_v31 = vsel %vm1812_vm2, %v1951_v37, %v1953_v25  ;;  %v5054_v39 = vsel %vm1812_vm2, %v5051_v23, %v5053_v51  ;;  %10548 = vmatmul.msk.bf16.gmra.mxu1 %vm477_vm1, %v16275_v41  ;;  %10809 = vmatmul.msk.bf16.gmra.mxu0 %vm477_vm1, %v13377_v63 }
 0x452   : > { %10635 = vmatmul.msk.bf16.gmra.mxu2 %vm477_vm1, %v16275_v41  ;;  %v2291_v8 = vadd.f32 %v1954_v31, %v16277_v27  ;;  %v11331_v41 = vld [vmem:[%s11582_s23 + $0x328] sm:$0xff] }
 0x453   : > { %v4261_v20 = vadd.f32 %v4007_v40, %v3420_v16 }
 0x454   : > { %10722 = vmatmul.msk.bf16.gmra.mxu3 %vm477_vm1, %v13377_v63 }
 0x455   : > { %v2577_v29 = vpop.f32.mrf.mxu2  ;;  %v13393_v56 = vadd.f32 %v5052_v11, %v4261_v20  ;;  %v11332_v11 = vld [vmem:[%s11582_s23 + $0x330] sm:$0xff] }
 0x456   : > { %v3083_v53 = vrot.slane %v2577_v29, 2  ;;  %v1449_v37 = vpop.f32.mrf.mxu1  ;;  %v4550_v23 = vpop.f32.mrf.mxu0  ;;  %v13401_v20 = vpack.c.bf16 %v11332_v11, %v11331_v41 }
 0x457   : > { %v4012_v4 = vpop.f32.mrf.mxu3  ;;  %16276 = vst [vmem:[#allocation182_spill] sm:$0xff] %v13393_v56  ;;  %v1955_v33 = vrot.slane %v1449_v37, 1  ;;  %v5055_v30 = vrot.slane %v4550_v23, 1  ;;  %v16280_v23 = vld [vmem:[#allocation189_spill] sm:$0xff] }
 0x458   : > { %v3084_v1 = vsel %vm2942_vm3, %v3081_v5, %v3083_v53  ;;  %16278 = vst [vmem:[#allocation185_spill] sm:$0xff] %v13401_v20 }
 0x459   : > { %v3421_v7 = vadd.f32 %v3084_v1, %v2291_v8  ;;  %v1956_v6 = vsel %vm1812_vm2, %v1953_v25, %v1955_v33  ;;  %v5056_v40 = vsel %vm1812_vm2, %v5053_v51, %v5055_v30  ;;  %v16281_v25 = vld [vmem:[#allocation38_spill] sm:$0xff] }
 0x45a   : > { %v2292_v27 = vadd.f32 %v1956_v6, %v16280_v23  ;;  %v11333_v23 = vld [vmem:[%s11582_s23 + $0x338] sm:$0xff] }
 0x45b   : > { %v4262_v16 = vadd.f32 %v4009_v46, %v3421_v7 }
 0x45d   : > { %v2579_v63 = vpop.f32.mrf.mxu2  ;;  %v13403_v29 = vadd.f32 %v5054_v39, %v4262_v16 }
 0x45e   : > { %v3085_v56 = vrot.slane %v2579_v63, 2  ;;  %v1452_v31 = vpop.f32.mrf.mxu1  ;;  %v4553_v37 = vpop.f32.mrf.mxu0 }
 0x45f   : > { %v4014_v57 = vpop.f32.mrf.mxu3  ;;  %16279 = vst [vmem:[#allocation219_spill] sm:$0xff] %v13403_v29  ;;  %v5057_v63 = vrot.slane %v4553_v37, 1 }
 0x460   : > { %v3086_v5 = vsel %vm2942_vm3, %v3083_v53, %v3085_v56  ;;  %v1957_v53 = vrot.slane %v1452_v31, 1 }
 0x461   : > { %v3422_v8 = vadd.f32 %v3086_v5, %v2292_v27  ;;  %10549 = vmatmul.msk.bf16.gmra.mxu1 %vm477_vm1, %v16281_v25  ;;  %10810 = vmatmul.msk.bf16.gmra.mxu0 %vm477_vm1, %v13401_v20 }
 0x462   : > { %10636 = vmatmul.msk.bf16.gmra.mxu2 %vm477_vm1, %v16281_v25  ;;  %v11335_v25 = vld [vmem:[%s11582_s23 + $0x348] sm:$0xff] }
 0x463   : > { %v4263_v46 = vadd.f32 %v4012_v4, %v3422_v8  ;;  %v11334_v4 = vld [vmem:[%s11582_s23 + $0x340] sm:$0xff]  ;;  %v16284_v8 = vld [vmem:[#allocation40_spill] sm:$0xff] }
 0x464   : > { %10723 = vmatmul.msk.bf16.gmra.mxu3 %vm477_vm1, %v13401_v20  ;;  %v13421_v27 = vpack.c.bf16 %v11334_v4, %v11333_v23 }
 0x465   : > { %v2582_v57 = vpop.f32.mrf.mxu2  ;;  %v13415_v39 = vadd.f32 %v5056_v40, %v4263_v46 }
 0x466   : > { %v1454_v41 = vpop.f32.mrf.mxu1  ;;  %v4555_v56 = vpop.f32.mrf.mxu0  ;;  %v3087_v6 = vrot.slane %v2582_v57, 2  ;;  %16283 = vst [vmem:[#allocation220_spill] sm:$0xff] %v13421_v27  ;;  %v16285_v57 = vld [vmem:[#allocation48_spill] sm:$0xff] }
 0x467   : > { %v4016_v51 = vpop.f32.mrf.mxu3  ;;  %16282 = vst [vmem:[#allocation189_spill] sm:$0xff] %v13415_v39  ;;  %v1958_v33 = vrot.slane %v1454_v41, 1  ;;  %v5058_v30 = vrot.slane %v4555_v56, 1 }
 0x469   : > { %v1959_v1 = vsel %vm1812_vm2, %v1957_v53, %v1958_v33  ;;  %v5059_v7 = vsel %vm1812_vm2, %v5057_v63, %v5058_v30 }
 0x46a   : > { %v2293_v46 = vadd.f32 %v1959_v1, %v16284_v8 }
 0x46d   : > { %v2584_v16 = vpop.f32.mrf.mxu2 }
 0x46e   : > { %v3088_v37 = vrot.slane %v2584_v16, 2  ;;  %v1457_v5 = vpop.f32.mrf.mxu1  ;;  %v4558_v40 = vpop.f32.mrf.mxu0 }
 0x46f   : > { %v4018_v11 = vpop.f32.mrf.mxu3  ;;  %v1960_v20 = vrot.slane %v1457_v5, 1  ;;  %v5060_v31 = vrot.slane %v4558_v40, 1  ;;  %v16287_v5 = vld [vmem:[#allocation43_spill] sm:$0xff] }
 0x470   : > { %v3089_v41 = vsel %vm2942_vm3, %v3087_v6, %v3088_v37 }
 0x471   : > { %v3423_v56 = vadd.f32 %v3089_v41, %v2293_v46  ;;  %v1961_v53 = vsel %vm1812_vm2, %v1958_v33, %v1960_v20  ;;  %v5061_v63 = vsel %vm1812_vm2, %v5058_v30, %v5060_v31  ;;  %10550 = vmatmul.msk.bf16.gmra.mxu1 %vm477_vm1, %v16285_v57  ;;  %10811 = vmatmul.msk.bf16.gmra.mxu0 %vm477_vm1, %v13421_v27 }
 0x472   : > { %10637 = vmatmul.msk.bf16.gmra.mxu2 %vm477_vm1, %v16285_v57  ;;  %v2294_v40 = vadd.f32 %v1961_v53, %v16287_v5 }
 0x473   : > { %v4264_v1 = vadd.f32 %v4016_v51, %v3423_v56 }
 0x474   : > { %10724 = vmatmul.msk.bf16.gmra.mxu3 %vm477_vm1, %v13421_v27 }
 0x475   : > { %v2587_v16 = vpop.f32.mrf.mxu2  ;;  %v13435_v33 = vadd.f32 %v5059_v7, %v4264_v1  ;;  %v11336_v7 = vld [vmem:[%s11582_s23 + $0x350] sm:$0xff] }
 0x476   : > { %v3090_v30 = vrot.slane %v2587_v16, 2  ;;  %v1459_v23 = vpop.f32.mrf.mxu1  ;;  %v4560_v4 = vpop.f32.mrf.mxu0  ;;  %v13443_v1 = vpack.c.bf16 %v11336_v7, %v11335_v25 }
 0x477   : > { %v4021_v6 = vpop.f32.mrf.mxu3  ;;  %16286 = vst [vmem:[#allocation40_spill] sm:$0xff] %v13435_v33  ;;  %v1962_v8 = vrot.slane %v1459_v23, 1  ;;  %v5062_v46 = vrot.slane %v4560_v4, 1  ;;  %v16290_v4 = vld [vmem:[#allocation50_spill] sm:$0xff] }
 0x478   : > { %v3091_v41 = vsel %vm2942_vm3, %v3088_v37, %v3090_v30  ;;  %16288 = vst [vmem:[#allocation43_spill] sm:$0xff] %v13443_v1 }
 0x479   : > { %v3424_v39 = vadd.f32 %v3091_v41, %v2294_v40  ;;  %v1963_v29 = vsel %vm1812_vm2, %v1960_v20, %v1962_v8  ;;  %v5063_v51 = vsel %vm1812_vm2, %v5060_v31, %v5062_v46  ;;  %v16291_v31 = vld [vmem:[#allocation56_spill] sm:$0xff] }
 0x47a   : > { %v2295_v5 = vadd.f32 %v1963_v29, %v16290_v4 }
 0x47b   : > { %v4265_v56 = vadd.f32 %v4018_v11, %v3424_v39 }
 0x47d   : > { %v2589_v27 = vpop.f32.mrf.mxu2  ;;  %v13445_v16 = vadd.f32 %v5061_v63, %v4265_v56  ;;  %v16293_v56 = vld [vmem:[#allocation53_spill] sm:$0xff] }
 0x47e   : > { %v3092_v33 = vrot.slane %v2589_v27, 2  ;;  %v1462_v53 = vpop.f32.mrf.mxu1  ;;  %v4563_v23 = vpop.f32.mrf.mxu0 }
 0x47f   : > { %v4023_v57 = vpop.f32.mrf.mxu3  ;;  %16289 = vst [vmem:[#allocation221_spill] sm:$0xff] %v13445_v16  ;;  %v1964_v37 = vrot.slane %v1462_v53, 1  ;;  %v5064_v40 = vrot.slane %v4563_v23, 1 }
 0x480   : > { %v3093_v20 = vsel %vm2942_vm3, %v3090_v30, %v3092_v33 }
 0x481   : > { %v3425_v41 = vadd.f32 %v3093_v20, %v2295_v5  ;;  %v1965_v39 = vsel %vm1812_vm2, %v1962_v8, %v1964_v37  ;;  %v5065_v11 = vsel %vm1812_vm2, %v5062_v46, %v5064_v40  ;;  %10551 = vmatmul.msk.bf16.gmra.mxu1 %vm477_vm1, %v16291_v31  ;;  %10812 = vmatmul.msk.bf16.gmra.mxu0 %vm477_vm1, %v13443_v1  ;;  %v11337_v40 = vld [vmem:[%s11582_s23 + $0x358] sm:$0xff]  ;;  %v11338_v20 = vld [vmem:[%s11582_s23 + $0x360] sm:$0xff] }
 0x482   : > { %10638 = vmatmul.msk.bf16.gmra.mxu2 %vm477_vm1, %v16291_v31  ;;  %v2296_v7 = vadd.f32 %v1965_v39, %v16293_v56  ;;  %v13465_v16 = vpack.c.bf16 %v11338_v20, %v11337_v40 }
 0x483   : > { %v4266_v29 = vadd.f32 %v4021_v6, %v3425_v41 }
 0x484   : > { %10725 = vmatmul.msk.bf16.gmra.mxu3 %vm477_vm1, %v13443_v1  ;;  %16294 = vst [vmem:[#allocation53_spill] sm:$0xff] %v13465_v16 }
 0x485   : > { %v2592_v25 = vpop.f32.mrf.mxu2  ;;  %v13459_v63 = vadd.f32 %v5063_v51, %v4266_v29 }
 0x486   : > { %v3094_v30 = vrot.slane %v2592_v25, 2  ;;  %v1464_v8 = vpop.f32.mrf.mxu1  ;;  %v4565_v46 = vpop.f32.mrf.mxu0 }
 0x487   : > { %v4026_v27 = vpop.f32.mrf.mxu3  ;;  %16292 = vst [vmem:[#allocation50_spill] sm:$0xff] %v13459_v63  ;;  %v1966_v29 = vrot.slane %v1464_v8, 1  ;;  %v5066_v25 = vrot.slane %v4565_v46, 1  ;;  %v11339_v63 = vld [vmem:[%s11582_s23 + $0x368] sm:$0xff] }
 0x488   : > { %v3095_v53 = vsel %vm2942_vm3, %v3092_v33, %v3094_v30  ;;  %v16296_v30 = vld [vmem:[#allocation63_spill] sm:$0xff] }
 0x489   : > { %v3426_v23 = vadd.f32 %v3095_v53, %v2296_v7  ;;  %v16297_v53 = vld [vmem:[#allocation59_spill] sm:$0xff] }
 0x48b   : > { %v4267_v4 = vadd.f32 %v4023_v57, %v3426_v23 }
 0x48d   : > { %v2594_v5 = vpop.f32.mrf.mxu2  ;;  %v13467_v6 = vadd.f32 %v5065_v11, %v4267_v4 }
 0x48e   : > { %v1467_v41 = vpop.f32.mrf.mxu1  ;;  %v4568_v51 = vpop.f32.mrf.mxu0  ;;  %v3096_v8 = vrot.slane %v2594_v5, 2 }
 0x48f   : > { %v4027_v37 = vpop.f32.mrf.mxu3  ;;  %16295 = vst [vmem:[#allocation222_spill] sm:$0xff] %v13467_v6  ;;  %v1967_v27 = vrot.slane %v1467_v41, 1  ;;  %v5067_v1 = vrot.slane %v4568_v51, 1 }
 0x491   : > { %v1968_v39 = vsel %vm1812_vm2, %v1966_v29, %v1967_v27  ;;  %v5068_v33 = vsel %vm1812_vm2, %v5066_v25, %v5067_v1  ;;  %10552 = vmatmul.msk.bf16.gmra.mxu1 %vm477_vm1, %v16296_v30  ;;  %10813 = vmatmul.msk.bf16.gmra.mxu0 %vm477_vm1, %v13465_v16 }
 0x492   : > { %10639 = vmatmul.msk.bf16.gmra.mxu2 %vm477_vm1, %v16296_v30  ;;  %v2297_v23 = vadd.f32 %v1968_v39, %v16297_v53  ;;  %v11340_v30 = vld [vmem:[%s11582_s23 + $0x370] sm:$0xff] }
 0x493   : > { %v13485_v5 = vpack.c.bf16 %v11340_v30, %v11339_v63 }
 0x494   : > { %10726 = vmatmul.msk.bf16.gmra.mxu3 %vm477_vm1, %v13465_v16 }
 0x495   : > { %v2597_v57 = vpop.f32.mrf.mxu2  ;;  %16298 = vst [vmem:[#allocation59_spill] sm:$0xff] %v13485_v5 }
 0x496   : > { %v3097_v46 = vrot.slane %v2597_v57, 2  ;;  %v1469_v56 = vpop.f32.mrf.mxu1  ;;  %v4570_v7 = vpop.f32.mrf.mxu0 }
 0x497   : > { %v4030_v11 = vpop.f32.mrf.mxu3  ;;  %v1969_v4 = vrot.slane %v1469_v56, 1  ;;  %v5069_v40 = vrot.slane %v4570_v7, 1  ;;  %v16300_v7 = vld [vmem:[#allocation65_spill] sm:$0xff] }
 0x498   : > { %v3098_v20 = vsel %vm2942_vm3, %v3096_v8, %v3097_v46 }
 0x499   : > { %v3427_v41 = vadd.f32 %v3098_v20, %v2297_v23  ;;  %v1970_v51 = vsel %vm1812_vm2, %v1967_v27, %v1969_v4  ;;  %v5070_v29 = vsel %vm1812_vm2, %v5067_v1, %v5069_v40 }
 0x49a   : > { %v2298_v53 = vadd.f32 %v1970_v51, %v16300_v7  ;;  %v16303_v51 = vld [vmem:[#allocation68_spill] sm:$0xff] }
 0x49b   : > { %v4268_v25 = vadd.f32 %v4027_v37, %v3427_v41  ;;  %v16301_v41 = vld [vmem:[#allocation73_spill] sm:$0xff] }
 0x49d   : > { %v2599_v16 = vpop.f32.mrf.mxu2  ;;  %v13487_v57 = vadd.f32 %v5068_v33, %v4268_v25 }
 0x49e   : > { %v3099_v31 = vrot.slane %v2599_v16, 2  ;;  %v1472_v39 = vpop.f32.mrf.mxu1  ;;  %v4573_v56 = vpop.f32.mrf.mxu0 }
 0x49f   : > { %v4032_v6 = vpop.f32.mrf.mxu3  ;;  %16299 = vst [vmem:[#allocation223_spill] sm:$0xff] %v13487_v57  ;;  %v1971_v8 = vrot.slane %v1472_v39, 1  ;;  %v5071_v23 = vrot.slane %v4573_v56, 1 }
 0x4a0   : > { %v3100_v27 = vsel %vm2942_vm3, %v3097_v46, %v3099_v31 }
 0x4a1   : > { %v3428_v20 = vadd.f32 %v3100_v27, %v2298_v53  ;;  %v1972_v1 = vsel %vm1812_vm2, %v1969_v4, %v1971_v8  ;;  %v5072_v37 = vsel %vm1812_vm2, %v5069_v40, %v5071_v23  ;;  %10553 = vmatmul.msk.bf16.gmra.mxu1 %vm477_vm1, %v16301_v41  ;;  %10814 = vmatmul.msk.bf16.gmra.mxu0 %vm477_vm1, %v13485_v5 }
 0x4a2   : > { %10640 = vmatmul.msk.bf16.gmra.mxu2 %vm477_vm1, %v16301_v41  ;;  %v2299_v25 = vadd.f32 %v1972_v1, %v16303_v51  ;;  %v11341_v41 = vld [vmem:[%s11582_s23 + $0x378] sm:$0xff] }
 0x4a3   : > { %v4269_v16 = vadd.f32 %v4030_v11, %v3428_v20 }
 0x4a4   : > { %10727 = vmatmul.msk.bf16.gmra.mxu3 %vm477_vm1, %v13485_v5 }
 0x4a5   : > { %v2602_v63 = vpop.f32.mrf.mxu2  ;;  %v13501_v30 = vadd.f32 %v5070_v29, %v4269_v16  ;;  %v11342_v29 = vld [vmem:[%s11582_s23 + $0x380] sm:$0xff] }
 0x4a6   : > { %v3101_v46 = vrot.slane %v2602_v63, 2  ;;  %v1474_v4 = vpop.f32.mrf.mxu1  ;;  %v4575_v40 = vpop.f32.mrf.mxu0  ;;  %v13509_v16 = vpack.c.bf16 %v11342_v29, %v11341_v41 }
 0x4a7   : > { %v4035_v33 = vpop.f32.mrf.mxu3  ;;  %16302 = vst [vmem:[#allocation65_spill] sm:$0xff] %v13501_v30  ;;  %v1973_v39 = vrot.slane %v1474_v4, 1  ;;  %v5073_v56 = vrot.slane %v4575_v40, 1  ;;  %v16306_v40 = vld [vmem:[#allocation75_spill] sm:$0xff] }
 0x4a8   : > { %v3102_v7 = vsel %vm2942_vm3, %v3099_v31, %v3101_v46  ;;  %16304 = vst [vmem:[#allocation68_spill] sm:$0xff] %v13509_v16 }
 0x4a9   : > { %v3429_v53 = vadd.f32 %v3102_v7, %v2299_v25  ;;  %v1974_v27 = vsel %vm1812_vm2, %v1971_v8, %v1973_v39  ;;  %v5074_v11 = vsel %vm1812_vm2, %v5071_v23, %v5073_v56  ;;  %v16307_v8 = vld [vmem:[#allocation81_spill] sm:$0xff] }
 0x4aa   : > { %v2300_v51 = vadd.f32 %v1974_v27, %v16306_v40  ;;  %v11343_v40 = vld [vmem:[%s11582_s23 + $0x388] sm:$0xff] }
 0x4ab   : > { %v4270_v20 = vadd.f32 %v4032_v6, %v3429_v53 }
 0x4ad   : > { %v2604_v5 = vpop.f32.mrf.mxu2  ;;  %v13511_v63 = vadd.f32 %v5072_v37, %v4270_v20 }
 0x4ae   : > { %v3103_v30 = vrot.slane %v2604_v5, 2  ;;  %v1477_v1 = vpop.f32.mrf.mxu1  ;;  %v4578_v4 = vpop.f32.mrf.mxu0 }
 0x4af   : > { %v4037_v57 = vpop.f32.mrf.mxu3  ;;  %16305 = vst [vmem:[#allocation224_spill] sm:$0xff] %v13511_v63  ;;  %v5075_v5 = vrot.slane %v4578_v4, 1 }
 0x4b0   : > { %v3104_v31 = vsel %vm2942_vm3, %v3101_v46, %v3103_v30  ;;  %v1975_v46 = vrot.slane %v1477_v1, 1 }
 0x4b1   : > { %v3430_v25 = vadd.f32 %v3104_v31, %v2300_v51  ;;  %10554 = vmatmul.msk.bf16.gmra.mxu1 %vm477_vm1, %v16307_v8  ;;  %10815 = vmatmul.msk.bf16.gmra.mxu0 %vm477_vm1, %v13509_v16 }
 0x4b2   : > { %10641 = vmatmul.msk.bf16.gmra.mxu2 %vm477_vm1, %v16307_v8  ;;  %v11345_v8 = vld [vmem:[%s11582_s23 + $0x398] sm:$0xff] }
 0x4b3   : > { %v4271_v6 = vadd.f32 %v4035_v33, %v3430_v25  ;;  %v11344_v33 = vld [vmem:[%s11582_s23 + $0x390] sm:$0xff] }
 0x4b4   : > { %10728 = vmatmul.msk.bf16.gmra.mxu3 %vm477_vm1, %v13509_v16  ;;  %v13529_v51 = vpack.c.bf16 %v11344_v33, %v11343_v40  ;;  %v16310_v25 = vld [vmem:[#allocation83_spill] sm:$0xff] }
 0x4b5   : > { %v2607_v57 = vpop.f32.mrf.mxu2  ;;  %v13523_v37 = vadd.f32 %v5074_v11, %v4271_v6 }
 0x4b6   : > { %v1479_v41 = vpop.f32.mrf.mxu1  ;;  %v4580_v30 = vpop.f32.mrf.mxu0  ;;  %v3105_v27 = vrot.slane %v2607_v57, 2  ;;  %16309 = vst [vmem:[#allocation225_spill] sm:$0xff] %v13529_v51  ;;  %v16311_v57 = vld [vmem:[#allocation93_spill] sm:$0xff] }
 0x4b7   : > { %v4039_v23 = vpop.f32.mrf.mxu3  ;;  %16308 = vst [vmem:[#allocation75_spill] sm:$0xff] %v13523_v37  ;;  %v1976_v39 = vrot.slane %v1479_v41, 1  ;;  %v5076_v56 = vrot.slane %v4580_v30, 1 }
 0x4b9   : > { %v1977_v7 = vsel %vm1812_vm2, %v1975_v46, %v1976_v39  ;;  %v5077_v53 = vsel %vm1812_vm2, %v5075_v5, %v5076_v56 }
 0x4ba   : > { %v2301_v6 = vadd.f32 %v1977_v7, %v16310_v25 }
 0x4bd   : > { %v2609_v20 = vpop.f32.mrf.mxu2 }
 0x4be   : > { %v3106_v4 = vrot.slane %v2609_v20, 2  ;;  %v1482_v31 = vpop.f32.mrf.mxu1  ;;  %v4583_v11 = vpop.f32.mrf.mxu0 }
 0x4bf   : > { %v4041_v29 = vpop.f32.mrf.mxu3  ;;  %v1978_v16 = vrot.slane %v1482_v31, 1  ;;  %v5078_v1 = vrot.slane %v4583_v11, 1  ;;  %v16313_v31 = vld [vmem:[#allocation87_spill] sm:$0xff] }
 0x4c0   : > { %v3107_v41 = vsel %vm2942_vm3, %v3105_v27, %v3106_v4 }
 0x4c1   : > { %v3431_v30 = vadd.f32 %v3107_v41, %v2301_v6  ;;  %v1979_v46 = vsel %vm1812_vm2, %v1976_v39, %v1978_v16  ;;  %v5079_v5 = vsel %vm1812_vm2, %v5076_v56, %v5078_v1  ;;  %10555 = vmatmul.msk.bf16.gmra.mxu1 %vm477_vm1, %v16311_v57  ;;  %10816 = vmatmul.msk.bf16.gmra.mxu0 %vm477_vm1, %v13529_v51 }
 0x4c2   : > { %10642 = vmatmul.msk.bf16.gmra.mxu2 %vm477_vm1, %v16311_v57  ;;  %v2302_v11 = vadd.f32 %v1979_v46, %v16313_v31 }
 0x4c3   : > { %v4272_v7 = vadd.f32 %v4039_v23, %v3431_v30 }
 0x4c4   : > { %10729 = vmatmul.msk.bf16.gmra.mxu3 %vm477_vm1, %v13529_v51 }
 0x4c5   : > { %v2612_v20 = vpop.f32.mrf.mxu2  ;;  %v13543_v39 = vadd.f32 %v5077_v53, %v4272_v7  ;;  %v11346_v53 = vld [vmem:[%s11582_s23 + $0x3a0] sm:$0xff] }
 0x4c6   : > { %v3108_v56 = vrot.slane %v2612_v20, 2  ;;  %v1484_v40 = vpop.f32.mrf.mxu1  ;;  %v4585_v33 = vpop.f32.mrf.mxu0  ;;  %v13551_v7 = vpack.c.bf16 %v11346_v53, %v11345_v8 }
 0x4c7   : > { %v4044_v27 = vpop.f32.mrf.mxu3  ;;  %16312 = vst [vmem:[#allocation83_spill] sm:$0xff] %v13543_v39  ;;  %v1980_v25 = vrot.slane %v1484_v40, 1  ;;  %v5080_v6 = vrot.slane %v4585_v33, 1  ;;  %v16316_v33 = vld [vmem:[#allocation95_spill] sm:$0xff] }
 0x4c8   : > { %v3109_v41 = vsel %vm2942_vm3, %v3106_v4, %v3108_v56  ;;  %16314 = vst [vmem:[#allocation87_spill] sm:$0xff] %v13551_v7 }
 0x4c9   : > { %v3432_v37 = vadd.f32 %v3109_v41, %v2302_v11  ;;  %v1981_v63 = vsel %vm1812_vm2, %v1978_v16, %v1980_v25  ;;  %v5081_v23 = vsel %vm1812_vm2, %v5078_v1, %v5080_v6  ;;  %v16317_v1 = vld [vmem:[#allocation103_spill] sm:$0xff] }
 0x4ca   : > { %v2303_v31 = vadd.f32 %v1981_v63, %v16316_v33 }
 0x4cb   : > { %v4273_v30 = vadd.f32 %v4041_v29, %v3432_v37 }
 0x4cd   : > { %v2614_v51 = vpop.f32.mrf.mxu2  ;;  %v13553_v20 = vadd.f32 %v5079_v5, %v4273_v30  ;;  %v16319_v30 = vld [vmem:[#allocation99_spill] sm:$0xff] }
 0x4ce   : > { %v3110_v39 = vrot.slane %v2614_v51, 2  ;;  %v1487_v46 = vpop.f32.mrf.mxu1  ;;  %v4588_v40 = vpop.f32.mrf.mxu0 }
 0x4cf   : > { %v4046_v57 = vpop.f32.mrf.mxu3  ;;  %16315 = vst [vmem:[#allocation226_spill] sm:$0xff] %v13553_v20  ;;  %v1982_v4 = vrot.slane %v1487_v46, 1  ;;  %v5082_v11 = vrot.slane %v4588_v40, 1 }
 0x4d0   : > { %v3111_v16 = vsel %vm2942_vm3, %v3108_v56, %v3110_v39 }
 0x4d1   : > { %v3433_v41 = vadd.f32 %v3111_v16, %v2303_v31  ;;  %v1983_v37 = vsel %vm1812_vm2, %v1980_v25, %v1982_v4  ;;  %v5083_v29 = vsel %vm1812_vm2, %v5080_v6, %v5082_v11  ;;  %10556 = vmatmul.msk.bf16.gmra.mxu1 %vm477_vm1, %v16317_v1  ;;  %10817 = vmatmul.msk.bf16.gmra.mxu0 %vm477_vm1, %v13551_v7  ;;  %v11347_v11 = vld [vmem:[%s11582_s23 + $0x3a8] sm:$0xff]  ;;  %v11348_v16 = vld [vmem:[%s11582_s23 + $0x3b0] sm:$0xff] }
 0x4d2   : > { %10643 = vmatmul.msk.bf16.gmra.mxu2 %vm477_vm1, %v16317_v1  ;;  %v2304_v53 = vadd.f32 %v1983_v37, %v16319_v30  ;;  %v13573_v20 = vpack.c.bf16 %v11348_v16, %v11347_v11 }
 0x4d3   : > { %v4274_v63 = vadd.f32 %v4044_v27, %v3433_v41 }
 0x4d4   : > { %10730 = vmatmul.msk.bf16.gmra.mxu3 %vm477_vm1, %v13551_v7  ;;  %16320 = vst [vmem:[#allocation99_spill] sm:$0xff] %v13573_v20 }
 0x4d5   : > { %v2617_v8 = vpop.f32.mrf.mxu2  ;;  %v13567_v5 = vadd.f32 %v5081_v23, %v4274_v63 }
 0x4d6   : > { %v3112_v56 = vrot.slane %v2617_v8, 2  ;;  %v1489_v25 = vpop.f32.mrf.mxu1  ;;  %v4590_v6 = vpop.f32.mrf.mxu0 }
 0x4d7   : > { %v4049_v51 = vpop.f32.mrf.mxu3  ;;  %16318 = vst [vmem:[#allocation95_spill] sm:$0xff] %v13567_v5  ;;  %v1984_v63 = vrot.slane %v1489_v25, 1  ;;  %v5084_v8 = vrot.slane %v4590_v6, 1  ;;  %v11349_v5 = vld [vmem:[%s11582_s23 + $0x3c0] sm:$0xff] }
 0x4d8   : > { %v3113_v46 = vsel %vm2942_vm3, %v3110_v39, %v3112_v56  ;;  %v16322_v56 = vld [vmem:[#allocation114_spill] sm:$0xff] }
 0x4d9   : > { %v3434_v40 = vadd.f32 %v3113_v46, %v2304_v53  ;;  %v16323_v46 = vld [vmem:[#allocation108_spill] sm:$0xff] }
 0x4db   : > { %v4275_v33 = vadd.f32 %v4046_v57, %v3434_v40 }
 0x4dd   : > { %v2619_v31 = vpop.f32.mrf.mxu2  ;;  %v13575_v27 = vadd.f32 %v5083_v29, %v4275_v33 }
 0x4de   : > { %v1492_v41 = vpop.f32.mrf.mxu1  ;;  %v4593_v23 = vpop.f32.mrf.mxu0  ;;  %v3114_v25 = vrot.slane %v2619_v31, 2 }
 0x4df   : > { %v4050_v4 = vpop.f32.mrf.mxu3  ;;  %16321 = vst [vmem:[#allocation227_spill] sm:$0xff] %v13575_v27  ;;  %v1985_v51 = vrot.slane %v1492_v41, 1  ;;  %v5085_v7 = vrot.slane %v4593_v23, 1 }
 0x4e1   : > { %v1986_v37 = vsel %vm1812_vm2, %v1984_v63, %v1985_v51  ;;  %v5086_v39 = vsel %vm1812_vm2, %v5084_v8, %v5085_v7  ;;  %10557 = vmatmul.msk.bf16.gmra.mxu1 %vm477_vm1, %v16322_v56  ;;  %10818 = vmatmul.msk.bf16.gmra.mxu0 %vm477_vm1, %v13573_v20 }
 0x4e2   : > { %10644 = vmatmul.msk.bf16.gmra.mxu2 %vm477_vm1, %v16322_v56  ;;  %v2305_v40 = vadd.f32 %v1986_v37, %v16323_v46  ;;  %v11350_v56 = vld [vmem:[%s11582_s23 + $0x3b8] sm:$0xff] }
 0x4e3   : > { %v13593_v31 = vpack.c.bf16 %v11349_v5, %v11350_v56 }
 0x4e4   : > { %10731 = vmatmul.msk.bf16.gmra.mxu3 %vm477_vm1, %v13573_v20 }
 0x4e5   : > { %v2622_v57 = vpop.f32.mrf.mxu2  ;;  %16324 = vst [vmem:[#allocation108_spill] sm:$0xff] %v13593_v31 }
 0x4e6   : > { %v3115_v6 = vrot.slane %v2622_v57, 2  ;;  %v1494_v30 = vpop.f32.mrf.mxu1  ;;  %v4595_v53 = vpop.f32.mrf.mxu0 }
 0x4e7   : > { %v4053_v29 = vpop.f32.mrf.mxu3  ;;  %v1987_v33 = vrot.slane %v1494_v30, 1  ;;  %v5087_v11 = vrot.slane %v4595_v53, 1  ;;  %v16326_v53 = vld [vmem:[#allocation116_spill] sm:$0xff] }
 0x4e8   : > { %v3116_v16 = vsel %vm2942_vm3, %v3114_v25, %v3115_v6 }
 0x4e9   : > { %v3435_v41 = vadd.f32 %v3116_v16, %v2305_v40  ;;  %v1988_v23 = vsel %vm1812_vm2, %v1985_v51, %v1987_v33  ;;  %v5088_v63 = vsel %vm1812_vm2, %v5085_v7, %v5087_v11 }
 0x4ea   : > { %v2306_v46 = vadd.f32 %v1988_v23, %v16326_v53  ;;  %v16329_v23 = vld [vmem:[#allocation122_spill] sm:$0xff] }
 0x4eb   : > { %v4276_v8 = vadd.f32 %v4050_v4, %v3435_v41  ;;  %v16327_v41 = vld [vmem:[#allocation128_spill] sm:$0xff] }
 0x4ed   : > { %v2624_v20 = vpop.f32.mrf.mxu2  ;;  %v13595_v57 = vadd.f32 %v5086_v39, %v4276_v8 }
 0x4ee   : > { %v3117_v1 = vrot.slane %v2624_v20, 2  ;;  %v1497_v37 = vpop.f32.mrf.mxu1  ;;  %v4598_v30 = vpop.f32.mrf.mxu0 }
 0x4ef   : > { %v4055_v27 = vpop.f32.mrf.mxu3  ;;  %16325 = vst [vmem:[#allocation228_spill] sm:$0xff] %v13595_v57  ;;  %v1989_v25 = vrot.slane %v1497_v37, 1  ;;  %v5089_v40 = vrot.slane %v4598_v30, 1 }
 0x4f0   : > { %v3118_v51 = vsel %vm2942_vm3, %v3115_v6, %v3117_v1 }
 0x4f1   : > { %v3436_v16 = vadd.f32 %v3118_v51, %v2306_v46  ;;  %v1990_v7 = vsel %vm1812_vm2, %v1987_v33, %v1989_v25  ;;  %v5090_v4 = vsel %vm1812_vm2, %v5087_v11, %v5089_v40  ;;  %10558 = vmatmul.msk.bf16.gmra.mxu1 %vm477_vm1, %v16327_v41  ;;  %10819 = vmatmul.msk.bf16.gmra.mxu0 %vm477_vm1, %v13593_v31 }
 0x4f2   : > { %10645 = vmatmul.msk.bf16.gmra.mxu2 %vm477_vm1, %v16327_v41  ;;  %v2307_v8 = vadd.f32 %v1990_v7, %v16329_v23  ;;  %v11351_v41 = vld [vmem:[%s11582_s23 + $0x3c8] sm:$0xff] }
 0x4f3   : > { %v4277_v20 = vadd.f32 %v4053_v29, %v3436_v16 }
 0x4f4   : > { %10732 = vmatmul.msk.bf16.gmra.mxu3 %vm477_vm1, %v13593_v31 }
 0x4f5   : > { %v2627_v5 = vpop.f32.mrf.mxu2  ;;  %v13609_v56 = vadd.f32 %v5088_v63, %v4277_v20  ;;  %v11352_v63 = vld [vmem:[%s11582_s23 + $0x3d0] sm:$0xff] }
 0x4f6   : > { %v3119_v6 = vrot.slane %v2627_v5, 2  ;;  %v1499_v33 = vpop.f32.mrf.mxu1  ;;  %v4600_v11 = vpop.f32.mrf.mxu0  ;;  %v13617_v20 = vpack.c.bf16 %v11352_v63, %v11351_v41 }
 0x4f7   : > { %v4058_v39 = vpop.f32.mrf.mxu3  ;;  %16328 = vst [vmem:[#allocation116_spill] sm:$0xff] %v13609_v56  ;;  %v1991_v37 = vrot.slane %v1499_v33, 1  ;;  %v5091_v30 = vrot.slane %v4600_v11, 1  ;;  %v16332_v11 = vld [vmem:[#allocation130_spill] sm:$0xff] }
 0x4f8   : > { %v3120_v53 = vsel %vm2942_vm3, %v3117_v1, %v3119_v6  ;;  %16330 = vst [vmem:[#allocation122_spill] sm:$0xff] %v13617_v20 }
 0x4f9   : > { %v3437_v46 = vadd.f32 %v3120_v53, %v2307_v8  ;;  %v1992_v51 = vsel %vm1812_vm2, %v1989_v25, %v1991_v37  ;;  %v5092_v29 = vsel %vm1812_vm2, %v5089_v40, %v5091_v30  ;;  %v16333_v25 = vld [vmem:[#allocation138_spill] sm:$0xff] }
 0x4fa   : > { %v2308_v23 = vadd.f32 %v1992_v51, %v16332_v11  ;;  %v11353_v11 = vld [vmem:[%s11582_s23 + $0x3d8] sm:$0xff] }
 0x4fb   : > { %v4278_v16 = vadd.f32 %v4055_v27, %v3437_v46 }
 0x4fd   : > { %v2629_v31 = vpop.f32.mrf.mxu2  ;;  %v13619_v5 = vadd.f32 %v5090_v4, %v4278_v16 }
 0x4fe   : > { %v3121_v56 = vrot.slane %v2629_v31, 2  ;;  %v1502_v7 = vpop.f32.mrf.mxu1  ;;  %v4603_v33 = vpop.f32.mrf.mxu0 }
 0x4ff   : > { %v4060_v57 = vpop.f32.mrf.mxu3  ;;  %16331 = vst [vmem:[#allocation229_spill] sm:$0xff] %v13619_v5  ;;  %v5093_v31 = vrot.slane %v4603_v33, 1 }
 0x500   : > { %v3122_v1 = vsel %vm2942_vm3, %v3119_v6, %v3121_v56  ;;  %v1993_v6 = vrot.slane %v1502_v7, 1 }
 0x501   : > { %v3438_v8 = vadd.f32 %v3122_v1, %v2308_v23  ;;  %10559 = vmatmul.msk.bf16.gmra.mxu1 %vm477_vm1, %v16333_v25  ;;  %10820 = vmatmul.msk.bf16.gmra.mxu0 %vm477_vm1, %v13617_v20 }
 0x502   : > { %10646 = vmatmul.msk.bf16.gmra.mxu2 %vm477_vm1, %v16333_v25  ;;  %v11355_v25 = vld [vmem:[%s11582_s23 + $0x3e8] sm:$0xff] }
 0x503   : > { %v4279_v27 = vadd.f32 %v4058_v39, %v3438_v8  ;;  %v11354_v39 = vld [vmem:[%s11582_s23 + $0x3e0] sm:$0xff]  ;;  %v16336_v8 = vld [vmem:[#allocation140_spill] sm:$0xff] }
 0x504   : > { %10733 = vmatmul.msk.bf16.gmra.mxu3 %vm477_vm1, %v13617_v20  ;;  %v13637_v23 = vpack.c.bf16 %v11354_v39, %v11353_v11 }
 0x505   : > { %v2632_v57 = vpop.f32.mrf.mxu2  ;;  %v13631_v4 = vadd.f32 %v5092_v29, %v4279_v27 }
 0x506   : > { %v1504_v41 = vpop.f32.mrf.mxu1  ;;  %v4605_v56 = vpop.f32.mrf.mxu0  ;;  %v3123_v51 = vrot.slane %v2632_v57, 2  ;;  %16335 = vst [vmem:[#allocation230_spill] sm:$0xff] %v13637_v23  ;;  %v16337_v57 = vld [vmem:[#allocation148_spill] sm:$0xff] }
 0x507   : > { %v4062_v40 = vpop.f32.mrf.mxu3  ;;  %16334 = vst [vmem:[#allocation130_spill] sm:$0xff] %v13631_v4  ;;  %v1994_v37 = vrot.slane %v1504_v41, 1  ;;  %v5094_v30 = vrot.slane %v4605_v56, 1 }
 0x509   : > { %v1995_v53 = vsel %vm1812_vm2, %v1993_v6, %v1994_v37  ;;  %v5095_v46 = vsel %vm1812_vm2, %v5093_v31, %v5094_v30 }
 0x50a   : > { %v2309_v27 = vadd.f32 %v1995_v53, %v16336_v8 }
 0x50d   : > { %v2634_v16 = vpop.f32.mrf.mxu2 }
 0x50e   : > { %v3124_v33 = vrot.slane %v2634_v16, 2  ;;  %v1507_v1 = vpop.f32.mrf.mxu1  ;;  %v4608_v29 = vpop.f32.mrf.mxu0 }
 0x50f   : > { %v4064_v63 = vpop.f32.mrf.mxu3  ;;  %v1996_v20 = vrot.slane %v1507_v1, 1  ;;  %v5096_v7 = vrot.slane %v4608_v29, 1  ;;  %v16339_v1 = vld [vmem:[#allocation144_spill] sm:$0xff] }
 0x510   : > { %v3125_v41 = vsel %vm2942_vm3, %v3123_v51, %v3124_v33 }
 0x511   : > { %v3439_v56 = vadd.f32 %v3125_v41, %v2309_v27  ;;  %v1997_v6 = vsel %vm1812_vm2, %v1994_v37, %v1996_v20  ;;  %v5097_v31 = vsel %vm1812_vm2, %v5094_v30, %v5096_v7  ;;  %10560 = vmatmul.msk.bf16.gmra.mxu1 %vm477_vm1, %v16337_v57  ;;  %10821 = vmatmul.msk.bf16.gmra.mxu0 %vm477_vm1, %v13637_v23 }
 0x512   : > { %10647 = vmatmul.msk.bf16.gmra.mxu2 %vm477_vm1, %v16337_v57  ;;  %v2310_v29 = vadd.f32 %v1997_v6, %v16339_v1 }
 0x513   : > { %v4280_v53 = vadd.f32 %v4062_v40, %v3439_v56 }
 0x514   : > { %10734 = vmatmul.msk.bf16.gmra.mxu3 %vm477_vm1, %v13637_v23 }
 0x515   : > { %v2637_v16 = vpop.f32.mrf.mxu2  ;;  %v13651_v37 = vadd.f32 %v5095_v46, %v4280_v53  ;;  %v11356_v46 = vld [vmem:[%s11582_s23 + $0x3f0] sm:$0xff] }
 0x516   : > { %v3126_v30 = vrot.slane %v2637_v16, 2  ;;  %v1509_v11 = vpop.f32.mrf.mxu1  ;;  %v4610_v39 = vpop.f32.mrf.mxu0  ;;  %v13659_v53 = vpack.c.bf16 %v11356_v46, %v11355_v25 }
 0x517   : > { %v4067_v51 = vpop.f32.mrf.mxu3  ;;  %16338 = vst [vmem:[#allocation140_spill] sm:$0xff] %v13651_v37  ;;  %v1998_v8 = vrot.slane %v1509_v11, 1  ;;  %v5098_v27 = vrot.slane %v4610_v39, 1  ;;  %v16342_v39 = vld [vmem:[#allocation150_spill] sm:$0xff] }
 0x518   : > { %v3127_v41 = vsel %vm2942_vm3, %v3124_v33, %v3126_v30  ;;  %16340 = vst [vmem:[#allocation144_spill] sm:$0xff] %v13659_v53 }
 0x519   : > { %v3440_v4 = vadd.f32 %v3127_v41, %v2310_v29  ;;  %v1999_v5 = vsel %vm1812_vm2, %v1996_v20, %v1998_v8  ;;  %v5099_v40 = vsel %vm1812_vm2, %v5096_v7, %v5098_v27  ;;  %v16343_v7 = vld [vmem:[#allocation7_spill] sm:$0xff] }
 0x51a   : > { %v2311_v1 = vadd.f32 %v1999_v5, %v16342_v39 }
 0x51b   : > { %v4281_v56 = vadd.f32 %v4064_v63, %v3440_v4 }
 0x51d   : > { %v2639_v23 = vpop.f32.mrf.mxu2  ;;  %v13661_v16 = vadd.f32 %v5097_v31, %v4281_v56  ;;  %v16345_v56 = vld [vmem:[#allocation152_spill] sm:$0xff] }
 0x51e   : > { %v3128_v37 = vrot.slane %v2639_v23, 2  ;;  %v1512_v6 = vpop.f32.mrf.mxu1  ;;  %v4613_v11 = vpop.f32.mrf.mxu0 }
 0x51f   : > { %v4069_v57 = vpop.f32.mrf.mxu3  ;;  %16341 = vst [vmem:[#allocation231_spill] sm:$0xff] %v13661_v16  ;;  %v2000_v33 = vrot.slane %v1512_v6, 1  ;;  %v5100_v29 = vrot.slane %v4613_v11, 1 }
 0x520   : > { %v3129_v20 = vsel %vm2942_vm3, %v3126_v30, %v3128_v37 }
 0x521   : > { %v3441_v41 = vadd.f32 %v3129_v20, %v2311_v1  ;;  %v2001_v4 = vsel %vm1812_vm2, %v1998_v8, %v2000_v33  ;;  %v5101_v63 = vsel %vm1812_vm2, %v5098_v27, %v5100_v29  ;;  %10561 = vmatmul.msk.bf16.gmra.mxu1 %vm477_vm1, %v16343_v7  ;;  %10822 = vmatmul.msk.bf16.gmra.mxu0 %vm477_vm1, %v13659_v53  ;;  %v11357_v29 = vld [vmem:[%s11582_s23 + $0x3f8] sm:$0xff]  ;;  %v11358_v20 = vld [vmem:[%s11582_s23 + $0x400] sm:$0xff] }
 0x522   : > { %10648 = vmatmul.msk.bf16.gmra.mxu2 %vm477_vm1, %v16343_v7  ;;  %v2312_v46 = vadd.f32 %v2001_v4, %v16345_v56  ;;  %v13681_v16 = vpack.c.bf16 %v11358_v20, %v11357_v29 }
 0x523   : > { %v4282_v5 = vadd.f32 %v4067_v51, %v3441_v41 }
 0x524   : > { %10735 = vmatmul.msk.bf16.gmra.mxu3 %vm477_vm1, %v13659_v53  ;;  %16346 = vst [vmem:[#allocation152_spill] sm:$0xff] %v13681_v16 }
 0x525   : > { %v2642_v25 = vpop.f32.mrf.mxu2  ;;  %v13675_v31 = vadd.f32 %v5099_v40, %v4282_v5 }
 0x526   : > { %v3130_v30 = vrot.slane %v2642_v25, 2  ;;  %v1514_v8 = vpop.f32.mrf.mxu1  ;;  %v4615_v27 = vpop.f32.mrf.mxu0 }
 0x527   : > { %v4072_v23 = vpop.f32.mrf.mxu3  ;;  %16344 = vst [vmem:[#allocation150_spill] sm:$0xff] %v13675_v31  ;;  %v2002_v5 = vrot.slane %v1514_v8, 1  ;;  %v5102_v25 = vrot.slane %v4615_v27, 1  ;;  %v11359_v31 = vld [vmem:[%s11582_s23 + $0x408] sm:$0xff] }
 0x528   : > { %v3131_v6 = vsel %vm2942_vm3, %v3128_v37, %v3130_v30  ;;  %v16348_v30 = vld [vmem:[#allocation10_spill] sm:$0xff] }
 0x529   : > { %v3442_v11 = vadd.f32 %v3131_v6, %v2312_v46  ;;  %v16349_v6 = vld [vmem:[#allocation154_spill] sm:$0xff] }
 0x52b   : > { %v4283_v39 = vadd.f32 %v4069_v57, %v3442_v11 }
 0x52d   : > { %v2644_v1 = vpop.f32.mrf.mxu2  ;;  %v13683_v51 = vadd.f32 %v5101_v63, %v4283_v39 }
 0x52e   : > { %v1517_v41 = vpop.f32.mrf.mxu1  ;;  %v4618_v40 = vpop.f32.mrf.mxu0  ;;  %v3132_v8 = vrot.slane %v2644_v1, 2 }
 0x52f   : > { %v4073_v33 = vpop.f32.mrf.mxu3  ;;  %16347 = vst [vmem:[#allocation232_spill] sm:$0xff] %v13683_v51  ;;  %v2003_v23 = vrot.slane %v1517_v41, 1  ;;  %v5103_v53 = vrot.slane %v4618_v40, 1 }
 0x531   : > { %v2004_v4 = vsel %vm1812_vm2, %v2002_v5, %v2003_v23  ;;  %v5104_v37 = vsel %vm1812_vm2, %v5102_v25, %v5103_v53  ;;  %10562 = vmatmul.msk.bf16.gmra.mxu1 %vm477_vm1, %v16348_v30  ;;  %10823 = vmatmul.msk.bf16.gmra.mxu0 %vm477_vm1, %v13681_v16 }
 0x532   : > { %10649 = vmatmul.msk.bf16.gmra.mxu2 %vm477_vm1, %v16348_v30  ;;  %v2313_v11 = vadd.f32 %v2004_v4, %v16349_v6  ;;  %v11360_v30 = vld [vmem:[%s11582_s23 + $0x410] sm:$0xff] }
 0x533   : > { %v13701_v1 = vpack.c.bf16 %v11360_v30, %v11359_v31 }
 0x534   : > { %10736 = vmatmul.msk.bf16.gmra.mxu3 %vm477_vm1, %v13681_v16 }
 0x535   : > { %v2647_v57 = vpop.f32.mrf.mxu2  ;;  %16350 = vst [vmem:[#allocation154_spill] sm:$0xff] %v13701_v1 }
 0x536   : > { %v3133_v27 = vrot.slane %v2647_v57, 2  ;;  %v1519_v56 = vpop.f32.mrf.mxu1  ;;  %v4620_v46 = vpop.f32.mrf.mxu0 }
 0x537   : > { %v4076_v63 = vpop.f32.mrf.mxu3  ;;  %v2005_v39 = vrot.slane %v1519_v56, 1  ;;  %v5105_v29 = vrot.slane %v4620_v46, 1  ;;  %v16352_v46 = vld [vmem:[#allocation156_spill] sm:$0xff] }
 0x538   : > { %v3134_v20 = vsel %vm2942_vm3, %v3132_v8, %v3133_v27 }
 0x539   : > { %v3443_v41 = vadd.f32 %v3134_v20, %v2313_v11  ;;  %v2006_v40 = vsel %vm1812_vm2, %v2003_v23, %v2005_v39  ;;  %v5106_v5 = vsel %vm1812_vm2, %v5103_v53, %v5105_v29 }
 0x53a   : > { %v2314_v6 = vadd.f32 %v2006_v40, %v16352_v46  ;;  %v16355_v40 = vld [vmem:[#allocation159_spill] sm:$0xff] }
 0x53b   : > { %v4284_v25 = vadd.f32 %v4073_v33, %v3443_v41  ;;  %v16353_v41 = vld [vmem:[#allocation14_spill] sm:$0xff] }
 0x53d   : > { %v2649_v16 = vpop.f32.mrf.mxu2  ;;  %v13703_v57 = vadd.f32 %v5104_v37, %v4284_v25 }
 0x53e   : > { %v3135_v7 = vrot.slane %v2649_v16, 2  ;;  %v1522_v4 = vpop.f32.mrf.mxu1  ;;  %v4623_v56 = vpop.f32.mrf.mxu0 }
 0x53f   : > { %v4078_v51 = vpop.f32.mrf.mxu3  ;;  %16351 = vst [vmem:[#allocation233_spill] sm:$0xff] %v13703_v57  ;;  %v2007_v8 = vrot.slane %v1522_v4, 1  ;;  %v5107_v11 = vrot.slane %v4623_v56, 1 }
 0x540   : > { %v3136_v23 = vsel %vm2942_vm3, %v3133_v27, %v3135_v7 }
 0x541   : > { %v3444_v20 = vadd.f32 %v3136_v23, %v2314_v6  ;;  %v2008_v53 = vsel %vm1812_vm2, %v2005_v39, %v2007_v8  ;;  %v5108_v33 = vsel %vm1812_vm2, %v5105_v29, %v5107_v11  ;;  %10563 = vmatmul.msk.bf16.gmra.mxu1 %vm477_vm1, %v16353_v41  ;;  %10824 = vmatmul.msk.bf16.gmra.mxu0 %vm477_vm1, %v13701_v1 }
 0x542   : > { %10650 = vmatmul.msk.bf16.gmra.mxu2 %vm477_vm1, %v16353_v41  ;;  %v2315_v25 = vadd.f32 %v2008_v53, %v16355_v40  ;;  %v11361_v41 = vld [vmem:[%s11582_s23 + $0x418] sm:$0xff] }
 0x543   : > { %v4285_v16 = vadd.f32 %v4076_v63, %v3444_v20 }
 0x544   : > { %10737 = vmatmul.msk.bf16.gmra.mxu3 %vm477_vm1, %v13701_v1 }
 0x545   : > { %v2652_v31 = vpop.f32.mrf.mxu2  ;;  %v13717_v30 = vadd.f32 %v5106_v5, %v4285_v16  ;;  %v11362_v5 = vld [vmem:[%s11582_s23 + $0x420] sm:$0xff] }
 0x546   : > { %v3137_v27 = vrot.slane %v2652_v31, 2  ;;  %v1524_v39 = vpop.f32.mrf.mxu1  ;;  %v4625_v29 = vpop.f32.mrf.mxu0  ;;  %v13725_v16 = vpack.c.bf16 %v11362_v5, %v11361_v41 }
 0x547   : > { %v4081_v37 = vpop.f32.mrf.mxu3  ;;  %16354 = vst [vmem:[#allocation156_spill] sm:$0xff] %v13717_v30  ;;  %v2009_v4 = vrot.slane %v1524_v39, 1  ;;  %v5109_v56 = vrot.slane %v4625_v29, 1  ;;  %v16358_v29 = vld [vmem:[#allocation162_spill] sm:$0xff] }
 0x548   : > { %v3138_v46 = vsel %vm2942_vm3, %v3135_v7, %v3137_v27  ;;  %16356 = vst [vmem:[#allocation159_spill] sm:$0xff] %v13725_v16 }
 0x549   : > { %v3445_v6 = vadd.f32 %v3138_v46, %v2315_v25  ;;  %v2010_v23 = vsel %vm1812_vm2, %v2007_v8, %v2009_v4  ;;  %v5110_v63 = vsel %vm1812_vm2, %v5107_v11, %v5109_v56  ;;  %v16359_v8 = vld [vmem:[#allocation19_spill] sm:$0xff] }
 0x54a   : > { %v2316_v40 = vadd.f32 %v2010_v23, %v16358_v29  ;;  %v11363_v29 = vld [vmem:[%s11582_s23 + $0x428] sm:$0xff] }
 0x54b   : > { %v4286_v20 = vadd.f32 %v4078_v51, %v3445_v6 }
 0x54d   : > { %v2654_v1 = vpop.f32.mrf.mxu2  ;;  %v13727_v31 = vadd.f32 %v5108_v33, %v4286_v20 }
 0x54e   : > { %v3139_v30 = vrot.slane %v2654_v1, 2  ;;  %v1527_v53 = vpop.f32.mrf.mxu1  ;;  %v4628_v39 = vpop.f32.mrf.mxu0 }
 0x54f   : > { %v4083_v57 = vpop.f32.mrf.mxu3  ;;  %16357 = vst [vmem:[#allocation234_spill] sm:$0xff] %v13727_v31  ;;  %v5111_v1 = vrot.slane %v4628_v39, 1 }
 0x550   : > { %v3140_v7 = vsel %vm2942_vm3, %v3137_v27, %v3139_v30  ;;  %v2011_v27 = vrot.slane %v1527_v53, 1 }
 0x551   : > { %v3446_v25 = vadd.f32 %v3140_v7, %v2316_v40  ;;  %10564 = vmatmul.msk.bf16.gmra.mxu1 %vm477_vm1, %v16359_v8  ;;  %10825 = vmatmul.msk.bf16.gmra.mxu0 %vm477_vm1, %v13725_v16 }
 0x552   : > { %10651 = vmatmul.msk.bf16.gmra.mxu2 %vm477_vm1, %v16359_v8  ;;  %v11365_v8 = vld [vmem:[%s11582_s23 + $0x438] sm:$0xff] }
 0x553   : > { %v4287_v51 = vadd.f32 %v4081_v37, %v3446_v25  ;;  %v11364_v37 = vld [vmem:[%s11582_s23 + $0x430] sm:$0xff]  ;;  %v16362_v25 = vld [vmem:[#allocation165_spill] sm:$0xff] }
 0x554   : > { %10738 = vmatmul.msk.bf16.gmra.mxu3 %vm477_vm1, %v13725_v16  ;;  %v13745_v40 = vpack.c.bf16 %v11364_v37, %v11363_v29 }
 0x555   : > { %v2657_v57 = vpop.f32.mrf.mxu2  ;;  %v13739_v33 = vadd.f32 %v5110_v63, %v4287_v51 }
 0x556   : > { %v1529_v41 = vpop.f32.mrf.mxu1  ;;  %v4630_v30 = vpop.f32.mrf.mxu0  ;;  %v3141_v23 = vrot.slane %v2657_v57, 2  ;;  %16361 = vst [vmem:[#allocation235_spill] sm:$0xff] %v13745_v40  ;;  %v16363_v57 = vld [vmem:[#allocation22_spill] sm:$0xff] }
 0x557   : > { %v4085_v11 = vpop.f32.mrf.mxu3  ;;  %16360 = vst [vmem:[#allocation162_spill] sm:$0xff] %v13739_v33  ;;  %v2012_v4 = vrot.slane %v1529_v41, 1  ;;  %v5112_v56 = vrot.slane %v4630_v30, 1 }
 0x559   : > { %v2013_v46 = vsel %vm1812_vm2, %v2011_v27, %v2012_v4  ;;  %v5113_v6 = vsel %vm1812_vm2, %v5111_v1, %v5112_v56 }
 0x55a   : > { %v2317_v51 = vadd.f32 %v2013_v46, %v16362_v25 }
 0x55d   : > { %v2659_v20 = vpop.f32.mrf.mxu2 }
 0x55e   : > { %v3142_v39 = vrot.slane %v2659_v20, 2  ;;  %v1532_v7 = vpop.f32.mrf.mxu1  ;;  %v4633_v63 = vpop.f32.mrf.mxu0 }
 0x55f   : > { %v4087_v5 = vpop.f32.mrf.mxu3  ;;  %v2014_v16 = vrot.slane %v1532_v7, 1  ;;  %v5114_v53 = vrot.slane %v4633_v63, 1  ;;  %v16365_v7 = vld [vmem:[#allocation168_spill] sm:$0xff] }
 0x560   : > { %v3143_v41 = vsel %vm2942_vm3, %v3141_v23, %v3142_v39 }
 0x561   : > { %v3447_v30 = vadd.f32 %v3143_v41, %v2317_v51  ;;  %v2015_v27 = vsel %vm1812_vm2, %v2012_v4, %v2014_v16  ;;  %v5115_v1 = vsel %vm1812_vm2, %v5112_v56, %v5114_v53  ;;  %10565 = vmatmul.msk.bf16.gmra.mxu1 %vm477_vm1, %v16363_v57  ;;  %10826 = vmatmul.msk.bf16.gmra.mxu0 %vm477_vm1, %v13745_v40 }
 0x562   : > { %10652 = vmatmul.msk.bf16.gmra.mxu2 %vm477_vm1, %v16363_v57  ;;  %v2318_v63 = vadd.f32 %v2015_v27, %v16365_v7 }
 0x563   : > { %v4288_v46 = vadd.f32 %v4085_v11, %v3447_v30 }
 0x564   : > { %10739 = vmatmul.msk.bf16.gmra.mxu3 %vm477_vm1, %v13745_v40 }
 0x565   : > { %v2662_v20 = vpop.f32.mrf.mxu2  ;;  %v13759_v4 = vadd.f32 %v5113_v6, %v4288_v46  ;;  %v11366_v6 = vld [vmem:[%s11582_s23 + $0x440] sm:$0xff] }
 0x566   : > { %v3144_v56 = vrot.slane %v2662_v20, 2  ;;  %v1534_v29 = vpop.f32.mrf.mxu1  ;;  %v4635_v37 = vpop.f32.mrf.mxu0  ;;  %v13767_v46 = vpack.c.bf16 %v11366_v6, %v11365_v8 }
 0x567   : > { %v4090_v23 = vpop.f32.mrf.mxu3  ;;  %16364 = vst [vmem:[#allocation165_spill] sm:$0xff] %v13759_v4  ;;  %v2016_v25 = vrot.slane %v1534_v29, 1  ;;  %v5116_v51 = vrot.slane %v4635_v37, 1  ;;  %v16368_v37 = vld [vmem:[#allocation172_spill] sm:$0xff] }
 0x568   : > { %v3145_v41 = vsel %vm2942_vm3, %v3142_v39, %v3144_v56  ;;  %16366 = vst [vmem:[#allocation168_spill] sm:$0xff] %v13767_v46 }
 0x569   : > { %v3448_v33 = vadd.f32 %v3145_v41, %v2318_v63  ;;  %v2017_v31 = vsel %vm1812_vm2, %v2014_v16, %v2016_v25  ;;  %v5117_v11 = vsel %vm1812_vm2, %v5114_v53, %v5116_v51  ;;  %v16369_v53 = vld [vmem:[#allocation26_spill] sm:$0xff] }
 0x56a   : > { %v2319_v7 = vadd.f32 %v2017_v31, %v16368_v37 }
 0x56b   : > { %v4289_v30 = vadd.f32 %v4087_v5, %v3448_v33 }
 0x56d   : > { %v2664_v40 = vpop.f32.mrf.mxu2  ;;  %v13769_v20 = vadd.f32 %v5115_v1, %v4289_v30  ;;  %v16371_v30 = vld [vmem:[#allocation175_spill] sm:$0xff] }
 0x56e   : > { %v3146_v4 = vrot.slane %v2664_v40, 2  ;;  %v1537_v27 = vpop.f32.mrf.mxu1  ;;  %v4638_v29 = vpop.f32.mrf.mxu0 }
 0x56f   : > { %v4092_v57 = vpop.f32.mrf.mxu3  ;;  %16367 = vst [vmem:[#allocation236_spill] sm:$0xff] %v13769_v20  ;;  %v2018_v39 = vrot.slane %v1537_v27, 1  ;;  %v5118_v63 = vrot.slane %v4638_v29, 1 }
 0x570   : > { %v3147_v16 = vsel %vm2942_vm3, %v3144_v56, %v3146_v4 }
 0x571   : > { %v3449_v41 = vadd.f32 %v3147_v16, %v2319_v7  ;;  %v2019_v33 = vsel %vm1812_vm2, %v2016_v25, %v2018_v39  ;;  %v5119_v5 = vsel %vm1812_vm2, %v5116_v51, %v5118_v63  ;;  %10566 = vmatmul.msk.bf16.gmra.mxu1 %vm477_vm1, %v16369_v53  ;;  %10827 = vmatmul.msk.bf16.gmra.mxu0 %vm477_vm1, %v13767_v46  ;;  %v11367_v63 = vld [vmem:[%s11582_s23 + $0x448] sm:$0xff]  ;;  %v11368_v16 = vld [vmem:[%s11582_s23 + $0x450] sm:$0xff] }
 0x572   : > { %10653 = vmatmul.msk.bf16.gmra.mxu2 %vm477_vm1, %v16369_v53  ;;  %v2320_v6 = vadd.f32 %v2019_v33, %v16371_v30  ;;  %v13789_v20 = vpack.c.bf16 %v11368_v16, %v11367_v63 }
 0x573   : > { %v4290_v31 = vadd.f32 %v4090_v23, %v3449_v41 }
 0x574   : > { %10740 = vmatmul.msk.bf16.gmra.mxu3 %vm477_vm1, %v13767_v46  ;;  %16372 = vst [vmem:[#allocation175_spill] sm:$0xff] %v13789_v20 }
 0x575   : > { %v2667_v8 = vpop.f32.mrf.mxu2  ;;  %v13783_v1 = vadd.f32 %v5117_v11, %v4290_v31 }
 0x576   : > { %v3148_v56 = vrot.slane %v2667_v8, 2  ;;  %v1539_v25 = vpop.f32.mrf.mxu1  ;;  %v4640_v51 = vpop.f32.mrf.mxu0 }
 0x577   : > { %v4095_v40 = vpop.f32.mrf.mxu3  ;;  %16370 = vst [vmem:[#allocation172_spill] sm:$0xff] %v13783_v1  ;;  %v2020_v31 = vrot.slane %v1539_v25, 1  ;;  %v5120_v8 = vrot.slane %v4640_v51, 1  ;;  %v11369_v1 = vld [vmem:[%s11582_s23 + $0x458] sm:$0xff] }
 0x578   : > { %v3149_v27 = vsel %vm2942_vm3, %v3146_v4, %v3148_v56  ;;  %v16374_v56 = vld [vmem:[#allocation30_spill] sm:$0xff] }
 0x579   : > { %v3450_v29 = vadd.f32 %v3149_v27, %v2320_v6  ;;  %v16375_v27 = vld [vmem:[#allocation179_spill] sm:$0xff] }
 0x57b   : > { %v4291_v37 = vadd.f32 %v4092_v57, %v3450_v29 }
 0x57d   : > { %v2669_v7 = vpop.f32.mrf.mxu2  ;;  %v13791_v23 = vadd.f32 %v5119_v5, %v4291_v37 }
 0x57e   : > { %v1542_v41 = vpop.f32.mrf.mxu1  ;;  %v4643_v11 = vpop.f32.mrf.mxu0  ;;  %v3150_v25 = vrot.slane %v2669_v7, 2 }
 0x57f   : > { %v4096_v39 = vpop.f32.mrf.mxu3  ;;  %16373 = vst [vmem:[#allocation237_spill] sm:$0xff] %v13791_v23  ;;  %v2021_v40 = vrot.slane %v1542_v41, 1  ;;  %v5121_v46 = vrot.slane %v4643_v11, 1 }
 0x581   : > { %v2022_v33 = vsel %vm1812_vm2, %v2020_v31, %v2021_v40  ;;  %v5122_v4 = vsel %vm1812_vm2, %v5120_v8, %v5121_v46  ;;  %10567 = vmatmul.msk.bf16.gmra.mxu1 %vm477_vm1, %v16374_v56  ;;  %10828 = vmatmul.msk.bf16.gmra.mxu0 %vm477_vm1, %v13789_v20 }
 0x582   : > { %10654 = vmatmul.msk.bf16.gmra.mxu2 %vm477_vm1, %v16374_v56  ;;  %v2321_v29 = vadd.f32 %v2022_v33, %v16375_v27  ;;  %v11370_v56 = vld [vmem:[%s11582_s23 + $0x460] sm:$0xff] }
 0x583   : > { %v13809_v7 = vpack.c.bf16 %v11370_v56, %v11369_v1 }
 0x584   : > { %10741 = vmatmul.msk.bf16.gmra.mxu3 %vm477_vm1, %v13789_v20 }
 0x585   : > { %v2672_v57 = vpop.f32.mrf.mxu2  ;;  %16376 = vst [vmem:[#allocation179_spill] sm:$0xff] %v13809_v7 }
 0x586   : > { %v3151_v51 = vrot.slane %v2672_v57, 2  ;;  %v1544_v30 = vpop.f32.mrf.mxu1  ;;  %v4645_v6 = vpop.f32.mrf.mxu0 }
 0x587   : > { %v4099_v5 = vpop.f32.mrf.mxu3  ;;  %v2023_v37 = vrot.slane %v1544_v30, 1  ;;  %v5123_v63 = vrot.slane %v4645_v6, 1  ;;  %v16378_v6 = vld [vmem:[#allocation183_spill] sm:$0xff] }
 0x588   : > { %v3152_v16 = vsel %vm2942_vm3, %v3150_v25, %v3151_v51 }
 0x589   : > { %v3451_v41 = vadd.f32 %v3152_v16, %v2321_v29  ;;  %v2024_v11 = vsel %vm1812_vm2, %v2021_v40, %v2023_v37  ;;  %v5124_v31 = vsel %vm1812_vm2, %v5121_v46, %v5123_v63 }
 0x58a   : > { %v2322_v27 = vadd.f32 %v2024_v11, %v16378_v6  ;;  %v16381_v11 = vld [vmem:[#allocation186_spill] sm:$0xff] }
 0x58b   : > { %v4292_v8 = vadd.f32 %v4096_v39, %v3451_v41  ;;  %v16379_v41 = vld [vmem:[#allocation34_spill] sm:$0xff] }
 0x58d   : > { %v2674_v20 = vpop.f32.mrf.mxu2  ;;  %v13811_v57 = vadd.f32 %v5122_v4, %v4292_v8 }
 0x58e   : > { %v3153_v53 = vrot.slane %v2674_v20, 2  ;;  %v1547_v33 = vpop.f32.mrf.mxu1  ;;  %v4648_v30 = vpop.f32.mrf.mxu0 }
 0x58f   : > { %v4101_v23 = vpop.f32.mrf.mxu3  ;;  %16377 = vst [vmem:[#allocation238_spill] sm:$0xff] %v13811_v57  ;;  %v2025_v25 = vrot.slane %v1547_v33, 1  ;;  %v5125_v29 = vrot.slane %v4648_v30, 1 }
 0x590   : > { %v3154_v40 = vsel %vm2942_vm3, %v3151_v51, %v3153_v53 }
 0x591   : > { %v3452_v16 = vadd.f32 %v3154_v40, %v2322_v27  ;;  %v2026_v46 = vsel %vm1812_vm2, %v2023_v37, %v2025_v25  ;;  %v5126_v39 = vsel %vm1812_vm2, %v5123_v63, %v5125_v29  ;;  %10568 = vmatmul.msk.bf16.gmra.mxu1 %vm477_vm1, %v16379_v41  ;;  %10829 = vmatmul.msk.bf16.gmra.mxu0 %vm477_vm1, %v13809_v7 }
 0x592   : > { %10655 = vmatmul.msk.bf16.gmra.mxu2 %vm477_vm1, %v16379_v41  ;;  %v2323_v8 = vadd.f32 %v2026_v46, %v16381_v11  ;;  %v11371_v41 = vld [vmem:[%s11582_s23 + $0x468] sm:$0xff] }
 0x593   : > { %v4293_v20 = vadd.f32 %v4099_v5, %v3452_v16 }
 0x594   : > { %10742 = vmatmul.msk.bf16.gmra.mxu3 %vm477_vm1, %v13809_v7 }
 0x595   : > { %v2677_v1 = vpop.f32.mrf.mxu2  ;;  %v13825_v56 = vadd.f32 %v5124_v31, %v4293_v20  ;;  %v11372_v31 = vld [vmem:[%s11582_s23 + $0x470] sm:$0xff] }
 0x596   : > { %v3155_v51 = vrot.slane %v2677_v1, 2  ;;  %v1549_v37 = vpop.f32.mrf.mxu1  ;;  %v4650_v63 = vpop.f32.mrf.mxu0  ;;  %v13833_v20 = vpack.c.bf16 %v11372_v31, %v11371_v41 }
 0x597   : > { %v4104_v4 = vpop.f32.mrf.mxu3  ;;  %16380 = vst [vmem:[#allocation183_spill] sm:$0xff] %v13825_v56  ;;  %v2027_v33 = vrot.slane %v1549_v37, 1  ;;  %v5127_v30 = vrot.slane %v4650_v63, 1  ;;  %v16384_v63 = vld [vmem:[#allocation190_spill] sm:$0xff] }
 0x598   : > { %v3156_v6 = vsel %vm2942_vm3, %v3153_v53, %v3155_v51  ;;  %16382 = vst [vmem:[#allocation186_spill] sm:$0xff] %v13833_v20 }
 0x599   : > { %v3453_v27 = vadd.f32 %v3156_v6, %v2323_v8  ;;  %v2028_v40 = vsel %vm1812_vm2, %v2025_v25, %v2027_v33  ;;  %v5128_v5 = vsel %vm1812_vm2, %v5125_v29, %v5127_v30  ;;  %v16385_v25 = vld [vmem:[#allocation39_spill] sm:$0xff] }
 0x59a   : > { %v2324_v11 = vadd.f32 %v2028_v40, %v16384_v63  ;;  %v11373_v63 = vld [vmem:[%s11582_s23 + $0x478] sm:$0xff] }
 0x59b   : > { %v4294_v16 = vadd.f32 %v4101_v23, %v3453_v27 }
 0x59d   : > { %v2679_v7 = vpop.f32.mrf.mxu2  ;;  %v13835_v1 = vadd.f32 %v5126_v39, %v4294_v16 }
 0x59e   : > { %v3157_v56 = vrot.slane %v2679_v7, 2  ;;  %v1552_v46 = vpop.f32.mrf.mxu1  ;;  %v4653_v37 = vpop.f32.mrf.mxu0 }
 0x59f   : > { %v4106_v57 = vpop.f32.mrf.mxu3  ;;  %16383 = vst [vmem:[#allocation239_spill] sm:$0xff] %v13835_v1  ;;  %v5129_v7 = vrot.slane %v4653_v37, 1 }
 0x5a0   : > { %v3158_v53 = vsel %vm2942_vm3, %v3155_v51, %v3157_v56  ;;  %v2029_v51 = vrot.slane %v1552_v46, 1 }
 0x5a1   : > { %v3454_v8 = vadd.f32 %v3158_v53, %v2324_v11  ;;  %10569 = vmatmul.msk.bf16.gmra.mxu1 %vm477_vm1, %v16385_v25  ;;  %10830 = vmatmul.msk.bf16.gmra.mxu0 %vm477_vm1, %v13833_v20 }
 0x5a2   : > { %10656 = vmatmul.msk.bf16.gmra.mxu2 %vm477_vm1, %v16385_v25  ;;  %v11375_v25 = vld [vmem:[%s11582_s23 + $0x488] sm:$0xff] }
 0x5a3   : > { %v4295_v23 = vadd.f32 %v4104_v4, %v3454_v8  ;;  %v11374_v4 = vld [vmem:[%s11582_s23 + $0x480] sm:$0xff] }
 0x5a4   : > { %10743 = vmatmul.msk.bf16.gmra.mxu3 %vm477_vm1, %v13833_v20  ;;  %v13853_v11 = vpack.c.bf16 %v11374_v4, %v11373_v63  ;;  %v16388_v8 = vld [vmem:[#allocation41_spill] sm:$0xff] }
 0x5a5   : > { %v2682_v57 = vpop.f32.mrf.mxu2  ;;  %v13847_v39 = vadd.f32 %v5128_v5, %v4295_v23 }
 0x5a6   : > { %v1554_v41 = vpop.f32.mrf.mxu1  ;;  %v4655_v56 = vpop.f32.mrf.mxu0  ;;  %v3159_v40 = vrot.slane %v2682_v57, 2  ;;  %16387 = vst [vmem:[#allocation240_spill] sm:$0xff] %v13853_v11  ;;  %v16389_v57 = vld [vmem:[#allocation49_spill] sm:$0xff] }
 0x5a7   : > { %v4108_v29 = vpop.f32.mrf.mxu3  ;;  %16386 = vst [vmem:[#allocation190_spill] sm:$0xff] %v13847_v39  ;;  %v2030_v33 = vrot.slane %v1554_v41, 1  ;;  %v5130_v30 = vrot.slane %v4655_v56, 1 }
 0x5a9   : > { %v2031_v6 = vsel %vm1812_vm2, %v2029_v51, %v2030_v33  ;;  %v5131_v27 = vsel %vm1812_vm2, %v5129_v7, %v5130_v30 }
 0x5aa   : > { %v2325_v23 = vadd.f32 %v2031_v6, %v16388_v8 }
 0x5ad   : > { %v2684_v16 = vpop.f32.mrf.mxu2 }
 0x5ae   : > { %v3160_v37 = vrot.slane %v2684_v16, 2  ;;  %v1557_v53 = vpop.f32.mrf.mxu1  ;;  %v4658_v5 = vpop.f32.mrf.mxu0 }
 0x5af   : > { %v4110_v31 = vpop.f32.mrf.mxu3  ;;  %v2032_v20 = vrot.slane %v1557_v53, 1  ;;  %v5132_v46 = vrot.slane %v4658_v5, 1  ;;  %v16391_v53 = vld [vmem:[#allocation44_spill] sm:$0xff] }
 0x5b0   : > { %v3161_v41 = vsel %vm2942_vm3, %v3159_v40, %v3160_v37 }
 0x5b1   : > { %v3455_v56 = vadd.f32 %v3161_v41, %v2325_v23  ;;  %v2033_v51 = vsel %vm1812_vm2, %v2030_v33, %v2032_v20  ;;  %v5133_v7 = vsel %vm1812_vm2, %v5130_v30, %v5132_v46  ;;  %10570 = vmatmul.msk.bf16.gmra.mxu1 %vm477_vm1, %v16389_v57  ;;  %10831 = vmatmul.msk.bf16.gmra.mxu0 %vm477_vm1, %v13853_v11 }
 0x5b2   : > { %10657 = vmatmul.msk.bf16.gmra.mxu2 %vm477_vm1, %v16389_v57  ;;  %v2326_v5 = vadd.f32 %v2033_v51, %v16391_v53 }
 0x5b3   : > { %v4296_v6 = vadd.f32 %v4108_v29, %v3455_v56 }
 0x5b4   : > { %10744 = vmatmul.msk.bf16.gmra.mxu3 %vm477_vm1, %v13853_v11 }
 0x5b5   : > { %v2687_v16 = vpop.f32.mrf.mxu2  ;;  %v13867_v33 = vadd.f32 %v5131_v27, %v4296_v6  ;;  %v11376_v27 = vld [vmem:[%s11582_s23 + $0x490] sm:$0xff] }
 0x5b6   : > { %v3162_v30 = vrot.slane %v2687_v16, 2  ;;  %v1559_v63 = vpop.f32.mrf.mxu1  ;;  %v4660_v4 = vpop.f32.mrf.mxu0  ;;  %v13875_v6 = vpack.c.bf16 %v11376_v27, %v11375_v25 }
 0x5b7   : > { %v4113_v40 = vpop.f32.mrf.mxu3  ;;  %16390 = vst [vmem:[#allocation41_spill] sm:$0xff] %v13867_v33  ;;  %v2034_v8 = vrot.slane %v1559_v63, 1  ;;  %v5134_v23 = vrot.slane %v4660_v4, 1  ;;  %v16394_v4 = vld [vmem:[#allocation51_spill] sm:$0xff] }
 0x5b8   : > { %v3163_v41 = vsel %vm2942_vm3, %v3160_v37, %v3162_v30  ;;  %16392 = vst [vmem:[#allocation44_spill] sm:$0xff] %v13875_v6 }
 0x5b9   : > { %v3456_v39 = vadd.f32 %v3163_v41, %v2326_v5  ;;  %v2035_v1 = vsel %vm1812_vm2, %v2032_v20, %v2034_v8  ;;  %v5135_v29 = vsel %vm1812_vm2, %v5132_v46, %v5134_v23  ;;  %v16395_v46 = vld [vmem:[#allocation57_spill] sm:$0xff] }
 0x5ba   : > { %v2327_v53 = vadd.f32 %v2035_v1, %v16394_v4 }
 0x5bb   : > { %v4297_v56 = vadd.f32 %v4110_v31, %v3456_v39 }
 0x5bd   : > { %v2689_v11 = vpop.f32.mrf.mxu2  ;;  %v13877_v16 = vadd.f32 %v5133_v7, %v4297_v56  ;;  %v16397_v56 = vld [vmem:[#allocation54_spill] sm:$0xff] }
 0x5be   : > { %v3164_v33 = vrot.slane %v2689_v11, 2  ;;  %v1562_v51 = vpop.f32.mrf.mxu1  ;;  %v4663_v63 = vpop.f32.mrf.mxu0 }
 0x5bf   : > { %v4115_v57 = vpop.f32.mrf.mxu3  ;;  %16393 = vst [vmem:[#allocation241_spill] sm:$0xff] %v13877_v16  ;;  %v2036_v37 = vrot.slane %v1562_v51, 1  ;;  %v5136_v5 = vrot.slane %v4663_v63, 1 }
 0x5c0   : > { %v3165_v20 = vsel %vm2942_vm3, %v3162_v30, %v3164_v33 }
 0x5c1   : > { %v3457_v41 = vadd.f32 %v3165_v20, %v2327_v53  ;;  %v2037_v39 = vsel %vm1812_vm2, %v2034_v8, %v2036_v37  ;;  %v5137_v31 = vsel %vm1812_vm2, %v5134_v23, %v5136_v5  ;;  %10571 = vmatmul.msk.bf16.gmra.mxu1 %vm477_vm1, %v16395_v46  ;;  %10832 = vmatmul.msk.bf16.gmra.mxu0 %vm477_vm1, %v13875_v6  ;;  %v11377_v5 = vld [vmem:[%s11582_s23 + $0x498] sm:$0xff]  ;;  %v11378_v20 = vld [vmem:[%s11582_s23 + $0x4a0] sm:$0xff] }
 0x5c2   : > { %10658 = vmatmul.msk.bf16.gmra.mxu2 %vm477_vm1, %v16395_v46  ;;  %v2328_v27 = vadd.f32 %v2037_v39, %v16397_v56  ;;  %v13897_v16 = vpack.c.bf16 %v11378_v20, %v11377_v5 }
 0x5c3   : > { %v4298_v1 = vadd.f32 %v4113_v40, %v3457_v41 }
 0x5c4   : > { %10745 = vmatmul.msk.bf16.gmra.mxu3 %vm477_vm1, %v13875_v6  ;;  %16398 = vst [vmem:[#allocation54_spill] sm:$0xff] %v13897_v16 }
 0x5c5   : > { %v2692_v25 = vpop.f32.mrf.mxu2  ;;  %v13891_v7 = vadd.f32 %v5135_v29, %v4298_v1 }
 0x5c6   : > { %v3166_v30 = vrot.slane %v2692_v25, 2  ;;  %v1564_v8 = vpop.f32.mrf.mxu1  ;;  %v4665_v23 = vpop.f32.mrf.mxu0 }
 0x5c7   : > { %v4118_v11 = vpop.f32.mrf.mxu3  ;;  %16396 = vst [vmem:[#allocation51_spill] sm:$0xff] %v13891_v7  ;;  %v2038_v1 = vrot.slane %v1564_v8, 1  ;;  %v5138_v25 = vrot.slane %v4665_v23, 1  ;;  %v11379_v7 = vld [vmem:[%s11582_s23 + $0x4a8] sm:$0xff] }
 0x5c8   : > { %v3167_v51 = vsel %vm2942_vm3, %v3164_v33, %v3166_v30  ;;  %v16400_v30 = vld [vmem:[#allocation64_spill] sm:$0xff] }
 0x5c9   : > { %v3458_v63 = vadd.f32 %v3167_v51, %v2328_v27  ;;  %v16401_v51 = vld [vmem:[#allocation60_spill] sm:$0xff] }
 0x5cb   : > { %v4299_v4 = vadd.f32 %v4115_v57, %v3458_v63 }
 0x5cd   : > { %v2694_v53 = vpop.f32.mrf.mxu2  ;;  %v13899_v40 = vadd.f32 %v5137_v31, %v4299_v4 }
 0x5ce   : > { %v1567_v41 = vpop.f32.mrf.mxu1  ;;  %v4668_v29 = vpop.f32.mrf.mxu0  ;;  %v3168_v8 = vrot.slane %v2694_v53, 2 }
 0x5cf   : > { %v4119_v37 = vpop.f32.mrf.mxu3  ;;  %16399 = vst [vmem:[#allocation242_spill] sm:$0xff] %v13899_v40  ;;  %v2039_v11 = vrot.slane %v1567_v41, 1  ;;  %v5139_v6 = vrot.slane %v4668_v29, 1 }
 0x5d1   : > { %v2040_v39 = vsel %vm1812_vm2, %v2038_v1, %v2039_v11  ;;  %v5140_v33 = vsel %vm1812_vm2, %v5138_v25, %v5139_v6  ;;  %10572 = vmatmul.msk.bf16.gmra.mxu1 %vm477_vm1, %v16400_v30  ;;  %10833 = vmatmul.msk.bf16.gmra.mxu0 %vm477_vm1, %v13897_v16 }
 0x5d2   : > { %10659 = vmatmul.msk.bf16.gmra.mxu2 %vm477_vm1, %v16400_v30  ;;  %v2329_v63 = vadd.f32 %v2040_v39, %v16401_v51  ;;  %v11380_v30 = vld [vmem:[%s11582_s23 + $0x4b0] sm:$0xff] }
 0x5d3   : > { %v13917_v53 = vpack.c.bf16 %v11380_v30, %v11379_v7 }
 0x5d4   : > { %10746 = vmatmul.msk.bf16.gmra.mxu3 %vm477_vm1, %v13897_v16 }
 0x5d5   : > { %v2697_v57 = vpop.f32.mrf.mxu2  ;;  %16402 = vst [vmem:[#allocation60_spill] sm:$0xff] %v13917_v53 }
 0x5d6   : > { %v3169_v23 = vrot.slane %v2697_v57, 2  ;;  %v1569_v56 = vpop.f32.mrf.mxu1  ;;  %v4670_v27 = vpop.f32.mrf.mxu0 }
 0x5d7   : > { %v4122_v31 = vpop.f32.mrf.mxu3  ;;  %v2041_v4 = vrot.slane %v1569_v56, 1  ;;  %v5141_v5 = vrot.slane %v4670_v27, 1  ;;  %v16404_v27 = vld [vmem:[#allocation66_spill] sm:$0xff] }
 0x5d8   : > { %v3170_v20 = vsel %vm2942_vm3, %v3168_v8, %v3169_v23 }
 0x5d9   : > { %v3459_v41 = vadd.f32 %v3170_v20, %v2329_v63  ;;  %v2042_v29 = vsel %vm1812_vm2, %v2039_v11, %v2041_v4  ;;  %v5142_v1 = vsel %vm1812_vm2, %v5139_v6, %v5141_v5 }
 0x5da   : > { %v2330_v51 = vadd.f32 %v2042_v29, %v16404_v27  ;;  %v16407_v29 = vld [vmem:[#allocation69_spill] sm:$0xff] }
 0x5db   : > { %v4300_v25 = vadd.f32 %v4119_v37, %v3459_v41  ;;  %v16405_v41 = vld [vmem:[#allocation74_spill] sm:$0xff] }
 0x5dd   : > { %v2699_v16 = vpop.f32.mrf.mxu2  ;;  %v13919_v57 = vadd.f32 %v5140_v33, %v4300_v25 }
 0x5de   : > { %v3171_v46 = vrot.slane %v2699_v16, 2  ;;  %v1572_v39 = vpop.f32.mrf.mxu1  ;;  %v4673_v56 = vpop.f32.mrf.mxu0 }
 0x5df   : > { %v4124_v40 = vpop.f32.mrf.mxu3  ;;  %16403 = vst [vmem:[#allocation243_spill] sm:$0xff] %v13919_v57  ;;  %v2043_v8 = vrot.slane %v1572_v39, 1  ;;  %v5143_v63 = vrot.slane %v4673_v56, 1 }
 0x5e0   : > { %v3172_v11 = vsel %vm2942_vm3, %v3169_v23, %v3171_v46 }
 0x5e1   : > { %v3460_v20 = vadd.f32 %v3172_v11, %v2330_v51  ;;  %v2044_v6 = vsel %vm1812_vm2, %v2041_v4, %v2043_v8  ;;  %v5144_v37 = vsel %vm1812_vm2, %v5141_v5, %v5143_v63  ;;  %10573 = vmatmul.msk.bf16.gmra.mxu1 %vm477_vm1, %v16405_v41  ;;  %10834 = vmatmul.msk.bf16.gmra.mxu0 %vm477_vm1, %v13917_v53 }
 0x5e2   : > { %10660 = vmatmul.msk.bf16.gmra.mxu2 %vm477_vm1, %v16405_v41  ;;  %v2331_v25 = vadd.f32 %v2044_v6, %v16407_v29  ;;  %v11381_v41 = vld [vmem:[%s11582_s23 + $0x4b8] sm:$0xff] }
 0x5e3   : > { %v4301_v16 = vadd.f32 %v4122_v31, %v3460_v20 }
 0x5e4   : > { %10747 = vmatmul.msk.bf16.gmra.mxu3 %vm477_vm1, %v13917_v53 }
 0x5e5   : > { %v2702_v7 = vpop.f32.mrf.mxu2  ;;  %v13933_v30 = vadd.f32 %v5142_v1, %v4301_v16  ;;  %v11382_v1 = vld [vmem:[%s11582_s23 + $0x4c0] sm:$0xff] }
 0x5e6   : > { %v3173_v23 = vrot.slane %v2702_v7, 2  ;;  %v1574_v4 = vpop.f32.mrf.mxu1  ;;  %v4675_v5 = vpop.f32.mrf.mxu0  ;;  %v13941_v16 = vpack.c.bf16 %v11382_v1, %v11381_v41 }
 0x5e7   : > { %v4127_v33 = vpop.f32.mrf.mxu3  ;;  %16406 = vst [vmem:[#allocation66_spill] sm:$0xff] %v13933_v30  ;;  %v2045_v39 = vrot.slane %v1574_v4, 1  ;;  %v5145_v56 = vrot.slane %v4675_v5, 1  ;;  %v16410_v5 = vld [vmem:[#allocation76_spill] sm:$0xff] }
 0x5e8   : > { %v3174_v27 = vsel %vm2942_vm3, %v3171_v46, %v3173_v23  ;;  %16408 = vst [vmem:[#allocation69_spill] sm:$0xff] %v13941_v16 }
 0x5e9   : > { %v3461_v51 = vadd.f32 %v3174_v27, %v2331_v25  ;;  %v2046_v11 = vsel %vm1812_vm2, %v2043_v8, %v2045_v39  ;;  %v5146_v31 = vsel %vm1812_vm2, %v5143_v63, %v5145_v56  ;;  %v16411_v8 = vld [vmem:[#allocation82_spill] sm:$0xff] }
 0x5ea   : > { %v2332_v29 = vadd.f32 %v2046_v11, %v16410_v5  ;;  %v11383_v5 = vld [vmem:[%s11582_s23 + $0x4c8] sm:$0xff] }
 0x5eb   : > { %v4302_v20 = vadd.f32 %v4124_v40, %v3461_v51 }
 0x5ed   : > { %v2704_v53 = vpop.f32.mrf.mxu2  ;;  %v13943_v7 = vadd.f32 %v5144_v37, %v4302_v20 }
 0x5ee   : > { %v3175_v30 = vrot.slane %v2704_v53, 2  ;;  %v1577_v6 = vpop.f32.mrf.mxu1  ;;  %v4678_v4 = vpop.f32.mrf.mxu0 }
 0x5ef   : > { %v4129_v57 = vpop.f32.mrf.mxu3  ;;  %16409 = vst [vmem:[#allocation244_spill] sm:$0xff] %v13943_v7  ;;  %v5147_v53 = vrot.slane %v4678_v4, 1 }
 0x5f0   : > { %v3176_v46 = vsel %vm2942_vm3, %v3173_v23, %v3175_v30  ;;  %v2047_v23 = vrot.slane %v1577_v6, 1 }
 0x5f1   : > { %v3462_v25 = vadd.f32 %v3176_v46, %v2332_v29  ;;  %10574 = vmatmul.msk.bf16.gmra.mxu1 %vm477_vm1, %v16411_v8  ;;  %10835 = vmatmul.msk.bf16.gmra.mxu0 %vm477_vm1, %v13941_v16 }
 0x5f2   : > { %10661 = vmatmul.msk.bf16.gmra.mxu2 %vm477_vm1, %v16411_v8  ;;  %v11385_v8 = vld [vmem:[%s11582_s23 + $0x4d8] sm:$0xff] }
 0x5f3   : > { %v4303_v40 = vadd.f32 %v4127_v33, %v3462_v25  ;;  %v11384_v33 = vld [vmem:[%s11582_s23 + $0x4d0] sm:$0xff]  ;;  %v16414_v25 = vld [vmem:[#allocation84_spill] sm:$0xff] }
 0x5f4   : > { %10748 = vmatmul.msk.bf16.gmra.mxu3 %vm477_vm1, %v13941_v16  ;;  %v13961_v29 = vpack.c.bf16 %v11384_v33, %v11383_v5 }
 0x5f5   : > { %v2707_v57 = vpop.f32.mrf.mxu2  ;;  %v13955_v37 = vadd.f32 %v5146_v31, %v4303_v40 }
 0x5f6   : > { %v1579_v41 = vpop.f32.mrf.mxu1  ;;  %v4680_v30 = vpop.f32.mrf.mxu0  ;;  %v3177_v11 = vrot.slane %v2707_v57, 2  ;;  %16413 = vst [vmem:[#allocation245_spill] sm:$0xff] %v13961_v29  ;;  %v16415_v57 = vld [vmem:[#allocation94_spill] sm:$0xff] }
 0x5f7   : > { %v4131_v63 = vpop.f32.mrf.mxu3  ;;  %16412 = vst [vmem:[#allocation76_spill] sm:$0xff] %v13955_v37  ;;  %v2048_v39 = vrot.slane %v1579_v41, 1  ;;  %v5148_v56 = vrot.slane %v4680_v30, 1 }
 0x5f9   : > { %v2049_v27 = vsel %vm1812_vm2, %v2047_v23, %v2048_v39  ;;  %v5149_v51 = vsel %vm1812_vm2, %v5147_v53, %v5148_v56 }
 0x5fa   : > { %v2333_v40 = vadd.f32 %v2049_v27, %v16414_v25 }
 0x5fd   : > { %v2709_v20 = vpop.f32.mrf.mxu2 }
 0x5fe   : > { %v3178_v4 = vrot.slane %v2709_v20, 2  ;;  %v1582_v46 = vpop.f32.mrf.mxu1  ;;  %v4683_v31 = vpop.f32.mrf.mxu0 }
 0x5ff   : > { %v4133_v1 = vpop.f32.mrf.mxu3  ;;  %v2050_v16 = vrot.slane %v1582_v46, 1  ;;  %v5150_v6 = vrot.slane %v4683_v31, 1  ;;  %v16417_v46 = vld [vmem:[#allocation88_spill] sm:$0xff] }
 0x600   : > { %v3179_v41 = vsel %vm2942_vm3, %v3177_v11, %v3178_v4 }
 0x601   : > { %v3463_v30 = vadd.f32 %v3179_v41, %v2333_v40  ;;  %v2051_v23 = vsel %vm1812_vm2, %v2048_v39, %v2050_v16  ;;  %v5151_v53 = vsel %vm1812_vm2, %v5148_v56, %v5150_v6  ;;  %10575 = vmatmul.msk.bf16.gmra.mxu1 %vm477_vm1, %v16415_v57  ;;  %10836 = vmatmul.msk.bf16.gmra.mxu0 %vm477_vm1, %v13961_v29 }
 0x602   : > { %10662 = vmatmul.msk.bf16.gmra.mxu2 %vm477_vm1, %v16415_v57  ;;  %v2334_v31 = vadd.f32 %v2051_v23, %v16417_v46 }
 0x603   : > { %v4304_v27 = vadd.f32 %v4131_v63, %v3463_v30 }
 0x604   : > { %10749 = vmatmul.msk.bf16.gmra.mxu3 %vm477_vm1, %v13961_v29 }
 0x605   : > { %v2712_v20 = vpop.f32.mrf.mxu2  ;;  %v13975_v39 = vadd.f32 %v5149_v51, %v4304_v27  ;;  %v11386_v51 = vld [vmem:[%s11582_s23 + $0x4e0] sm:$0xff] }
 0x606   : > { %v3180_v56 = vrot.slane %v2712_v20, 2  ;;  %v1584_v5 = vpop.f32.mrf.mxu1  ;;  %v4685_v33 = vpop.f32.mrf.mxu0  ;;  %v13983_v27 = vpack.c.bf16 %v11386_v51, %v11385_v8 }
 0x607   : > { %v4136_v11 = vpop.f32.mrf.mxu3  ;;  %16416 = vst [vmem:[#allocation84_spill] sm:$0xff] %v13975_v39  ;;  %v2052_v25 = vrot.slane %v1584_v5, 1  ;;  %v5152_v40 = vrot.slane %v4685_v33, 1  ;;  %v16420_v33 = vld [vmem:[#allocation96_spill] sm:$0xff] }
 0x608   : > { %v3181_v41 = vsel %vm2942_vm3, %v3178_v4, %v3180_v56  ;;  %16418 = vst [vmem:[#allocation88_spill] sm:$0xff] %v13983_v27 }
 0x609   : > { %v3464_v37 = vadd.f32 %v3181_v41, %v2334_v31  ;;  %v2053_v7 = vsel %vm1812_vm2, %v2050_v16, %v2052_v25  ;;  %v5153_v63 = vsel %vm1812_vm2, %v5150_v6, %v5152_v40  ;;  %v16421_v6 = vld [vmem:[#allocation104_spill] sm:$0xff] }
 0x60a   : > { %v2335_v46 = vadd.f32 %v2053_v7, %v16420_v33 }
 0x60b   : > { %v4305_v30 = vadd.f32 %v4133_v1, %v3464_v37 }
 0x60d   : > { %v2714_v29 = vpop.f32.mrf.mxu2  ;;  %v13985_v20 = vadd.f32 %v5151_v53, %v4305_v30  ;;  %v16423_v30 = vld [vmem:[#allocation100_spill] sm:$0xff] }
 0x60e   : > { %v3182_v39 = vrot.slane %v2714_v29, 2  ;;  %v1587_v23 = vpop.f32.mrf.mxu1  ;;  %v4688_v5 = vpop.f32.mrf.mxu0 }
 0x60f   : > { %v4138_v57 = vpop.f32.mrf.mxu3  ;;  %16419 = vst [vmem:[#allocation246_spill] sm:$0xff] %v13985_v20  ;;  %v2054_v4 = vrot.slane %v1587_v23, 1  ;;  %v5154_v31 = vrot.slane %v4688_v5, 1 }
 0x610   : > { %v3183_v16 = vsel %vm2942_vm3, %v3180_v56, %v3182_v39 }
 0x611   : > { %v3465_v41 = vadd.f32 %v3183_v16, %v2335_v46  ;;  %v2055_v37 = vsel %vm1812_vm2, %v2052_v25, %v2054_v4  ;;  %v5155_v1 = vsel %vm1812_vm2, %v5152_v40, %v5154_v31  ;;  %10576 = vmatmul.msk.bf16.gmra.mxu1 %vm477_vm1, %v16421_v6  ;;  %10837 = vmatmul.msk.bf16.gmra.mxu0 %vm477_vm1, %v13983_v27  ;;  %v11387_v31 = vld [vmem:[%s11582_s23 + $0x4e8] sm:$0xff]  ;;  %v11388_v16 = vld [vmem:[%s11582_s23 + $0x4f0] sm:$0xff] }
 0x612   : > { %10663 = vmatmul.msk.bf16.gmra.mxu2 %vm477_vm1, %v16421_v6  ;;  %v2336_v51 = vadd.f32 %v2055_v37, %v16423_v30  ;;  %v14005_v20 = vpack.c.bf16 %v11388_v16, %v11387_v31 }
 0x613   : > { %v4306_v7 = vadd.f32 %v4136_v11, %v3465_v41 }
 0x614   : > { %10750 = vmatmul.msk.bf16.gmra.mxu3 %vm477_vm1, %v13983_v27  ;;  %16424 = vst [vmem:[#allocation100_spill] sm:$0xff] %v14005_v20 }
 0x615   : > { %v2717_v8 = vpop.f32.mrf.mxu2  ;;  %v13999_v53 = vadd.f32 %v5153_v63, %v4306_v7 }
 0x616   : > { %v3184_v56 = vrot.slane %v2717_v8, 2  ;;  %v1589_v25 = vpop.f32.mrf.mxu1  ;;  %v4690_v40 = vpop.f32.mrf.mxu0 }
 0x617   : > { %v4141_v29 = vpop.f32.mrf.mxu3  ;;  %16422 = vst [vmem:[#allocation96_spill] sm:$0xff] %v13999_v53  ;;  %v2056_v7 = vrot.slane %v1589_v25, 1  ;;  %v5156_v8 = vrot.slane %v4690_v40, 1 }
 0x618   : > { %v3185_v23 = vsel %vm2942_vm3, %v3182_v39, %v3184_v56  ;;  %v16426_v56 = vld [vmem:[#allocation115_spill] sm:$0xff] }
 0x619   : > { %v3466_v5 = vadd.f32 %v3185_v23, %v2336_v51  ;;  %v16427_v23 = vld [vmem:[#allocation109_spill] sm:$0xff] }
 0x61b   : > { %v4307_v33 = vadd.f32 %v4138_v57, %v3466_v5 }
 0x61d   : > { %v2719_v46 = vpop.f32.mrf.mxu2  ;;  %v14007_v11 = vadd.f32 %v5155_v1, %v4307_v33 }
 0x61e   : > { %v1592_v41 = vpop.f32.mrf.mxu1  ;;  %v4693_v63 = vpop.f32.mrf.mxu0  ;;  %v3186_v25 = vrot.slane %v2719_v46, 2 }
 0x61f   : > { %v4142_v4 = vpop.f32.mrf.mxu3  ;;  %16425 = vst [vmem:[#allocation247_spill] sm:$0xff] %v14007_v11  ;;  %v2057_v29 = vrot.slane %v1592_v41, 1  ;;  %v5157_v27 = vrot.slane %v4693_v63, 1 }
 0x621   : > { %v2058_v37 = vsel %vm1812_vm2, %v2056_v7, %v2057_v29  ;;  %v5158_v39 = vsel %vm1812_vm2, %v5156_v8, %v5157_v27  ;;  %10577 = vmatmul.msk.bf16.gmra.mxu1 %vm477_vm1, %v16426_v56  ;;  %10838 = vmatmul.msk.bf16.gmra.mxu0 %vm477_vm1, %v14005_v20  ;;  %v375_v8 = vld [vmem:[%s11582_s23 + $0x500] sm:$0xff] }
 0x622   : > { %10664 = vmatmul.msk.bf16.gmra.mxu2 %vm477_vm1, %v16426_v56  ;;  %v2337_v5 = vadd.f32 %v2058_v37, %v16427_v23  ;;  %v11389_v56 = vld [vmem:[%s11582_s23 + $0x4f8] sm:$0xff] }
 0x623   : > { %v14025_v46 = vpack.c.bf16 %v375_v8, %v11389_v56 }
 0x624   : > { %10751 = vmatmul.msk.bf16.gmra.mxu3 %vm477_vm1, %v14005_v20 }
 0x625   : > { %v2722_v57 = vpop.f32.mrf.mxu2  ;;  %16428 = vst [vmem:[#allocation109_spill] sm:$0xff] %v14025_v46 }
 0x626   : > { %v3187_v40 = vrot.slane %v2722_v57, 2  ;;  %v1594_v30 = vpop.f32.mrf.mxu1  ;;  %v4695_v51 = vpop.f32.mrf.mxu0 }
 0x627   : > { %v4145_v1 = vpop.f32.mrf.mxu3  ;;  %v2059_v33 = vrot.slane %v1594_v30, 1  ;;  %v5159_v31 = vrot.slane %v4695_v51, 1  ;;  %v16430_v51 = vld [vmem:[#allocation117_spill] sm:$0xff] }
 0x628   : > { %v3188_v16 = vsel %vm2942_vm3, %v3186_v25, %v3187_v40 }
 0x629   : > { %v3467_v41 = vadd.f32 %v3188_v16, %v2337_v5  ;;  %v2060_v63 = vsel %vm1812_vm2, %v2057_v29, %v2059_v33  ;;  %v5160_v7 = vsel %vm1812_vm2, %v5157_v27, %v5159_v31 }
 0x62a   : > { %v2338_v23 = vadd.f32 %v2060_v63, %v16430_v51  ;;  %v16433_v63 = vld [vmem:[#allocation123_spill] sm:$0xff] }
 0x62b   : > { %v4308_v20 = vadd.f32 %v4142_v4, %v3467_v41  ;;  %v16431_v41 = vld [vmem:[#allocation129_spill] sm:$0xff] }
 0x62d   : > { %v2724_v11 = vpop.f32.mrf.mxu2  ;;  %v14027_v57 = vadd.f32 %v5158_v39, %v4308_v20 }
 0x62e   : > { %v3189_v6 = vrot.slane %v2724_v11, 2  ;;  %v1597_v37 = vpop.f32.mrf.mxu1  ;;  %v4698_v30 = vpop.f32.mrf.mxu0 }
 0x62f   : > { %v4147_v53 = vpop.f32.mrf.mxu3  ;;  %16429 = vst [vmem:[#allocation248_spill] sm:$0xff] %v14027_v57  ;;  %v2061_v25 = vrot.slane %v1597_v37, 1  ;;  %v5161_v5 = vrot.slane %v4698_v30, 1  ;;  %v376_v57 = vld [vmem:[%s11582_s23 + $0x508] sm:$0xff] }
 0x630   : > { %v3190_v29 = vsel %vm2942_vm3, %v3187_v40, %v3189_v6 }
 0x631   : > { %v3468_v16 = vadd.f32 %v3190_v29, %v2338_v23  ;;  %v2062_v27 = vsel %vm1812_vm2, %v2059_v33, %v2061_v25  ;;  %v5162_v4 = vsel %vm1812_vm2, %v5159_v31, %v5161_v5  ;;  %10578 = vmatmul.msk.bf16.gmra.mxu1 %vm477_vm1, %v16431_v41  ;;  %10839 = vmatmul.msk.bf16.gmra.mxu0 %vm477_vm1, %v14025_v46 }
 0x632   : > { %10665 = vmatmul.msk.bf16.gmra.mxu2 %vm477_vm1, %v16431_v41  ;;  %v2339_v8 = vadd.f32 %v2062_v27, %v16433_v63 }
 0x633   : > { %v4309_v20 = vadd.f32 %v4145_v1, %v3468_v16  ;;  %v377_v1 = vld [vmem:[%s11582_s23 + $0x510] sm:$0xff] }
 0x634   : > { %10752 = vmatmul.msk.bf16.gmra.mxu3 %vm477_vm1, %v14025_v46 }
 0x635   : > { %v2727_v11 = vpop.f32.mrf.mxu2  ;;  %v14041_v56 = vadd.f32 %v5160_v7, %v4309_v20  ;;  %v14049_v20 = vpack.c.bf16 %v377_v1, %v376_v57  ;;  %v378_v1 = vld [vmem:[%s11582_s23 + $0x518] sm:$0xff] }
 0x636   : > { %v3191_v40 = vrot.slane %v2727_v11, 2  ;;  %v1599_v33 = vpop.f32.mrf.mxu1  ;;  %v4700_v31 = vpop.f32.mrf.mxu0 }
 0x637   : > { %v4150_v39 = vpop.f32.mrf.mxu3  ;;  %16432 = vst [vmem:[#allocation117_spill] sm:$0xff] %v14041_v56  ;;  %v2063_v37 = vrot.slane %v1599_v33, 1  ;;  %v5163_v30 = vrot.slane %v4700_v31, 1  ;;  %v16436_v31 = vld [vmem:[#allocation131_spill] sm:$0xff] }
 0x638   : > { %v3192_v51 = vsel %vm2942_vm3, %v3189_v6, %v3191_v40  ;;  %16434 = vst [vmem:[#allocation123_spill] sm:$0xff] %v14049_v20 }
 0x639   : > { %v3469_v23 = vadd.f32 %v3192_v51, %v2339_v8  ;;  %v2064_v29 = vsel %vm1812_vm2, %v2061_v25, %v2063_v37  ;;  %v5164_v46 = vsel %vm1812_vm2, %v5161_v5, %v5163_v30  ;;  %v16437_v25 = vld [vmem:[#allocation139_spill] sm:$0xff] }
 0x63a   : > { %v2340_v63 = vadd.f32 %v2064_v29, %v16436_v31 }
 0x63b   : > { %v4310_v16 = vadd.f32 %v4147_v53, %v3469_v23 }
 0x63d   : > { %v2729_v41 = vpop.f32.mrf.mxu2  ;;  %v14051_v11 = vadd.f32 %v5162_v4, %v4310_v16  ;;  %v379_v16 = vld [vmem:[%s11582_s23 + $0x520] sm:$0xff] }
 0x63e   : > { %v3193_v56 = vrot.slane %v2729_v41, 2  ;;  %v1602_v27 = vpop.f32.mrf.mxu1  ;;  %v4703_v33 = vpop.f32.mrf.mxu0 }
 0x63f   : > { %v4152_v7 = vpop.f32.mrf.mxu3  ;;  %16435 = vst [vmem:[#allocation249_spill] sm:$0xff] %v14051_v11  ;;  %v5165_v57 = vrot.slane %v4703_v33, 1  ;;  %v2065_v37 = vrot.slane %v1602_v27, 1 }
 0x640   : > { %v3194_v6 = vsel %vm2942_vm3, %v3191_v40, %v3193_v56 }
 0x641   : > { %v3470_v8 = vadd.f32 %v3194_v6, %v2340_v63  ;;  %10579 = vmatmul.msk.bf16.gmra.mxu1 %vm477_vm1, %v16437_v25  ;;  %10840 = vmatmul.msk.bf16.gmra.mxu0 %vm477_vm1, %v14049_v20 }
 0x642   : > { %10666 = vmatmul.msk.bf16.gmra.mxu2 %vm477_vm1, %v16437_v25 }
 0x643   : > { %v4311_v53 = vadd.f32 %v4150_v39, %v3470_v8  ;;  %v14069_v39 = vpack.c.bf16 %v379_v16, %v378_v1  ;;  %v16440_v8 = vld [vmem:[#allocation141_spill] sm:$0xff] }
 0x644   : > { %10753 = vmatmul.msk.bf16.gmra.mxu3 %vm477_vm1, %v14049_v20 }
 0x645   : > { %v2732_v5 = vpop.f32.mrf.mxu2  ;;  %v14063_v41 = vadd.f32 %v5164_v46, %v4311_v53  ;;  %16439 = vst [vmem:[#allocation250_spill] sm:$0xff] %v14069_v39 }
 0x646   : > { %v1604_v56 = vpop.f32.mrf.mxu1  ;;  %v4705_v40 = vpop.f32.mrf.mxu0  ;;  %v3195_v7 = vrot.slane %v2732_v5, 2 }
 0x647   : > { %v4154_v4 = vpop.f32.mrf.mxu3  ;;  %16438 = vst [vmem:[#allocation131_spill] sm:$0xff] %v14063_v41  ;;  %v2066_v30 = vrot.slane %v1604_v56, 1  ;;  %v5166_v51 = vrot.slane %v4705_v40, 1  ;;  %v16441_v41 = vld [vmem:[#allocation149_spill] sm:$0xff] }
 0x649   : > { %v2067_v23 = vsel %vm1812_vm2, %v2065_v37, %v2066_v30  ;;  %v5167_v29 = vsel %vm1812_vm2, %v5165_v57, %v5166_v51 }
 0x64a   : > { %v2341_v53 = vadd.f32 %v2067_v23, %v16440_v8 }
 0x64d   : > { %v2734_v31 = vpop.f32.mrf.mxu2 }
 0x64e   : > { %v3196_v33 = vrot.slane %v2734_v31, 2  ;;  %v1607_v6 = vpop.f32.mrf.mxu1  ;;  %v4708_v46 = vpop.f32.mrf.mxu0  ;;  %v16443_v31 = vld [vmem:[#allocation145_spill] sm:$0xff] }
 0x64f   : > { %v4156_v63 = vpop.f32.mrf.mxu3  ;;  %v2068_v20 = vrot.slane %v1607_v6, 1  ;;  %v5168_v27 = vrot.slane %v4708_v46, 1 }
 0x650   : > { %v3197_v56 = vsel %vm2942_vm3, %v3195_v7, %v3196_v33 }
 0x651   : > { %v3471_v40 = vadd.f32 %v3197_v56, %v2341_v53  ;;  %v2069_v37 = vsel %vm1812_vm2, %v2066_v30, %v2068_v20  ;;  %v5169_v57 = vsel %vm1812_vm2, %v5166_v51, %v5168_v27  ;;  %10580 = vmatmul.msk.bf16.gmra.mxu1 %vm477_vm1, %v16441_v41  ;;  %10841 = vmatmul.msk.bf16.gmra.mxu0 %vm477_vm1, %v14069_v39 }
 0x652   : > { %10667 = vmatmul.msk.bf16.gmra.mxu2 %vm477_vm1, %v16441_v41  ;;  %v2342_v6 = vadd.f32 %v2069_v37, %v16443_v31 }
 0x653   : > { %v4312_v5 = vadd.f32 %v4154_v4, %v3471_v40 }
 0x654   : > { %10754 = vmatmul.msk.bf16.gmra.mxu3 %vm477_vm1, %v14069_v39 }
 0x655   : > { %v2737_v23 = vpop.f32.mrf.mxu2  ;;  %v14083_v16 = vadd.f32 %v5167_v29, %v4312_v5 }
 0x656   : > { %v3198_v30 = vrot.slane %v2737_v23, 2  ;;  %v1609_v7 = vpop.f32.mrf.mxu1  ;;  %v4710_v51 = vpop.f32.mrf.mxu0 }
 0x657   : > { %v4159_v1 = vpop.f32.mrf.mxu3  ;;  %16442 = vst [vmem:[#allocation141_spill] sm:$0xff] %v14083_v16  ;;  %v2070_v46 = vrot.slane %v1609_v7, 1  ;;  %v5170_v8 = vrot.slane %v4710_v51, 1  ;;  %v16445_v16 = vld [vmem:[#allocation151_spill] sm:$0xff] }
 0x658   : > { %v3199_v53 = vsel %vm2942_vm3, %v3196_v33, %v3198_v30 }
 0x659   : > { %v3472_v56 = vadd.f32 %v3199_v53, %v2342_v6  ;;  %v2071_v11 = vsel %vm1812_vm2, %v2068_v20, %v2070_v46  ;;  %v5171_v41 = vsel %vm1812_vm2, %v5168_v27, %v5170_v8  ;;  %v16446_v27 = vld [vmem:[#allocation11_spill] sm:$0xff] }
 0x65a   : > { %v2343_v10 = vadd.f32 %v2071_v11, %v16445_v16 }
 0x65b   : > { %v4313_v39 = vadd.f32 %v4156_v63, %v3472_v56  ;;  %v16447_v63 = vld [vmem:[#allocation23_spill] sm:$0xff] }
 0x65d   : > { %v2739_v4 = vpop.f32.mrf.mxu2  ;;  %v14089_v25 = vadd.f32 %v5169_v57, %v4313_v39 }
 0x65e   : > { %v3200_v29 = vrot.slane %v2739_v4, 2  ;;  %v1612_v5 = vpop.f32.mrf.mxu1  ;;  %v4713_v23 = vpop.f32.mrf.mxu0 }
 0x65f   : > { %v4161_v40 = vpop.f32.mrf.mxu3  ;;  %16444 = vst [vmem:[#allocation145_spill] sm:$0xff] %v14089_v25  ;;  %v2072_v37 = vrot.slane %v1612_v5, 1  ;;  %v5172_v7 = vrot.slane %v4713_v23, 1 }
 0x660   : > { %v3201_v51 = vsel %vm2942_vm3, %v3198_v30, %v3200_v29 }
 0x661   : > { %v3473_v33 = vadd.f32 %v3201_v51, %v2343_v10  ;;  %v2073_v31 = vsel %vm1812_vm2, %v2070_v46, %v2072_v37  ;;  %v5173_v20 = vsel %vm1812_vm2, %v5170_v8, %v5172_v7  ;;  %10849 = vmatmul.msk.bf16.vlgmr.msra.gmra.mxu1 %vm477_vm1, %v16446_v27  ;;  %11110 = vmatmul.msk.bf16.vlgmr.msra.gmra.mxu0 %vm477_vm1, %v16447_v63  ;;  %v16449_v46 = vld [vmem:[#allocation153_spill] sm:$0xff] }
 0x662   : > { %10936 = vmatmul.msk.bf16.vlgmr.msra.gmra.mxu2 %vm477_vm1, %v16447_v63  ;;  %v2344_v8 = vadd.f32 %v2073_v31, %v16449_v46 }
 0x663   : > { %v4314_v11 = vadd.f32 %v4159_v1, %v3473_v33 }
 0x664   : > { %11023 = vmatmul.msk.bf16.vlgmr.msra.gmra.mxu3 %vm477_vm1, %v16447_v63 }
 0x665   : > { %v2742_v39 = vpop.f32.mrf.mxu2  ;;  %v14103_v10 = vadd.f32 %v5171_v41, %v4314_v11 }
 0x666   : > { %v3202_v16 = vrot.slane %v2742_v39, 2  ;;  %v1614_v30 = vpop.f32.mrf.mxu1  ;;  %v4715_v6 = vpop.f32.mrf.mxu0  ;;  %v16451_v39 = vld [vmem:[#allocation15_spill] sm:$0xff] }
 0x667   : > { %v4164_v57 = vpop.f32.mrf.mxu3  ;;  %16448 = vst [vmem:[#allocation151_spill] sm:$0xff] %v14103_v10  ;;  %v2074_v1 = vrot.slane %v1614_v30, 1  ;;  %v5174_v33 = vrot.slane %v4715_v6, 1  ;;  %v16453_v6 = vld [vmem:[#allocation155_spill] sm:$0xff]  ;;  %v16455_v10 = vld [vmem:[#allocation157_spill] sm:$0xff] }
 0x668   : > { %v3203_v53 = vsel %vm2942_vm3, %v3200_v29, %v3202_v16  ;;  %v16452_v29 = vld [vmem:[#allocation27_spill] sm:$0xff] }
 0x669   : > { %v3474_v56 = vadd.f32 %v3203_v53, %v2344_v8 }
 0x66b   : > { %v4315_v4 = vadd.f32 %v4161_v40, %v3474_v56 }
 0x66d   : > { %v2744_v5 = vpop.f32.mrf.mxu2  ;;  %v14107_v37 = vadd.f32 %v5173_v20, %v4315_v4 }
 0x66e   : > { %v1617_v7 = vpop.f32.mrf.mxu1  ;;  %v4718_v51 = vpop.f32.mrf.mxu0  ;;  %v3204_v20 = vrot.slane %v2744_v5, 2 }
 0x66f   : > { %v4165_v23 = vpop.f32.mrf.mxu3  ;;  %16450 = vst [vmem:[#allocation11_spill] sm:$0xff] %v14107_v37  ;;  %v2075_v27 = vrot.slane %v1617_v7, 1  ;;  %v5175_v41 = vrot.slane %v4718_v51, 1 }
 0x671   : > { %v2076_v63 = vsel %vm1812_vm2, %v2074_v1, %v2075_v27  ;;  %v5176_v11 = vsel %vm1812_vm2, %v5174_v33, %v5175_v41  ;;  %10850 = vmatmul.msk.bf16.gmra.mxu1 %vm477_vm1, %v16451_v39  ;;  %11111 = vmatmul.msk.bf16.gmra.mxu0 %vm477_vm1, %v16452_v29 }
 0x672   : > { %10937 = vmatmul.msk.bf16.gmra.mxu2 %vm477_vm1, %v16452_v29  ;;  %v2345_v46 = vadd.f32 %v2076_v63, %v16453_v6 }
 0x674   : > { %11024 = vmatmul.msk.bf16.gmra.mxu3 %vm477_vm1, %v16452_v29 }
 0x675   : > { %v2747_v40 = vpop.f32.mrf.mxu2 }
 0x676   : > { %v3205_v57 = vrot.slane %v2747_v40, 2  ;;  %v1619_v16 = vpop.f32.mrf.mxu1  ;;  %v4720_v30 = vpop.f32.mrf.mxu0 }
 0x677   : > { %v4168_v31 = vpop.f32.mrf.mxu3  ;;  %v2077_v8 = vrot.slane %v1619_v16, 1  ;;  %v5177_v53 = vrot.slane %v4720_v30, 1 }
 0x678   : > { %v3206_v56 = vsel %vm2942_vm3, %v3204_v20, %v3205_v57 }
 0x679   : > { %v3475_v4 = vadd.f32 %v3206_v56, %v2345_v46  ;;  %v2078_v7 = vsel %vm1812_vm2, %v2075_v27, %v2077_v8  ;;  %v5178_v51 = vsel %vm1812_vm2, %v5175_v41, %v5177_v53  ;;  %v16456_v41 = vld [vmem:[#allocation16_spill] sm:$0xff] }
 0x67a   : > { %v2346_v25 = vadd.f32 %v2078_v7, %v16455_v10 }
 0x67b   : > { %v4316_v1 = vadd.f32 %v4165_v23, %v3475_v4  ;;  %v16457_v23 = vld [vmem:[#allocation31_spill] sm:$0xff] }
 0x67d   : > { %v2749_v33 = vpop.f32.mrf.mxu2  ;;  %v14123_v29 = vadd.f32 %v5176_v11, %v4316_v1 }
 0x67e   : > { %v3207_v5 = vrot.slane %v2749_v33, 2  ;;  %v1622_v40 = vpop.f32.mrf.mxu1  ;;  %v4723_v37 = vpop.f32.mrf.mxu0 }
 0x67f   : > { %v4170_v39 = vpop.f32.mrf.mxu3  ;;  %16454 = vst [vmem:[#allocation23_spill] sm:$0xff] %v14123_v29  ;;  %v2079_v63 = vrot.slane %v1622_v40, 1  ;;  %v5179_v16 = vrot.slane %v4723_v37, 1 }
 0x680   : > { %v3208_v30 = vsel %vm2942_vm3, %v3205_v57, %v3207_v5 }
 0x681   : > { %v3476_v20 = vadd.f32 %v3208_v30, %v2346_v25  ;;  %v2080_v6 = vsel %vm1812_vm2, %v2077_v8, %v2079_v63  ;;  %v5180_v27 = vsel %vm1812_vm2, %v5177_v53, %v5179_v16  ;;  %10851 = vmatmul.msk.bf16.gmra.mxu1 %vm477_vm1, %v16456_v41  ;;  %11112 = vmatmul.msk.bf16.gmra.mxu0 %vm477_vm1, %v16457_v23  ;;  %v16459_v53 = vld [vmem:[#allocation160_spill] sm:$0xff] }
 0x682   : > { %10938 = vmatmul.msk.bf16.gmra.mxu2 %vm477_vm1, %v16457_v23  ;;  %v2347_v56 = vadd.f32 %v2080_v6, %v16459_v53 }
 0x683   : > { %v4317_v10 = vadd.f32 %v4168_v31, %v3476_v20 }
 0x684   : > { %11025 = vmatmul.msk.bf16.gmra.mxu3 %vm477_vm1, %v16457_v23 }
 0x685   : > { %v2752_v37 = vpop.f32.mrf.mxu2  ;;  %v14137_v25 = vadd.f32 %v5178_v51, %v4317_v10 }
 0x686   : > { %v3209_v57 = vrot.slane %v2752_v37, 2  ;;  %v1624_v46 = vpop.f32.mrf.mxu1  ;;  %v4725_v8 = vpop.f32.mrf.mxu0 }
 0x687   : > { %v4173_v11 = vpop.f32.mrf.mxu3  ;;  %16458 = vst [vmem:[#allocation153_spill] sm:$0xff] %v14137_v25  ;;  %v2081_v4 = vrot.slane %v1624_v46, 1  ;;  %v5181_v7 = vrot.slane %v4725_v8, 1  ;;  %v16461_v25 = vld [vmem:[#allocation163_spill] sm:$0xff]  ;;  %v16462_v8 = vld [vmem:[#allocation164_spill] sm:$0xff] }
 0x688   : > { %v3210_v1 = vsel %vm2942_vm3, %v3207_v5, %v3209_v57  ;;  %v16463_v5 = vld [vmem:[#allocation35_spill] sm:$0xff] }
 0x689   : > { %v3477_v33 = vadd.f32 %v3210_v1, %v2347_v56  ;;  %v2082_v40 = vsel %vm1812_vm2, %v2079_v63, %v2081_v4  ;;  %v5182_v30 = vsel %vm1812_vm2, %v5179_v16, %v5181_v7 }
 0x68a   : > { %v2348_v29 = vadd.f32 %v2082_v40, %v16461_v25 }
 0x68b   : > { %v4318_v41 = vadd.f32 %v4170_v39, %v3477_v33 }
 0x68d   : > { %v2754_v31 = vpop.f32.mrf.mxu2  ;;  %v14143_v23 = vadd.f32 %v5180_v27, %v4318_v41 }
 0x68e   : > { %v3211_v51 = vrot.slane %v2754_v31, 2  ;;  %v1627_v10 = vpop.f32.mrf.mxu1  ;;  %v4728_v37 = vpop.f32.mrf.mxu0 }
 0x68f   : > { %v4175_v20 = vpop.f32.mrf.mxu3  ;;  %16460 = vst [vmem:[#allocation15_spill] sm:$0xff] %v14143_v23  ;;  %v5183_v63 = vrot.slane %v4728_v37, 1  ;;  %v2083_v53 = vrot.slane %v1627_v10, 1 }
 0x690   : > { %v3212_v6 = vsel %vm2942_vm3, %v3209_v57, %v3211_v51  ;;  %v16465_v51 = vld [vmem:[#allocation166_spill] sm:$0xff] }
 0x691   : > { %v3478_v46 = vadd.f32 %v3212_v6, %v2348_v29  ;;  %10852 = vmatmul.msk.bf16.gmra.mxu1 %vm477_vm1, %v16462_v8  ;;  %11113 = vmatmul.msk.bf16.gmra.mxu0 %vm477_vm1, %v16463_v5 }
 0x692   : > { %10939 = vmatmul.msk.bf16.gmra.mxu2 %vm477_vm1, %v16463_v5 }
 0x693   : > { %v4319_v39 = vadd.f32 %v4173_v11, %v3478_v46 }
 0x694   : > { %11026 = vmatmul.msk.bf16.gmra.mxu3 %vm477_vm1, %v16463_v5 }
 0x695   : > { %v2757_v16 = vpop.f32.mrf.mxu2  ;;  %v14155_v25 = vadd.f32 %v5182_v30, %v4319_v39  ;;  %v16466_v39 = vld [vmem:[#allocation170_spill] sm:$0xff] }
 0x696   : > { %v1629_v57 = vpop.f32.mrf.mxu1  ;;  %v4730_v29 = vpop.f32.mrf.mxu0  ;;  %v3213_v33 = vrot.slane %v2757_v16, 2 }
 0x697   : > { %v4177_v27 = vpop.f32.mrf.mxu3  ;;  %16464 = vst [vmem:[#allocation27_spill] sm:$0xff] %v14155_v25  ;;  %v2084_v56 = vrot.slane %v1629_v57, 1  ;;  %v5184_v4 = vrot.slane %v4730_v29, 1 }
 0x699   : > { %v2085_v7 = vsel %vm1812_vm2, %v2083_v53, %v2084_v56  ;;  %v5185_v1 = vsel %vm1812_vm2, %v5183_v63, %v5184_v4  ;;  %v16467_v63 = vld [vmem:[#allocation45_spill] sm:$0xff] }
 0x69a   : > { %v2349_v37 = vadd.f32 %v2085_v7, %v16465_v51 }
 0x69d   : > { %v2759_v40 = vpop.f32.mrf.mxu2 }
 0x69e   : > { %v3214_v31 = vrot.slane %v2759_v40, 2  ;;  %v1632_v20 = vpop.f32.mrf.mxu1  ;;  %v4733_v11 = vpop.f32.mrf.mxu0 }
 0x69f   : > { %v4179_v41 = vpop.f32.mrf.mxu3  ;;  %v2086_v6 = vrot.slane %v1632_v20, 1  ;;  %v5186_v30 = vrot.slane %v4733_v11, 1 }
 0x6a0   : > { %v3215_v46 = vsel %vm2942_vm3, %v3213_v33, %v3214_v31  ;;  %v16469_v33 = vld [vmem:[#allocation169_spill] sm:$0xff] }
 0x6a1   : > { %v3479_v8 = vadd.f32 %v3215_v46, %v2349_v37  ;;  %v2087_v10 = vsel %vm1812_vm2, %v2084_v56, %v2086_v6  ;;  %v5187_v5 = vsel %vm1812_vm2, %v5184_v4, %v5186_v30  ;;  %10853 = vmatmul.msk.bf16.gmra.mxu1 %vm477_vm1, %v16466_v39  ;;  %11114 = vmatmul.msk.bf16.gmra.mxu0 %vm477_vm1, %v16467_v63 }
 0x6a2   : > { %10940 = vmatmul.msk.bf16.gmra.mxu2 %vm477_vm1, %v16467_v63  ;;  %v2350_v40 = vadd.f32 %v2087_v10, %v16469_v33 }
 0x6a3   : > { %v4320_v16 = vadd.f32 %v4177_v27, %v3479_v8 }
 0x6a4   : > { %11027 = vmatmul.msk.bf16.gmra.mxu3 %vm477_vm1, %v16467_v63 }
 0x6a5   : > { %v2762_v57 = vpop.f32.mrf.mxu2  ;;  %v14171_v53 = vadd.f32 %v5185_v1, %v4320_v16 }
 0x6a6   : > { %v3216_v56 = vrot.slane %v2762_v57, 2  ;;  %v1634_v7 = vpop.f32.mrf.mxu1  ;;  %v4735_v4 = vpop.f32.mrf.mxu0 }
 0x6a7   : > { %v4182_v29 = vpop.f32.mrf.mxu3  ;;  %16468 = vst [vmem:[#allocation155_spill] sm:$0xff] %v14171_v53  ;;  %v2088_v20 = vrot.slane %v1634_v7, 1  ;;  %v5188_v11 = vrot.slane %v4735_v4, 1  ;;  %v16470_v53 = vld [vmem:[#allocation173_spill] sm:$0xff] }
 0x6a8   : > { %v3217_v51 = vsel %vm2942_vm3, %v3214_v31, %v3216_v56 }
 0x6a9   : > { %v3480_v37 = vadd.f32 %v3217_v51, %v2350_v40  ;;  %v2089_v46 = vsel %vm1812_vm2, %v2086_v6, %v2088_v20  ;;  %v5189_v39 = vsel %vm1812_vm2, %v5186_v30, %v5188_v11  ;;  %v16471_v30 = vld [vmem:[#allocation177_spill] sm:$0xff] }
 0x6aa   : > { %v2351_v23 = vadd.f32 %v2089_v46, %v16470_v53 }
 0x6ab   : > { %v4321_v63 = vadd.f32 %v4179_v41, %v3480_v37 }
 0x6ad   : > { %v2764_v27 = vpop.f32.mrf.mxu2  ;;  %v14177_v25 = vadd.f32 %v5187_v5, %v4321_v63 }
 0x6ae   : > { %v3218_v1 = vrot.slane %v2764_v27, 2  ;;  %v1637_v16 = vpop.f32.mrf.mxu1  ;;  %v4738_v57 = vpop.f32.mrf.mxu0 }
 0x6af   : > { %v4184_v8 = vpop.f32.mrf.mxu3  ;;  %v2090_v10 = vrot.slane %v1637_v16, 1  ;;  %v5190_v7 = vrot.slane %v4738_v57, 1 }
 0x6b0   : > { %v3219_v4 = vsel %vm2942_vm3, %v3216_v56, %v3218_v1 }
 0x6b1   : > { %v3481_v31 = vadd.f32 %v3219_v4, %v2351_v23  ;;  %v2091_v33 = vsel %vm1812_vm2, %v2088_v20, %v2090_v10  ;;  %v5191_v6 = vsel %vm1812_vm2, %v5188_v11, %v5190_v7  ;;  %10854 = vmatmul.msk.bf16.gmra.mxu1 %vm477_vm1, %v16471_v30  ;;  %11115 = vmatmul.msk.bf16.gmra.mxu0 %vm477_vm1, %v11919_v14  ;;  %v16472_v11 = vld [vmem:[#allocation176_spill] sm:$0xff] }
 0x6b2   : > { %10941 = vmatmul.msk.bf16.gmra.mxu2 %vm477_vm1, %v11919_v14  ;;  %v2352_v51 = vadd.f32 %v2091_v33, %v16472_v11 }
 0x6b3   : > { %v4322_v41 = vadd.f32 %v4182_v29, %v3481_v31 }
 0x6b4   : > { %11028 = vmatmul.msk.bf16.gmra.mxu3 %vm477_vm1, %v11919_v14 }
 0x6b5   : > { %v2767_v5 = vpop.f32.mrf.mxu2  ;;  %v14191_v23 = vadd.f32 %v5189_v39, %v4322_v41  ;;  %v16474_v41 = vld [vmem:[#allocation181_spill] sm:$0xff] }
 0x6b6   : > { %v3220_v56 = vrot.slane %v2767_v5, 2  ;;  %v1639_v40 = vpop.f32.mrf.mxu1  ;;  %v4740_v20 = vpop.f32.mrf.mxu0 }
 0x6b7   : > { %v4187_v53 = vpop.f32.mrf.mxu3  ;;  %v2092_v29 = vrot.slane %v1639_v40, 1  ;;  %v5192_v7 = vrot.slane %v4740_v20, 1 }
 0x6b8   : > { %v3221_v37 = vsel %vm2942_vm3, %v3218_v1, %v3220_v56  ;;  %v16475_v56 = vld [vmem:[#allocation180_spill] sm:$0xff] }
 0x6b9   : > { %v3482_v46 = vadd.f32 %v3221_v37, %v2352_v51 }
 0x6bb   : > { %v4323_v63 = vadd.f32 %v4184_v8, %v3482_v46 }
 0x6bd   : > { %v2769_v27 = vpop.f32.mrf.mxu2  ;;  %v14195_v57 = vadd.f32 %v5191_v6, %v4323_v63 }
 0x6be   : > { %v1642_v10 = vpop.f32.mrf.mxu1  ;;  %v4743_v14 = vpop.f32.mrf.mxu0  ;;  %v3222_v33 = vrot.slane %v2769_v27, 2 }
 0x6bf   : > { %v4188_v16 = vpop.f32.mrf.mxu3  ;;  %16473 = vst [vmem:[#allocation157_spill] sm:$0xff] %v14195_v57  ;;  %v2093_v4 = vrot.slane %v1642_v10, 1  ;;  %v5193_v39 = vrot.slane %v4743_v14, 1 }
 0x6c1   : > { %v2094_v31 = vsel %vm1812_vm2, %v2092_v29, %v2093_v4  ;;  %v5194_v30 = vsel %vm1812_vm2, %v5192_v7, %v5193_v39  ;;  %10855 = vmatmul.msk.bf16.gmra.mxu1 %vm477_vm1, %v16474_v41  ;;  %11116 = vmatmul.msk.bf16.gmra.mxu0 %vm477_vm1, %v11957_v35 }
 0x6c2   : > { %10942 = vmatmul.msk.bf16.gmra.mxu2 %vm477_vm1, %v11957_v35  ;;  %v2353_v40 = vadd.f32 %v2094_v31, %v16475_v56 }
 0x6c4   : > { %11029 = vmatmul.msk.bf16.gmra.mxu3 %vm477_vm1, %v11957_v35 }
 0x6c5   : > { %v2772_v8 = vpop.f32.mrf.mxu2 }
 0x6c6   : > { %v3223_v6 = vrot.slane %v2772_v8, 2  ;;  %v1644_v5 = vpop.f32.mrf.mxu1  ;;  %v4745_v53 = vpop.f32.mrf.mxu0  ;;  %v16476_v8 = vld [vmem:[#allocation184_spill] sm:$0xff] }
 0x6c7   : > { %v4191_v1 = vpop.f32.mrf.mxu3  ;;  %v2095_v20 = vrot.slane %v1644_v5, 1  ;;  %v5195_v11 = vrot.slane %v4745_v53, 1 }
 0x6c8   : > { %v3224_v51 = vsel %vm2942_vm3, %v3222_v33, %v3223_v6 }
 0x6c9   : > { %v3483_v37 = vadd.f32 %v3224_v51, %v2353_v40  ;;  %v2096_v46 = vsel %vm1812_vm2, %v2093_v4, %v2095_v20  ;;  %v5196_v63 = vsel %vm1812_vm2, %v5193_v39, %v5195_v11  ;;  %v16477_v39 = vld [vmem:[#allocation188_spill] sm:$0xff]  ;;  %v16479_v51 = vld [vmem:[#allocation187_spill] sm:$0xff] }
 0x6ca   : > { %v2354_v57 = vadd.f32 %v2096_v46, %v16476_v8 }
 0x6cb   : > { %v4324_v10 = vadd.f32 %v4188_v16, %v3483_v37 }
 0x6cd   : > { %v2774_v14 = vpop.f32.mrf.mxu2  ;;  %v14211_v29 = vadd.f32 %v5194_v30, %v4324_v10 }
 0x6ce   : > { %v3225_v27 = vrot.slane %v2774_v14, 2  ;;  %v1647_v7 = vpop.f32.mrf.mxu1  ;;  %v4748_v41 = vpop.f32.mrf.mxu0 }
 0x6cf   : > { %v4193_v35 = vpop.f32.mrf.mxu3  ;;  %v2097_v31 = vrot.slane %v1647_v7, 1  ;;  %v5197_v5 = vrot.slane %v4748_v41, 1 }
 0x6d0   : > { %v3226_v53 = vsel %vm2942_vm3, %v3223_v6, %v3225_v27 }
 0x6d1   : > { %v3484_v33 = vadd.f32 %v3226_v53, %v2354_v57  ;;  %v2098_v56 = vsel %vm1812_vm2, %v2095_v20, %v2097_v31  ;;  %v5198_v4 = vsel %vm1812_vm2, %v5195_v11, %v5197_v5  ;;  %10856 = vmatmul.msk.bf16.gmra.mxu1 %vm477_vm1, %v16477_v39  ;;  %11117 = vmatmul.msk.bf16.gmra.mxu0 %vm477_vm1, %v12003_v52 }
 0x6d2   : > { %10943 = vmatmul.msk.bf16.gmra.mxu2 %vm477_vm1, %v12003_v52  ;;  %v2355_v37 = vadd.f32 %v2098_v56, %v16479_v51 }
 0x6d3   : > { %v4325_v16 = vadd.f32 %v4191_v1, %v3484_v33 }
 0x6d4   : > { %11030 = vmatmul.msk.bf16.gmra.mxu3 %vm477_vm1, %v12003_v52 }
 0x6d5   : > { %v2777_v30 = vpop.f32.mrf.mxu2  ;;  %v14225_v57 = vadd.f32 %v5196_v63, %v4325_v16 }
 0x6d6   : > { %v3227_v40 = vrot.slane %v2777_v30, 2  ;;  %v1649_v20 = vpop.f32.mrf.mxu1  ;;  %v4750_v11 = vpop.f32.mrf.mxu0  ;;  %v16480_v30 = vld [vmem:[#allocation191_spill] sm:$0xff] }
 0x6d7   : > { %v4196_v6 = vpop.f32.mrf.mxu3  ;;  %16478 = vst [vmem:[#allocation16_spill] sm:$0xff] %v14225_v57  ;;  %v2099_v46 = vrot.slane %v1649_v20, 1  ;;  %v5199_v10 = vrot.slane %v4750_v11, 1  ;;  %v16481_v11 = vld [vmem:[#allocation192_spill] sm:$0xff] }
 0x6d8   : > { %v3228_v14 = vsel %vm2942_vm3, %v3225_v27, %v3227_v40 }
 0x6d9   : > { %v3485_v7 = vadd.f32 %v3228_v14, %v2355_v37  ;;  %v2100_v41 = vsel %vm1812_vm2, %v2097_v31, %v2099_v46  ;;  %v5200_v8 = vsel %vm1812_vm2, %v5197_v5, %v5199_v10 }
 0x6da   : > { %v2356_v57 = vadd.f32 %v2100_v41, %v16480_v30 }
 0x6db   : > { %v4326_v52 = vadd.f32 %v4193_v35, %v3485_v7 }
 0x6dd   : > { %v2779_v1 = vpop.f32.mrf.mxu2  ;;  %v14231_v33 = vadd.f32 %v5198_v4, %v4326_v52 }
 0x6de   : > { %v3229_v63 = vrot.slane %v2779_v1, 2  ;;  %v5482_v39 = vpop.f32.mrf.mxu1  ;;  %v8281_v16 = vpop.f32.mrf.mxu0 }
 0x6df   : > { %v4198_v53 = vpop.f32.mrf.mxu3  ;;  %v8841_v7 = vrot.slane %v8281_v16, 2 }
 0x6e0   : > { %v3230_v56 = vsel %vm2942_vm3, %v3227_v40, %v3229_v63 }
 0x6e1   : > { %v3486_v20 = vadd.f32 %v3230_v56, %v2356_v57  ;;  %10857 = vmatmul.msk.bf16.gmra.mxu1 %vm477_vm1, %v16481_v11  ;;  %11118 = vmatmul.msk.bf16.gmra.mxu0 %vm477_vm1, %v16119_v19  ;;  %v6042_v57 = vrot.slane %v5482_v39, 2  ;;  %v14251_v39 = vld [vmem:[%s15653_s2] ss:$0 sm:$0xff] }
 0x6e2   : > { %10944 = vmatmul.msk.bf16.gmra.mxu2 %vm477_vm1, %v16119_v19  ;;  %v16482_v56 = vld [vmem:[#allocation193_spill] sm:$0xff] }
 0x6e3   : > { %v4327_v35 = vadd.f32 %v4196_v6, %v3486_v20 }
 0x6e4   : > { %11031 = vmatmul.msk.bf16.gmra.mxu3 %vm477_vm1, %v16119_v19 }
 0x6e5   : > { %v6631_v31 = vpop.f32.mrf.mxu2  ;;  %v14243_v5 = vadd.f32 %v5200_v8, %v4327_v35 }
 0x6e6   : > { %v5484_v4 = vpop.f32.mrf.mxu1  ;;  %v8283_v40 = vpop.f32.mrf.mxu0 }
 0x6e7   : > { %v7152_v27 = vpop.f32.mrf.mxu3  ;;  %v6043_v51 = vrot.slane %v5484_v4, 2  ;;  %v8842_v52 = vrot.slane %v8283_v40, 2 }
 0x6e8   : > { %v7712_v41 = vrot.slane %v7152_v27, 1 }
 0x6e9   : > { %v6044_v37 = vsel %vm2942_vm3, %v6042_v57, %v6043_v51  ;;  %v8843_v16 = vsel %vm2942_vm3, %v8841_v7, %v8842_v52 }
 0x6ea   : > { %v6458_v46 = vadd.f32 %v6044_v37, %v12559_v58 }
 0x6ec   : > { %v6999_v53 = vadd.f32 %v6631_v31, %v6458_v46 }
 0x6ed   : > { %v6633_v14 = vpop.f32.mrf.mxu2 }
 0x6ee   : > { %v5487_v19 = vpop.f32.mrf.mxu1  ;;  %v8286_v6 = vpop.f32.mrf.mxu0 }
 0x6ef   : > { %v7154_v10 = vpop.f32.mrf.mxu3  ;;  %v6045_v63 = vrot.slane %v5487_v19, 2  ;;  %v8844_v4 = vrot.slane %v8286_v6, 2 }
 0x6f0   : > { %v7713_v1 = vrot.slane %v7154_v10, 1 }
 0x6f1   : > { %v6046_v58 = vsel %vm2942_vm3, %v6043_v51, %v6045_v63  ;;  %10858 = vmatmul.msk.bf16.gmra.mxu1 %vm477_vm1, %v16482_v56  ;;  %11119 = vmatmul.msk.bf16.gmra.mxu0 %vm477_vm1, %v16125_v43 }
 0x6f2   : > { %v7714_v8 = vsel %vm1812_vm2, %v7712_v41, %v7713_v1  ;;  %10945 = vmatmul.msk.bf16.gmra.mxu2 %vm477_vm1, %v16125_v43  ;;  %v6459_v11 = vadd.f32 %v6046_v58, %v12569_v32  ;;  %v8845_v32 = vsel %vm2942_vm3, %v8842_v52, %v8844_v4 }
 0x6f3   : > { %v8128_v30 = vadd.f32 %v7714_v8, %v6999_v53 }
 0x6f4   : > { %11032 = vmatmul.msk.bf16.gmra.mxu3 %vm477_vm1, %v16125_v43  ;;  %v7000_v46 = vadd.f32 %v6633_v14, %v6459_v11 }
 0x6f5   : > { %v9257_v20 = vadd.f32 %v8843_v16, %v8128_v30  ;;  %v6636_v31 = vpop.f32.mrf.mxu2 }
 0x6f6   : > { %v5489_v57 = vpop.f32.mrf.mxu1  ;;  %v8288_v51 = vpop.f32.mrf.mxu0 }
 0x6f7   : > { %v9389_v35 = vadd.f32 %v14251_v39, %v9257_v20  ;;  %v7157_v27 = vpop.f32.mrf.mxu3  ;;  %v6047_v10 = vrot.slane %v5489_v57, 2  ;;  %v8846_v16 = vrot.slane %v8288_v51, 2 }
 0x6f8   : > { %v7715_v40 = vrot.slane %v7157_v27, 1 }
 0x6f9   : > { %v9517_v37 = vmax.f32 %v9389_v35, 0.0  ;;  %v6048_v19 = vsel %vm2942_vm3, %v6045_v63, %v6047_v10  ;;  %v8847_v51 = vsel %vm2942_vm3, %v8844_v4, %v8846_v16 }
 0x6fa   : > { %v7716_v7 = vsel %vm1812_vm2, %v7713_v1, %v7715_v40  ;;  %v6460_v6 = vadd.f32 %v6048_v19, %v12583_v9 }
 0x6fb   : > { %v9645_v41 = vmin.f32 %v9517_v37, 0.4  ;;  %v8129_v43 = vadd.f32 %v7716_v7, %v7000_v46 }
 0x6fc   : > { %v7001_v63 = vadd.f32 %v6636_v31, %v6460_v6 }
 0x6fd   : > { %v9773_v53 = vmul.f32 2.5, %v9645_v41  ;;  %v9258_v8 = vadd.f32 %v8845_v32, %v8129_v43  ;;  %v6638_v56 = vpop.f32.mrf.mxu2 }
 0x6fe   : > { %v5492_v1 = vpop.f32.mrf.mxu1  ;;  %v8291_v11 = vpop.f32.mrf.mxu0 }
 0x6ff   : > { %v9901_v30 = vfloor.f32 %v9773_v53  ;;  %v9390_v58 = vadd.f32 %v14251_v39, %v9258_v8  ;;  %v7159_v14 = vpop.f32.mrf.mxu3  ;;  %v6049_v57 = vrot.slane %v5492_v1, 2  ;;  %v8848_v4 = vrot.slane %v8291_v11, 2 }
 0x700   : > { %v7717_v20 = vrot.slane %v7159_v14, 1 }
 0x701   : > { %v10029_v35 = vmul.f32 0.4, %v9901_v30  ;;  %v9518_v27 = vmax.f32 %v9390_v58, 0.0  ;;  %v6050_v46 = vsel %vm2942_vm3, %v6047_v10, %v6049_v57  ;;  %10859 = vmatmul.msk.bf16.gmra.mxu1 %vm477_vm1, %v12567_v36  ;;  %11120 = vmatmul.msk.bf16.gmra.mxu0 %vm477_vm1, %v16133_v34 }
 0x702   : > { %v7718_v52 = vsel %vm1812_vm2, %v7715_v40, %v7717_v20  ;;  %v6461_v7 = vadd.f32 %v6050_v46, %v12591_v28  ;;  %10946 = vmatmul.msk.bf16.gmra.mxu2 %vm477_vm1, %v16133_v34 }
 0x703   : > { %10157 = vst [vmem:[%s14274_s11] sm:$0xff] %v10029_v35  ;;  %v9646_v9 = vmin.f32 %v9518_v27, 0.4  ;;  %v8130_v37 = vadd.f32 %v7718_v52, %v7001_v63 }
 0x704   : > { %11033 = vmatmul.msk.bf16.gmra.mxu3 %vm477_vm1, %v16133_v34  ;;  %v7002_v30 = vadd.f32 %v6638_v56, %v6461_v7  ;;  %v8849_v34 = vsel %vm2942_vm3, %v8846_v16, %v8848_v4 }
 0x705   : > { %v9774_v31 = vmul.f32 2.5, %v9646_v9  ;;  %v9259_v40 = vadd.f32 %v8847_v51, %v8130_v37  ;;  %v6641_v43 = vpop.f32.mrf.mxu2 }
 0x706   : > { %v5494_v32 = vpop.f32.mrf.mxu1  ;;  %v8293_v53 = vpop.f32.mrf.mxu0 }
 0x707   : > { %v9902_v10 = vfloor.f32 %v9774_v31  ;;  %v9391_v41 = vadd.f32 %v14251_v39, %v9259_v40  ;;  %v7162_v36 = vpop.f32.mrf.mxu3  ;;  %v6051_v56 = vrot.slane %v5494_v32, 2 }
 0x708   : > { %v7719_v19 = vrot.slane %v7162_v36, 1 }
 0x709   : > { %v10030_v8 = vmul.f32 0.4, %v9902_v10  ;;  %v9519_v6 = vmax.f32 %v9391_v41, 0.0 }
 0x70a   : > { %v7720_v58 = vsel %vm1812_vm2, %v7717_v20, %v7719_v19 }
 0x70b   : > { %10158 = vst [vmem:[%s14274_s11 + $0x8] sm:$0xff] %v10030_v8  ;;  %v9647_v28 = vmin.f32 %v9519_v6, 0.4  ;;  %v8131_v14 = vadd.f32 %v7720_v58, %v7002_v30  ;;  %v8850_v30 = vrot.slane %v8293_v53, 2 }
 0x70d   : > { %v9775_v1 = vmul.f32 2.5, %v9647_v28  ;;  %v9260_v35 = vadd.f32 %v8849_v34, %v8131_v14  ;;  %v6642_v57 = vpop.f32.mrf.mxu2 }
 0x70e   : > { %v5497_v52 = vpop.f32.mrf.mxu1  ;;  %v8296_v9 = vpop.f32.mrf.mxu0 }
 0x70f   : > { %v9903_v27 = vfloor.f32 %v9775_v1  ;;  %v9392_v63 = vadd.f32 %v14251_v39, %v9260_v35  ;;  %v7164_v11 = vpop.f32.mrf.mxu3  ;;  %v6052_v51 = vrot.slane %v5497_v52, 2  ;;  %v8851_v43 = vrot.slane %v8296_v9, 2 }
 0x710   : > { %v7721_v36 = vrot.slane %v7164_v11, 1 }
 0x711   : > { %v10031_v37 = vmul.f32 0.4, %v9903_v27  ;;  %v9520_v46 = vmax.f32 %v9392_v63, 0.0  ;;  %v6053_v31 = vsel %vm2942_vm3, %v6051_v56, %v6052_v51  ;;  %10860 = vmatmul.msk.bf16.gmra.mxu1 %vm477_vm1, %v12589_v17  ;;  %11121 = vmatmul.msk.bf16.gmra.mxu0 %vm477_vm1, %v16139_v22 }
 0x712   : > { %v6462_v40 = vadd.f32 %v6053_v31, %v12611_v21  ;;  %10947 = vmatmul.msk.bf16.gmra.mxu2 %vm477_vm1, %v16139_v22 }
 0x713   : > { %10159 = vst [vmem:[%s14274_s11 + $0x10] sm:$0xff] %v10031_v37  ;;  %v9648_v20 = vmin.f32 %v9520_v46, 0.4 }
 0x714   : > { %11034 = vmatmul.msk.bf16.gmra.mxu3 %vm477_vm1, %v16139_v22  ;;  %v7003_v8 = vadd.f32 %v6642_v57, %v6462_v40  ;;  %v8852_v22 = vsel %vm2942_vm3, %v8850_v30, %v8851_v43  ;;  %v16483_v40 = vld [vmem:[#allocation195_spill] sm:$0xff] }
 0x715   : > { %v9776_v16 = vmul.f32 2.5, %v9648_v20  ;;  %v6645_v41 = vpop.f32.mrf.mxu2 }
 0x716   : > { %v5499_v17 = vpop.f32.mrf.mxu1  ;;  %v8298_v19 = vpop.f32.mrf.mxu0 }
 0x717   : > { %v9904_v7 = vfloor.f32 %v9776_v16  ;;  %v7167_v10 = vpop.f32.mrf.mxu3  ;;  %v6054_v6 = vrot.slane %v5499_v17, 2  ;;  %v8853_v63 = vrot.slane %v8298_v19, 2 }
 0x718   : > { %v7722_v4 = vrot.slane %v7167_v10, 1 }
 0x719   : > { %v10032_v32 = vmul.f32 0.4, %v9904_v7  ;;  %v6055_v21 = vsel %vm2942_vm3, %v6052_v51, %v6054_v6 }
 0x71a   : > { %v7723_v58 = vsel %vm1812_vm2, %v7721_v36, %v7722_v4  ;;  %v6463_v34 = vadd.f32 %v6055_v21, %v12625_v3  ;;  %v8854_v3 = vsel %vm2942_vm3, %v8851_v43, %v8853_v63 }
 0x71b   : > { %10160 = vst [vmem:[%s14274_s11 + $0x18] sm:$0xff] %v10032_v32  ;;  %v8132_v28 = vadd.f32 %v7723_v58, %v7003_v8 }
 0x71c   : > { %v7004_v9 = vadd.f32 %v6645_v41, %v6463_v34 }
 0x71d   : > { %v9261_v14 = vadd.f32 %v8852_v22, %v8132_v28  ;;  %v6647_v27 = vpop.f32.mrf.mxu2 }
 0x71e   : > { %v5502_v57 = vpop.f32.mrf.mxu1  ;;  %v8301_v52 = vpop.f32.mrf.mxu0 }
 0x71f   : > { %v9393_v1 = vadd.f32 %v14251_v39, %v9261_v14  ;;  %v7169_v35 = vpop.f32.mrf.mxu3  ;;  %v6056_v37 = vrot.slane %v5502_v57, 2  ;;  %v8855_v43 = vrot.slane %v8301_v52, 2 }
 0x720   : > { %v7724_v11 = vrot.slane %v7169_v35, 1 }
 0x721   : > { %v9521_v53 = vmax.f32 %v9393_v1, 0.0  ;;  %v6057_v20 = vsel %vm2942_vm3, %v6054_v6, %v6056_v37  ;;  %10861 = vmatmul.msk.bf16.gmra.mxu1 %vm477_vm1, %v12609_v12  ;;  %11122 = vmatmul.msk.bf16.gmra.mxu0 %vm477_vm1, %v16144_v59  ;;  %v8856_v22 = vsel %vm2942_vm3, %v8853_v63, %v8855_v43  ;;  %v16484_v1 = vld [vmem:[#allocation71_spill] sm:$0xff] }
 0x722   : > { %v7725_v46 = vsel %vm1812_vm2, %v7722_v4, %v7724_v11  ;;  %v6464_v7 = vadd.f32 %v6057_v20, %v16483_v40  ;;  %10948 = vmatmul.msk.bf16.gmra.mxu2 %vm477_vm1, %v16144_v59 }
 0x723   : > { %v9649_v56 = vmin.f32 %v9521_v53, 0.4  ;;  %v8133_v51 = vadd.f32 %v7725_v46, %v7004_v9 }
 0x724   : > { %11035 = vmatmul.msk.bf16.gmra.mxu3 %vm477_vm1, %v16144_v59  ;;  %v7005_v6 = vadd.f32 %v6647_v27, %v6464_v7 }
 0x725   : > { %v9777_v31 = vmul.f32 2.5, %v9649_v56  ;;  %v9262_v16 = vadd.f32 %v8854_v3, %v8133_v51  ;;  %v6650_v36 = vpop.f32.mrf.mxu2 }
 0x726   : > { %v5504_v17 = vpop.f32.mrf.mxu1  ;;  %v8303_v19 = vpop.f32.mrf.mxu0 }
 0x727   : > { %v9905_v10 = vfloor.f32 %v9777_v31  ;;  %v9394_v41 = vadd.f32 %v14251_v39, %v9262_v16  ;;  %v7172_v12 = vpop.f32.mrf.mxu3  ;;  %v6058_v30 = vrot.slane %v5504_v17, 2  ;;  %v8857_v9 = vrot.slane %v8303_v19, 2  ;;  %v16485_v16 = vld [vmem:[#allocation194_spill] sm:$0xff] }
 0x728   : > { %v7726_v4 = vrot.slane %v7172_v12, 1 }
 0x729   : > { %v10033_v32 = vmul.f32 0.4, %v9905_v10  ;;  %v9522_v8 = vmax.f32 %v9394_v41, 0.0  ;;  %v6059_v59 = vsel %vm2942_vm3, %v6056_v37, %v6058_v30  ;;  %v8858_v40 = vsel %vm2942_vm3, %v8855_v43, %v8857_v9 }
 0x72a   : > { %v7727_v58 = vsel %vm1812_vm2, %v7724_v11, %v7726_v4  ;;  %v6465_v35 = vadd.f32 %v6059_v59, %v16484_v1 }
 0x72b   : > { %10161 = vst [vmem:[%s14274_s11 + $0x20] sm:$0xff] %v10033_v32  ;;  %v9650_v28 = vmin.f32 %v9522_v8, 0.4  ;;  %v8134_v21 = vadd.f32 %v7727_v58, %v7005_v6 }
 0x72c   : > { %v7006_v3 = vadd.f32 %v6650_v36, %v6465_v35 }
 0x72d   : > { %v9778_v14 = vmul.f32 2.5, %v9650_v28  ;;  %v9263_v34 = vadd.f32 %v8856_v22, %v8134_v21  ;;  %v6652_v27 = vpop.f32.mrf.mxu2  ;;  %v16486_v21 = vld [vmem:[#allocation107_spill] sm:$0xff] }
 0x72e   : > { %v5507_v11 = vpop.f32.mrf.mxu1  ;;  %v8306_v56 = vpop.f32.mrf.mxu0 }
 0x72f   : > { %v9906_v57 = vfloor.f32 %v9778_v14  ;;  %v9395_v52 = vadd.f32 %v14251_v39, %v9263_v34  ;;  %v7174_v53 = vpop.f32.mrf.mxu3  ;;  %v6060_v8 = vrot.slane %v5507_v11, 2  ;;  %v8859_v34 = vrot.slane %v8306_v56, 2  ;;  %v16488_v56 = vld [vmem:[#allocation146_spill] sm:$0xff] }
 0x730   : > { %v7728_v46 = vrot.slane %v7174_v53, 1 }
 0x731   : > { %v10034_v51 = vmul.f32 0.4, %v9906_v57  ;;  %v9523_v20 = vmax.f32 %v9395_v52, 0.0  ;;  %10862 = vmatmul.msk.bf16.gmra.mxu1 %vm477_vm1, %v16485_v16  ;;  %11123 = vmatmul.msk.bf16.gmra.mxu0 %vm477_vm1, %v16150_v38 }
 0x732   : > { %v7729_v37 = vsel %vm1812_vm2, %v7726_v4, %v7728_v46  ;;  %10949 = vmatmul.msk.bf16.gmra.mxu2 %vm477_vm1, %v16150_v38 }
 0x733   : > { %10162 = vst [vmem:[%s14274_s11 + $0x28] sm:$0xff] %v10034_v51  ;;  %v9651_v63 = vmin.f32 %v9523_v20, 0.4  ;;  %v8135_v31 = vadd.f32 %v7729_v37, %v7006_v3  ;;  %v16487_v3 = vld [vmem:[#allocation77_spill] sm:$0xff] }
 0x734   : > { %11036 = vmatmul.msk.bf16.gmra.mxu3 %vm477_vm1, %v16150_v38 }
 0x735   : > { %v9779_v7 = vmul.f32 2.5, %v9651_v63  ;;  %v9264_v10 = vadd.f32 %v8858_v40, %v8135_v31  ;;  %v6654_v4 = vpop.f32.mrf.mxu2  ;;  %v16489_v31 = vld [vmem:[#allocation79_spill] sm:$0xff] }
 0x736   : > { %v5509_v17 = vpop.f32.mrf.mxu1  ;;  %v8308_v19 = vpop.f32.mrf.mxu0 }
 0x737   : > { %v9907_v41 = vfloor.f32 %v9779_v7  ;;  %v9396_v12 = vadd.f32 %v14251_v39, %v9264_v10  ;;  %v7177_v36 = vpop.f32.mrf.mxu3  ;;  %v6061_v6 = vrot.slane %v5509_v17, 2  ;;  %v8860_v35 = vrot.slane %v8308_v19, 2 }
 0x738   : > { %v7730_v1 = vrot.slane %v7177_v36, 1 }
 0x739   : > { %v10035_v43 = vmul.f32 0.4, %v9907_v41  ;;  %v9524_v32 = vmax.f32 %v9396_v12, 0.0  ;;  %v6062_v58 = vsel %vm2942_vm3, %v6060_v8, %v6061_v6  ;;  %v8861_v37 = vsel %vm2942_vm3, %v8859_v34, %v8860_v35 }
 0x73a   : > { %v6466_v59 = vadd.f32 %v6062_v58, %v16486_v21 }
 0x73b   : > { %10163 = vst [vmem:[%s14274_s11 + $0x30] sm:$0xff] %v10035_v43  ;;  %v9652_v30 = vmin.f32 %v9524_v32, 0.4 }
 0x73c   : > { %v7007_v9 = vadd.f32 %v6654_v4, %v6466_v59  ;;  %v16490_v59 = vld [vmem:[#allocation89_spill] sm:$0xff] }
 0x73d   : > { %v9780_v28 = vmul.f32 2.5, %v9652_v30  ;;  %v6656_v14 = vpop.f32.mrf.mxu2 }
 0x73e   : > { %v5512_v52 = vpop.f32.mrf.mxu1  ;;  %v8311_v53 = vpop.f32.mrf.mxu0 }
 0x73f   : > { %v9908_v38 = vfloor.f32 %v9780_v28  ;;  %v7179_v22 = vpop.f32.mrf.mxu3  ;;  %v6063_v46 = vrot.slane %v5512_v52, 2  ;;  %v8862_v41 = vrot.slane %v8311_v53, 2 }
 0x740   : > { %v7731_v57 = vrot.slane %v7179_v22, 1 }
 0x741   : > { %v10036_v27 = vmul.f32 0.4, %v9908_v38  ;;  %v6064_v20 = vsel %vm2942_vm3, %v6061_v6, %v6063_v46  ;;  %10863 = vmatmul.msk.bf16.gmra.mxu1 %vm477_vm1, %v16487_v3  ;;  %11124 = vmatmul.msk.bf16.gmra.mxu0 %vm477_vm1, %v16488_v56  ;;  %v8863_v58 = vsel %vm2942_vm3, %v8860_v35, %v8862_v41 }
 0x742   : > { %v7732_v11 = vsel %vm1812_vm2, %v7730_v1, %v7731_v57  ;;  %v6467_v16 = vadd.f32 %v6064_v20, %v16489_v31  ;;  %10950 = vmatmul.msk.bf16.gmra.mxu2 %vm477_vm1, %v16488_v56 }
 0x743   : > { %10164 = vst [vmem:[%s14274_s11 + $0x38] sm:$0xff] %v10036_v27  ;;  %v8136_v51 = vadd.f32 %v7732_v11, %v7007_v9 }
 0x744   : > { %11037 = vmatmul.msk.bf16.gmra.mxu3 %vm477_vm1, %v16488_v56  ;;  %v7008_v19 = vadd.f32 %v6656_v14, %v6467_v16  ;;  %v16491_v56 = vld [vmem:[#allocation120_spill] sm:$0xff] }
 0x745   : > { %v9265_v63 = vadd.f32 %v8861_v37, %v8136_v51  ;;  %v6659_v10 = vpop.f32.mrf.mxu2 }
 0x746   : > { %v5514_v36 = vpop.f32.mrf.mxu1  ;;  %v8313_v4 = vpop.f32.mrf.mxu0 }
 0x747   : > { %v9397_v40 = vadd.f32 %v14251_v39, %v9265_v63  ;;  %v7182_v7 = vpop.f32.mrf.mxu3  ;;  %v6065_v43 = vrot.slane %v5514_v36, 2  ;;  %v8864_v14 = vrot.slane %v8313_v4, 2 }
 0x748   : > { %v7733_v12 = vrot.slane %v7182_v7, 1 }
 0x749   : > { %v9525_v17 = vmax.f32 %v9397_v40, 0.0  ;;  %v6066_v30 = vsel %vm2942_vm3, %v6063_v46, %v6065_v43  ;;  %v8865_v63 = vsel %vm2942_vm3, %v8862_v41, %v8864_v14  ;;  %v16492_v40 = vld [vmem:[#allocation121_spill] sm:$0xff] }
 0x74a   : > { %v7734_v32 = vsel %vm1812_vm2, %v7731_v57, %v7733_v12  ;;  %v6468_v38 = vadd.f32 %v6066_v30, %v16490_v59 }
 0x74b   : > { %v9653_v8 = vmin.f32 %v9525_v17, 0.4  ;;  %v8137_v6 = vadd.f32 %v7734_v32, %v7008_v19 }
 0x74c   : > { %v7009_v51 = vadd.f32 %v6659_v10, %v6468_v38 }
 0x74d   : > { %v9781_v28 = vmul.f32 2.5, %v9653_v8  ;;  %v9266_v21 = vadd.f32 %v8863_v58, %v8137_v6  ;;  %v6661_v52 = vpop.f32.mrf.mxu2 }
 0x74e   : > { %v5517_v27 = vpop.f32.mrf.mxu1  ;;  %v8316_v57 = vpop.f32.mrf.mxu0 }
 0x74f   : > { %v9909_v22 = vfloor.f32 %v9781_v28  ;;  %v9398_v34 = vadd.f32 %v14251_v39, %v9266_v21  ;;  %v7184_v1 = vpop.f32.mrf.mxu3  ;;  %v6067_v46 = vrot.slane %v5517_v27, 2  ;;  %v8866_v41 = vrot.slane %v8316_v57, 2 }
 0x750   : > { %v7735_v53 = vrot.slane %v7184_v1, 1 }
 0x751   : > { %v10037_v9 = vmul.f32 0.4, %v9909_v22  ;;  %v9526_v11 = vmax.f32 %v9398_v34, 0.0  ;;  %v6068_v37 = vsel %vm2942_vm3, %v6065_v43, %v6067_v46  ;;  %10864 = vmatmul.msk.bf16.gmra.mxu1 %vm477_vm1, %v16491_v56  ;;  %11125 = vmatmul.msk.bf16.gmra.mxu0 %vm477_vm1, %v16157_v15 }
 0x752   : > { %v7736_v35 = vsel %vm1812_vm2, %v7733_v12, %v7735_v53  ;;  %v6469_v7 = vadd.f32 %v6068_v37, %v16492_v40  ;;  %10951 = vmatmul.msk.bf16.gmra.mxu2 %vm477_vm1, %v16157_v15 }
 0x753   : > { %10165 = vst [vmem:[%s14274_s11 + $0x40] sm:$0xff] %v10037_v9  ;;  %v9654_v20 = vmin.f32 %v9526_v11, 0.4  ;;  %v8138_v3 = vadd.f32 %v7736_v35, %v7009_v51  ;;  %v16493_v35 = vld [vmem:[#allocation85_spill] sm:$0xff] }
 0x754   : > { %11038 = vmatmul.msk.bf16.gmra.mxu3 %vm477_vm1, %v16157_v15  ;;  %v7010_v6 = vadd.f32 %v6661_v52, %v6469_v7  ;;  %v8867_v15 = vsel %vm2942_vm3, %v8864_v14, %v8866_v41 }
 0x755   : > { %v9782_v31 = vmul.f32 2.5, %v9654_v20  ;;  %v9267_v16 = vadd.f32 %v8865_v63, %v8138_v3  ;;  %v6664_v4 = vpop.f32.mrf.mxu2  ;;  %v16494_v20 = vld [vmem:[#allocation91_spill] sm:$0xff] }
 0x756   : > { %v5519_v19 = vpop.f32.mrf.mxu1  ;;  %v8318_v43 = vpop.f32.mrf.mxu0 }
 0x757   : > { %v9910_v10 = vfloor.f32 %v9782_v31  ;;  %v9399_v12 = vadd.f32 %v14251_v39, %v9267_v16  ;;  %v7187_v36 = vpop.f32.mrf.mxu3  ;;  %v6069_v52 = vrot.slane %v5519_v19, 2  ;;  %v8868_v41 = vrot.slane %v8318_v43, 2 }
 0x758   : > { %v7737_v17 = vrot.slane %v7187_v36, 1 }
 0x759   : > { %v10038_v32 = vmul.f32 0.4, %v9910_v10  ;;  %v9527_v8 = vmax.f32 %v9399_v12, 0.0 }
 0x75a   : > { %v7738_v30 = vsel %vm1812_vm2, %v7735_v53, %v7737_v17 }
 0x75b   : > { %10166 = vst [vmem:[%s14274_s11 + $0x48] sm:$0xff] %v10038_v32  ;;  %v9655_v58 = vmin.f32 %v9527_v8, 0.4  ;;  %v8139_v28 = vadd.f32 %v7738_v30, %v7010_v6  ;;  %v16495_v6 = vld [vmem:[#allocation101_spill] sm:$0xff] }
 0x75d   : > { %v9783_v21 = vmul.f32 2.5, %v9655_v58  ;;  %v9268_v59 = vadd.f32 %v8867_v15, %v8139_v28  ;;  %v6665_v1 = vpop.f32.mrf.mxu2 }
 0x75e   : > { %v5522_v27 = vpop.f32.mrf.mxu1  ;;  %v8321_v57 = vpop.f32.mrf.mxu0 }
 0x75f   : > { %v9911_v38 = vfloor.f32 %v9783_v21  ;;  %v9400_v22 = vadd.f32 %v14251_v39, %v9268_v59  ;;  %v7189_v34 = vpop.f32.mrf.mxu3  ;;  %v6070_v51 = vrot.slane %v5522_v27, 2  ;;  %v8869_v16 = vrot.slane %v8321_v57, 2 }
 0x760   : > { %v7739_v31 = vrot.slane %v7189_v34, 1 }
 0x761   : > { %v10039_v9 = vmul.f32 0.4, %v9911_v38  ;;  %v9528_v11 = vmax.f32 %v9400_v22, 0.0  ;;  %v6071_v46 = vsel %vm2942_vm3, %v6069_v52, %v6070_v51  ;;  %10865 = vmatmul.msk.bf16.gmra.mxu1 %vm477_vm1, %v16493_v35  ;;  %11126 = vmatmul.msk.bf16.gmra.mxu0 %vm477_vm1, %v16161_v54  ;;  %v16496_v52 = vld [vmem:[#allocation132_spill] sm:$0xff]  ;;  %v16497_v35 = vld [vmem:[#allocation133_spill] sm:$0xff] }
 0x762   : > { %v6470_v3 = vadd.f32 %v6071_v46, %v16494_v20  ;;  %10952 = vmatmul.msk.bf16.gmra.mxu2 %vm477_vm1, %v16161_v54 }
 0x763   : > { %10167 = vst [vmem:[%s14274_s11 + $0x50] sm:$0xff] %v10039_v9  ;;  %v9656_v53 = vmin.f32 %v9528_v11, 0.4 }
 0x764   : > { %11039 = vmatmul.msk.bf16.gmra.mxu3 %vm477_vm1, %v16161_v54  ;;  %v7011_v36 = vadd.f32 %v6665_v1, %v6470_v3  ;;  %v8870_v54 = vsel %vm2942_vm3, %v8868_v41, %v8869_v16 }
 0x765   : > { %v9784_v14 = vmul.f32 2.5, %v9656_v53  ;;  %v6668_v63 = vpop.f32.mrf.mxu2 }
 0x766   : > { %v5524_v7 = vpop.f32.mrf.mxu1  ;;  %v8323_v10 = vpop.f32.mrf.mxu0 }
 0x767   : > { %v9912_v37 = vfloor.f32 %v9784_v14  ;;  %v7192_v56 = vpop.f32.mrf.mxu3  ;;  %v6072_v4 = vrot.slane %v5524_v7, 2  ;;  %v8871_v21 = vrot.slane %v8323_v10, 2 }
 0x768   : > { %v7740_v40 = vrot.slane %v7192_v56, 1 }
 0x769   : > { %v10040_v12 = vmul.f32 0.4, %v9912_v37  ;;  %v6073_v32 = vsel %vm2942_vm3, %v6070_v51, %v6072_v4  ;;  %v8872_v51 = vsel %vm2942_vm3, %v8869_v16, %v8871_v21 }
 0x76a   : > { %v7741_v17 = vsel %vm1812_vm2, %v7739_v31, %v7740_v40  ;;  %v6471_v30 = vadd.f32 %v6073_v32, %v16495_v6 }
 0x76b   : > { %10168 = vst [vmem:[%s14274_s11 + $0x58] sm:$0xff] %v10040_v12  ;;  %v8140_v19 = vadd.f32 %v7741_v17, %v7011_v36 }
 0x76c   : > { %v7012_v34 = vadd.f32 %v6668_v63, %v6471_v30 }
 0x76d   : > { %v9269_v8 = vadd.f32 %v8870_v54, %v8140_v19  ;;  %v6670_v15 = vpop.f32.mrf.mxu2 }
 0x76e   : > { %v5527_v38 = vpop.f32.mrf.mxu1  ;;  %v8326_v22 = vpop.f32.mrf.mxu0 }
 0x76f   : > { %v9401_v58 = vadd.f32 %v14251_v39, %v9269_v8  ;;  %v7194_v28 = vpop.f32.mrf.mxu3  ;;  %v6074_v1 = vrot.slane %v5527_v38, 2  ;;  %v8873_v63 = vrot.slane %v8326_v22, 2  ;;  %v16498_v8 = vld [vmem:[#allocation110_spill] sm:$0xff] }
 0x770   : > { %v7742_v59 = vrot.slane %v7194_v28, 1 }
 0x771   : > { %v9529_v43 = vmax.f32 %v9401_v58, 0.0  ;;  %v6075_v11 = vsel %vm2942_vm3, %v6072_v4, %v6074_v1  ;;  %10866 = vmatmul.msk.bf16.gmra.mxu1 %vm477_vm1, %v16496_v52  ;;  %11127 = vmatmul.msk.bf16.gmra.mxu0 %vm477_vm1, %v16163_v0  ;;  %v8874_v19 = vsel %vm2942_vm3, %v8871_v21, %v8873_v63 }
 0x772   : > { %v7743_v27 = vsel %vm1812_vm2, %v7740_v40, %v7742_v59  ;;  %v6472_v14 = vadd.f32 %v6075_v11, %v16497_v35  ;;  %10953 = vmatmul.msk.bf16.gmra.mxu2 %vm477_vm1, %v16163_v0  ;;  %v16499_v11 = vld [vmem:[#allocation97_spill] sm:$0xff] }
 0x773   : > { %v9657_v57 = vmin.f32 %v9529_v43, 0.4  ;;  %v8141_v9 = vadd.f32 %v7743_v27, %v7012_v34 }
 0x774   : > { %11040 = vmatmul.msk.bf16.gmra.mxu3 %vm477_vm1, %v16163_v0  ;;  %v7013_v12 = vadd.f32 %v6670_v15, %v6472_v14 }
 0x775   : > { %v9785_v53 = vmul.f32 2.5, %v9657_v57  ;;  %v9270_v46 = vadd.f32 %v8872_v51, %v8141_v9  ;;  %v6673_v56 = vpop.f32.mrf.mxu2 }
 0x776   : > { %v5529_v16 = vpop.f32.mrf.mxu1  ;;  %v8328_v40 = vpop.f32.mrf.mxu0 }
 0x777   : > { %v9913_v20 = vfloor.f32 %v9785_v53  ;;  %v9402_v3 = vadd.f32 %v14251_v39, %v9270_v46  ;;  %v7197_v37 = vpop.f32.mrf.mxu3  ;;  %v6076_v36 = vrot.slane %v5529_v16, 2  ;;  %v8875_v38 = vrot.slane %v8328_v40, 2 }
 0x778   : > { %v7744_v31 = vrot.slane %v7197_v37, 1 }
 0x779   : > { %v10041_v7 = vmul.f32 0.4, %v9913_v20  ;;  %v9530_v10 = vmax.f32 %v9402_v3, 0.0  ;;  %v6077_v0 = vsel %vm2942_vm3, %v6074_v1, %v6076_v36  ;;  %v8876_v52 = vsel %vm2942_vm3, %v8873_v63, %v8875_v38 }
 0x77a   : > { %v7745_v4 = vsel %vm1812_vm2, %v7742_v59, %v7744_v31  ;;  %v6473_v6 = vadd.f32 %v6077_v0, %v16498_v8 }
 0x77b   : > { %10169 = vst [vmem:[%s14274_s11 + $0x60] sm:$0xff] %v10041_v7  ;;  %v9658_v41 = vmin.f32 %v9530_v10, 0.4  ;;  %v8142_v17 = vadd.f32 %v7745_v4, %v7013_v12  ;;  %v16500_v12 = vld [vmem:[#allocation112_spill] sm:$0xff] }
 0x77c   : > { %v7014_v27 = vadd.f32 %v6673_v56, %v6473_v6 }
 0x77d   : > { %v9786_v32 = vmul.f32 2.5, %v9658_v41  ;;  %v9271_v54 = vadd.f32 %v8874_v19, %v8142_v17  ;;  %v6675_v15 = vpop.f32.mrf.mxu2 }
 0x77e   : > { %v5532_v59 = vpop.f32.mrf.mxu1  ;;  %v8331_v57 = vpop.f32.mrf.mxu0 }
 0x77f   : > { %v9914_v30 = vfloor.f32 %v9786_v32  ;;  %v9403_v58 = vadd.f32 %v14251_v39, %v9271_v54  ;;  %v7199_v28 = vpop.f32.mrf.mxu3  ;;  %v6078_v63 = vrot.slane %v5532_v59, 2  ;;  %v8877_v41 = vrot.slane %v8331_v57, 2 }
 0x780   : > { %v7746_v22 = vrot.slane %v7199_v28, 1 }
 0x781   : > { %v10042_v43 = vmul.f32 0.4, %v9914_v30  ;;  %v9531_v34 = vmax.f32 %v9403_v58, 0.0  ;;  %10867 = vmatmul.msk.bf16.gmra.mxu1 %vm477_vm1, %v16499_v11  ;;  %11128 = vmatmul.msk.bf16.gmra.mxu0 %vm477_vm1, %v16166_v47 }
 0x782   : > { %v7747_v1 = vsel %vm1812_vm2, %v7744_v31, %v7746_v22  ;;  %10954 = vmatmul.msk.bf16.gmra.mxu2 %vm477_vm1, %v16166_v47  ;;  %v16501_v22 = vld [vmem:[#allocation105_spill] sm:$0xff] }
 0x783   : > { %10170 = vst [vmem:[%s14274_s11 + $0x68] sm:$0xff] %v10042_v43  ;;  %v9659_v21 = vmin.f32 %v9531_v34, 0.4  ;;  %v8143_v9 = vadd.f32 %v7747_v1, %v7014_v27 }
 0x784   : > { %11041 = vmatmul.msk.bf16.gmra.mxu3 %vm477_vm1, %v16166_v47 }
 0x785   : > { %v9787_v51 = vmul.f32 2.5, %v9659_v21  ;;  %v9272_v53 = vadd.f32 %v8876_v52, %v8143_v9  ;;  %v6677_v20 = vpop.f32.mrf.mxu2 }
 0x786   : > { %v5534_v3 = vpop.f32.mrf.mxu1  ;;  %v8333_v16 = vpop.f32.mrf.mxu0 }
 0x787   : > { %v9915_v46 = vfloor.f32 %v9787_v51  ;;  %v9404_v35 = vadd.f32 %v14251_v39, %v9272_v53  ;;  %v7202_v14 = vpop.f32.mrf.mxu3  ;;  %v6079_v31 = vrot.slane %v5534_v3, 2  ;;  %v8878_v0 = vrot.slane %v8333_v16, 2 }
 0x788   : > { %v7748_v17 = vrot.slane %v7202_v14, 1 }
 0x789   : > { %v10043_v37 = vmul.f32 0.4, %v9915_v46  ;;  %v9532_v56 = vmax.f32 %v9404_v35, 0.0  ;;  %v6080_v7 = vsel %vm2942_vm3, %v6078_v63, %v6079_v31  ;;  %v8879_v59 = vsel %vm2942_vm3, %v8877_v41, %v8878_v0 }
 0x78a   : > { %v6474_v36 = vadd.f32 %v6080_v7, %v16500_v12 }
 0x78b   : > { %10171 = vst [vmem:[%s14274_s11 + $0x70] sm:$0xff] %v10043_v37  ;;  %v9660_v40 = vmin.f32 %v9532_v56, 0.4  ;;  %v16502_v56 = vld [vmem:[#allocation118_spill] sm:$0xff] }
 0x78c   : > { %v7015_v6 = vadd.f32 %v6677_v20, %v6474_v36 }
 0x78d   : > { %v9788_v10 = vmul.f32 2.5, %v9660_v40  ;;  %v6679_v32 = vpop.f32.mrf.mxu2 }
 0x78e   : > { %v5537_v54 = vpop.f32.mrf.mxu1  ;;  %v8336_v58 = vpop.f32.mrf.mxu0 }
 0x78f   : > { %v9916_v47 = vfloor.f32 %v9788_v10  ;;  %v7204_v4 = vpop.f32.mrf.mxu3  ;;  %v6081_v30 = vrot.slane %v5537_v54, 2  ;;  %v8880_v1 = vrot.slane %v8336_v58, 2 }
 0x790   : > { %v7749_v19 = vrot.slane %v7204_v4, 1 }
 0x791   : > { %v10044_v8 = vmul.f32 0.4, %v9916_v47  ;;  %v6082_v38 = vsel %vm2942_vm3, %v6079_v31, %v6081_v30  ;;  %10868 = vmatmul.msk.bf16.gmra.mxu1 %vm477_vm1, %v16501_v22  ;;  %11129 = vmatmul.msk.bf16.gmra.mxu0 %vm477_vm1, %v16169_v13  ;;  %v8881_v3 = vsel %vm2942_vm3, %v8878_v0, %v8880_v1 }
 0x792   : > { %v7750_v28 = vsel %vm1812_vm2, %v7748_v17, %v7749_v19  ;;  %v6475_v34 = vadd.f32 %v6082_v38, %v12785_v44  ;;  %10955 = vmatmul.msk.bf16.gmra.mxu2 %vm477_vm1, %v16169_v13 }
 0x793   : > { %10172 = vst [vmem:[%s14274_s11 + $0x78] sm:$0xff] %v10044_v8  ;;  %v8144_v15 = vadd.f32 %v7750_v28, %v7015_v6  ;;  %v16503_v6 = vld [vmem:[#allocation124_spill] sm:$0xff] }
 0x794   : > { %11042 = vmatmul.msk.bf16.gmra.mxu3 %vm477_vm1, %v16169_v13  ;;  %v7016_v51 = vadd.f32 %v6679_v32, %v6475_v34 }
 0x795   : > { %v9273_v43 = vadd.f32 %v8879_v59, %v8144_v15  ;;  %v6682_v9 = vpop.f32.mrf.mxu2  ;;  %v16504_v15 = vld [vmem:[#allocation134_spill] sm:$0xff] }
 0x796   : > { %v5539_v11 = vpop.f32.mrf.mxu1  ;;  %v8338_v46 = vpop.f32.mrf.mxu0 }
 0x797   : > { %v9405_v27 = vadd.f32 %v14251_v39, %v9273_v43  ;;  %v7207_v57 = vpop.f32.mrf.mxu3  ;;  %v6083_v53 = vrot.slane %v5539_v11, 2  ;;  %v8882_v7 = vrot.slane %v8338_v46, 2 }
 0x798   : > { %v7751_v21 = vrot.slane %v7207_v57, 1 }
 0x799   : > { %v9533_v52 = vmax.f32 %v9405_v27, 0.0  ;;  %v6084_v44 = vsel %vm2942_vm3, %v6081_v30, %v6083_v53  ;;  %v8883_v30 = vsel %vm2942_vm3, %v8880_v1, %v8882_v7 }
 0x79a   : > { %v7752_v35 = vsel %vm1812_vm2, %v7749_v19, %v7751_v21  ;;  %v6476_v63 = vadd.f32 %v6084_v44, %v16502_v56 }
 0x79b   : > { %v9661_v14 = vmin.f32 %v9533_v52, 0.4  ;;  %v8145_v20 = vadd.f32 %v7752_v35, %v7016_v51 }
 0x79c   : > { %v7017_v41 = vadd.f32 %v6682_v9, %v6476_v63 }
 0x79d   : > { %v9789_v13 = vmul.f32 2.5, %v9661_v14  ;;  %v9274_v37 = vadd.f32 %v8881_v3, %v8145_v20  ;;  %v6684_v12 = vpop.f32.mrf.mxu2 }
 0x79e   : > { %v5542_v36 = vpop.f32.mrf.mxu1  ;;  %v8341_v19 = vpop.f32.mrf.mxu0 }
 0x79f   : > { %v9917_v31 = vfloor.f32 %v9789_v13  ;;  %v9406_v16 = vadd.f32 %v14251_v39, %v9274_v37  ;;  %v7209_v40 = vpop.f32.mrf.mxu3  ;;  %v6085_v17 = vrot.slane %v5542_v36, 2  ;;  %v8884_v34 = vrot.slane %v8341_v19, 2  ;;  %v16505_v36 = vld [vmem:[#allocation126_spill] sm:$0xff] }
 0x7a0   : > { %v7753_v10 = vrot.slane %v7209_v40, 1 }
 0x7a1   : > { %v10045_v47 = vmul.f32 0.4, %v9917_v31  ;;  %v9534_v4 = vmax.f32 %v9406_v16, 0.0  ;;  %v6086_v8 = vsel %vm2942_vm3, %v6083_v53, %v6085_v17  ;;  %10869 = vmatmul.msk.bf16.gmra.mxu1 %vm477_vm1, %v16503_v6  ;;  %11130 = vmatmul.msk.bf16.gmra.mxu0 %vm477_vm1, %v16172_v48 }
 0x7a2   : > { %v7754_v0 = vsel %vm1812_vm2, %v7751_v21, %v7753_v10  ;;  %v6477_v38 = vadd.f32 %v6086_v8, %v16504_v15  ;;  %10956 = vmatmul.msk.bf16.gmra.mxu2 %vm477_vm1, %v16172_v48 }
 0x7a3   : > { %10173 = vst [vmem:[%s14274_s11 + $0x80] sm:$0xff] %v10045_v47  ;;  %v9662_v32 = vmin.f32 %v9534_v4, 0.4  ;;  %v8146_v54 = vadd.f32 %v7754_v0, %v7017_v41 }
 0x7a4   : > { %11043 = vmatmul.msk.bf16.gmra.mxu3 %vm477_vm1, %v16172_v48  ;;  %v7018_v11 = vadd.f32 %v6684_v12, %v6477_v38  ;;  %v8885_v48 = vsel %vm2942_vm3, %v8882_v7, %v8884_v34 }
 0x7a5   : > { %v9790_v58 = vmul.f32 2.5, %v9662_v32  ;;  %v9275_v28 = vadd.f32 %v8883_v30, %v8146_v54  ;;  %v6687_v57 = vpop.f32.mrf.mxu2 }
 0x7a6   : > { %v5544_v1 = vpop.f32.mrf.mxu1  ;;  %v8343_v52 = vpop.f32.mrf.mxu0 }
 0x7a7   : > { %v9918_v22 = vfloor.f32 %v9790_v58  ;;  %v9407_v59 = vadd.f32 %v14251_v39, %v9275_v28  ;;  %v7212_v43 = vpop.f32.mrf.mxu3  ;;  %v6087_v31 = vrot.slane %v5544_v1, 2  ;;  %v8886_v58 = vrot.slane %v8343_v52, 2 }
 0x7a8   : > { %v7755_v27 = vrot.slane %v7212_v43, 1  ;;  %v14488_v43 = vld [vmem:[%s15653_s2] ss:$0 sm:$0xff] }
 0x7a9   : > { %v10046_v21 = vmul.f32 0.4, %v9918_v22  ;;  %v9535_v9 = vmax.f32 %v9407_v59, 0.0  ;;  %v16506_v22 = vld [vmem:[#allocation142_spill] sm:$0xff] }
 0x7aa   : > { %v7756_v51 = vsel %vm1812_vm2, %v7753_v10, %v7755_v27 }
 0x7ab   : > { %10174 = vst [vmem:[%s14274_s11 + $0x88] sm:$0xff] %v10046_v21  ;;  %v9663_v53 = vmin.f32 %v9535_v9, 0.4  ;;  %v8147_v46 = vadd.f32 %v7756_v51, %v7018_v11 }
 0x7ad   : > { %v9791_v35 = vmul.f32 2.5, %v9663_v53  ;;  %v9276_v14 = vadd.f32 %v8885_v48, %v8147_v46  ;;  %v6688_v13 = vpop.f32.mrf.mxu2 }
 0x7ae   : > { %v5547_v37 = vpop.f32.mrf.mxu1  ;;  %v8346_v40 = vpop.f32.mrf.mxu0 }
 0x7af   : > { %v9919_v20 = vfloor.f32 %v9791_v35  ;;  %v9408_v44 = vadd.f32 %v14251_v39, %v9276_v14  ;;  %v7214_v3 = vpop.f32.mrf.mxu3  ;;  %v6088_v16 = vrot.slane %v5547_v37, 2  ;;  %v8887_v17 = vrot.slane %v8346_v40, 2 }
 0x7b0   : > { %v7757_v41 = vrot.slane %v7214_v3, 1 }
 0x7b1   : > { %v10047_v56 = vmul.f32 0.4, %v9919_v20  ;;  %v9536_v63 = vmax.f32 %v9408_v44, 0.0  ;;  %v6089_v12 = vsel %vm2942_vm3, %v6087_v31, %v6088_v16  ;;  %10870 = vmatmul.msk.bf16.gmra.mxu1 %vm477_vm1, %v16505_v36  ;;  %11131 = vmatmul.msk.bf16.gmra.mxu0 %vm477_vm1, %v16176_v62  ;;  %v16507_v20 = vld [vmem:[#allocation136_spill] sm:$0xff] }
 0x7b2   : > { %v6478_v7 = vadd.f32 %v6089_v12, %v12827_v45  ;;  %10957 = vmatmul.msk.bf16.gmra.mxu2 %vm477_vm1, %v16176_v62 }
 0x7b3   : > { %10175 = vst [vmem:[%s14274_s11 + $0x90] sm:$0xff] %v10047_v56  ;;  %v9664_v10 = vmin.f32 %v9536_v63, 0.4 }
 0x7b4   : > { %11044 = vmatmul.msk.bf16.gmra.mxu3 %vm477_vm1, %v16176_v62  ;;  %v7019_v8 = vadd.f32 %v6688_v13, %v6478_v7  ;;  %v8888_v62 = vsel %vm2942_vm3, %v8886_v58, %v8887_v17 }
 0x7b5   : > { %v9792_v39 = vmul.f32 2.5, %v9664_v10  ;;  %v6691_v0 = vpop.f32.mrf.mxu2 }
 0x7b6   : > { %v5549_v32 = vpop.f32.mrf.mxu1  ;;  %v8348_v30 = vpop.f32.mrf.mxu0 }
 0x7b7   : > { %v9920_v47 = vfloor.f32 %v9792_v39  ;;  %v7217_v4 = vpop.f32.mrf.mxu3  ;;  %v6090_v6 = vrot.slane %v5549_v32, 2  ;;  %v8889_v57 = vrot.slane %v8348_v30, 2 }
 0x7b8   : > { %v7758_v19 = vrot.slane %v7217_v4, 1 }
 0x7b9   : > { %v10048_v54 = vmul.f32 0.4, %v9920_v47  ;;  %v6091_v45 = vsel %vm2942_vm3, %v6088_v16, %v6090_v6  ;;  %v8890_v44 = vsel %vm2942_vm3, %v8887_v17, %v8889_v57 }
 0x7ba   : > { %v7759_v28 = vsel %vm1812_vm2, %v7757_v41, %v7758_v19  ;;  %v6479_v59 = vadd.f32 %v6091_v45, %v16506_v22 }
 0x7bb   : > { %10176 = vst [vmem:[%s14274_s11 + $0x98] sm:$0xff] %v10048_v54  ;;  %v8148_v15 = vadd.f32 %v7759_v28, %v7019_v8  ;;  %v16508_v54 = vld [vmem:[#allocation8_spill] sm:$0xff] }
 0x7bc   : > { %v7020_v52 = vadd.f32 %v6691_v0, %v6479_v59 }
 0x7bd   : > { %v9277_v38 = vadd.f32 %v8888_v62, %v8148_v15  ;;  %v6693_v21 = vpop.f32.mrf.mxu2 }
 0x7be   : > { %v5552_v9 = vpop.f32.mrf.mxu1  ;;  %v8351_v53 = vpop.f32.mrf.mxu0 }
 0x7bf   : > { %v9409_v34 = vadd.f32 %v14488_v43, %v9277_v38  ;;  %v7219_v27 = vpop.f32.mrf.mxu3  ;;  %v6092_v51 = vrot.slane %v5552_v9, 2  ;;  %v8891_v16 = vrot.slane %v8351_v53, 2 }
 0x7c0   : > { %v7760_v1 = vrot.slane %v7219_v27, 1 }
 0x7c1   : > { %v9537_v11 = vmax.f32 %v9409_v34, 0.0  ;;  %v6093_v14 = vsel %vm2942_vm3, %v6090_v6, %v6092_v51  ;;  %10871 = vmatmul.msk.bf16.gmra.mxu1 %vm477_vm1, %v16507_v20  ;;  %11132 = vmatmul.msk.bf16.gmra.mxu0 %vm477_vm1, %v16179_v42 }
 0x7c2   : > { %v7761_v46 = vsel %vm1812_vm2, %v7758_v19, %v7760_v1  ;;  %v6480_v37 = vadd.f32 %v6093_v14, %v12851_v60  ;;  %10958 = vmatmul.msk.bf16.gmra.mxu2 %vm477_vm1, %v16179_v42  ;;  %v8892_v19 = vsel %vm2942_vm3, %v8889_v57, %v8891_v16 }
 0x7c3   : > { %v9665_v48 = vmin.f32 %v9537_v11, 0.4  ;;  %v8149_v35 = vadd.f32 %v7761_v46, %v7020_v52 }
 0x7c4   : > { %11045 = vmatmul.msk.bf16.gmra.mxu3 %vm477_vm1, %v16179_v42  ;;  %v7021_v7 = vadd.f32 %v6693_v21, %v6480_v37  ;;  %v16509_v21 = vld [vmem:[#allocation5_spill] sm:$0xff] }
 0x7c5   : > { %v9793_v3 = vmul.f32 2.5, %v9665_v48  ;;  %v9278_v13 = vadd.f32 %v8890_v44, %v8149_v35  ;;  %v6696_v10 = vpop.f32.mrf.mxu2 }
 0x7c6   : > { %v5554_v12 = vpop.f32.mrf.mxu1  ;;  %v8353_v4 = vpop.f32.mrf.mxu0 }
 0x7c7   : > { %v9921_v56 = vfloor.f32 %v9793_v3  ;;  %v9410_v63 = vadd.f32 %v14488_v43, %v9278_v13  ;;  %v7222_v31 = vpop.f32.mrf.mxu3  ;;  %v6094_v47 = vrot.slane %v5554_v12, 2  ;;  %v8893_v28 = vrot.slane %v8353_v4, 2 }
 0x7c8   : > { %v7762_v40 = vrot.slane %v7222_v31, 1  ;;  %v16510_v31 = vld [vmem:[#allocation17_spill] sm:$0xff] }
 0x7c9   : > { %v10049_v36 = vmul.f32 0.4, %v9921_v56  ;;  %v9538_v39 = vmax.f32 %v9410_v63, 0.0  ;;  %v6095_v42 = vsel %vm2942_vm3, %v6092_v51, %v6094_v47  ;;  %v8894_v9 = vsel %vm2942_vm3, %v8891_v16, %v8893_v28 }
 0x7ca   : > { %v7763_v41 = vsel %vm1812_vm2, %v7760_v1, %v7762_v40  ;;  %v6481_v8 = vadd.f32 %v6095_v42, %v16508_v54 }
 0x7cb   : > { %10177 = vst [vmem:[%s14274_s11 + $0xa0] sm:$0xff] %v10049_v36  ;;  %v9666_v60 = vmin.f32 %v9538_v39, 0.4  ;;  %v8150_v17 = vadd.f32 %v7763_v41, %v7021_v7 }
 0x7cc   : > { %v7022_v59 = vadd.f32 %v6696_v10, %v6481_v8 }
 0x7cd   : > { %v9794_v0 = vmul.f32 2.5, %v9666_v60  ;;  %v9279_v32 = vadd.f32 %v8892_v19, %v8150_v17  ;;  %v6698_v45 = vpop.f32.mrf.mxu2 }
 0x7ce   : > { %v5557_v62 = vpop.f32.mrf.mxu1  ;;  %v8356_v34 = vpop.f32.mrf.mxu0 }
 0x7cf   : > { %v9922_v6 = vfloor.f32 %v9794_v0  ;;  %v9411_v30 = vadd.f32 %v14488_v43, %v9279_v32  ;;  %v7224_v58 = vpop.f32.mrf.mxu3  ;;  %v6096_v44 = vrot.slane %v5557_v62, 2  ;;  %v8895_v10 = vrot.slane %v8356_v34, 2  ;;  %v16511_v32 = vld [vmem:[#allocation12_spill] sm:$0xff] }
 0x7d0   : > { %v7764_v15 = vrot.slane %v7224_v58, 1 }
 0x7d1   : > { %v10050_v38 = vmul.f32 0.4, %v9922_v6  ;;  %v9539_v22 = vmax.f32 %v9411_v30, 0.0  ;;  %10872 = vmatmul.msk.bf16.gmra.mxu1 %vm477_vm1, %v16509_v21  ;;  %11133 = vmatmul.msk.bf16.gmra.mxu0 %vm477_vm1, %v16183_v61 }
 0x7d2   : > { %v7765_v27 = vsel %vm1812_vm2, %v7762_v40, %v7764_v15  ;;  %10959 = vmatmul.msk.bf16.gmra.mxu2 %vm477_vm1, %v16183_v61 }
 0x7d3   : > { %10178 = vst [vmem:[%s14274_s11 + $0xa8] sm:$0xff] %v10050_v38  ;;  %v9667_v57 = vmin.f32 %v9539_v22, 0.4  ;;  %v8151_v1 = vadd.f32 %v7765_v27, %v7022_v59 }
 0x7d4   : > { %11046 = vmatmul.msk.bf16.gmra.mxu3 %vm477_vm1, %v16183_v61 }
 0x7d5   : > { %v9795_v11 = vmul.f32 2.5, %v9667_v57  ;;  %v9280_v52 = vadd.f32 %v8894_v9, %v8151_v1  ;;  %v6700_v48 = vpop.f32.mrf.mxu2 }
 0x7d6   : > { %v5559_v35 = vpop.f32.mrf.mxu1  ;;  %v8358_v13 = vpop.f32.mrf.mxu0 }
 0x7d7   : > { %v9923_v51 = vfloor.f32 %v9795_v11  ;;  %v9412_v53 = vadd.f32 %v14488_v43, %v9280_v52  ;;  %v7227_v46 = vpop.f32.mrf.mxu3  ;;  %v6097_v3 = vrot.slane %v5559_v35, 2  ;;  %v8896_v36 = vrot.slane %v8358_v13, 2  ;;  %v16512_v11 = vld [vmem:[#allocation24_spill] sm:$0xff] }
 0x7d8   : > { %v7766_v12 = vrot.slane %v7227_v46, 1 }
 0x7d9   : > { %v10051_v14 = vmul.f32 0.4, %v9923_v51  ;;  %v9540_v20 = vmax.f32 %v9412_v53, 0.0  ;;  %v6098_v56 = vsel %vm2942_vm3, %v6096_v44, %v6097_v3  ;;  %v8897_v54 = vsel %vm2942_vm3, %v8895_v10, %v8896_v36 }
 0x7da   : > { %v6482_v16 = vadd.f32 %v6098_v56, %v16510_v31 }
 0x7db   : > { %10179 = vst [vmem:[%s14274_s11 + $0xb0] sm:$0xff] %v10051_v14  ;;  %v9668_v37 = vmin.f32 %v9540_v20, 0.4 }
 0x7dc   : > { %v7023_v41 = vadd.f32 %v6700_v48, %v6482_v16 }
 0x7dd   : > { %v9796_v63 = vmul.f32 2.5, %v9668_v37  ;;  %v6702_v7 = vpop.f32.mrf.mxu2 }
 0x7de   : > { %v5562_v47 = vpop.f32.mrf.mxu1  ;;  %v8361_v17 = vpop.f32.mrf.mxu0 }
 0x7df   : > { %v9924_v61 = vfloor.f32 %v9796_v63  ;;  %v7229_v40 = vpop.f32.mrf.mxu3  ;;  %v6099_v60 = vrot.slane %v5562_v47, 2  ;;  %v8898_v28 = vrot.slane %v8361_v17, 2 }
 0x7e0   : > { %v7767_v39 = vrot.slane %v7229_v40, 1  ;;  %v16513_v40 = vld [vmem:[#allocation20_spill] sm:$0xff] }
 0x7e1   : > { %v10052_v4 = vmul.f32 0.4, %v9924_v61  ;;  %v6100_v0 = vsel %vm2942_vm3, %v6097_v3, %v6099_v60  ;;  %10873 = vmatmul.msk.bf16.gmra.mxu1 %vm477_vm1, %v16511_v32  ;;  %11134 = vmatmul.msk.bf16.gmra.mxu0 %vm477_vm1, %v16187_v49  ;;  %v8899_v21 = vsel %vm2942_vm3, %v8896_v36, %v8898_v28 }
 0x7e2   : > { %v7768_v42 = vsel %vm1812_vm2, %v7766_v12, %v7767_v39  ;;  %v6483_v6 = vadd.f32 %v6100_v0, %v12893_v2  ;;  %10960 = vmatmul.msk.bf16.gmra.mxu2 %vm477_vm1, %v16187_v49  ;;  %v16514_v12 = vld [vmem:[#allocation55_spill] sm:$0xff] }
 0x7e3   : > { %10180 = vst [vmem:[%s14274_s11 + $0xb8] sm:$0xff] %v10052_v4  ;;  %v8152_v19 = vadd.f32 %v7768_v42, %v7023_v41 }
 0x7e4   : > { %11047 = vmatmul.msk.bf16.gmra.mxu3 %vm477_vm1, %v16187_v49  ;;  %v7024_v22 = vadd.f32 %v6702_v7, %v6483_v6  ;;  %v16515_v7 = vld [vmem:[#allocation197_spill] sm:$0xff] }
 0x7e5   : > { %v9281_v8 = vadd.f32 %v8897_v54, %v8152_v19  ;;  %v6705_v45 = vpop.f32.mrf.mxu2 }
 0x7e6   : > { %v5564_v62 = vpop.f32.mrf.mxu1  ;;  %v8363_v34 = vpop.f32.mrf.mxu0 }
 0x7e7   : > { %v9413_v30 = vadd.f32 %v14488_v43, %v9281_v8  ;;  %v7232_v58 = vpop.f32.mrf.mxu3  ;;  %v6101_v59 = vrot.slane %v5564_v62, 2  ;;  %v8900_v48 = vrot.slane %v8363_v34, 2 }
 0x7e8   : > { %v7769_v15 = vrot.slane %v7232_v58, 1 }
 0x7e9   : > { %v9541_v38 = vmax.f32 %v9413_v30, 0.0  ;;  %v6102_v2 = vsel %vm2942_vm3, %v6099_v60, %v6101_v59  ;;  %v8901_v10 = vsel %vm2942_vm3, %v8898_v28, %v8900_v48 }
 0x7ea   : > { %v7770_v27 = vsel %vm1812_vm2, %v7767_v39, %v7769_v15  ;;  %v6484_v52 = vadd.f32 %v6102_v2, %v16512_v11 }
 0x7eb   : > { %v9669_v57 = vmin.f32 %v9541_v38, 0.4  ;;  %v8153_v1 = vadd.f32 %v7770_v27, %v7024_v22 }
 0x7ec   : > { %v7025_v13 = vadd.f32 %v6705_v45, %v6484_v52  ;;  %v16516_v52 = vld [vmem:[#allocation196_spill] sm:$0xff] }
 0x7ed   : > { %v9797_v49 = vmul.f32 2.5, %v9669_v57  ;;  %v9282_v9 = vadd.f32 %v8899_v21, %v8153_v1  ;;  %v6707_v14 = vpop.f32.mrf.mxu2 }
 0x7ee   : > { %v5567_v20 = vpop.f32.mrf.mxu1  ;;  %v8366_v56 = vpop.f32.mrf.mxu0 }
 0x7ef   : > { %v9925_v51 = vfloor.f32 %v9797_v49  ;;  %v9414_v53 = vadd.f32 %v14488_v43, %v9282_v9  ;;  %v7234_v46 = vpop.f32.mrf.mxu3  ;;  %v6103_v37 = vrot.slane %v5567_v20, 2  ;;  %v8902_v17 = vrot.slane %v8366_v56, 2 }
 0x7f0   : > { %v7771_v35 = vrot.slane %v7234_v46, 1  ;;  %v16518_v46 = vld [vmem:[#allocation198_spill] sm:$0xff] }
 0x7f1   : > { %v10053_v44 = vmul.f32 0.4, %v9925_v51  ;;  %v9542_v3 = vmax.f32 %v9414_v53, 0.0  ;;  %v6104_v61 = vsel %vm2942_vm3, %v6101_v59, %v6103_v37  ;;  %10874 = vmatmul.msk.bf16.gmra.mxu1 %vm477_vm1, %v16513_v40  ;;  %11135 = vmatmul.msk.bf16.gmra.mxu0 %vm477_vm1, %v16514_v12  ;;  %v16517_v51 = vld [vmem:[#allocation61_spill] sm:$0xff] }
 0x7f2   : > { %v7772_v63 = vsel %vm1812_vm2, %v7769_v15, %v7771_v35  ;;  %v6485_v47 = vadd.f32 %v6104_v61, %v16515_v7  ;;  %10961 = vmatmul.msk.bf16.gmra.mxu2 %vm477_vm1, %v16514_v12  ;;  %v8903_v15 = vsel %vm2942_vm3, %v8900_v48, %v8902_v17  ;;  %v16519_v7 = vld [vmem:[#allocation32_spill] sm:$0xff] }
 0x7f3   : > { %10181 = vst [vmem:[%s14274_s11 + $0xc0] sm:$0xff] %v10053_v44  ;;  %v9670_v31 = vmin.f32 %v9542_v3, 0.4  ;;  %v8154_v16 = vadd.f32 %v7772_v63, %v7025_v13 }
 0x7f4   : > { %11048 = vmatmul.msk.bf16.gmra.mxu3 %vm477_vm1, %v16514_v12  ;;  %v7026_v8 = vadd.f32 %v6707_v14, %v6485_v47 }
 0x7f5   : > { %v9798_v36 = vmul.f32 2.5, %v9670_v31  ;;  %v9283_v39 = vadd.f32 %v8901_v10, %v8154_v16  ;;  %v6710_v19 = vpop.f32.mrf.mxu2 }
 0x7f6   : > { %v5569_v0 = vpop.f32.mrf.mxu1  ;;  %v8368_v6 = vpop.f32.mrf.mxu0 }
 0x7f7   : > { %v9926_v4 = vfloor.f32 %v9798_v36  ;;  %v9415_v41 = vadd.f32 %v14488_v43, %v9283_v39  ;;  %v7237_v60 = vpop.f32.mrf.mxu3  ;;  %v6105_v2 = vrot.slane %v5569_v0, 2  ;;  %v8904_v61 = vrot.slane %v8368_v6, 2 }
 0x7f8   : > { %v7773_v42 = vrot.slane %v7237_v60, 1 }
 0x7f9   : > { %v10054_v32 = vmul.f32 0.4, %v9926_v4  ;;  %v9543_v54 = vmax.f32 %v9415_v41, 0.0 }
 0x7fa   : > { %v7774_v30 = vsel %vm1812_vm2, %v7771_v35, %v7773_v42 }
 0x7fb   : > { %10182 = vst [vmem:[%s14274_s11 + $0xc8] sm:$0xff] %v10054_v32  ;;  %v9671_v58 = vmin.f32 %v9543_v54, 0.4  ;;  %v8155_v28 = vadd.f32 %v7774_v30, %v7026_v8 }
 0x7fd   : > { %v9799_v45 = vmul.f32 2.5, %v9671_v58  ;;  %v9284_v62 = vadd.f32 %v8903_v15, %v8155_v28  ;;  %v6711_v34 = vpop.f32.mrf.mxu2  ;;  %v16520_v15 = vld [vmem:[#allocation28_spill] sm:$0xff] }
 0x7fe   : > { %v5572_v27 = vpop.f32.mrf.mxu1  ;;  %v8371_v49 = vpop.f32.mrf.mxu0 }
 0x7ff   : > { %v9927_v38 = vfloor.f32 %v9799_v45  ;;  %v9416_v22 = vadd.f32 %v14488_v43, %v9284_v62  ;;  %v7239_v59 = vpop.f32.mrf.mxu3  ;;  %v6106_v21 = vrot.slane %v5572_v27, 2  ;;  %v8905_v44 = vrot.slane %v8371_v49, 2  ;;  %v16521_v62 = vld [vmem:[#allocation70_spill] sm:$0xff] }
 0x800   : > { %v7775_v20 = vrot.slane %v7239_v59, 1  ;;  %v16522_v59 = vld [vmem:[#allocation200_spill] sm:$0xff] }
 0x801   : > { %v10055_v57 = vmul.f32 0.4, %v9927_v38  ;;  %v9544_v1 = vmax.f32 %v9416_v22, 0.0  ;;  %v6107_v11 = vsel %vm2942_vm3, %v6105_v2, %v6106_v21  ;;  %10875 = vmatmul.msk.bf16.gmra.mxu1 %vm477_vm1, %v16516_v52  ;;  %11136 = vmatmul.msk.bf16.gmra.mxu0 %vm477_vm1, %v16517_v51  ;;  %v8906_v36 = vsel %vm2942_vm3, %v8904_v61, %v8905_v44 }
 0x802   : > { %v6486_v48 = vadd.f32 %v6107_v11, %v16518_v46  ;;  %10962 = vmatmul.msk.bf16.gmra.mxu2 %vm477_vm1, %v16517_v51 }
 0x803   : > { %10183 = vst [vmem:[%s14274_s11 + $0xd0] sm:$0xff] %v10055_v57  ;;  %v9672_v9 = vmin.f32 %v9544_v1, 0.4 }
 0x804   : > { %11049 = vmatmul.msk.bf16.gmra.mxu3 %vm477_vm1, %v16517_v51  ;;  %v7027_v63 = vadd.f32 %v6711_v34, %v6486_v48 }
 0x805   : > { %v9800_v53 = vmul.f32 2.5, %v9672_v9  ;;  %v6714_v13 = vpop.f32.mrf.mxu2 }
 0x806   : > { %v5574_v37 = vpop.f32.mrf.mxu1  ;;  %v8373_v16 = vpop.f32.mrf.mxu0 }
 0x807   : > { %v9928_v35 = vfloor.f32 %v9800_v53  ;;  %v7242_v14 = vpop.f32.mrf.mxu3  ;;  %v6108_v31 = vrot.slane %v5574_v37, 2  ;;  %v8907_v60 = vrot.slane %v8373_v16, 2  ;;  %v16523_v37 = vld [vmem:[#allocation36_spill] sm:$0xff] }
 0x808   : > { %v7776_v3 = vrot.slane %v7242_v14, 1 }
 0x809   : > { %v10056_v56 = vmul.f32 0.4, %v9928_v35  ;;  %v6109_v12 = vsel %vm2942_vm3, %v6106_v21, %v6108_v31  ;;  %v8908_v45 = vsel %vm2942_vm3, %v8905_v44, %v8907_v60 }
 0x80a   : > { %v7777_v40 = vsel %vm1812_vm2, %v7775_v20, %v7776_v3  ;;  %v6487_v47 = vadd.f32 %v6109_v12, %v16519_v7 }
 0x80b   : > { %10184 = vst [vmem:[%s14274_s11 + $0xd8] sm:$0xff] %v10056_v56  ;;  %v8156_v10 = vadd.f32 %v7777_v40, %v7027_v63 }
 0x80c   : > { %v7028_v32 = vadd.f32 %v6714_v13, %v6487_v47 }
 0x80d   : > { %v9285_v39 = vadd.f32 %v8906_v36, %v8156_v10  ;;  %v6716_v42 = vpop.f32.mrf.mxu2 }
 0x80e   : > { %v5577_v19 = vpop.f32.mrf.mxu1  ;;  %v8376_v8 = vpop.f32.mrf.mxu0 }
 0x80f   : > { %v9417_v4 = vadd.f32 %v14488_v43, %v9285_v39  ;;  %v7244_v41 = vpop.f32.mrf.mxu3  ;;  %v6110_v54 = vrot.slane %v5577_v19, 2  ;;  %v8909_v2 = vrot.slane %v8376_v8, 2  ;;  %v16525_v19 = vld [vmem:[#allocation78_spill] sm:$0xff] }
 0x810   : > { %v7778_v17 = vrot.slane %v7244_v41, 1 }
 0x811   : > { %v9545_v0 = vmax.f32 %v9417_v4, 0.0  ;;  %v6111_v28 = vsel %vm2942_vm3, %v6108_v31, %v6110_v54  ;;  %10876 = vmatmul.msk.bf16.gmra.mxu1 %vm477_vm1, %v16520_v15  ;;  %11137 = vmatmul.msk.bf16.gmra.mxu0 %vm477_vm1, %v16521_v62  ;;  %v8910_v44 = vsel %vm2942_vm3, %v8907_v60, %v8909_v2 }
 0x812   : > { %v7779_v6 = vsel %vm1812_vm2, %v7776_v3, %v7778_v17  ;;  %v6488_v34 = vadd.f32 %v6111_v28, %v16522_v59  ;;  %10963 = vmatmul.msk.bf16.gmra.mxu2 %vm477_vm1, %v16521_v62 }
 0x813   : > { %v9673_v30 = vmin.f32 %v9545_v0, 0.4  ;;  %v8157_v58 = vadd.f32 %v7779_v6, %v7028_v32 }
 0x814   : > { %11050 = vmatmul.msk.bf16.gmra.mxu3 %vm477_vm1, %v16521_v62  ;;  %v7029_v51 = vadd.f32 %v6716_v42, %v6488_v34 }
 0x815   : > { %v9801_v38 = vmul.f32 2.5, %v9673_v30  ;;  %v9286_v22 = vadd.f32 %v8908_v45, %v8157_v58  ;;  %v6719_v49 = vpop.f32.mrf.mxu2 }
 0x816   : > { %v5579_v9 = vpop.f32.mrf.mxu1  ;;  %v8378_v46 = vpop.f32.mrf.mxu0 }
 0x817   : > { %v9929_v27 = vfloor.f32 %v9801_v38  ;;  %v9418_v57 = vadd.f32 %v14488_v43, %v9286_v22  ;;  %v7247_v1 = vpop.f32.mrf.mxu3  ;;  %v6112_v53 = vrot.slane %v5579_v9, 2  ;;  %v8911_v61 = vrot.slane %v8378_v46, 2 }
 0x818   : > { %v7780_v21 = vrot.slane %v7247_v1, 1 }
 0x819   : > { %v10057_v11 = vmul.f32 0.4, %v9929_v27  ;;  %v9546_v52 = vmax.f32 %v9418_v57, 0.0  ;;  %v6113_v20 = vsel %vm2942_vm3, %v6110_v54, %v6112_v53  ;;  %v8912_v42 = vsel %vm2942_vm3, %v8909_v2, %v8911_v61  ;;  %v16526_v27 = vld [vmem:[#allocation37_spill] sm:$0xff] }
 0x81a   : > { %v7781_v48 = vsel %vm1812_vm2, %v7778_v17, %v7780_v21  ;;  %v6489_v56 = vadd.f32 %v6113_v20, %v16523_v37  ;;  %v16524_v17 = vld [vmem:[#allocation199_spill] sm:$0xff]  ;;  %v16528_v37 = vld [vmem:[#allocation90_spill] sm:$0xff] }
 0x81b   : > { %10185 = vst [vmem:[%s14274_s11 + $0xe0] sm:$0xff] %v10057_v11  ;;  %v9674_v35 = vmin.f32 %v9546_v52, 0.4  ;;  %v8158_v14 = vadd.f32 %v7781_v48, %v7029_v51 }
 0x81c   : > { %v7030_v7 = vadd.f32 %v6719_v49, %v6489_v56 }
 0x81d   : > { %v9802_v3 = vmul.f32 2.5, %v9674_v35  ;;  %v9287_v13 = vadd.f32 %v8910_v44, %v8158_v14  ;;  %v6721_v10 = vpop.f32.mrf.mxu2 }
 0x81e   : > { %v5582_v12 = vpop.f32.mrf.mxu1  ;;  %v8381_v47 = vpop.f32.mrf.mxu0 }
 0x81f   : > { %v9930_v63 = vfloor.f32 %v9802_v3  ;;  %v9419_v31 = vadd.f32 %v14488_v43, %v9287_v13  ;;  %v7249_v16 = vpop.f32.mrf.mxu3  ;;  %v6114_v45 = vrot.slane %v5582_v12, 2  ;;  %v16527_v3 = vld [vmem:[#allocation201_spill] sm:$0xff] }
 0x820   : > { %v7782_v40 = vrot.slane %v7249_v16, 1 }
 0x821   : > { %v10058_v36 = vmul.f32 0.4, %v9930_v63  ;;  %v9547_v39 = vmax.f32 %v9419_v31, 0.0  ;;  %10877 = vmatmul.msk.bf16.gmra.mxu1 %vm477_vm1, %v16524_v17  ;;  %11138 = vmatmul.msk.bf16.gmra.mxu0 %vm477_vm1, %v16525_v19  ;;  %v16529_v63 = vld [vmem:[#allocation42_spill] sm:$0xff] }
 0x822   : > { %v7783_v4 = vsel %vm1812_vm2, %v7780_v21, %v7782_v40  ;;  %10964 = vmatmul.msk.bf16.gmra.mxu2 %vm477_vm1, %v16525_v19  ;;  %v8913_v21 = vrot.slane %v8381_v47, 2 }
 0x823   : > { %10186 = vst [vmem:[%s14274_s11 + $0xe8] sm:$0xff] %v10058_v36  ;;  %v9675_v41 = vmin.f32 %v9547_v39, 0.4  ;;  %v8159_v60 = vadd.f32 %v7783_v4, %v7030_v7 }
 0x824   : > { %11051 = vmatmul.msk.bf16.gmra.mxu3 %vm477_vm1, %v16525_v19 }
 0x825   : > { %v9803_v0 = vmul.f32 2.5, %v9675_v41  ;;  %v9288_v32 = vadd.f32 %v8912_v42, %v8159_v60  ;;  %v6723_v30 = vpop.f32.mrf.mxu2 }
 0x826   : > { %v5584_v58 = vpop.f32.mrf.mxu1  ;;  %v8383_v38 = vpop.f32.mrf.mxu0 }
 0x827   : > { %v9931_v54 = vfloor.f32 %v9803_v0  ;;  %v9420_v8 = vadd.f32 %v14488_v43, %v9288_v32  ;;  %v7252_v6 = vpop.f32.mrf.mxu3  ;;  %v6115_v62 = vrot.slane %v5584_v58, 2  ;;  %v8914_v9 = vrot.slane %v8383_v38, 2 }
 0x828   : > { %v7784_v49 = vrot.slane %v7252_v6, 1 }
 0x829   : > { %v10059_v28 = vmul.f32 0.4, %v9931_v54  ;;  %v9548_v15 = vmax.f32 %v9420_v8, 0.0  ;;  %v6116_v59 = vsel %vm2942_vm3, %v6114_v45, %v6115_v62  ;;  %v8915_v13 = vsel %vm2942_vm3, %v8913_v21, %v8914_v9  ;;  %v16530_v54 = vld [vmem:[#allocation47_spill] sm:$0xff] }
 0x82a   : > { %v6490_v57 = vadd.f32 %v6116_v59, %v16526_v27 }
 0x82b   : > { %10187 = vst [vmem:[%s14274_s11 + $0xf0] sm:$0xff] %v10059_v28  ;;  %v9676_v22 = vmin.f32 %v9548_v15, 0.4 }
 0x82c   : > { %v7031_v46 = vadd.f32 %v6723_v30, %v6490_v57 }
 0x82d   : > { %v9804_v34 = vmul.f32 2.5, %v9676_v22  ;;  %v6725_v52 = vpop.f32.mrf.mxu2 }
 0x82e   : > { %v5587_v51 = vpop.f32.mrf.mxu1  ;;  %v8386_v35 = vpop.f32.mrf.mxu0 }
 0x82f   : > { %v9932_v1 = vfloor.f32 %v9804_v34  ;;  %v7254_v2 = vpop.f32.mrf.mxu3  ;;  %v6117_v48 = vrot.slane %v5587_v51, 2  ;;  %v8916_v40 = vrot.slane %v8386_v35, 2 }
 0x830   : > { %v7785_v11 = vrot.slane %v7254_v2, 1 }
 0x831   : > { %v10060_v53 = vmul.f32 0.4, %v9932_v1  ;;  %v6118_v44 = vsel %vm2942_vm3, %v6115_v62, %v6117_v48  ;;  %10878 = vmatmul.msk.bf16.gmra.mxu1 %vm477_vm1, %v16527_v3  ;;  %11139 = vmatmul.msk.bf16.gmra.mxu0 %vm477_vm1, %v16528_v37  ;;  %v8917_v19 = vsel %vm2942_vm3, %v8914_v9, %v8916_v40 }
 0x832   : > { %v7786_v14 = vsel %vm1812_vm2, %v7784_v49, %v7785_v11  ;;  %v6491_v31 = vadd.f32 %v6118_v44, %v16529_v63  ;;  %10965 = vmatmul.msk.bf16.gmra.mxu2 %vm477_vm1, %v16528_v37  ;;  %v16531_v49 = vld [vmem:[#allocation46_spill] sm:$0xff] }
 0x833   : > { %10188 = vst [vmem:[%s14274_s11 + $0xf8] sm:$0xff] %v10060_v53  ;;  %v8160_v20 = vadd.f32 %v7786_v14, %v7031_v46  ;;  %v16533_v53 = vld [vmem:[#allocation202_spill] sm:$0xff] }
 0x834   : > { %11052 = vmatmul.msk.bf16.gmra.mxu3 %vm477_vm1, %v16528_v37  ;;  %v7032_v7 = vadd.f32 %v6725_v52, %v6491_v31 }
 0x835   : > { %v9289_v56 = vadd.f32 %v8915_v13, %v8160_v20  ;;  %v6728_v12 = vpop.f32.mrf.mxu2 }
 0x836   : > { %v5589_v36 = vpop.f32.mrf.mxu1  ;;  %v8388_v4 = vpop.f32.mrf.mxu0 }
 0x837   : > { %v9421_v16 = vadd.f32 %v14488_v43, %v9289_v56  ;;  %v7257_v61 = vpop.f32.mrf.mxu3  ;;  %v6119_v47 = vrot.slane %v5589_v36, 2  ;;  %v8918_v28 = vrot.slane %v8388_v4, 2 }
 0x838   : > { %v7787_v10 = vrot.slane %v7257_v61, 1 }
 0x839   : > { %v9549_v39 = vmax.f32 %v9421_v16, 0.0  ;;  %v6120_v42 = vsel %vm2942_vm3, %v6117_v48, %v6119_v47  ;;  %v8919_v9 = vsel %vm2942_vm3, %v8916_v40, %v8918_v28 }
 0x83a   : > { %v7788_v41 = vsel %vm1812_vm2, %v7785_v11, %v7787_v10  ;;  %v6492_v8 = vadd.f32 %v6120_v42, %v16530_v54  ;;  %v16532_v11 = vld [vmem:[#allocation102_spill] sm:$0xff] }
 0x83b   : > { %v9677_v60 = vmin.f32 %v9549_v39, 0.4  ;;  %v8161_v17 = vadd.f32 %v7788_v41, %v7032_v7 }
 0x83c   : > { %v7033_v59 = vadd.f32 %v6728_v12, %v6492_v8  ;;  %v16534_v8 = vld [vmem:[#allocation52_spill] sm:$0xff] }
 0x83d   : > { %v9805_v0 = vmul.f32 2.5, %v9677_v60  ;;  %v9290_v32 = vadd.f32 %v8917_v19, %v8161_v17  ;;  %v6730_v45 = vpop.f32.mrf.mxu2 }
 0x83e   : > { %v5592_v62 = vpop.f32.mrf.mxu1  ;;  %v8391_v27 = vpop.f32.mrf.mxu0 }
 0x83f   : > { %v9933_v6 = vfloor.f32 %v9805_v0  ;;  %v9422_v30 = vadd.f32 %v14488_v43, %v9290_v32  ;;  %v7259_v58 = vpop.f32.mrf.mxu3  ;;  %v6121_v34 = vrot.slane %v5592_v62, 2  ;;  %v8920_v20 = vrot.slane %v8391_v27, 2 }
 0x840   : > { %v7789_v15 = vrot.slane %v7259_v58, 1  ;;  %v16536_v58 = vld [vmem:[#allocation203_spill] sm:$0xff] }
 0x841   : > { %v10061_v38 = vmul.f32 0.4, %v9933_v6  ;;  %v9550_v22 = vmax.f32 %v9422_v30, 0.0  ;;  %v6122_v21 = vsel %vm2942_vm3, %v6119_v47, %v6121_v34  ;;  %10879 = vmatmul.msk.bf16.gmra.mxu1 %vm477_vm1, %v16531_v49  ;;  %11140 = vmatmul.msk.bf16.gmra.mxu0 %vm477_vm1, %v16532_v11  ;;  %v16535_v6 = vld [vmem:[#allocation111_spill] sm:$0xff] }
 0x842   : > { %v7790_v57 = vsel %vm1812_vm2, %v7787_v10, %v7789_v15  ;;  %v6493_v46 = vadd.f32 %v6122_v21, %v16533_v53  ;;  %10966 = vmatmul.msk.bf16.gmra.mxu2 %vm477_vm1, %v16532_v11  ;;  %v8921_v10 = vsel %vm2942_vm3, %v8918_v28, %v8920_v20  ;;  %v16537_v53 = vld [vmem:[#allocation62_spill] sm:$0xff] }
 0x843   : > { %10189 = vst [vmem:[%s14274_s11 + $0x100] sm:$0xff] %v10061_v38  ;;  %v9678_v1 = vmin.f32 %v9550_v22, 0.4  ;;  %v8162_v2 = vadd.f32 %v7790_v57, %v7033_v59 }
 0x844   : > { %11053 = vmatmul.msk.bf16.gmra.mxu3 %vm477_vm1, %v16532_v11  ;;  %v7034_v63 = vadd.f32 %v6730_v45, %v6493_v46 }
 0x845   : > { %v9806_v52 = vmul.f32 2.5, %v9678_v1  ;;  %v9291_v51 = vadd.f32 %v8919_v9, %v8162_v2  ;;  %v6733_v3 = vpop.f32.mrf.mxu2 }
 0x846   : > { %v5594_v13 = vpop.f32.mrf.mxu1  ;;  %v8393_v31 = vpop.f32.mrf.mxu0 }
 0x847   : > { %v9934_v48 = vfloor.f32 %v9806_v52  ;;  %v9423_v35 = vadd.f32 %v14488_v43, %v9291_v51  ;;  %v7262_v14 = vpop.f32.mrf.mxu3  ;;  %v6123_v42 = vrot.slane %v5594_v13, 2  ;;  %v8922_v21 = vrot.slane %v8393_v31, 2 }
 0x848   : > { %v7791_v44 = vrot.slane %v7262_v14, 1 }
 0x849   : > { %v10062_v37 = vmul.f32 0.4, %v9934_v48  ;;  %v9551_v56 = vmax.f32 %v9423_v35, 0.0 }
 0x84a   : > { %v7792_v16 = vsel %vm1812_vm2, %v7789_v15, %v7791_v44 }
 0x84b   : > { %10190 = vst [vmem:[%s14274_s11 + $0x108] sm:$0xff] %v10062_v37  ;;  %v9679_v61 = vmin.f32 %v9551_v56, 0.4  ;;  %v8163_v40 = vadd.f32 %v7792_v16, %v7034_v63 }
 0x84d   : > { %v9807_v12 = vmul.f32 2.5, %v9679_v61  ;;  %v9292_v36 = vadd.f32 %v8921_v10, %v8163_v40  ;;  %v6734_v4 = vpop.f32.mrf.mxu2  ;;  %v16538_v10 = vld [vmem:[#allocation58_spill] sm:$0xff] }
 0x84e   : > { %v5597_v41 = vpop.f32.mrf.mxu1  ;;  %v8396_v0 = vpop.f32.mrf.mxu0 }
 0x84f   : > { %v9935_v39 = vfloor.f32 %v9807_v12  ;;  %v9424_v7 = vadd.f32 %v14488_v43, %v9292_v36  ;;  %v7264_v47 = vpop.f32.mrf.mxu3  ;;  %v6124_v19 = vrot.slane %v5597_v41, 2  ;;  %v8923_v38 = vrot.slane %v8396_v0, 2  ;;  %v16539_v36 = vld [vmem:[#allocation125_spill] sm:$0xff] }
 0x850   : > { %v7793_v62 = vrot.slane %v7264_v47, 1  ;;  %v16540_v47 = vld [vmem:[#allocation204_spill] sm:$0xff] }
 0x851   : > { %v10063_v60 = vmul.f32 0.4, %v9935_v39  ;;  %v9552_v17 = vmax.f32 %v9424_v7, 0.0  ;;  %v6125_v54 = vsel %vm2942_vm3, %v6123_v42, %v6124_v19  ;;  %10880 = vmatmul.msk.bf16.gmra.mxu1 %vm477_vm1, %v16534_v8  ;;  %11141 = vmatmul.msk.bf16.gmra.mxu0 %vm477_vm1, %v16535_v6  ;;  %v8924_v52 = vsel %vm2942_vm3, %v8922_v21, %v8923_v38 }
 0x852   : > { %v6494_v28 = vadd.f32 %v6125_v54, %v16536_v58  ;;  %10967 = vmatmul.msk.bf16.gmra.mxu2 %vm477_vm1, %v16535_v6 }
 0x853   : > { %10191 = vst [vmem:[%s14274_s11 + $0x110] sm:$0xff] %v10063_v60  ;;  %v9680_v32 = vmin.f32 %v9552_v17, 0.4 }
 0x854   : > { %11054 = vmatmul.msk.bf16.gmra.mxu3 %vm477_vm1, %v16535_v6  ;;  %v7035_v57 = vadd.f32 %v6734_v4, %v6494_v28 }
 0x855   : > { %v9808_v30 = vmul.f32 2.5, %v9680_v32  ;;  %v6737_v59 = vpop.f32.mrf.mxu2 }
 0x856   : > { %v5599_v34 = vpop.f32.mrf.mxu1  ;;  %v8398_v2 = vpop.f32.mrf.mxu0 }
 0x857   : > { %v9936_v15 = vfloor.f32 %v9808_v30  ;;  %v7267_v45 = vpop.f32.mrf.mxu3  ;;  %v6126_v1 = vrot.slane %v5599_v34, 2  ;;  %v8925_v14 = vrot.slane %v8398_v2, 2  ;;  %v16541_v34 = vld [vmem:[#allocation72_spill] sm:$0xff] }
 0x858   : > { %v7794_v22 = vrot.slane %v7267_v45, 1 }
 0x859   : > { %v10064_v27 = vmul.f32 0.4, %v9936_v15  ;;  %v6127_v11 = vsel %vm2942_vm3, %v6124_v19, %v6126_v1  ;;  %v8926_v12 = vsel %vm2942_vm3, %v8923_v38, %v8925_v14 }
 0x85a   : > { %v7795_v49 = vsel %vm1812_vm2, %v7793_v62, %v7794_v22  ;;  %v6495_v46 = vadd.f32 %v6127_v11, %v16537_v53 }
 0x85b   : > { %10192 = vst [vmem:[%s14274_s11 + $0x118] sm:$0xff] %v10064_v27  ;;  %v8164_v9 = vadd.f32 %v7795_v49, %v7035_v57 }
 0x85c   : > { %v7036_v37 = vadd.f32 %v6737_v59, %v6495_v46 }
 0x85d   : > { %v9293_v51 = vadd.f32 %v8924_v52, %v8164_v9  ;;  %v6739_v44 = vpop.f32.mrf.mxu2 }
 0x85e   : > { %v5602_v3 = vpop.f32.mrf.mxu1  ;;  %v8401_v63 = vpop.f32.mrf.mxu0 }
 0x85f   : > { %v9425_v48 = vadd.f32 %v14488_v43, %v9293_v51  ;;  %v7269_v35 = vpop.f32.mrf.mxu3  ;;  %v6128_v56 = vrot.slane %v5602_v3, 2  ;;  %v8927_v42 = vrot.slane %v8401_v63, 2 }
 0x860   : > { %v7796_v20 = vrot.slane %v7269_v35, 1 }
 0x861   : > { %v9553_v13 = vmax.f32 %v9425_v48, 0.0  ;;  %v6129_v40 = vsel %vm2942_vm3, %v6126_v1, %v6128_v56  ;;  %10881 = vmatmul.msk.bf16.gmra.mxu1 %vm477_vm1, %v16538_v10  ;;  %11142 = vmatmul.msk.bf16.gmra.mxu0 %vm477_vm1, %v16539_v36  ;;  %v8928_v38 = vsel %vm2942_vm3, %v8925_v14, %v8927_v42 }
 0x862   : > { %v7797_v31 = vsel %vm1812_vm2, %v7794_v22, %v7796_v20  ;;  %v6496_v4 = vadd.f32 %v6129_v40, %v16540_v47  ;;  %10968 = vmatmul.msk.bf16.gmra.mxu2 %vm477_vm1, %v16539_v36 }
 0x863   : > { %v9681_v16 = vmin.f32 %v9553_v13, 0.4  ;;  %v8165_v61 = vadd.f32 %v7797_v31, %v7036_v37 }
 0x864   : > { %11055 = vmatmul.msk.bf16.gmra.mxu3 %vm477_vm1, %v16539_v36  ;;  %v7037_v6 = vadd.f32 %v6739_v44, %v6496_v4  ;;  %v16543_v4 = vld [vmem:[#allocation80_spill] sm:$0xff] }
 0x865   : > { %v9809_v39 = vmul.f32 2.5, %v9681_v16  ;;  %v9294_v7 = vadd.f32 %v8926_v12, %v8165_v61  ;;  %v6742_v0 = vpop.f32.mrf.mxu2 }
 0x866   : > { %v5604_v32 = vpop.f32.mrf.mxu1  ;;  %v8403_v58 = vpop.f32.mrf.mxu0 }
 0x867   : > { %v9937_v41 = vfloor.f32 %v9809_v39  ;;  %v9426_v60 = vadd.f32 %v14488_v43, %v9294_v7  ;;  %v7272_v17 = vpop.f32.mrf.mxu3  ;;  %v6130_v30 = vrot.slane %v5604_v32, 2  ;;  %v8929_v21 = vrot.slane %v8403_v58, 2 }
 0x868   : > { %v7798_v19 = vrot.slane %v7272_v17, 1 }
 0x869   : > { %v10065_v54 = vmul.f32 0.4, %v9937_v41  ;;  %v9554_v8 = vmax.f32 %v9426_v60, 0.0  ;;  %v6131_v62 = vsel %vm2942_vm3, %v6128_v56, %v6130_v30  ;;  %v8930_v44 = vsel %vm2942_vm3, %v8927_v42, %v8929_v21 }
 0x86a   : > { %v7799_v28 = vsel %vm1812_vm2, %v7796_v20, %v7798_v19  ;;  %v6497_v27 = vadd.f32 %v6131_v62, %v16541_v34  ;;  %v16542_v20 = vld [vmem:[#allocation67_spill] sm:$0xff]  ;;  %v16544_v62 = vld [vmem:[#allocation205_spill] sm:$0xff]  ;;  %v16546_v34 = vld [vmem:[#allocation206_spill] sm:$0xff] }
 0x86b   : > { %10193 = vst [vmem:[%s14274_s11 + $0x120] sm:$0xff] %v10065_v54  ;;  %v9682_v15 = vmin.f32 %v9554_v8, 0.4  ;;  %v8166_v45 = vadd.f32 %v7799_v28, %v7037_v6 }
 0x86c   : > { %v7038_v53 = vadd.f32 %v6742_v0, %v6497_v27 }
 0x86d   : > { %v9810_v22 = vmul.f32 2.5, %v9682_v15  ;;  %v9295_v59 = vadd.f32 %v8928_v38, %v8166_v45  ;;  %v6744_v9 = vpop.f32.mrf.mxu2 }
 0x86e   : > { %v5607_v11 = vpop.f32.mrf.mxu1  ;;  %v8406_v46 = vpop.f32.mrf.mxu0 }
 0x86f   : > { %v9938_v57 = vfloor.f32 %v9810_v22  ;;  %v9427_v1 = vadd.f32 %v14488_v43, %v9295_v59  ;;  %v7274_v2 = vpop.f32.mrf.mxu3  ;;  %v6132_v10 = vrot.slane %v5607_v11, 2  ;;  %v8931_v17 = vrot.slane %v8406_v46, 2  ;;  %v16545_v22 = vld [vmem:[#allocation147_spill] sm:$0xff] }
 0x870   : > { %v7800_v49 = vrot.slane %v7274_v2, 1 }
 0x871   : > { %v10066_v52 = vmul.f32 0.4, %v9938_v57  ;;  %v9555_v51 = vmax.f32 %v9427_v1, 0.0  ;;  %10882 = vmatmul.msk.bf16.gmra.mxu1 %vm477_vm1, %v16542_v20  ;;  %11143 = vmatmul.msk.bf16.gmra.mxu0 %vm477_vm1, %v16235_v18 }
 0x872   : > { %v7801_v48 = vsel %vm1812_vm2, %v7798_v19, %v7800_v49  ;;  %10969 = vmatmul.msk.bf16.gmra.mxu2 %vm477_vm1, %v16235_v18 }
 0x873   : > { %10194 = vst [vmem:[%s14274_s11 + $0x128] sm:$0xff] %v10066_v52  ;;  %v9683_v35 = vmin.f32 %v9555_v51, 0.4  ;;  %v8167_v14 = vadd.f32 %v7801_v48, %v7038_v53 }
 0x874   : > { %11056 = vmatmul.msk.bf16.gmra.mxu3 %vm477_vm1, %v16235_v18 }
 0x875   : > { %v9811_v3 = vmul.f32 2.5, %v9683_v35  ;;  %v9296_v13 = vadd.f32 %v8930_v44, %v8167_v14  ;;  %v6746_v31 = vpop.f32.mrf.mxu2 }
 0x876   : > { %v5609_v16 = vpop.f32.mrf.mxu1  ;;  %v8408_v36 = vpop.f32.mrf.mxu0 }
 0x877   : > { %v9939_v37 = vfloor.f32 %v9811_v3  ;;  %v9428_v56 = vadd.f32 %v14488_v43, %v9296_v13  ;;  %v7277_v63 = vpop.f32.mrf.mxu3  ;;  %v6133_v12 = vrot.slane %v5609_v16, 2  ;;  %v8932_v19 = vrot.slane %v8408_v36, 2 }
 0x878   : > { %v7802_v42 = vrot.slane %v7277_v63, 1 }
 0x879   : > { %v10067_v61 = vmul.f32 0.4, %v9939_v37  ;;  %v9556_v40 = vmax.f32 %v9428_v56, 0.0  ;;  %v6134_v7 = vsel %vm2942_vm3, %v6132_v10, %v6133_v12  ;;  %v8933_v38 = vsel %vm2942_vm3, %v8931_v17, %v8932_v19  ;;  %v14722_v56 = vld [vmem:[%s15653_s2] ss:$0 sm:$0xff]  ;;  %v16548_v17 = vld [vmem:[#allocation86_spill] sm:$0xff] }
 0x87a   : > { %v6498_v41 = vadd.f32 %v6134_v7, %v16543_v4 }
 0x87b   : > { %10195 = vst [vmem:[%s14274_s11 + $0x130] sm:$0xff] %v10067_v61  ;;  %v9684_v39 = vmin.f32 %v9556_v40, 0.4 }
 0x87c   : > { %v7039_v6 = vadd.f32 %v6746_v31, %v6498_v41 }
 0x87d   : > { %v9812_v47 = vmul.f32 2.5, %v9684_v39  ;;  %v6748_v32 = vpop.f32.mrf.mxu2 }
 0x87e   : > { %v5612_v54 = vpop.f32.mrf.mxu1  ;;  %v8411_v58 = vpop.f32.mrf.mxu0 }
 0x87f   : > { %v9940_v18 = vfloor.f32 %v9812_v47  ;;  %v7279_v60 = vpop.f32.mrf.mxu3  ;;  %v6135_v30 = vrot.slane %v5612_v54, 2  ;;  %v8934_v2 = vrot.slane %v8411_v58, 2 }
 0x880   : > { %v7803_v0 = vrot.slane %v7279_v60, 1 }
 0x881   : > { %v10068_v8 = vmul.f32 0.4, %v9940_v18  ;;  %v6136_v45 = vsel %vm2942_vm3, %v6133_v12, %v6135_v30  ;;  %10883 = vmatmul.msk.bf16.gmra.mxu1 %vm477_vm1, %v16544_v62  ;;  %11144 = vmatmul.msk.bf16.gmra.mxu0 %vm477_vm1, %v16545_v22  ;;  %v8935_v20 = vsel %vm2942_vm3, %v8932_v19, %v8934_v2 }
 0x882   : > { %v7804_v28 = vsel %vm1812_vm2, %v7802_v42, %v7803_v0  ;;  %v6499_v27 = vadd.f32 %v6136_v45, %v16546_v34  ;;  %10970 = vmatmul.msk.bf16.gmra.mxu2 %vm477_vm1, %v16545_v22 }
 0x883   : > { %10196 = vst [vmem:[%s14274_s11 + $0x138] sm:$0xff] %v10068_v8  ;;  %v8168_v15 = vadd.f32 %v7804_v28, %v7039_v6 }
 0x884   : > { %11057 = vmatmul.msk.bf16.gmra.mxu3 %vm477_vm1, %v16545_v22  ;;  %v7040_v52 = vadd.f32 %v6748_v32, %v6499_v27  ;;  %v16549_v32 = vld [vmem:[#allocation207_spill] sm:$0xff] }
 0x885   : > { %v9297_v59 = vadd.f32 %v8933_v38, %v8168_v15  ;;  %v6751_v49 = vpop.f32.mrf.mxu2 }
 0x886   : > { %v5614_v9 = vpop.f32.mrf.mxu1  ;;  %v8413_v53 = vpop.f32.mrf.mxu0 }
 0x887   : > { %v9429_v57 = vadd.f32 %v14488_v43, %v9297_v59  ;;  %v7282_v1 = vpop.f32.mrf.mxu3  ;;  %v6137_v51 = vrot.slane %v5614_v9, 2  ;;  %v16547_v43 = vld [vmem:[#allocation92_spill] sm:$0xff]  ;;  %v8936_v16 = vrot.slane %v8413_v53, 2 }
 0x888   : > { %v7805_v21 = vrot.slane %v7282_v1, 1 }
 0x889   : > { %v9557_v11 = vmax.f32 %v9429_v57, 0.0  ;;  %v6138_v14 = vsel %vm2942_vm3, %v6135_v30, %v6137_v51  ;;  %v8937_v42 = vsel %vm2942_vm3, %v8934_v2, %v8936_v16 }
 0x88a   : > { %v7806_v46 = vsel %vm1812_vm2, %v7803_v0, %v7805_v21  ;;  %v6500_v13 = vadd.f32 %v6138_v14, %v16547_v43  ;;  %v16551_v43 = vld [vmem:[#allocation208_spill] sm:$0xff] }
 0x88b   : > { %v9685_v48 = vmin.f32 %v9557_v11, 0.4  ;;  %v8169_v35 = vadd.f32 %v7806_v46, %v7040_v52 }
 0x88c   : > { %v7041_v39 = vadd.f32 %v6751_v49, %v6500_v13 }
 0x88d   : > { %v9813_v44 = vmul.f32 2.5, %v9685_v48  ;;  %v9298_v3 = vadd.f32 %v8935_v20, %v8169_v35  ;;  %v6753_v40 = vpop.f32.mrf.mxu2 }
 0x88e   : > { %v5617_v10 = vpop.f32.mrf.mxu1  ;;  %v8416_v47 = vpop.f32.mrf.mxu0 }
 0x88f   : > { %v9941_v37 = vfloor.f32 %v9813_v44  ;;  %v9430_v63 = vadd.f32 %v14722_v56, %v9298_v3  ;;  %v7284_v31 = vpop.f32.mrf.mxu3  ;;  %v6139_v7 = vrot.slane %v5617_v10, 2  ;;  %v8938_v58 = vrot.slane %v8416_v47, 2  ;;  %v16550_v44 = vld [vmem:[#allocation98_spill] sm:$0xff] }
 0x890   : > { %v7807_v61 = vrot.slane %v7284_v31, 1 }
 0x891   : > { %v10069_v12 = vmul.f32 0.4, %v9941_v37  ;;  %v9558_v36 = vmax.f32 %v9430_v63, 0.0  ;;  %v6140_v60 = vsel %vm2942_vm3, %v6137_v51, %v6139_v7  ;;  %10884 = vmatmul.msk.bf16.gmra.mxu1 %vm477_vm1, %v16548_v17  ;;  %11145 = vmatmul.msk.bf16.gmra.mxu0 %vm477_vm1, %v16243_v24  ;;  %v16552_v17 = vld [vmem:[#allocation113_spill] sm:$0xff] }
 0x892   : > { %v7808_v4 = vsel %vm1812_vm2, %v7805_v21, %v7807_v61  ;;  %v6501_v54 = vadd.f32 %v6140_v60, %v16549_v32  ;;  %10971 = vmatmul.msk.bf16.gmra.mxu2 %vm477_vm1, %v16243_v24 }
 0x893   : > { %10197 = vst [vmem:[%s14274_s11 + $0x140] sm:$0xff] %v10069_v12  ;;  %v9686_v41 = vmin.f32 %v9558_v36, 0.4  ;;  %v8170_v18 = vadd.f32 %v7808_v4, %v7041_v39 }
 0x894   : > { %11058 = vmatmul.msk.bf16.gmra.mxu3 %vm477_vm1, %v16243_v24  ;;  %v7042_v22 = vadd.f32 %v6753_v40, %v6501_v54  ;;  %v8939_v24 = vsel %vm2942_vm3, %v8936_v16, %v8938_v58 }
 0x895   : > { %v9814_v19 = vmul.f32 2.5, %v9686_v41  ;;  %v9299_v0 = vadd.f32 %v8937_v42, %v8170_v18  ;;  %v6756_v15 = vpop.f32.mrf.mxu2 }
 0x896   : > { %v5619_v45 = vpop.f32.mrf.mxu1  ;;  %v8418_v59 = vpop.f32.mrf.mxu0 }
 0x897   : > { %v9942_v8 = vfloor.f32 %v9814_v19  ;;  %v9431_v6 = vadd.f32 %v14722_v56, %v9299_v0  ;;  %v7287_v30 = vpop.f32.mrf.mxu3  ;;  %v6141_v46 = vrot.slane %v5619_v45, 2  ;;  %v8940_v47 = vrot.slane %v8418_v59, 2  ;;  %v16553_v59 = vld [vmem:[#allocation106_spill] sm:$0xff] }
 0x898   : > { %v7809_v28 = vrot.slane %v7287_v30, 1 }
 0x899   : > { %v10070_v62 = vmul.f32 0.4, %v9942_v8  ;;  %v9559_v38 = vmax.f32 %v9431_v6, 0.0 }
 0x89a   : > { %v7810_v34 = vsel %vm1812_vm2, %v7807_v61, %v7809_v28 }
 0x89b   : > { %10198 = vst [vmem:[%s14274_s11 + $0x148] sm:$0xff] %v10070_v62  ;;  %v9687_v27 = vmin.f32 %v9559_v38, 0.4  ;;  %v8171_v57 = vadd.f32 %v7810_v34, %v7042_v22 }
 0x89d   : > { %v9815_v1 = vmul.f32 2.5, %v9687_v27  ;;  %v9300_v2 = vadd.f32 %v8939_v24, %v8171_v57  ;;  %v6757_v11 = vpop.f32.mrf.mxu2  ;;  %v16554_v24 = vld [vmem:[#allocation209_spill] sm:$0xff] }
 0x89e   : > { %v5622_v52 = vpop.f32.mrf.mxu1  ;;  %v8421_v35 = vpop.f32.mrf.mxu0 }
 0x89f   : > { %v9943_v21 = vfloor.f32 %v9815_v1  ;;  %v9432_v49 = vadd.f32 %v14722_v56, %v9300_v2  ;;  %v7289_v9 = vpop.f32.mrf.mxu3  ;;  %v6142_v48 = vrot.slane %v5622_v52, 2  ;;  %v8941_v16 = vrot.slane %v8421_v35, 2 }
 0x8a0   : > { %v7811_v31 = vrot.slane %v7289_v9, 1 }
 0x8a1   : > { %v10071_v51 = vmul.f32 0.4, %v9943_v21  ;;  %v9560_v53 = vmax.f32 %v9432_v49, 0.0  ;;  %v6143_v20 = vsel %vm2942_vm3, %v6141_v46, %v6142_v48  ;;  %10885 = vmatmul.msk.bf16.gmra.mxu1 %vm477_vm1, %v16550_v44  ;;  %11146 = vmatmul.msk.bf16.gmra.mxu0 %vm477_vm1, %v16247_v26 }
 0x8a2   : > { %v6502_v13 = vadd.f32 %v6143_v20, %v16551_v43  ;;  %10972 = vmatmul.msk.bf16.gmra.mxu2 %vm477_vm1, %v16247_v26 }
 0x8a3   : > { %10199 = vst [vmem:[%s14274_s11 + $0x150] sm:$0xff] %v10071_v51  ;;  %v9688_v14 = vmin.f32 %v9560_v53, 0.4 }
 0x8a4   : > { %11059 = vmatmul.msk.bf16.gmra.mxu3 %vm477_vm1, %v16247_v26  ;;  %v7043_v36 = vadd.f32 %v6757_v11, %v6502_v13  ;;  %v8942_v26 = vsel %vm2942_vm3, %v8940_v47, %v8941_v16 }
 0x8a5   : > { %v9816_v3 = vmul.f32 2.5, %v9688_v14  ;;  %v6760_v40 = vpop.f32.mrf.mxu2 }
 0x8a6   : > { %v5624_v10 = vpop.f32.mrf.mxu1  ;;  %v8423_v7 = vpop.f32.mrf.mxu0 }
 0x8a7   : > { %v9944_v37 = vfloor.f32 %v9816_v3  ;;  %v7292_v63 = vpop.f32.mrf.mxu3  ;;  %v6144_v39 = vrot.slane %v5624_v10, 2  ;;  %v8943_v32 = vrot.slane %v8423_v7, 2 }
 0x8a8   : > { %v7812_v61 = vrot.slane %v7292_v63, 1  ;;  %v16555_v63 = vld [vmem:[#allocation127_spill] sm:$0xff] }
 0x8a9   : > { %v10072_v12 = vmul.f32 0.4, %v9944_v37  ;;  %v6145_v18 = vsel %vm2942_vm3, %v6142_v48, %v6144_v39  ;;  %v8944_v34 = vsel %vm2942_vm3, %v8941_v16, %v8943_v32 }
 0x8aa   : > { %v7813_v4 = vsel %vm1812_vm2, %v7811_v31, %v7812_v61  ;;  %v6503_v42 = vadd.f32 %v6145_v18, %v16552_v17  ;;  %v16556_v17 = vld [vmem:[#allocation119_spill] sm:$0xff] }
 0x8ab   : > { %10200 = vst [vmem:[%s14274_s11 + $0x158] sm:$0xff] %v10072_v12  ;;  %v8172_v41 = vadd.f32 %v7813_v4, %v7043_v36 }
 0x8ac   : > { %v7044_v58 = vadd.f32 %v6760_v40, %v6503_v42 }
 0x8ad   : > { %v9301_v60 = vadd.f32 %v8942_v26, %v8172_v41  ;;  %v6762_v8 = vpop.f32.mrf.mxu2 }
 0x8ae   : > { %v5627_v6 = vpop.f32.mrf.mxu1  ;;  %v8426_v15 = vpop.f32.mrf.mxu0 }
 0x8af   : > { %v9433_v19 = vadd.f32 %v14722_v56, %v9301_v60  ;;  %v7294_v0 = vpop.f32.mrf.mxu3  ;;  %v6146_v28 = vrot.slane %v5627_v6, 2  ;;  %v8945_v9 = vrot.slane %v8426_v15, 2 }
 0x8b0   : > { %v7814_v54 = vrot.slane %v7294_v0, 1 }
 0x8b1   : > { %v9561_v30 = vmax.f32 %v9433_v19, 0.0  ;;  %v6147_v22 = vsel %vm2942_vm3, %v6144_v39, %v6146_v28  ;;  %10886 = vmatmul.msk.bf16.gmra.mxu1 %vm477_vm1, %v16553_v59  ;;  %11147 = vmatmul.msk.bf16.gmra.mxu0 %vm477_vm1, %v16250_v50  ;;  %v8946_v43 = vsel %vm2942_vm3, %v8943_v32, %v8945_v9 }
 0x8b2   : > { %v7815_v45 = vsel %vm1812_vm2, %v7812_v61, %v7814_v54  ;;  %v6504_v1 = vadd.f32 %v6147_v22, %v16554_v24  ;;  %10973 = vmatmul.msk.bf16.gmra.mxu2 %vm477_vm1, %v16250_v50 }
 0x8b3   : > { %v9689_v62 = vmin.f32 %v9561_v30, 0.4  ;;  %v8173_v38 = vadd.f32 %v7815_v45, %v7044_v58 }
 0x8b4   : > { %11060 = vmatmul.msk.bf16.gmra.mxu3 %vm477_vm1, %v16250_v50  ;;  %v7045_v48 = vadd.f32 %v6762_v8, %v6504_v1 }
 0x8b5   : > { %v9817_v27 = vmul.f32 2.5, %v9689_v62  ;;  %v9302_v57 = vadd.f32 %v8944_v34, %v8173_v38  ;;  %v6765_v52 = vpop.f32.mrf.mxu2  ;;  %v16557_v34 = vld [vmem:[#allocation137_spill] sm:$0xff] }
 0x8b6   : > { %v5629_v51 = vpop.f32.mrf.mxu1  ;;  %v8428_v14 = vpop.f32.mrf.mxu0 }
 0x8b7   : > { %v9945_v2 = vfloor.f32 %v9817_v27  ;;  %v9434_v21 = vadd.f32 %v14722_v56, %v9302_v57  ;;  %v7297_v49 = vpop.f32.mrf.mxu3  ;;  %v6148_v35 = vrot.slane %v5629_v51, 2  ;;  %v8947_v10 = vrot.slane %v8428_v14, 2  ;;  %v16558_v14 = vld [vmem:[#allocation135_spill] sm:$0xff] }
 0x8b8   : > { %v7816_v11 = vrot.slane %v7297_v49, 1 }
 0x8b9   : > { %v10073_v53 = vmul.f32 0.4, %v9945_v2  ;;  %v9562_v46 = vmax.f32 %v9434_v21, 0.0  ;;  %v6149_v50 = vsel %vm2942_vm3, %v6146_v28, %v6148_v35  ;;  %v8948_v42 = vsel %vm2942_vm3, %v8945_v9, %v8947_v10 }
 0x8ba   : > { %v7817_v20 = vsel %vm1812_vm2, %v7814_v54, %v7816_v11  ;;  %v6505_v31 = vadd.f32 %v6149_v50, %v16555_v63  ;;  %v16560_v50 = vld [vmem:[#allocation210_spill] sm:$0xff] }
 0x8bb   : > { %10201 = vst [vmem:[%s14274_s11 + $0x160] sm:$0xff] %v10073_v53  ;;  %v9690_v44 = vmin.f32 %v9562_v46, 0.4  ;;  %v8174_v3 = vadd.f32 %v7817_v20, %v7045_v48 }
 0x8bc   : > { %v7046_v4 = vadd.f32 %v6765_v52, %v6505_v31 }
 0x8bd   : > { %v9818_v13 = vmul.f32 2.5, %v9690_v44  ;;  %v9303_v37 = vadd.f32 %v8946_v43, %v8174_v3  ;;  %v6767_v36 = vpop.f32.mrf.mxu2  ;;  %v16559_v44 = vld [vmem:[#allocation21_spill] sm:$0xff] }
 0x8be   : > { %v5632_v39 = vpop.f32.mrf.mxu1  ;;  %v8431_v41 = vpop.f32.mrf.mxu0 }
 0x8bf   : > { %v9946_v16 = vfloor.f32 %v9818_v13  ;;  %v9435_v61 = vadd.f32 %v14722_v56, %v9303_v37  ;;  %v7299_v40 = vpop.f32.mrf.mxu3  ;;  %v6150_v15 = vrot.slane %v5632_v39, 2  ;;  %v8949_v24 = vrot.slane %v8431_v41, 2 }
 0x8c0   : > { %v7818_v12 = vrot.slane %v7299_v40, 1 }
 0x8c1   : > { %v10074_v7 = vmul.f32 0.4, %v9946_v16  ;;  %v9563_v47 = vmax.f32 %v9435_v61, 0.0  ;;  %10887 = vmatmul.msk.bf16.gmra.mxu1 %vm477_vm1, %v16556_v17  ;;  %11148 = vmatmul.msk.bf16.gmra.mxu0 %vm477_vm1, %v16256_v55 }
 0x8c2   : > { %v7819_v18 = vsel %vm1812_vm2, %v7816_v11, %v7818_v12  ;;  %10974 = vmatmul.msk.bf16.gmra.mxu2 %vm477_vm1, %v16256_v55 }
 0x8c3   : > { %10202 = vst [vmem:[%s14274_s11 + $0x168] sm:$0xff] %v10074_v7  ;;  %v9691_v26 = vmin.f32 %v9563_v47, 0.4  ;;  %v8175_v60 = vadd.f32 %v7819_v18, %v7046_v4 }
 0x8c4   : > { %11061 = vmatmul.msk.bf16.gmra.mxu3 %vm477_vm1, %v16256_v55 }
 0x8c5   : > { %v9819_v19 = vmul.f32 2.5, %v9691_v26  ;;  %v9304_v0 = vadd.f32 %v8948_v42, %v8175_v60  ;;  %v6769_v6 = vpop.f32.mrf.mxu2  ;;  %v16561_v60 = vld [vmem:[#allocation6_spill] sm:$0xff] }
 0x8c6   : > { %v5634_v30 = vpop.f32.mrf.mxu1  ;;  %v8433_v62 = vpop.f32.mrf.mxu0 }
 0x8c7   : > { %v9947_v32 = vfloor.f32 %v9819_v19  ;;  %v9436_v54 = vadd.f32 %v14722_v56, %v9304_v0  ;;  %v7302_v8 = vpop.f32.mrf.mxu3  ;;  %v6151_v45 = vrot.slane %v5634_v30, 2  ;;  %v8950_v2 = vrot.slane %v8433_v62, 2 }
 0x8c8   : > { %v7820_v1 = vrot.slane %v7302_v8, 1 }
 0x8c9   : > { %v10075_v58 = vmul.f32 0.4, %v9947_v32  ;;  %v9564_v28 = vmax.f32 %v9436_v54, 0.0  ;;  %v6152_v22 = vsel %vm2942_vm3, %v6150_v15, %v6151_v45  ;;  %v8951_v20 = vsel %vm2942_vm3, %v8949_v24, %v8950_v2 }
 0x8ca   : > { %v6506_v27 = vadd.f32 %v6152_v22, %v16557_v34  ;;  %v16562_v34 = vld [vmem:[#allocation143_spill] sm:$0xff] }
 0x8cb   : > { %10203 = vst [vmem:[%s14274_s11 + $0x170] sm:$0xff] %v10075_v58  ;;  %v9692_v38 = vmin.f32 %v9564_v28, 0.4 }
 0x8cc   : > { %v7047_v52 = vadd.f32 %v6769_v6, %v6506_v27 }
 0x8cd   : > { %v9820_v59 = vmul.f32 2.5, %v9692_v38  ;;  %v6771_v49 = vpop.f32.mrf.mxu2 }
 0x8ce   : > { %v5637_v9 = vpop.f32.mrf.mxu1  ;;  %v8436_v53 = vpop.f32.mrf.mxu0 }
 0x8cf   : > { %v9948_v55 = vfloor.f32 %v9820_v59  ;;  %v7304_v57 = vpop.f32.mrf.mxu3  ;;  %v6153_v51 = vrot.slane %v5637_v9, 2  ;;  %v8952_v63 = vrot.slane %v8436_v53, 2 }
 0x8d0   : > { %v7821_v21 = vrot.slane %v7304_v57, 1 }
 0x8d1   : > { %v10076_v11 = vmul.f32 0.4, %v9948_v55  ;;  %v6154_v35 = vsel %vm2942_vm3, %v6151_v45, %v6153_v51  ;;  %10888 = vmatmul.msk.bf16.gmra.mxu1 %vm477_vm1, %v16558_v14  ;;  %11149 = vmatmul.msk.bf16.gmra.mxu0 %vm477_vm1, %v16559_v44  ;;  %v8953_v41 = vsel %vm2942_vm3, %v8950_v2, %v8952_v63  ;;  %v16563_v55 = vld [vmem:[#allocation25_spill] sm:$0xff] }
 0x8d2   : > { %v7822_v46 = vsel %vm1812_vm2, %v7820_v1, %v7821_v21  ;;  %v6507_v43 = vadd.f32 %v6154_v35, %v16560_v50  ;;  %10975 = vmatmul.msk.bf16.gmra.mxu2 %vm477_vm1, %v16559_v44  ;;  %v16564_v1 = vld [vmem:[#allocation212_spill] sm:$0xff] }
 0x8d3   : > { %10204 = vst [vmem:[%s14274_s11 + $0x178] sm:$0xff] %v10076_v11  ;;  %v8176_v48 = vadd.f32 %v7822_v46, %v7047_v52 }
 0x8d4   : > { %11062 = vmatmul.msk.bf16.gmra.mxu3 %vm477_vm1, %v16559_v44  ;;  %v7048_v10 = vadd.f32 %v6771_v49, %v6507_v43 }
 0x8d5   : > { %v9305_v3 = vadd.f32 %v8951_v20, %v8176_v48  ;;  %v6774_v16 = vpop.f32.mrf.mxu2 }
 0x8d6   : > { %v5639_v61 = vpop.f32.mrf.mxu1  ;;  %v8438_v36 = vpop.f32.mrf.mxu0 }
 0x8d7   : > { %v9437_v13 = vadd.f32 %v14722_v56, %v9305_v3  ;;  %v7307_v37 = vpop.f32.mrf.mxu3  ;;  %v6155_v12 = vrot.slane %v5639_v61, 2  ;;  %v8954_v32 = vrot.slane %v8438_v36, 2 }
 0x8d8   : > { %v7823_v31 = vrot.slane %v7307_v37, 1 }
 0x8d9   : > { %v9565_v40 = vmax.f32 %v9437_v13, 0.0  ;;  %v6156_v4 = vsel %vm2942_vm3, %v6153_v51, %v6155_v12  ;;  %v8955_v27 = vsel %vm2942_vm3, %v8952_v63, %v8954_v32 }
 0x8da   : > { %v7824_v39 = vsel %vm1812_vm2, %v7821_v21, %v7823_v31  ;;  %v6508_v17 = vadd.f32 %v6156_v4, %v16561_v60  ;;  %v16565_v4 = vld [vmem:[#allocation211_spill] sm:$0xff] }
 0x8db   : > { %v9693_v7 = vmin.f32 %v9565_v40, 0.4  ;;  %v8177_v47 = vadd.f32 %v7824_v39, %v7048_v10 }
 0x8dc   : > { %v7049_v28 = vadd.f32 %v6774_v16, %v6508_v17 }
 0x8dd   : > { %v9821_v18 = vmul.f32 2.5, %v9693_v7  ;;  %v9306_v26 = vadd.f32 %v8953_v41, %v8177_v47  ;;  %v6776_v8 = vpop.f32.mrf.mxu2  ;;  %v16566_v41 = vld [vmem:[#allocation29_spill] sm:$0xff] }
 0x8de   : > { %v5642_v6 = vpop.f32.mrf.mxu1  ;;  %v8441_v45 = vpop.f32.mrf.mxu0 }
 0x8df   : > { %v9949_v42 = vfloor.f32 %v9821_v18  ;;  %v9438_v19 = vadd.f32 %v14722_v56, %v9306_v26  ;;  %v7309_v0 = vpop.f32.mrf.mxu3  ;;  %v6157_v15 = vrot.slane %v5642_v6, 2  ;;  %v8956_v11 = vrot.slane %v8441_v45, 2  ;;  %v16567_v26 = vld [vmem:[#allocation213_spill] sm:$0xff] }
 0x8e0   : > { %v7825_v54 = vrot.slane %v7309_v0, 1 }
 0x8e1   : > { %v10077_v30 = vmul.f32 0.4, %v9949_v42  ;;  %v9566_v58 = vmax.f32 %v9438_v19, 0.0  ;;  %v6158_v59 = vsel %vm2942_vm3, %v6155_v12, %v6157_v15  ;;  %10889 = vmatmul.msk.bf16.gmra.mxu1 %vm477_vm1, %v16562_v34  ;;  %11150 = vmatmul.msk.bf16.gmra.mxu0 %vm477_vm1, %v16563_v55  ;;  %v8957_v50 = vsel %vm2942_vm3, %v8954_v32, %v8956_v11  ;;  %v16568_v34 = vld [vmem:[#allocation13_spill] sm:$0xff] }
 0x8e2   : > { %v7826_v62 = vsel %vm1812_vm2, %v7823_v31, %v7825_v54  ;;  %v6509_v2 = vadd.f32 %v6158_v59, %v16564_v1  ;;  %10976 = vmatmul.msk.bf16.gmra.mxu2 %vm477_vm1, %v16563_v55 }
 0x8e3   : > { %10205 = vst [vmem:[%s14274_s11 + $0x180] sm:$0xff] %v10077_v30  ;;  %v9694_v38 = vmin.f32 %v9566_v58, 0.4  ;;  %v8178_v22 = vadd.f32 %v7826_v62, %v7049_v28 }
 0x8e4   : > { %11063 = vmatmul.msk.bf16.gmra.mxu3 %vm477_vm1, %v16563_v55  ;;  %v7050_v35 = vadd.f32 %v6776_v8, %v6509_v2 }
 0x8e5   : > { %v9822_v57 = vmul.f32 2.5, %v9694_v38  ;;  %v9307_v24 = vadd.f32 %v8955_v27, %v8178_v22  ;;  %v6779_v51 = vpop.f32.mrf.mxu2 }
 0x8e6   : > { %v5644_v53 = vpop.f32.mrf.mxu1  ;;  %v8443_v14 = vpop.f32.mrf.mxu0 }
 0x8e7   : > { %v9950_v21 = vfloor.f32 %v9822_v57  ;;  %v9439_v49 = vadd.f32 %v14722_v56, %v9307_v24  ;;  %v7312_v9 = vpop.f32.mrf.mxu3  ;;  %v6159_v12 = vrot.slane %v5644_v53, 2  ;;  %v8958_v15 = vrot.slane %v8443_v14, 2 }
 0x8e8   : > { %v7827_v52 = vrot.slane %v7312_v9, 1 }
 0x8e9   : > { %v10078_v46 = vmul.f32 0.4, %v9950_v21  ;;  %v9567_v48 = vmax.f32 %v9439_v49, 0.0 }
 0x8ea   : > { %v7828_v20 = vsel %vm1812_vm2, %v7825_v54, %v7827_v52 }
 0x8eb   : > { %10206 = vst [vmem:[%s14274_s11 + $0x188] sm:$0xff] %v10078_v46  ;;  %v9695_v44 = vmin.f32 %v9567_v48, 0.4  ;;  %v8179_v3 = vadd.f32 %v7828_v20, %v7050_v35  ;;  %v16569_v35 = vld [vmem:[#allocation9_spill] sm:$0xff] }
 0x8ec   : > { %v16570_v20 = vld [vmem:[#allocation33_spill] sm:$0xff] }
 0x8ed   : > { %v9823_v43 = vmul.f32 2.5, %v9695_v44  ;;  %v9308_v13 = vadd.f32 %v8957_v50, %v8179_v3  ;;  %v6780_v16 = vpop.f32.mrf.mxu2  ;;  %v16571_v50 = vld [vmem:[#allocation214_spill] sm:$0xff] }
 0x8ee   : > { %v5647_v61 = vpop.f32.mrf.mxu1  ;;  %v8446_v39 = vpop.f32.mrf.mxu0 }
 0x8ef   : > { %v9951_v37 = vfloor.f32 %v9823_v43  ;;  %v9440_v63 = vadd.f32 %v14722_v56, %v9308_v13  ;;  %v7314_v31 = vpop.f32.mrf.mxu3  ;;  %v6160_v36 = vrot.slane %v5647_v61, 2  ;;  %v8959_v0 = vrot.slane %v8446_v39, 2 }
 0x8f0   : > { %v7829_v19 = vrot.slane %v7314_v31, 1 }
 0x8f1   : > { %v10079_v40 = vmul.f32 0.4, %v9951_v37  ;;  %v9568_v10 = vmax.f32 %v9440_v63, 0.0  ;;  %v6161_v47 = vsel %vm2942_vm3, %v6159_v12, %v6160_v36  ;;  %10890 = vmatmul.msk.bf16.gmra.mxu1 %vm477_vm1, %v16565_v4  ;;  %11151 = vmatmul.msk.bf16.gmra.mxu0 %vm477_vm1, %v16566_v41  ;;  %v8960_v22 = vsel %vm2942_vm3, %v8958_v15, %v8959_v0 }
 0x8f2   : > { %v6510_v60 = vadd.f32 %v6161_v47, %v16567_v26  ;;  %10977 = vmatmul.msk.bf16.gmra.mxu2 %vm477_vm1, %v16566_v41 }
 0x8f3   : > { %10207 = vst [vmem:[%s14274_s11 + $0x190] sm:$0xff] %v10079_v40  ;;  %v9696_v7 = vmin.f32 %v9568_v10, 0.4 }
 0x8f4   : > { %11064 = vmatmul.msk.bf16.gmra.mxu3 %vm477_vm1, %v16566_v41  ;;  %v7051_v30 = vadd.f32 %v6780_v16, %v6510_v60 }
 0x8f5   : > { %v9824_v18 = vmul.f32 2.5, %v9696_v7  ;;  %v6783_v54 = vpop.f32.mrf.mxu2 }
 0x8f6   : > { %v5649_v8 = vpop.f32.mrf.mxu1  ;;  %v8448_v28 = vpop.f32.mrf.mxu0 }
 0x8f7   : > { %v9952_v17 = vfloor.f32 %v9824_v18  ;;  %v7317_v42 = vpop.f32.mrf.mxu3  ;;  %v6162_v58 = vrot.slane %v5649_v8, 2  ;;  %v8961_v24 = vrot.slane %v8448_v28, 2 }
 0x8f8   : > { %v7830_v32 = vrot.slane %v7317_v42, 1  ;;  %v16572_v42 = vld [vmem:[#allocation161_spill] sm:$0xff] }
 0x8f9   : > { %v10080_v6 = vmul.f32 0.4, %v9952_v17  ;;  %v6163_v38 = vsel %vm2942_vm3, %v6160_v36, %v6162_v58  ;;  %v8962_v14 = vsel %vm2942_vm3, %v8959_v0, %v8961_v24 }
 0x8fa   : > { %v7831_v45 = vsel %vm1812_vm2, %v7829_v19, %v7830_v32  ;;  %v6511_v27 = vadd.f32 %v6163_v38, %v16568_v34  ;;  %v16573_v34 = vld [vmem:[#allocation158_spill] sm:$0xff] }
 0x8fb   : > { %10208 = vst [vmem:[%s14274_s11 + $0x198] sm:$0xff] %v10080_v6  ;;  %v8180_v62 = vadd.f32 %v7831_v45, %v7051_v30 }
 0x8fc   : > { %v7052_v9 = vadd.f32 %v6783_v54, %v6511_v27 }
 0x8fd   : > { %v9309_v59 = vadd.f32 %v8960_v22, %v8180_v62  ;;  %v6785_v2 = vpop.f32.mrf.mxu2 }
 0x8fe   : > { %v5652_v21 = vpop.f32.mrf.mxu1  ;;  %v8451_v52 = vpop.f32.mrf.mxu0 }
 0x8ff   : > { %v9441_v55 = vadd.f32 %v14722_v56, %v9309_v59  ;;  %v7319_v57 = vpop.f32.mrf.mxu3  ;;  %v6164_v11 = vrot.slane %v5652_v21, 2  ;;  %v8963_v31 = vrot.slane %v8451_v52, 2 }
 0x900   : > { %v7832_v1 = vrot.slane %v7319_v57, 1 }
 0x901   : > { %v9569_v49 = vmax.f32 %v9441_v55, 0.0  ;;  %v6165_v48 = vsel %vm2942_vm3, %v6162_v58, %v6164_v11  ;;  %10891 = vmatmul.msk.bf16.gmra.mxu1 %vm477_vm1, %v16569_v35  ;;  %11152 = vmatmul.msk.bf16.gmra.mxu0 %vm477_vm1, %v16570_v20  ;;  %v8964_v26 = vsel %vm2942_vm3, %v8961_v24, %v8963_v31  ;;  %v16574_v55 = vld [vmem:[#allocation38_spill] sm:$0xff] }
 0x902   : > { %v7833_v51 = vsel %vm1812_vm2, %v7830_v32, %v7832_v1  ;;  %v6512_v43 = vadd.f32 %v6165_v48, %v16571_v50  ;;  %10978 = vmatmul.msk.bf16.gmra.mxu2 %vm477_vm1, %v16570_v20 }
 0x903   : > { %v9697_v53 = vmin.f32 %v9569_v49, 0.4  ;;  %v8181_v46 = vadd.f32 %v7833_v51, %v7052_v9 }
 0x904   : > { %11065 = vmatmul.msk.bf16.gmra.mxu3 %vm477_vm1, %v16570_v20  ;;  %v7053_v36 = vadd.f32 %v6785_v2, %v6512_v43  ;;  %v16575_v20 = vld [vmem:[#allocation215_spill] sm:$0xff] }
 0x905   : > { %v9825_v44 = vmul.f32 2.5, %v9697_v53  ;;  %v9310_v3 = vadd.f32 %v8962_v14, %v8181_v46  ;;  %v6788_v61 = vpop.f32.mrf.mxu2 }
 0x906   : > { %v5654_v40 = vpop.f32.mrf.mxu1  ;;  %v8453_v7 = vpop.f32.mrf.mxu0 }
 0x907   : > { %v9953_v13 = vfloor.f32 %v9825_v44  ;;  %v9442_v37 = vadd.f32 %v14722_v56, %v9310_v3  ;;  %v7322_v63 = vpop.f32.mrf.mxu3  ;;  %v6166_v39 = vrot.slane %v5654_v40, 2  ;;  %v8965_v8 = vrot.slane %v8453_v7, 2 }
 0x908   : > { %v7834_v16 = vrot.slane %v7322_v63, 1 }
 0x909   : > { %v10081_v10 = vmul.f32 0.4, %v9953_v13  ;;  %v9570_v12 = vmax.f32 %v9442_v37, 0.0  ;;  %v6167_v18 = vsel %vm2942_vm3, %v6164_v11, %v6166_v39  ;;  %v8966_v27 = vsel %vm2942_vm3, %v8963_v31, %v8965_v8 }
 0x90a   : > { %v7835_v47 = vsel %vm1812_vm2, %v7832_v1, %v7834_v16  ;;  %v6513_v19 = vadd.f32 %v6167_v18, %v16572_v42 }
 0x90b   : > { %10209 = vst [vmem:[%s14274_s11 + $0x1a0] sm:$0xff] %v10081_v10  ;;  %v9698_v4 = vmin.f32 %v9570_v12, 0.4  ;;  %v8182_v41 = vadd.f32 %v7835_v47, %v7053_v36  ;;  %v16576_v47 = vld [vmem:[#allocation18_spill] sm:$0xff] }
 0x90c   : > { %v7054_v45 = vadd.f32 %v6788_v61, %v6513_v19 }
 0x90d   : > { %v9826_v60 = vmul.f32 2.5, %v9698_v4  ;;  %v9311_v17 = vadd.f32 %v8964_v26, %v8182_v41  ;;  %v6790_v30 = vpop.f32.mrf.mxu2  ;;  %v16577_v41 = vld [vmem:[#allocation48_spill] sm:$0xff] }
 0x90e   : > { %v5657_v58 = vpop.f32.mrf.mxu1  ;;  %v8456_v62 = vpop.f32.mrf.mxu0  ;;  %v16578_v26 = vld [vmem:[#allocation216_spill] sm:$0xff] }
 0x90f   : > { %v9954_v0 = vfloor.f32 %v9826_v60  ;;  %v9443_v32 = vadd.f32 %v14722_v56, %v9311_v17  ;;  %v7324_v54 = vpop.f32.mrf.mxu3  ;;  %v6168_v51 = vrot.slane %v5657_v58, 2  ;;  %v8967_v43 = vrot.slane %v8456_v62, 2 }
 0x910   : > { %v7836_v6 = vrot.slane %v7324_v54, 1 }
 0x911   : > { %v10082_v28 = vmul.f32 0.4, %v9954_v0  ;;  %v9571_v15 = vmax.f32 %v9443_v32, 0.0  ;;  %10892 = vmatmul.msk.bf16.gmra.mxu1 %vm477_vm1, %v16573_v34  ;;  %11153 = vmatmul.msk.bf16.gmra.mxu0 %vm477_vm1, %v16574_v55  ;;  %v16579_v34 = vld [vmem:[#allocation171_spill] sm:$0xff] }
 0x912   : > { %v7837_v38 = vsel %vm1812_vm2, %v7834_v16, %v7836_v6  ;;  %10979 = vmatmul.msk.bf16.gmra.mxu2 %vm477_vm1, %v16574_v55 }
 0x913   : > { %10210 = vst [vmem:[%s14274_s11 + $0x1a8] sm:$0xff] %v10082_v28  ;;  %v9699_v22 = vmin.f32 %v9571_v15, 0.4  ;;  %v8183_v59 = vadd.f32 %v7837_v38, %v7054_v45 }
 0x914   : > { %11066 = vmatmul.msk.bf16.gmra.mxu3 %vm477_vm1, %v16574_v55 }
 0x915   : > { %v9827_v57 = vmul.f32 2.5, %v9699_v22  ;;  %v9312_v24 = vadd.f32 %v8966_v27, %v8183_v59  ;;  %v6792_v49 = vpop.f32.mrf.mxu2 }
 0x916   : > { %v5659_v9 = vpop.f32.mrf.mxu1  ;;  %v8458_v46 = vpop.f32.mrf.mxu0 }
 0x917   : > { %v9955_v1 = vfloor.f32 %v9827_v57  ;;  %v9444_v2 = vadd.f32 %v14722_v56, %v9312_v24  ;;  %v7327_v21 = vpop.f32.mrf.mxu3  ;;  %v6169_v53 = vrot.slane %v5659_v9, 2  ;;  %v8968_v37 = vrot.slane %v8458_v46, 2 }
 0x918   : > { %v7838_v13 = vrot.slane %v7327_v21, 1 }
 0x919   : > { %v10083_v11 = vmul.f32 0.4, %v9955_v1  ;;  %v9572_v52 = vmax.f32 %v9444_v2, 0.0  ;;  %v6170_v35 = vsel %vm2942_vm3, %v6168_v51, %v6169_v53  ;;  %v8969_v4 = vsel %vm2942_vm3, %v8967_v43, %v8968_v37 }
 0x91a   : > { %v6514_v44 = vadd.f32 %v6170_v35, %v16575_v20  ;;  %v16580_v20 = vld [vmem:[#allocation167_spill] sm:$0xff] }
 0x91b   : > { %10211 = vst [vmem:[%s14274_s11 + $0x1b0] sm:$0xff] %v10083_v11  ;;  %v9700_v48 = vmin.f32 %v9572_v52, 0.4 }
 0x91c   : > { %v7055_v40 = vadd.f32 %v6792_v49, %v6514_v44 }
 0x91d   : > { %v9828_v14 = vmul.f32 2.5, %v9700_v48  ;;  %v6794_v31 = vpop.f32.mrf.mxu2 }
 0x91e   : > { %v5662_v16 = vpop.f32.mrf.mxu1  ;;  %v8461_v12 = vpop.f32.mrf.mxu0 }
 0x91f   : > { %v9956_v3 = vfloor.f32 %v9828_v14  ;;  %v7329_v50 = vpop.f32.mrf.mxu3  ;;  %v6171_v10 = vrot.slane %v5662_v16, 2  ;;  %v8970_v19 = vrot.slane %v8461_v12, 2 }
 0x920   : > { %v7839_v63 = vrot.slane %v7329_v50, 1 }
 0x921   : > { %v10084_v61 = vmul.f32 0.4, %v9956_v3  ;;  %v6172_v7 = vsel %vm2942_vm3, %v6169_v53, %v6171_v10  ;;  %10893 = vmatmul.msk.bf16.gmra.mxu1 %vm477_vm1, %v16576_v47  ;;  %11154 = vmatmul.msk.bf16.gmra.mxu0 %vm477_vm1, %v16577_v41  ;;  %v8971_v38 = vsel %vm2942_vm3, %v8968_v37, %v8970_v19  ;;  %v16581_v3 = vld [vmem:[#allocation56_spill] sm:$0xff] }
 0x922   : > { %v7840_v36 = vsel %vm1812_vm2, %v7838_v13, %v7839_v63  ;;  %v6515_v60 = vadd.f32 %v6172_v7, %v16578_v26  ;;  %10980 = vmatmul.msk.bf16.gmra.mxu2 %vm477_vm1, %v16577_v41  ;;  %v16582_v13 = vld [vmem:[#allocation217_spill] sm:$0xff] }
 0x923   : > { %10212 = vst [vmem:[%s14274_s11 + $0x1b8] sm:$0xff] %v10084_v61  ;;  %v8184_v39 = vadd.f32 %v7840_v36, %v7055_v40 }
 0x924   : > { %11067 = vmatmul.msk.bf16.gmra.mxu3 %vm477_vm1, %v16577_v41  ;;  %v7056_v6 = vadd.f32 %v6794_v31, %v6515_v60 }
 0x925   : > { %v9313_v18 = vadd.f32 %v8969_v4, %v8184_v39  ;;  %v6797_v32 = vpop.f32.mrf.mxu2 }
 0x926   : > { %v5664_v54 = vpop.f32.mrf.mxu1  ;;  %v8463_v58 = vpop.f32.mrf.mxu0 }
 0x927   : > { %v9445_v17 = vadd.f32 %v14722_v56, %v9313_v18  ;;  %v7332_v42 = vpop.f32.mrf.mxu3  ;;  %v6173_v30 = vrot.slane %v5664_v54, 2  ;;  %v8972_v1 = vrot.slane %v8463_v58, 2 }
 0x928   : > { %v7841_v0 = vrot.slane %v7332_v42, 1 }
 0x929   : > { %v9573_v8 = vmax.f32 %v9445_v17, 0.0  ;;  %v6174_v62 = vsel %vm2942_vm3, %v6171_v10, %v6173_v30  ;;  %v8973_v44 = vsel %vm2942_vm3, %v8970_v19, %v8972_v1 }
 0x92a   : > { %v7842_v28 = vsel %vm1812_vm2, %v7839_v63, %v7841_v0  ;;  %v6516_v27 = vadd.f32 %v6174_v62, %v16579_v34  ;;  %v16583_v62 = vld [vmem:[#allocation174_spill] sm:$0xff] }
 0x92b   : > { %v9701_v15 = vmin.f32 %v9573_v8, 0.4  ;;  %v8185_v45 = vadd.f32 %v7842_v28, %v7056_v6 }
 0x92c   : > { %v7057_v52 = vadd.f32 %v6797_v32, %v6516_v27 }
 0x92d   : > { %v9829_v22 = vmul.f32 2.5, %v9701_v15  ;;  %v9314_v59 = vadd.f32 %v8971_v38, %v8185_v45  ;;  %v6799_v21 = vpop.f32.mrf.mxu2  ;;  %v16584_v38 = vld [vmem:[#allocation63_spill] sm:$0xff] }
 0x92e   : > { %v5667_v49 = vpop.f32.mrf.mxu1  ;;  %v8466_v53 = vpop.f32.mrf.mxu0 }
 0x92f   : > { %v9957_v55 = vfloor.f32 %v9829_v22  ;;  %v9446_v57 = vadd.f32 %v14722_v56, %v9314_v59  ;;  %v7334_v24 = vpop.f32.mrf.mxu3  ;;  %v6175_v51 = vrot.slane %v5667_v49, 2  ;;  %v8974_v61 = vrot.slane %v8466_v53, 2  ;;  %v16585_v59 = vld [vmem:[#allocation218_spill] sm:$0xff] }
 0x930   : > { %v7843_v2 = vrot.slane %v7334_v24, 1 }
 0x931   : > { %v10085_v9 = vmul.f32 0.4, %v9957_v55  ;;  %v9574_v11 = vmax.f32 %v9446_v57, 0.0  ;;  %v6176_v14 = vsel %vm2942_vm3, %v6173_v30, %v6175_v51  ;;  %10894 = vmatmul.msk.bf16.gmra.mxu1 %vm477_vm1, %v16580_v20  ;;  %11155 = vmatmul.msk.bf16.gmra.mxu0 %vm477_vm1, %v16581_v3  ;;  %v8975_v26 = vsel %vm2942_vm3, %v8972_v1, %v8974_v61  ;;  %v16586_v20 = vld [vmem:[#allocation182_spill] sm:$0xff] }
 0x932   : > { %v7844_v46 = vsel %vm1812_vm2, %v7841_v0, %v7843_v2  ;;  %v6517_v37 = vadd.f32 %v6176_v14, %v16582_v13  ;;  %10981 = vmatmul.msk.bf16.gmra.mxu2 %vm477_vm1, %v16581_v3 }
 0x933   : > { %10213 = vst [vmem:[%s14274_s11 + $0x1c0] sm:$0xff] %v10085_v9  ;;  %v9702_v48 = vmin.f32 %v9574_v11, 0.4  ;;  %v8186_v35 = vadd.f32 %v7844_v46, %v7057_v52 }
 0x934   : > { %11068 = vmatmul.msk.bf16.gmra.mxu3 %vm477_vm1, %v16581_v3  ;;  %v7058_v7 = vadd.f32 %v6799_v21, %v6517_v37 }
 0x935   : > { %v9830_v50 = vmul.f32 2.5, %v9702_v48  ;;  %v9315_v43 = vadd.f32 %v8973_v44, %v8186_v35  ;;  %v6802_v10 = vpop.f32.mrf.mxu2 }
 0x936   : > { %v5669_v12 = vpop.f32.mrf.mxu1  ;;  %v8468_v47 = vpop.f32.mrf.mxu0 }
 0x937   : > { %v9958_v63 = vfloor.f32 %v9830_v50  ;;  %v9447_v31 = vadd.f32 %v14722_v56, %v9315_v43  ;;  %v7337_v16 = vpop.f32.mrf.mxu3  ;;  %v6177_v30 = vrot.slane %v5669_v12, 2  ;;  %v8976_v51 = vrot.slane %v8468_v47, 2 }
 0x938   : > { %v7845_v40 = vrot.slane %v7337_v16, 1 }
 0x939   : > { %v10086_v36 = vmul.f32 0.4, %v9958_v63  ;;  %v9575_v39 = vmax.f32 %v9447_v31, 0.0 }
 0x93a   : > { %v7846_v4 = vsel %vm1812_vm2, %v7843_v2, %v7845_v40 }
 0x93b   : > { %10214 = vst [vmem:[%s14274_s11 + $0x1c8] sm:$0xff] %v10086_v36  ;;  %v9703_v41 = vmin.f32 %v9575_v39, 0.4  ;;  %v8187_v18 = vadd.f32 %v7846_v4, %v7058_v7  ;;  %v16587_v7 = vld [vmem:[#allocation178_spill] sm:$0xff]  ;;  %v16588_v4 = vld [vmem:[#allocation73_spill] sm:$0xff] }
 0x93d   : > { %v9831_v60 = vmul.f32 2.5, %v9703_v41  ;;  %v9316_v17 = vadd.f32 %v8975_v26, %v8187_v18  ;;  %v6803_v32 = vpop.f32.mrf.mxu2  ;;  %v16589_v26 = vld [vmem:[#allocation219_spill] sm:$0xff] }
 0x93e   : > { %v5672_v54 = vpop.f32.mrf.mxu1  ;;  %v8471_v28 = vpop.f32.mrf.mxu0 }
 0x93f   : > { %v9959_v42 = vfloor.f32 %v9831_v60  ;;  %v9448_v19 = vadd.f32 %v14722_v56, %v9316_v17  ;;  %v7339_v0 = vpop.f32.mrf.mxu3  ;;  %v6178_v58 = vrot.slane %v5672_v54, 2  ;;  %v8977_v24 = vrot.slane %v8471_v28, 2 }
 0x940   : > { %v7847_v57 = vrot.slane %v7339_v0, 1 }
 0x941   : > { %v10087_v8 = vmul.f32 0.4, %v9959_v42  ;;  %v9576_v6 = vmax.f32 %v9448_v19, 0.0  ;;  %v6179_v45 = vsel %vm2942_vm3, %v6177_v30, %v6178_v58  ;;  %10895 = vmatmul.msk.bf16.gmra.mxu1 %vm477_vm1, %v16583_v62  ;;  %11156 = vmatmul.msk.bf16.gmra.mxu0 %vm477_vm1, %v16584_v38  ;;  %v8978_v35 = vsel %vm2942_vm3, %v8976_v51, %v8977_v24 }
 0x942   : > { %v6518_v34 = vadd.f32 %v6179_v45, %v16585_v59  ;;  %10982 = vmatmul.msk.bf16.gmra.mxu2 %vm477_vm1, %v16584_v38 }
 0x943   : > { %10215 = vst [vmem:[%s14274_s11 + $0x1d0] sm:$0xff] %v10087_v8  ;;  %v9704_v15 = vmin.f32 %v9576_v6, 0.4 }
 0x944   : > { %11069 = vmatmul.msk.bf16.gmra.mxu3 %vm477_vm1, %v16584_v38  ;;  %v7059_v9 = vadd.f32 %v6803_v32, %v6518_v34 }
 0x945   : > { %v9832_v22 = vmul.f32 2.5, %v9704_v15  ;;  %v6806_v2 = vpop.f32.mrf.mxu2 }
 0x946   : > { %v5674_v21 = vpop.f32.mrf.mxu1  ;;  %v8473_v52 = vpop.f32.mrf.mxu0 }
 0x947   : > { %v9960_v27 = vfloor.f32 %v9832_v22  ;;  %v7342_v55 = vpop.f32.mrf.mxu3  ;;  %v6180_v11 = vrot.slane %v5674_v21, 2  ;;  %v8979_v43 = vrot.slane %v8473_v52, 2 }
 0x948   : > { %v7848_v1 = vrot.slane %v7342_v55, 1 }
 0x949   : > { %v10088_v49 = vmul.f32 0.4, %v9960_v27  ;;  %v6181_v48 = vsel %vm2942_vm3, %v6178_v58, %v6180_v11  ;;  %v8980_v47 = vsel %vm2942_vm3, %v8977_v24, %v8979_v43  ;;  %v16590_v27 = vld [vmem:[#allocation189_spill] sm:$0xff] }
 0x94a   : > { %v7849_v53 = vsel %vm1812_vm2, %v7847_v57, %v7848_v1  ;;  %v6519_v44 = vadd.f32 %v6181_v48, %v16586_v20  ;;  %v14957_v24 = vld [vmem:[%s15653_s2] ss:$0 sm:$0xff] }
 0x94b   : > { %10216 = vst [vmem:[%s14274_s11 + $0x1d8] sm:$0xff] %v10088_v49  ;;  %v8188_v46 = vadd.f32 %v7849_v53, %v7059_v9  ;;  %v16591_v20 = vld [vmem:[#allocation185_spill] sm:$0xff] }
 0x94c   : > { %v7060_v16 = vadd.f32 %v6806_v2, %v6519_v44 }
 0x94d   : > { %v9317_v14 = vadd.f32 %v8978_v35, %v8188_v46  ;;  %v6808_v37 = vpop.f32.mrf.mxu2 }
 0x94e   : > { %v5677_v63 = vpop.f32.mrf.mxu1  ;;  %v8476_v40 = vpop.f32.mrf.mxu0 }
 0x94f   : > { %v9449_v3 = vadd.f32 %v14722_v56, %v9317_v14  ;;  %v7344_v50 = vpop.f32.mrf.mxu3  ;;  %v6182_v61 = vrot.slane %v5677_v63, 2  ;;  %v8981_v0 = vrot.slane %v8476_v40, 2 }
 0x950   : > { %v7850_v13 = vrot.slane %v7344_v50, 1 }
 0x951   : > { %v9577_v31 = vmax.f32 %v9449_v3, 0.0  ;;  %v6183_v39 = vsel %vm2942_vm3, %v6180_v11, %v6182_v61  ;;  %10896 = vmatmul.msk.bf16.gmra.mxu1 %vm477_vm1, %v16587_v7  ;;  %11157 = vmatmul.msk.bf16.gmra.mxu0 %vm477_vm1, %v16588_v4  ;;  %v8982_v59 = vsel %vm2942_vm3, %v8979_v43, %v8981_v0  ;;  %v16592_v3 = vld [vmem:[#allocation81_spill] sm:$0xff] }
 0x952   : > { %v7851_v10 = vsel %vm1812_vm2, %v7848_v1, %v7850_v13  ;;  %v6520_v60 = vadd.f32 %v6183_v39, %v16589_v26  ;;  %10983 = vmatmul.msk.bf16.gmra.mxu2 %vm477_vm1, %v16588_v4 }
 0x953   : > { %v9705_v12 = vmin.f32 %v9577_v31, 0.4  ;;  %v8189_v36 = vadd.f32 %v7851_v10, %v7060_v16 }
 0x954   : > { %11070 = vmatmul.msk.bf16.gmra.mxu3 %vm477_vm1, %v16588_v4  ;;  %v7061_v58 = vadd.f32 %v6808_v37, %v6520_v60  ;;  %v16593_v4 = vld [vmem:[#allocation40_spill] sm:$0xff] }
 0x955   : > { %v9833_v41 = vmul.f32 2.5, %v9705_v12  ;;  %v9318_v18 = vadd.f32 %v8980_v47, %v8189_v36  ;;  %v6811_v54 = vpop.f32.mrf.mxu2 }
 0x956   : > { %v5679_v8 = vpop.f32.mrf.mxu1  ;;  %v8478_v15 = vpop.f32.mrf.mxu0 }
 0x957   : > { %v9961_v17 = vfloor.f32 %v9833_v41  ;;  %v9450_v42 = vadd.f32 %v14722_v56, %v9318_v18  ;;  %v7347_v19 = vpop.f32.mrf.mxu3  ;;  %v6184_v28 = vrot.slane %v5679_v8, 2  ;;  %v8983_v21 = vrot.slane %v8478_v15, 2 }
 0x958   : > { %v7852_v32 = vrot.slane %v7347_v19, 1 }
 0x959   : > { %v10089_v6 = vmul.f32 0.4, %v9961_v17  ;;  %v9578_v30 = vmax.f32 %v9450_v42, 0.0  ;;  %v6185_v22 = vsel %vm2942_vm3, %v6182_v61, %v6184_v28  ;;  %v8984_v44 = vsel %vm2942_vm3, %v8981_v0, %v8983_v21 }
 0x95a   : > { %v7853_v45 = vsel %vm1812_vm2, %v7850_v13, %v7852_v32  ;;  %v6521_v55 = vadd.f32 %v6185_v22, %v16590_v27 }
 0x95b   : > { %10217 = vst [vmem:[%s14274_s11 + $0x1e0] sm:$0xff] %v10089_v6  ;;  %v9706_v62 = vmin.f32 %v9578_v30, 0.4  ;;  %v8190_v38 = vadd.f32 %v7853_v45, %v7061_v58  ;;  %v16594_v45 = vld [vmem:[#allocation220_spill] sm:$0xff] }
 0x95c   : > { %v7062_v53 = vadd.f32 %v6811_v54, %v6521_v55 }
 0x95d   : > { %v9834_v56 = vmul.f32 2.5, %v9706_v62  ;;  %v9319_v34 = vadd.f32 %v8982_v59, %v8190_v38  ;;  %v6813_v9 = vpop.f32.mrf.mxu2  ;;  %v16595_v38 = vld [vmem:[#allocation93_spill] sm:$0xff] }
 0x95e   : > { %v5682_v11 = vpop.f32.mrf.mxu1  ;;  %v8481_v46 = vpop.f32.mrf.mxu0  ;;  %v16596_v59 = vld [vmem:[#allocation221_spill] sm:$0xff] }
 0x95f   : > { %v9962_v57 = vfloor.f32 %v9834_v56  ;;  %v9451_v1 = vadd.f32 %v14957_v24, %v9319_v34  ;;  %v7349_v2 = vpop.f32.mrf.mxu3  ;;  %v6186_v10 = vrot.slane %v5682_v11, 2  ;;  %v8985_v60 = vrot.slane %v8481_v46, 2 }
 0x960   : > { %v7854_v49 = vrot.slane %v7349_v2, 1 }
 0x961   : > { %v10090_v52 = vmul.f32 0.4, %v9962_v57  ;;  %v9579_v51 = vmax.f32 %v9451_v1, 0.0  ;;  %10897 = vmatmul.msk.bf16.gmra.mxu1 %vm477_vm1, %v16591_v20  ;;  %11158 = vmatmul.msk.bf16.gmra.mxu0 %vm477_vm1, %v16592_v3  ;;  %v16597_v20 = vld [vmem:[#allocation50_spill] sm:$0xff] }
 0x962   : > { %v7855_v48 = vsel %vm1812_vm2, %v7852_v32, %v7854_v49  ;;  %10984 = vmatmul.msk.bf16.gmra.mxu2 %vm477_vm1, %v16592_v3 }
 0x963   : > { %10218 = vst [vmem:[%s14274_s11 + $0x1e8] sm:$0xff] %v10090_v52  ;;  %v9707_v35 = vmin.f32 %v9579_v51, 0.4  ;;  %v8191_v14 = vadd.f32 %v7855_v48, %v7062_v53 }
 0x964   : > { %11071 = vmatmul.msk.bf16.gmra.mxu3 %vm477_vm1, %v16592_v3 }
 0x965   : > { %v9835_v50 = vmul.f32 2.5, %v9707_v35  ;;  %v9320_v43 = vadd.f32 %v8984_v44, %v8191_v14  ;;  %v6815_v31 = vpop.f32.mrf.mxu2 }
 0x966   : > { %v5684_v16 = vpop.f32.mrf.mxu1  ;;  %v8483_v36 = vpop.f32.mrf.mxu0 }
 0x967   : > { %v9963_v13 = vfloor.f32 %v9835_v50  ;;  %v9452_v37 = vadd.f32 %v14957_v24, %v9320_v43  ;;  %v7352_v63 = vpop.f32.mrf.mxu3  ;;  %v6187_v12 = vrot.slane %v5684_v16, 2  ;;  %v8986_v42 = vrot.slane %v8483_v36, 2 }
 0x968   : > { %v7856_v17 = vrot.slane %v7352_v63, 1 }
 0x969   : > { %v10091_v61 = vmul.f32 0.4, %v9963_v13  ;;  %v9580_v40 = vmax.f32 %v9452_v37, 0.0  ;;  %v6188_v7 = vsel %vm2942_vm3, %v6186_v10, %v6187_v12  ;;  %v8987_v62 = vsel %vm2942_vm3, %v8985_v60, %v8986_v42 }
 0x96a   : > { %v6522_v41 = vadd.f32 %v6188_v7, %v16593_v4  ;;  %v16598_v4 = vld [vmem:[#allocation43_spill] sm:$0xff] }
 0x96b   : > { %10219 = vst [vmem:[%s14274_s11 + $0x1f0] sm:$0xff] %v10091_v61  ;;  %v9708_v39 = vmin.f32 %v9580_v40, 0.4 }
 0x96c   : > { %v7063_v8 = vadd.f32 %v6815_v31, %v6522_v41 }
 0x96d   : > { %v9836_v47 = vmul.f32 2.5, %v9708_v39  ;;  %v6817_v0 = vpop.f32.mrf.mxu2 }
 0x96e   : > { %v5687_v32 = vpop.f32.mrf.mxu1  ;;  %v8486_v30 = vpop.f32.mrf.mxu0 }
 0x96f   : > { %v9964_v18 = vfloor.f32 %v9836_v47  ;;  %v7354_v26 = vpop.f32.mrf.mxu3  ;;  %v6189_v6 = vrot.slane %v5687_v32, 2  ;;  %v8988_v55 = vrot.slane %v8486_v30, 2 }
 0x970   : > { %v7857_v19 = vrot.slane %v7354_v26, 1 }
 0x971   : > { %v10092_v54 = vmul.f32 0.4, %v9964_v18  ;;  %v6190_v15 = vsel %vm2942_vm3, %v6187_v12, %v6189_v6  ;;  %10898 = vmatmul.msk.bf16.gmra.mxu1 %vm477_vm1, %v16594_v45  ;;  %11159 = vmatmul.msk.bf16.gmra.mxu0 %vm477_vm1, %v16595_v38  ;;  %v8989_v48 = vsel %vm2942_vm3, %v8986_v42, %v8988_v55  ;;  %v16599_v18 = vld [vmem:[#allocation103_spill] sm:$0xff] }
 0x972   : > { %v7858_v58 = vsel %vm1812_vm2, %v7856_v17, %v7857_v19  ;;  %v6523_v56 = vadd.f32 %v6190_v15, %v16596_v59  ;;  %10985 = vmatmul.msk.bf16.gmra.mxu2 %vm477_vm1, %v16595_v38  ;;  %v16600_v17 = vld [vmem:[#allocation222_spill] sm:$0xff] }
 0x973   : > { %10220 = vst [vmem:[%s14274_s11 + $0x1f8] sm:$0xff] %v10092_v54  ;;  %v8192_v28 = vadd.f32 %v7858_v58, %v7063_v8 }
 0x974   : > { %11072 = vmatmul.msk.bf16.gmra.mxu3 %vm477_vm1, %v16595_v38  ;;  %v7064_v49 = vadd.f32 %v6817_v0, %v6523_v56 }
 0x975   : > { %v9321_v22 = vadd.f32 %v8987_v62, %v8192_v28  ;;  %v6820_v1 = vpop.f32.mrf.mxu2 }
 0x976   : > { %v5689_v2 = vpop.f32.mrf.mxu1  ;;  %v8488_v11 = vpop.f32.mrf.mxu0 }
 0x977   : > { %v9453_v34 = vadd.f32 %v14957_v24, %v9321_v22  ;;  %v7357_v27 = vpop.f32.mrf.mxu3  ;;  %v6191_v9 = vrot.slane %v5689_v2, 2  ;;  %v8990_v13 = vrot.slane %v8488_v11, 2 }
 0x978   : > { %v7859_v57 = vrot.slane %v7357_v27, 1 }
 0x979   : > { %v9581_v21 = vmax.f32 %v9453_v34, 0.0  ;;  %v6192_v46 = vsel %vm2942_vm3, %v6189_v6, %v6191_v9  ;;  %v8991_v41 = vsel %vm2942_vm3, %v8988_v55, %v8990_v13 }
 0x97a   : > { %v7860_v52 = vsel %vm1812_vm2, %v7857_v19, %v7859_v57  ;;  %v6524_v44 = vadd.f32 %v6192_v46, %v16597_v20  ;;  %v16601_v46 = vld [vmem:[#allocation53_spill] sm:$0xff] }
 0x97b   : > { %v9709_v51 = vmin.f32 %v9581_v21, 0.4  ;;  %v8193_v53 = vadd.f32 %v7860_v52, %v7064_v49 }
 0x97c   : > { %v7065_v40 = vadd.f32 %v6820_v1, %v6524_v44 }
 0x97d   : > { %v9837_v35 = vmul.f32 2.5, %v9709_v51  ;;  %v9322_v14 = vadd.f32 %v8989_v48, %v8193_v53  ;;  %v6822_v63 = vpop.f32.mrf.mxu2  ;;  %v16602_v48 = vld [vmem:[#allocation114_spill] sm:$0xff] }
 0x97e   : > { %v5692_v31 = vpop.f32.mrf.mxu1  ;;  %v8491_v12 = vpop.f32.mrf.mxu0 }
 0x97f   : > { %v9965_v3 = vfloor.f32 %v9837_v35  ;;  %v9454_v50 = vadd.f32 %v14957_v24, %v9322_v14  ;;  %v7359_v43 = vpop.f32.mrf.mxu3  ;;  %v6193_v10 = vrot.slane %v5692_v31, 2  ;;  %v8992_v54 = vrot.slane %v8491_v12, 2  ;;  %v16603_v14 = vld [vmem:[#allocation223_spill] sm:$0xff] }
 0x980   : > { %v7861_v37 = vrot.slane %v7359_v43, 1 }
 0x981   : > { %v10093_v16 = vmul.f32 0.4, %v9965_v3  ;;  %v9582_v61 = vmax.f32 %v9454_v50, 0.0  ;;  %v6194_v47 = vsel %vm2942_vm3, %v6191_v9, %v6193_v10  ;;  %10899 = vmatmul.msk.bf16.gmra.mxu1 %vm477_vm1, %v16598_v4  ;;  %11160 = vmatmul.msk.bf16.gmra.mxu0 %vm477_vm1, %v16599_v18  ;;  %v8993_v59 = vsel %vm2942_vm3, %v8990_v13, %v8992_v54  ;;  %v16604_v4 = vld [vmem:[#allocation65_spill] sm:$0xff] }
 0x982   : > { %v7862_v36 = vsel %vm1812_vm2, %v7859_v57, %v7861_v37  ;;  %v6525_v42 = vadd.f32 %v6194_v47, %v16600_v17  ;;  %10986 = vmatmul.msk.bf16.gmra.mxu2 %vm477_vm1, %v16599_v18 }
 0x983   : > { %10221 = vst [vmem:[%s14274_s11 + $0x200] sm:$0xff] %v10093_v16  ;;  %v9710_v39 = vmin.f32 %v9582_v61, 0.4  ;;  %v8194_v7 = vadd.f32 %v7862_v36, %v7065_v40 }
 0x984   : > { %11073 = vmatmul.msk.bf16.gmra.mxu3 %vm477_vm1, %v16599_v18  ;;  %v7066_v15 = vadd.f32 %v6822_v63, %v6525_v42 }
 0x985   : > { %v9838_v26 = vmul.f32 2.5, %v9710_v39  ;;  %v9323_v60 = vadd.f32 %v8991_v41, %v8194_v7  ;;  %v6825_v6 = vpop.f32.mrf.mxu2 }
 0x986   : > { %v5694_v30 = vpop.f32.mrf.mxu1  ;;  %v8493_v45 = vpop.f32.mrf.mxu0 }
 0x987   : > { %v9966_v19 = vfloor.f32 %v9838_v26  ;;  %v9455_v0 = vadd.f32 %v14957_v24, %v9323_v60  ;;  %v7362_v32 = vpop.f32.mrf.mxu3  ;;  %v6195_v9 = vrot.slane %v5694_v30, 2  ;;  %v8994_v10 = vrot.slane %v8493_v45, 2 }
 0x988   : > { %v7863_v8 = vrot.slane %v7362_v32, 1 }
 0x989   : > { %v10094_v58 = vmul.f32 0.4, %v9966_v19  ;;  %v9583_v28 = vmax.f32 %v9455_v0, 0.0 }
 0x98a   : > { %v7864_v62 = vsel %vm1812_vm2, %v7861_v37, %v7863_v8 }
 0x98b   : > { %10222 = vst [vmem:[%s14274_s11 + $0x208] sm:$0xff] %v10094_v58  ;;  %v9711_v38 = vmin.f32 %v9583_v28, 0.4  ;;  %v8195_v22 = vadd.f32 %v7864_v62, %v7066_v15  ;;  %v16605_v15 = vld [vmem:[#allocation59_spill] sm:$0xff]  ;;  %v16606_v62 = vld [vmem:[#allocation128_spill] sm:$0xff] }
 0x98d   : > { %v9839_v56 = vmul.f32 2.5, %v9711_v38  ;;  %v9324_v34 = vadd.f32 %v8993_v59, %v8195_v22  ;;  %v6826_v1 = vpop.f32.mrf.mxu2  ;;  %v16607_v59 = vld [vmem:[#allocation224_spill] sm:$0xff] }
 0x98e   : > { %v5697_v2 = vpop.f32.mrf.mxu1  ;;  %v8496_v52 = vpop.f32.mrf.mxu0 }
 0x98f   : > { %v9967_v27 = vfloor.f32 %v9839_v56  ;;  %v9456_v55 = vadd.f32 %v14957_v24, %v9324_v34  ;;  %v7364_v57 = vpop.f32.mrf.mxu3  ;;  %v6196_v11 = vrot.slane %v5697_v2, 2  ;;  %v8995_v43 = vrot.slane %v8496_v52, 2 }
 0x990   : > { %v7865_v50 = vrot.slane %v7364_v57, 1 }
 0x991   : > { %v10095_v21 = vmul.f32 0.4, %v9967_v27  ;;  %v9584_v49 = vmax.f32 %v9456_v55, 0.0  ;;  %v6197_v53 = vsel %vm2942_vm3, %v6195_v9, %v6196_v11  ;;  %10900 = vmatmul.msk.bf16.gmra.mxu1 %vm477_vm1, %v16601_v46  ;;  %11161 = vmatmul.msk.bf16.gmra.mxu0 %vm477_vm1, %v16602_v48  ;;  %v8996_v7 = vsel %vm2942_vm3, %v8994_v10, %v8995_v43 }
 0x992   : > { %v6526_v20 = vadd.f32 %v6197_v53, %v16603_v14  ;;  %10987 = vmatmul.msk.bf16.gmra.mxu2 %vm477_vm1, %v16602_v48 }
 0x993   : > { %10223 = vst [vmem:[%s14274_s11 + $0x210] sm:$0xff] %v10095_v21  ;;  %v9712_v51 = vmin.f32 %v9584_v49, 0.4 }
 0x994   : > { %11074 = vmatmul.msk.bf16.gmra.mxu3 %vm477_vm1, %v16602_v48  ;;  %v7067_v16 = vadd.f32 %v6826_v1, %v6526_v20 }
 0x995   : > { %v9840_v35 = vmul.f32 2.5, %v9712_v51  ;;  %v6829_v37 = vpop.f32.mrf.mxu2 }
 0x996   : > { %v5699_v63 = vpop.f32.mrf.mxu1  ;;  %v8498_v40 = vpop.f32.mrf.mxu0 }
 0x997   : > { %v9968_v44 = vfloor.f32 %v9840_v35  ;;  %v7367_v3 = vpop.f32.mrf.mxu3  ;;  %v6198_v61 = vrot.slane %v5699_v63, 2  ;;  %v8997_v60 = vrot.slane %v8498_v40, 2 }
 0x998   : > { %v7866_v13 = vrot.slane %v7367_v3, 1  ;;  %v16608_v3 = vld [vmem:[#allocation75_spill] sm:$0xff] }
 0x999   : > { %v10096_v31 = vmul.f32 0.4, %v9968_v44  ;;  %v6199_v39 = vsel %vm2942_vm3, %v6196_v11, %v6198_v61  ;;  %v8998_v45 = vsel %vm2942_vm3, %v8995_v43, %v8997_v60 }
 0x99a   : > { %v7867_v12 = vsel %vm1812_vm2, %v7865_v50, %v7866_v13  ;;  %v6527_v41 = vadd.f32 %v6199_v39, %v16604_v4  ;;  %v16609_v4 = vld [vmem:[#allocation68_spill] sm:$0xff] }
 0x99b   : > { %10224 = vst [vmem:[%s14274_s11 + $0x218] sm:$0xff] %v10096_v31  ;;  %v8196_v36 = vadd.f32 %v7867_v12, %v7067_v16 }
 0x99c   : > { %v7068_v32 = vadd.f32 %v6829_v37, %v6527_v41 }
 0x99d   : > { %v9325_v47 = vadd.f32 %v8996_v7, %v8196_v36  ;;  %v6831_v42 = vpop.f32.mrf.mxu2 }
 0x99e   : > { %v5702_v19 = vpop.f32.mrf.mxu1  ;;  %v8501_v8 = vpop.f32.mrf.mxu0 }
 0x99f   : > { %v9457_v18 = vadd.f32 %v14957_v24, %v9325_v47  ;;  %v7369_v26 = vpop.f32.mrf.mxu3  ;;  %v6200_v54 = vrot.slane %v5702_v19, 2  ;;  %v8999_v57 = vrot.slane %v8501_v8, 2 }
 0x9a0   : > { %v7868_v17 = vrot.slane %v7369_v26, 1 }
 0x9a1   : > { %v9585_v0 = vmax.f32 %v9457_v18, 0.0  ;;  %v6201_v28 = vsel %vm2942_vm3, %v6198_v61, %v6200_v54  ;;  %10901 = vmatmul.msk.bf16.gmra.mxu1 %vm477_vm1, %v16605_v15  ;;  %11162 = vmatmul.msk.bf16.gmra.mxu0 %vm477_vm1, %v16606_v62  ;;  %v9000_v14 = vsel %vm2942_vm3, %v8997_v60, %v8999_v57  ;;  %v16610_v18 = vld [vmem:[#allocation138_spill] sm:$0xff] }
 0x9a2   : > { %v7869_v6 = vsel %vm1812_vm2, %v7866_v13, %v7868_v17  ;;  %v6528_v56 = vadd.f32 %v6201_v28, %v16607_v59  ;;  %10988 = vmatmul.msk.bf16.gmra.mxu2 %vm477_vm1, %v16606_v62 }
 0x9a3   : > { %v9713_v30 = vmin.f32 %v9585_v0, 0.4  ;;  %v8197_v58 = vadd.f32 %v7869_v6, %v7068_v32 }
 0x9a4   : > { %11075 = vmatmul.msk.bf16.gmra.mxu3 %vm477_vm1, %v16606_v62  ;;  %v7069_v11 = vadd.f32 %v6831_v42, %v6528_v56  ;;  %v16611_v62 = vld [vmem:[#allocation83_spill] sm:$0xff] }
 0x9a5   : > { %v9841_v38 = vmul.f32 2.5, %v9713_v30  ;;  %v9326_v22 = vadd.f32 %v8998_v45, %v8197_v58  ;;  %v6834_v2 = vpop.f32.mrf.mxu2 }
 0x9a6   : > { %v5704_v21 = vpop.f32.mrf.mxu1  ;;  %v8503_v51 = vpop.f32.mrf.mxu0 }
 0x9a7   : > { %v9969_v34 = vfloor.f32 %v9841_v38  ;;  %v9458_v27 = vadd.f32 %v14957_v24, %v9326_v22  ;;  %v7372_v55 = vpop.f32.mrf.mxu3  ;;  %v6202_v52 = vrot.slane %v5704_v21, 2  ;;  %v9001_v63 = vrot.slane %v8503_v51, 2 }
 0x9a8   : > { %v7870_v1 = vrot.slane %v7372_v55, 1 }
 0x9a9   : > { %v10097_v49 = vmul.f32 0.4, %v9969_v34  ;;  %v9586_v9 = vmax.f32 %v9458_v27, 0.0  ;;  %v6203_v35 = vsel %vm2942_vm3, %v6200_v54, %v6202_v52  ;;  %v9002_v41 = vsel %vm2942_vm3, %v8999_v57, %v9001_v63 }
 0x9aa   : > { %v7871_v53 = vsel %vm1812_vm2, %v7868_v17, %v7870_v1  ;;  %v6529_v50 = vadd.f32 %v6203_v35, %v16608_v3 }
 0x9ab   : > { %10225 = vst [vmem:[%s14274_s11 + $0x220] sm:$0xff] %v10097_v49  ;;  %v9714_v46 = vmin.f32 %v9586_v9, 0.4  ;;  %v8198_v48 = vadd.f32 %v7871_v53, %v7069_v11  ;;  %v16612_v53 = vld [vmem:[#allocation225_spill] sm:$0xff] }
 0x9ac   : > { %v7070_v12 = vadd.f32 %v6834_v2, %v6529_v50 }
 0x9ad   : > { %v9842_v20 = vmul.f32 2.5, %v9714_v46  ;;  %v9327_v44 = vadd.f32 %v9000_v14, %v8198_v48  ;;  %v6836_v16 = vpop.f32.mrf.mxu2  ;;  %v16613_v48 = vld [vmem:[#allocation148_spill] sm:$0xff]  ;;  %v16614_v14 = vld [vmem:[#allocation226_spill] sm:$0xff] }
 0x9ae   : > { %v5707_v61 = vpop.f32.mrf.mxu1  ;;  %v8506_v36 = vpop.f32.mrf.mxu0 }
 0x9af   : > { %v9970_v43 = vfloor.f32 %v9842_v20  ;;  %v9459_v13 = vadd.f32 %v14957_v24, %v9327_v44  ;;  %v7374_v37 = vpop.f32.mrf.mxu3  ;;  %v6204_v6 = vrot.slane %v5707_v61, 2  ;;  %v9003_v56 = vrot.slane %v8506_v36, 2 }
 0x9b0   : > { %v7872_v31 = vrot.slane %v7374_v37, 1 }
 0x9b1   : > { %v10098_v40 = vmul.f32 0.4, %v9970_v43  ;;  %v9587_v10 = vmax.f32 %v9459_v13, 0.0  ;;  %10902 = vmatmul.msk.bf16.gmra.mxu1 %vm477_vm1, %v16609_v4  ;;  %11163 = vmatmul.msk.bf16.gmra.mxu0 %vm477_vm1, %v16610_v18  ;;  %v16615_v4 = vld [vmem:[#allocation95_spill] sm:$0xff] }
 0x9b2   : > { %v7873_v39 = vsel %vm1812_vm2, %v7870_v1, %v7872_v31  ;;  %10989 = vmatmul.msk.bf16.gmra.mxu2 %vm477_vm1, %v16610_v18 }
 0x9b3   : > { %10226 = vst [vmem:[%s14274_s11 + $0x228] sm:$0xff] %v10098_v40  ;;  %v9715_v7 = vmin.f32 %v9587_v10, 0.4  ;;  %v8199_v47 = vadd.f32 %v7873_v39, %v7070_v12 }
 0x9b4   : > { %11076 = vmatmul.msk.bf16.gmra.mxu3 %vm477_vm1, %v16610_v18 }
 0x9b5   : > { %v9843_v26 = vmul.f32 2.5, %v9715_v7  ;;  %v9328_v60 = vadd.f32 %v9002_v41, %v8199_v47  ;;  %v6838_v0 = vpop.f32.mrf.mxu2 }
 0x9b6   : > { %v5709_v32 = vpop.f32.mrf.mxu1  ;;  %v8508_v58 = vpop.f32.mrf.mxu0 }
 0x9b7   : > { %v9971_v17 = vfloor.f32 %v9843_v26  ;;  %v9460_v42 = vadd.f32 %v14957_v24, %v9328_v60  ;;  %v7377_v19 = vpop.f32.mrf.mxu3  ;;  %v6205_v30 = vrot.slane %v5709_v32, 2  ;;  %v9004_v27 = vrot.slane %v8508_v58, 2 }
 0x9b8   : > { %v7874_v34 = vrot.slane %v7377_v19, 1 }
 0x9b9   : > { %v10099_v54 = vmul.f32 0.4, %v9971_v17  ;;  %v9588_v8 = vmax.f32 %v9460_v42, 0.0  ;;  %v6206_v15 = vsel %vm2942_vm3, %v6204_v6, %v6205_v30  ;;  %v9005_v46 = vsel %vm2942_vm3, %v9003_v56, %v9004_v27 }
 0x9ba   : > { %v6530_v38 = vadd.f32 %v6206_v15, %v16611_v62  ;;  %v16616_v62 = vld [vmem:[#allocation87_spill] sm:$0xff] }
 0x9bb   : > { %10227 = vst [vmem:[%s14274_s11 + $0x230] sm:$0xff] %v10099_v54  ;;  %v9716_v28 = vmin.f32 %v9588_v8, 0.4 }
 0x9bc   : > { %v7071_v21 = vadd.f32 %v6838_v0, %v6530_v38 }
 0x9bd   : > { %v9844_v45 = vmul.f32 2.5, %v9716_v28  ;;  %v6840_v57 = vpop.f32.mrf.mxu2 }
 0x9be   : > { %v5712_v1 = vpop.f32.mrf.mxu1  ;;  %v8511_v9 = vpop.f32.mrf.mxu0 }
 0x9bf   : > { %v9972_v22 = vfloor.f32 %v9844_v45  ;;  %v7379_v59 = vpop.f32.mrf.mxu3  ;;  %v6207_v49 = vrot.slane %v5712_v1, 2  ;;  %v9006_v50 = vrot.slane %v8511_v9, 2 }
 0x9c0   : > { %v7875_v55 = vrot.slane %v7379_v59, 1 }
 0x9c1   : > { %v10100_v2 = vmul.f32 0.4, %v9972_v22  ;;  %v6208_v51 = vsel %vm2942_vm3, %v6205_v30, %v6207_v49  ;;  %10903 = vmatmul.msk.bf16.gmra.mxu1 %vm477_vm1, %v16612_v53  ;;  %11164 = vmatmul.msk.bf16.gmra.mxu0 %vm477_vm1, %v16613_v48  ;;  %v9007_v39 = vsel %vm2942_vm3, %v9004_v27, %v9006_v50  ;;  %v16617_v22 = vld [vmem:[#allocation7_spill] sm:$0xff] }
 0x9c2   : > { %v7876_v11 = vsel %vm1812_vm2, %v7874_v34, %v7875_v55  ;;  %v6531_v20 = vadd.f32 %v6208_v51, %v16614_v14  ;;  %10990 = vmatmul.msk.bf16.gmra.mxu2 %vm477_vm1, %v16613_v48  ;;  %v16618_v34 = vld [vmem:[#allocation227_spill] sm:$0xff] }
 0x9c3   : > { %10228 = vst [vmem:[%s14274_s11 + $0x238] sm:$0xff] %v10100_v2  ;;  %v8200_v52 = vadd.f32 %v7876_v11, %v7071_v21 }
 0x9c4   : > { %11077 = vmatmul.msk.bf16.gmra.mxu3 %vm477_vm1, %v16613_v48  ;;  %v7072_v31 = vadd.f32 %v6840_v57, %v6531_v20 }
 0x9c5   : > { %v9329_v35 = vadd.f32 %v9005_v46, %v8200_v52  ;;  %v6843_v13 = vpop.f32.mrf.mxu2 }
 0x9c6   : > { %v5714_v37 = vpop.f32.mrf.mxu1  ;;  %v8513_v61 = vpop.f32.mrf.mxu0 }
 0x9c7   : > { %v9461_v44 = vadd.f32 %v14957_v24, %v9329_v35  ;;  %v7382_v3 = vpop.f32.mrf.mxu3  ;;  %v6209_v16 = vrot.slane %v5714_v37, 2  ;;  %v9008_v17 = vrot.slane %v8513_v61, 2 }
 0x9c8   : > { %v7877_v43 = vrot.slane %v7382_v3, 1 }
 0x9c9   : > { %v9589_v63 = vmax.f32 %v9461_v44, 0.0  ;;  %v6210_v36 = vsel %vm2942_vm3, %v6207_v49, %v6209_v16  ;;  %v9009_v38 = vsel %vm2942_vm3, %v9006_v50, %v9008_v17 }
 0x9ca   : > { %v7878_v40 = vsel %vm1812_vm2, %v7875_v55, %v7877_v43  ;;  %v6532_v41 = vadd.f32 %v6210_v36, %v16615_v4  ;;  %v16619_v36 = vld [vmem:[#allocation99_spill] sm:$0xff] }
 0x9cb   : > { %v9717_v10 = vmin.f32 %v9589_v63, 0.4  ;;  %v8201_v12 = vadd.f32 %v7878_v40, %v7072_v31 }
 0x9cc   : > { %v7073_v8 = vadd.f32 %v6843_v13, %v6532_v41 }
 0x9cd   : > { %v9845_v7 = vmul.f32 2.5, %v9717_v10  ;;  %v9330_v47 = vadd.f32 %v9007_v39, %v8201_v12  ;;  %v6845_v19 = vpop.f32.mrf.mxu2  ;;  %v16620_v39 = vld [vmem:[#allocation10_spill] sm:$0xff] }
 0x9ce   : > { %v5717_v0 = vpop.f32.mrf.mxu1  ;;  %v8516_v30 = vpop.f32.mrf.mxu0 }
 0x9cf   : > { %v9973_v18 = vfloor.f32 %v9845_v7  ;;  %v9462_v26 = vadd.f32 %v14957_v24, %v9330_v47  ;;  %v7384_v60 = vpop.f32.mrf.mxu3  ;;  %v6211_v6 = vrot.slane %v5717_v0, 2  ;;  %v9010_v2 = vrot.slane %v8516_v30, 2  ;;  %v16621_v47 = vld [vmem:[#allocation228_spill] sm:$0xff] }
 0x9d0   : > { %v7879_v42 = vrot.slane %v7384_v60, 1 }
 0x9d1   : > { %v10101_v32 = vmul.f32 0.4, %v9973_v18  ;;  %v9590_v54 = vmax.f32 %v9462_v26, 0.0  ;;  %v6212_v45 = vsel %vm2942_vm3, %v6209_v16, %v6211_v6  ;;  %10904 = vmatmul.msk.bf16.gmra.mxu1 %vm477_vm1, %v16616_v62  ;;  %11165 = vmatmul.msk.bf16.gmra.mxu0 %vm477_vm1, %v16617_v22  ;;  %v9011_v14 = vsel %vm2942_vm3, %v9008_v17, %v9010_v2  ;;  %v16622_v62 = vld [vmem:[#allocation116_spill] sm:$0xff] }
 0x9d2   : > { %v7880_v58 = vsel %vm1812_vm2, %v7877_v43, %v7879_v42  ;;  %v6533_v27 = vadd.f32 %v6212_v45, %v16618_v34  ;;  %10991 = vmatmul.msk.bf16.gmra.mxu2 %vm477_vm1, %v16617_v22 }
 0x9d3   : > { %10229 = vst [vmem:[%s14274_s11 + $0x240] sm:$0xff] %v10101_v32  ;;  %v9718_v28 = vmin.f32 %v9590_v54, 0.4  ;;  %v8202_v15 = vadd.f32 %v7880_v58, %v7073_v8 }
 0x9d4   : > { %11078 = vmatmul.msk.bf16.gmra.mxu3 %vm477_vm1, %v16617_v22  ;;  %v7074_v51 = vadd.f32 %v6845_v19, %v6533_v27 }
 0x9d5   : > { %v9846_v59 = vmul.f32 2.5, %v9718_v28  ;;  %v9331_v56 = vadd.f32 %v9009_v38, %v8202_v15  ;;  %v6848_v49 = vpop.f32.mrf.mxu2 }
 0x9d6   : > { %v5719_v9 = vpop.f32.mrf.mxu1  ;;  %v8518_v53 = vpop.f32.mrf.mxu0 }
 0x9d7   : > { %v9974_v55 = vfloor.f32 %v9846_v59  ;;  %v9463_v57 = vadd.f32 %v14957_v24, %v9331_v56  ;;  %v7387_v1 = vpop.f32.mrf.mxu3  ;;  %v6213_v16 = vrot.slane %v5719_v9, 2  ;;  %v9012_v6 = vrot.slane %v8518_v53, 2 }
 0x9d8   : > { %v7881_v21 = vrot.slane %v7387_v1, 1 }
 0x9d9   : > { %v10102_v11 = vmul.f32 0.4, %v9974_v55  ;;  %v9591_v52 = vmax.f32 %v9463_v57, 0.0 }
 0x9da   : > { %v7882_v46 = vsel %vm1812_vm2, %v7879_v42, %v7881_v21 }
 0x9db   : > { %10230 = vst [vmem:[%s14274_s11 + $0x248] sm:$0xff] %v10102_v11  ;;  %v9719_v48 = vmin.f32 %v9591_v52, 0.4  ;;  %v8203_v35 = vadd.f32 %v7882_v46, %v7074_v51  ;;  %v16623_v51 = vld [vmem:[#allocation108_spill] sm:$0xff]  ;;  %v16624_v46 = vld [vmem:[#allocation14_spill] sm:$0xff] }
 0x9dd   : > { %v9847_v20 = vmul.f32 2.5, %v9719_v48  ;;  %v9332_v44 = vadd.f32 %v9011_v14, %v8203_v35  ;;  %v6849_v13 = vpop.f32.mrf.mxu2  ;;  %v16625_v14 = vld [vmem:[#allocation229_spill] sm:$0xff] }
 0x9de   : > { %v5722_v37 = vpop.f32.mrf.mxu1  ;;  %v8521_v40 = vpop.f32.mrf.mxu0 }
 0x9df   : > { %v9975_v3 = vfloor.f32 %v9847_v20  ;;  %v9464_v50 = vadd.f32 %v14957_v24, %v9332_v44  ;;  %v7389_v43 = vpop.f32.mrf.mxu3  ;;  %v6214_v61 = vrot.slane %v5722_v37, 2  ;;  %v9013_v60 = vrot.slane %v8521_v40, 2 }
 0x9e0   : > { %v7883_v26 = vrot.slane %v7389_v43, 1 }
 0x9e1   : > { %v10103_v63 = vmul.f32 0.4, %v9975_v3  ;;  %v9592_v31 = vmax.f32 %v9464_v50, 0.0  ;;  %v6215_v12 = vsel %vm2942_vm3, %v6213_v16, %v6214_v61  ;;  %10905 = vmatmul.msk.bf16.gmra.mxu1 %vm477_vm1, %v16619_v36  ;;  %11166 = vmatmul.msk.bf16.gmra.mxu0 %vm477_vm1, %v16620_v39  ;;  %v9014_v15 = vsel %vm2942_vm3, %v9012_v6, %v9013_v60 }
 0x9e2   : > { %v6534_v4 = vadd.f32 %v6215_v12, %v16621_v47  ;;  %10992 = vmatmul.msk.bf16.gmra.mxu2 %vm477_vm1, %v16620_v39 }
 0x9e3   : > { %10231 = vst [vmem:[%s14274_s11 + $0x250] sm:$0xff] %v10103_v63  ;;  %v9720_v10 = vmin.f32 %v9592_v31, 0.4 }
 0x9e4   : > { %11079 = vmatmul.msk.bf16.gmra.mxu3 %vm477_vm1, %v16620_v39  ;;  %v7075_v32 = vadd.f32 %v6849_v13, %v6534_v4 }
 0x9e5   : > { %v9848_v7 = vmul.f32 2.5, %v9720_v10  ;;  %v6852_v42 = vpop.f32.mrf.mxu2 }
 0x9e6   : > { %v5724_v19 = vpop.f32.mrf.mxu1  ;;  %v8523_v8 = vpop.f32.mrf.mxu0 }
 0x9e7   : > { %v9976_v41 = vfloor.f32 %v9848_v7  ;;  %v7392_v18 = vpop.f32.mrf.mxu3  ;;  %v6216_v54 = vrot.slane %v5724_v19, 2  ;;  %v9015_v56 = vrot.slane %v8523_v8, 2 }
 0x9e8   : > { %v7884_v17 = vrot.slane %v7392_v18, 1  ;;  %v16626_v18 = vld [vmem:[#allocation130_spill] sm:$0xff] }
 0x9e9   : > { %v10104_v0 = vmul.f32 0.4, %v9976_v41  ;;  %v6217_v28 = vsel %vm2942_vm3, %v6214_v61, %v6216_v54  ;;  %v9016_v53 = vsel %vm2942_vm3, %v9013_v60, %v9015_v56 }
 0x9ea   : > { %v7885_v30 = vsel %vm1812_vm2, %v7883_v26, %v7884_v17  ;;  %v6535_v38 = vadd.f32 %v6217_v28, %v16622_v62  ;;  %v16627_v62 = vld [vmem:[#allocation122_spill] sm:$0xff] }
 0x9eb   : > { %10232 = vst [vmem:[%s14274_s11 + $0x258] sm:$0xff] %v10104_v0  ;;  %v8204_v58 = vadd.f32 %v7885_v30, %v7075_v32 }
 0x9ec   : > { %v7076_v1 = vadd.f32 %v6852_v42, %v6535_v38 }
 0x9ed   : > { %v9333_v45 = vadd.f32 %v9014_v15, %v8204_v58  ;;  %v6854_v27 = vpop.f32.mrf.mxu2 }
 0x9ee   : > { %v5727_v55 = vpop.f32.mrf.mxu1  ;;  %v8526_v21 = vpop.f32.mrf.mxu0 }
 0x9ef   : > { %v9465_v22 = vadd.f32 %v14957_v24, %v9333_v45  ;;  %v7394_v59 = vpop.f32.mrf.mxu3  ;;  %v6218_v2 = vrot.slane %v5727_v55, 2  ;;  %v9017_v43 = vrot.slane %v8526_v21, 2 }
 0x9f0   : > { %v7886_v34 = vrot.slane %v7394_v59, 1 }
 0x9f1   : > { %v9593_v57 = vmax.f32 %v9465_v22, 0.0  ;;  %v6219_v52 = vsel %vm2942_vm3, %v6216_v54, %v6218_v2  ;;  %10906 = vmatmul.msk.bf16.gmra.mxu1 %vm477_vm1, %v16623_v51  ;;  %11167 = vmatmul.msk.bf16.gmra.mxu0 %vm477_vm1, %v16624_v46  ;;  %v9018_v47 = vsel %vm2942_vm3, %v9015_v56, %v9017_v43  ;;  %v16628_v22 = vld [vmem:[#allocation19_spill] sm:$0xff] }
 0x9f2   : > { %v7887_v49 = vsel %vm1812_vm2, %v7884_v17, %v7886_v34  ;;  %v6536_v20 = vadd.f32 %v6219_v52, %v16625_v14  ;;  %10993 = vmatmul.msk.bf16.gmra.mxu2 %vm477_vm1, %v16624_v46 }
 0x9f3   : > { %v9721_v9 = vmin.f32 %v9593_v57, 0.4  ;;  %v8205_v11 = vadd.f32 %v7887_v49, %v7076_v1 }
 0x9f4   : > { %11080 = vmatmul.msk.bf16.gmra.mxu3 %vm477_vm1, %v16624_v46  ;;  %v7077_v61 = vadd.f32 %v6854_v27, %v6536_v20  ;;  %v16629_v46 = vld [vmem:[#allocation140_spill] sm:$0xff] }
 0x9f5   : > { %v9849_v48 = vmul.f32 2.5, %v9721_v9  ;;  %v9334_v35 = vadd.f32 %v9016_v53, %v8205_v11  ;;  %v6857_v37 = vpop.f32.mrf.mxu2 }
 0x9f6   : > { %v5729_v63 = vpop.f32.mrf.mxu1  ;;  %v8528_v10 = vpop.f32.mrf.mxu0 }
 0x9f7   : > { %v9977_v44 = vfloor.f32 %v9849_v48  ;;  %v9466_v3 = vadd.f32 %v14957_v24, %v9334_v35  ;;  %v7397_v50 = vpop.f32.mrf.mxu3  ;;  %v6220_v40 = vrot.slane %v5729_v63, 2  ;;  %v9019_v19 = vrot.slane %v8528_v10, 2 }
 0x9f8   : > { %v7888_v13 = vrot.slane %v7397_v50, 1 }
 0x9f9   : > { %v10105_v31 = vmul.f32 0.4, %v9977_v44  ;;  %v9594_v16 = vmax.f32 %v9466_v3, 0.0  ;;  %v6221_v7 = vsel %vm2942_vm3, %v6218_v2, %v6220_v40  ;;  %v9020_v38 = vsel %vm2942_vm3, %v9017_v43, %v9019_v19 }
 0x9fa   : > { %v7889_v12 = vsel %vm1812_vm2, %v7886_v34, %v7888_v13  ;;  %v6537_v26 = vadd.f32 %v6221_v7, %v16626_v18 }
 0x9fb   : > { %10233 = vst [vmem:[%s14274_s11 + $0x260] sm:$0xff] %v10105_v31  ;;  %v9722_v36 = vmin.f32 %v9594_v16, 0.4  ;;  %v8206_v39 = vadd.f32 %v7889_v12, %v7077_v61  ;;  %v16630_v12 = vld [vmem:[#allocation230_spill] sm:$0xff] }
 0x9fc   : > { %v7078_v30 = vadd.f32 %v6857_v37, %v6537_v26 }
 0x9fd   : > { %v9850_v4 = vmul.f32 2.5, %v9722_v36  ;;  %v9335_v41 = vadd.f32 %v9018_v47, %v8206_v39  ;;  %v6859_v32 = vpop.f32.mrf.mxu2  ;;  %v16631_v39 = vld [vmem:[#allocation22_spill] sm:$0xff]  ;;  %v16632_v47 = vld [vmem:[#allocation231_spill] sm:$0xff] }
 0x9fe   : > { %v5732_v54 = vpop.f32.mrf.mxu1  ;;  %v8531_v58 = vpop.f32.mrf.mxu0 }
 0x9ff   : > { %v9978_v60 = vfloor.f32 %v9850_v4  ;;  %v9467_v17 = vadd.f32 %v14957_v24, %v9335_v41  ;;  %v7399_v42 = vpop.f32.mrf.mxu3  ;;  %v6222_v49 = vrot.slane %v5732_v54, 2  ;;  %v9021_v20 = vrot.slane %v8531_v58, 2 }
 0xa00   : > { %v7890_v0 = vrot.slane %v7399_v42, 1 }
 0xa01   : > { %v10106_v8 = vmul.f32 0.4, %v9978_v60  ;;  %v9595_v6 = vmax.f32 %v9467_v17, 0.0  ;;  %10907 = vmatmul.msk.bf16.gmra.mxu1 %vm477_vm1, %v16627_v62  ;;  %11168 = vmatmul.msk.bf16.gmra.mxu0 %vm477_vm1, %v16628_v22  ;;  %v16633_v62 = vld [vmem:[#allocation150_spill] sm:$0xff] }
 0xa02   : > { %v7891_v28 = vsel %vm1812_vm2, %v7888_v13, %v7890_v0  ;;  %10994 = vmatmul.msk.bf16.gmra.mxu2 %vm477_vm1, %v16628_v22 }
 0xa03   : > { %10234 = vst [vmem:[%s14274_s11 + $0x268] sm:$0xff] %v10106_v8  ;;  %v9723_v15 = vmin.f32 %v9595_v6, 0.4  ;;  %v8207_v45 = vadd.f32 %v7891_v28, %v7078_v30 }
 0xa04   : > { %11081 = vmatmul.msk.bf16.gmra.mxu3 %vm477_vm1, %v16628_v22 }
 0xa05   : > { %v9851_v59 = vmul.f32 2.5, %v9723_v15  ;;  %v9336_v56 = vadd.f32 %v9020_v38, %v8207_v45  ;;  %v6861_v57 = vpop.f32.mrf.mxu2 }
 0xa06   : > { %v5734_v1 = vpop.f32.mrf.mxu1  ;;  %v8533_v11 = vpop.f32.mrf.mxu0 }
 0xa07   : > { %v9979_v34 = vfloor.f32 %v9851_v59  ;;  %v9468_v27 = vadd.f32 %v14957_v24, %v9336_v56  ;;  %v7402_v55 = vpop.f32.mrf.mxu3  ;;  %v6223_v9 = vrot.slane %v5734_v1, 2  ;;  %v9022_v3 = vrot.slane %v8533_v11, 2 }
 0xa08   : > { %v7892_v44 = vrot.slane %v7402_v55, 1 }
 0xa09   : > { %v10107_v2 = vmul.f32 0.4, %v9979_v34  ;;  %v9596_v21 = vmax.f32 %v9468_v27, 0.0  ;;  %v6224_v51 = vsel %vm2942_vm3, %v6222_v49, %v6223_v9  ;;  %v9023_v36 = vsel %vm2942_vm3, %v9021_v20, %v9022_v3 }
 0xa0a   : > { %v6538_v48 = vadd.f32 %v6224_v51, %v16629_v46  ;;  %v16634_v46 = vld [vmem:[#allocation144_spill] sm:$0xff] }
 0xa0b   : > { %10235 = vst [vmem:[%s14274_s11 + $0x270] sm:$0xff] %v10107_v2  ;;  %v9724_v52 = vmin.f32 %v9596_v21, 0.4 }
 0xa0c   : > { %v7079_v63 = vadd.f32 %v6861_v57, %v6538_v48 }
 0xa0d   : > { %v9852_v53 = vmul.f32 2.5, %v9724_v52  ;;  %v6863_v43 = vpop.f32.mrf.mxu2 }
 0xa0e   : > { %v5737_v13 = vpop.f32.mrf.mxu1  ;;  %v8536_v16 = vpop.f32.mrf.mxu0 }
 0xa0f   : > { %v9980_v35 = vfloor.f32 %v9852_v53  ;;  %v7404_v14 = vpop.f32.mrf.mxu3  ;;  %v6225_v31 = vrot.slane %v5737_v13, 2  ;;  %v9024_v26 = vrot.slane %v8536_v16, 2 }
 0xa10   : > { %v7893_v50 = vrot.slane %v7404_v14, 1 }
 0xa11   : > { %v10108_v37 = vmul.f32 0.4, %v9980_v35  ;;  %v6226_v10 = vsel %vm2942_vm3, %v6223_v9, %v6225_v31  ;;  %10908 = vmatmul.msk.bf16.gmra.mxu1 %vm477_vm1, %v16630_v12  ;;  %11169 = vmatmul.msk.bf16.gmra.mxu0 %vm477_vm1, %v16631_v39  ;;  %v9025_v28 = vsel %vm2942_vm3, %v9022_v3, %v9024_v26  ;;  %v16635_v35 = vld [vmem:[#allocation26_spill] sm:$0xff] }
 0xa12   : > { %v7894_v61 = vsel %vm1812_vm2, %v7892_v44, %v7893_v50  ;;  %v6539_v4 = vadd.f32 %v6226_v10, %v16632_v47  ;;  %10995 = vmatmul.msk.bf16.gmra.mxu2 %vm477_vm1, %v16631_v39  ;;  %v16636_v44 = vld [vmem:[#allocation232_spill] sm:$0xff] }
 0xa13   : > { %10236 = vst [vmem:[%s14274_s11 + $0x278] sm:$0xff] %v10108_v37  ;;  %v8208_v40 = vadd.f32 %v7894_v61, %v7079_v63 }
 0xa14   : > { %11082 = vmatmul.msk.bf16.gmra.mxu3 %vm477_vm1, %v16631_v39  ;;  %v7080_v0 = vadd.f32 %v6863_v43, %v6539_v4 }
 0xa15   : > { %v9337_v7 = vadd.f32 %v9023_v36, %v8208_v40  ;;  %v6866_v17 = vpop.f32.mrf.mxu2 }
 0xa16   : > { %v5739_v42 = vpop.f32.mrf.mxu1  ;;  %v8538_v54 = vpop.f32.mrf.mxu0 }
 0xa17   : > { %v9469_v41 = vadd.f32 %v14957_v24, %v9337_v7  ;;  %v7407_v18 = vpop.f32.mrf.mxu3  ;;  %v6227_v32 = vrot.slane %v5739_v42, 2  ;;  %v9026_v34 = vrot.slane %v8538_v54, 2 }
 0xa18   : > { %v7895_v60 = vrot.slane %v7407_v18, 1  ;;  %v15190_v18 = vld [vmem:[%s15653_s2] ss:$0 sm:$0xff] }
 0xa19   : > { %v9597_v19 = vmax.f32 %v9469_v41, 0.0  ;;  %v6228_v58 = vsel %vm2942_vm3, %v6225_v31, %v6227_v32  ;;  %v9027_v48 = vsel %vm2942_vm3, %v9024_v26, %v9026_v34 }
 0xa1a   : > { %v7896_v8 = vsel %vm1812_vm2, %v7893_v50, %v7895_v60  ;;  %v6540_v38 = vadd.f32 %v6228_v58, %v16633_v62  ;;  %v16637_v58 = vld [vmem:[#allocation152_spill] sm:$0xff] }
 0xa1b   : > { %v9725_v6 = vmin.f32 %v9597_v19, 0.4  ;;  %v8209_v30 = vadd.f32 %v7896_v8, %v7080_v0 }
 0xa1c   : > { %v7081_v21 = vadd.f32 %v6866_v17, %v6540_v38 }
 0xa1d   : > { %v9853_v15 = vmul.f32 2.5, %v9725_v6  ;;  %v9338_v45 = vadd.f32 %v9025_v28, %v8209_v30  ;;  %v6868_v55 = vpop.f32.mrf.mxu2  ;;  %v16638_v28 = vld [vmem:[#allocation30_spill] sm:$0xff] }
 0xa1e   : > { %v5742_v57 = vpop.f32.mrf.mxu1  ;;  %v8541_v9 = vpop.f32.mrf.mxu0 }
 0xa1f   : > { %v9981_v22 = vfloor.f32 %v9853_v15  ;;  %v9470_v59 = vadd.f32 %v14957_v24, %v9338_v45  ;;  %v7409_v56 = vpop.f32.mrf.mxu3  ;;  %v6229_v49 = vrot.slane %v5742_v57, 2  ;;  %v9028_v37 = vrot.slane %v8541_v9, 2  ;;  %v16639_v45 = vld [vmem:[#allocation233_spill] sm:$0xff] }
 0xa20   : > { %v7897_v27 = vrot.slane %v7409_v56, 1 }
 0xa21   : > { %v10109_v1 = vmul.f32 0.4, %v9981_v22  ;;  %v9598_v2 = vmax.f32 %v9470_v59, 0.0  ;;  %v6230_v53 = vsel %vm2942_vm3, %v6227_v32, %v6229_v49  ;;  %10909 = vmatmul.msk.bf16.gmra.mxu1 %vm477_vm1, %v16634_v46  ;;  %11170 = vmatmul.msk.bf16.gmra.mxu0 %vm477_vm1, %v16635_v35  ;;  %v9029_v47 = vsel %vm2942_vm3, %v9026_v34, %v9028_v37  ;;  %v16640_v46 = vld [vmem:[#allocation156_spill] sm:$0xff] }
 0xa22   : > { %v7898_v11 = vsel %vm1812_vm2, %v7895_v60, %v7897_v27  ;;  %v6541_v3 = vadd.f32 %v6230_v53, %v16636_v44  ;;  %10996 = vmatmul.msk.bf16.gmra.mxu2 %vm477_vm1, %v16635_v35 }
 0xa23   : > { %10237 = vst [vmem:[%s14274_s11 + $0x280] sm:$0xff] %v10109_v1  ;;  %v9726_v52 = vmin.f32 %v9598_v2, 0.4  ;;  %v8210_v51 = vadd.f32 %v7898_v11, %v7081_v21 }
 0xa24   : > { %11083 = vmatmul.msk.bf16.gmra.mxu3 %vm477_vm1, %v16635_v35  ;;  %v7082_v10 = vadd.f32 %v6868_v55, %v6541_v3 }
 0xa25   : > { %v9854_v14 = vmul.f32 2.5, %v9726_v52  ;;  %v9339_v20 = vadd.f32 %v9027_v48, %v8210_v51  ;;  %v6871_v31 = vpop.f32.mrf.mxu2 }
 0xa26   : > { %v5744_v16 = vpop.f32.mrf.mxu1  ;;  %v8543_v12 = vpop.f32.mrf.mxu0 }
 0xa27   : > { %v9982_v50 = vfloor.f32 %v9854_v14  ;;  %v9471_v43 = vadd.f32 %v14957_v24, %v9339_v20  ;;  %v7412_v13 = vpop.f32.mrf.mxu3  ;;  %v6231_v32 = vrot.slane %v5744_v16, 2  ;;  %v9030_v49 = vrot.slane %v8543_v12, 2 }
 0xa28   : > { %v7899_v63 = vrot.slane %v7412_v13, 1 }
 0xa29   : > { %v10110_v61 = vmul.f32 0.4, %v9982_v50  ;;  %v9599_v40 = vmax.f32 %v9471_v43, 0.0 }
 0xa2a   : > { %v7900_v36 = vsel %vm1812_vm2, %v7897_v27, %v7899_v63 }
 0xa2b   : > { %10238 = vst [vmem:[%s14274_s11 + $0x288] sm:$0xff] %v10110_v61  ;;  %v9727_v39 = vmin.f32 %v9599_v40, 0.4  ;;  %v8211_v7 = vadd.f32 %v7900_v36, %v7082_v10  ;;  %v16641_v10 = vld [vmem:[#allocation154_spill] sm:$0xff] }
 0xa2c   : > { %v16642_v36 = vld [vmem:[#allocation34_spill] sm:$0xff] }
 0xa2d   : > { %v9855_v4 = vmul.f32 2.5, %v9727_v39  ;;  %v9340_v41 = vadd.f32 %v9029_v47, %v8211_v7  ;;  %v6872_v17 = vpop.f32.mrf.mxu2  ;;  %v16643_v47 = vld [vmem:[#allocation234_spill] sm:$0xff] }
 0xa2e   : > { %v5747_v42 = vpop.f32.mrf.mxu1  ;;  %v8546_v8 = vpop.f32.mrf.mxu0 }
 0xa2f   : > { %v9983_v24 = vfloor.f32 %v9855_v4  ;;  %v9472_v26 = vadd.f32 %v15190_v18, %v9340_v41  ;;  %v7414_v60 = vpop.f32.mrf.mxu3  ;;  %v6232_v54 = vrot.slane %v5747_v42, 2  ;;  %v9031_v56 = vrot.slane %v8546_v8, 2 }
 0xa30   : > { %v7901_v59 = vrot.slane %v7414_v60, 1 }
 0xa31   : > { %v10111_v19 = vmul.f32 0.4, %v9983_v24  ;;  %v9600_v0 = vmax.f32 %v9472_v26, 0.0  ;;  %v6233_v30 = vsel %vm2942_vm3, %v6231_v32, %v6232_v54  ;;  %10910 = vmatmul.msk.bf16.gmra.mxu1 %vm477_vm1, %v16637_v58  ;;  %11171 = vmatmul.msk.bf16.gmra.mxu0 %vm477_vm1, %v16638_v28  ;;  %v9032_v51 = vsel %vm2942_vm3, %v9030_v49, %v9031_v56 }
 0xa32   : > { %v6542_v62 = vadd.f32 %v6233_v30, %v16639_v45  ;;  %10997 = vmatmul.msk.bf16.gmra.mxu2 %vm477_vm1, %v16638_v28 }
 0xa33   : > { %10239 = vst [vmem:[%s14274_s11 + $0x290] sm:$0xff] %v10111_v19  ;;  %v9728_v6 = vmin.f32 %v9600_v0, 0.4 }
 0xa34   : > { %11084 = vmatmul.msk.bf16.gmra.mxu3 %vm477_vm1, %v16638_v28  ;;  %v7083_v1 = vadd.f32 %v6872_v17, %v6542_v62 }
 0xa35   : > { %v9856_v15 = vmul.f32 2.5, %v9728_v6  ;;  %v6875_v27 = vpop.f32.mrf.mxu2 }
 0xa36   : > { %v5749_v55 = vpop.f32.mrf.mxu1  ;;  %v8548_v21 = vpop.f32.mrf.mxu0 }
 0xa37   : > { %v9984_v38 = vfloor.f32 %v9856_v15  ;;  %v7417_v22 = vpop.f32.mrf.mxu3  ;;  %v6234_v2 = vrot.slane %v5749_v55, 2  ;;  %v9033_v20 = vrot.slane %v8548_v21, 2 }
 0xa38   : > { %v7902_v34 = vrot.slane %v7417_v22, 1  ;;  %v16644_v22 = vld [vmem:[#allocation162_spill] sm:$0xff] }
 0xa39   : > { %v10112_v57 = vmul.f32 0.4, %v9984_v38  ;;  %v6235_v52 = vsel %vm2942_vm3, %v6232_v54, %v6234_v2  ;;  %v9034_v12 = vsel %vm2942_vm3, %v9031_v56, %v9033_v20 }
 0xa3a   : > { %v7903_v9 = vsel %vm1812_vm2, %v7901_v59, %v7902_v34  ;;  %v6543_v48 = vadd.f32 %v6235_v52, %v16640_v46  ;;  %v16645_v46 = vld [vmem:[#allocation159_spill] sm:$0xff] }
 0xa3b   : > { %10240 = vst [vmem:[%s14274_s11 + $0x298] sm:$0xff] %v10112_v57  ;;  %v8212_v11 = vadd.f32 %v7903_v9, %v7083_v1 }
 0xa3c   : > { %v7084_v13 = vadd.f32 %v6875_v27, %v6543_v48 }
 0xa3d   : > { %v9341_v53 = vadd.f32 %v9032_v51, %v8212_v11  ;;  %v6877_v3 = vpop.f32.mrf.mxu2 }
 0xa3e   : > { %v5752_v50 = vpop.f32.mrf.mxu1  ;;  %v8551_v63 = vpop.f32.mrf.mxu0 }
 0xa3f   : > { %v9473_v35 = vadd.f32 %v15190_v18, %v9341_v53  ;;  %v7419_v14 = vpop.f32.mrf.mxu3  ;;  %v6236_v37 = vrot.slane %v5752_v50, 2  ;;  %v9035_v60 = vrot.slane %v8551_v63, 2 }
 0xa40   : > { %v7904_v44 = vrot.slane %v7419_v14, 1 }
 0xa41   : > { %v9601_v43 = vmax.f32 %v9473_v35, 0.0  ;;  %v6237_v40 = vsel %vm2942_vm3, %v6234_v2, %v6236_v37  ;;  %10911 = vmatmul.msk.bf16.gmra.mxu1 %vm477_vm1, %v16641_v10  ;;  %11172 = vmatmul.msk.bf16.gmra.mxu0 %vm477_vm1, %v16642_v36  ;;  %v9036_v45 = vsel %vm2942_vm3, %v9033_v20, %v9035_v60  ;;  %v16646_v35 = vld [vmem:[#allocation39_spill] sm:$0xff] }
 0xa42   : > { %v7905_v31 = vsel %vm1812_vm2, %v7902_v34, %v7904_v44  ;;  %v6544_v4 = vadd.f32 %v6237_v40, %v16643_v47  ;;  %10998 = vmatmul.msk.bf16.gmra.mxu2 %vm477_vm1, %v16642_v36 }
 0xa43   : > { %v9729_v16 = vmin.f32 %v9601_v43, 0.4  ;;  %v8213_v61 = vadd.f32 %v7905_v31, %v7084_v13 }
 0xa44   : > { %11085 = vmatmul.msk.bf16.gmra.mxu3 %vm477_vm1, %v16642_v36  ;;  %v7085_v54 = vadd.f32 %v6877_v3, %v6544_v4  ;;  %v16647_v36 = vld [vmem:[#allocation165_spill] sm:$0xff] }
 0xa45   : > { %v9857_v39 = vmul.f32 2.5, %v9729_v16  ;;  %v9342_v7 = vadd.f32 %v9034_v12, %v8213_v61  ;;  %v6880_v42 = vpop.f32.mrf.mxu2 }
 0xa46   : > { %v5754_v19 = vpop.f32.mrf.mxu1  ;;  %v8553_v6 = vpop.f32.mrf.mxu0 }
 0xa47   : > { %v9985_v41 = vfloor.f32 %v9857_v39  ;;  %v9474_v24 = vadd.f32 %v15190_v18, %v9342_v7  ;;  %v7422_v26 = vpop.f32.mrf.mxu3  ;;  %v6238_v8 = vrot.slane %v5754_v19, 2  ;;  %v9037_v55 = vrot.slane %v8553_v6, 2 }
 0xa48   : > { %v7906_v17 = vrot.slane %v7422_v26, 1 }
 0xa49   : > { %v10113_v0 = vmul.f32 0.4, %v9985_v41  ;;  %v9602_v32 = vmax.f32 %v9474_v24, 0.0  ;;  %v6239_v15 = vsel %vm2942_vm3, %v6236_v37, %v6238_v8  ;;  %v9038_v48 = vsel %vm2942_vm3, %v9035_v60, %v9037_v55 }
 0xa4a   : > { %v7907_v30 = vsel %vm1812_vm2, %v7904_v44, %v7906_v17  ;;  %v6545_v59 = vadd.f32 %v6239_v15, %v16644_v22 }
 0xa4b   : > { %10241 = vst [vmem:[%s14274_s11 + $0x2a0] sm:$0xff] %v10113_v0  ;;  %v9730_v58 = vmin.f32 %v9602_v32, 0.4  ;;  %v8214_v28 = vadd.f32 %v7907_v30, %v7085_v54  ;;  %v16648_v30 = vld [vmem:[#allocation235_spill] sm:$0xff] }
 0xa4c   : > { %v7086_v9 = vadd.f32 %v6880_v42, %v6545_v59 }
 0xa4d   : > { %v9858_v62 = vmul.f32 2.5, %v9730_v58  ;;  %v9343_v38 = vadd.f32 %v9036_v45, %v8214_v28  ;;  %v6882_v1 = vpop.f32.mrf.mxu2  ;;  %v16649_v28 = vld [vmem:[#allocation49_spill] sm:$0xff]  ;;  %v16650_v45 = vld [vmem:[#allocation236_spill] sm:$0xff] }
 0xa4e   : > { %v5757_v2 = vpop.f32.mrf.mxu1  ;;  %v8556_v11 = vpop.f32.mrf.mxu0 }
 0xa4f   : > { %v9986_v56 = vfloor.f32 %v9858_v62  ;;  %v9475_v34 = vadd.f32 %v15190_v18, %v9343_v38  ;;  %v7424_v27 = vpop.f32.mrf.mxu3  ;;  %v6240_v31 = vrot.slane %v5757_v2, 2  ;;  %v9039_v4 = vrot.slane %v8556_v11, 2 }
 0xa50   : > { %v7908_v57 = vrot.slane %v7424_v27, 1 }
 0xa51   : > { %v10114_v21 = vmul.f32 0.4, %v9986_v56  ;;  %v9603_v49 = vmax.f32 %v9475_v34, 0.0  ;;  %10912 = vmatmul.msk.bf16.gmra.mxu1 %vm477_vm1, %v16645_v46  ;;  %11173 = vmatmul.msk.bf16.gmra.mxu0 %vm477_vm1, %v16646_v35  ;;  %v16651_v46 = vld [vmem:[#allocation172_spill] sm:$0xff] }
 0xa52   : > { %v7909_v52 = vsel %vm1812_vm2, %v7906_v17, %v7908_v57  ;;  %10999 = vmatmul.msk.bf16.gmra.mxu2 %vm477_vm1, %v16646_v35 }
 0xa53   : > { %10242 = vst [vmem:[%s14274_s11 + $0x2a8] sm:$0xff] %v10114_v21  ;;  %v9731_v51 = vmin.f32 %v9603_v49, 0.4  ;;  %v8215_v53 = vadd.f32 %v7909_v52, %v7086_v9 }
 0xa54   : > { %11086 = vmatmul.msk.bf16.gmra.mxu3 %vm477_vm1, %v16646_v35 }
 0xa55   : > { %v9859_v14 = vmul.f32 2.5, %v9731_v51  ;;  %v9344_v20 = vadd.f32 %v9038_v48, %v8215_v53  ;;  %v6884_v43 = vpop.f32.mrf.mxu2 }
 0xa56   : > { %v5759_v13 = vpop.f32.mrf.mxu1  ;;  %v8558_v61 = vpop.f32.mrf.mxu0 }
 0xa57   : > { %v9987_v44 = vfloor.f32 %v9859_v14  ;;  %v9476_v3 = vadd.f32 %v15190_v18, %v9344_v20  ;;  %v7427_v50 = vpop.f32.mrf.mxu3  ;;  %v6241_v16 = vrot.slane %v5759_v13, 2  ;;  %v9040_v24 = vrot.slane %v8558_v61, 2 }
 0xa58   : > { %v7910_v41 = vrot.slane %v7427_v50, 1 }
 0xa59   : > { %v10115_v37 = vmul.f32 0.4, %v9987_v44  ;;  %v9604_v63 = vmax.f32 %v9476_v3, 0.0  ;;  %v6242_v10 = vsel %vm2942_vm3, %v6240_v31, %v6241_v16  ;;  %v9041_v58 = vsel %vm2942_vm3, %v9039_v4, %v9040_v24 }
 0xa5a   : > { %v6546_v39 = vadd.f32 %v6242_v10, %v16647_v36  ;;  %v16652_v36 = vld [vmem:[#allocation168_spill] sm:$0xff] }
 0xa5b   : > { %10243 = vst [vmem:[%s14274_s11 + $0x2b0] sm:$0xff] %v10115_v37  ;;  %v9732_v40 = vmin.f32 %v9604_v63, 0.4 }
 0xa5c   : > { %v7087_v19 = vadd.f32 %v6884_v43, %v6546_v39 }
 0xa5d   : > { %v9860_v12 = vmul.f32 2.5, %v9732_v40  ;;  %v6886_v60 = vpop.f32.mrf.mxu2 }
 0xa5e   : > { %v5762_v17 = vpop.f32.mrf.mxu1  ;;  %v8561_v32 = vpop.f32.mrf.mxu0 }
 0xa5f   : > { %v9988_v7 = vfloor.f32 %v9860_v12  ;;  %v7429_v47 = vpop.f32.mrf.mxu3  ;;  %v6243_v0 = vrot.slane %v5762_v17, 2  ;;  %v9042_v59 = vrot.slane %v8561_v32, 2 }
 0xa60   : > { %v7911_v26 = vrot.slane %v7429_v47, 1 }
 0xa61   : > { %v10116_v42 = vmul.f32 0.4, %v9988_v7  ;;  %v6244_v6 = vsel %vm2942_vm3, %v6241_v16, %v6243_v0  ;;  %10913 = vmatmul.msk.bf16.gmra.mxu1 %vm477_vm1, %v16648_v30  ;;  %11174 = vmatmul.msk.bf16.gmra.mxu0 %vm477_vm1, %v16649_v28  ;;  %v9043_v52 = vsel %vm2942_vm3, %v9040_v24, %v9042_v59  ;;  %v16653_v7 = vld [vmem:[#allocation57_spill] sm:$0xff] }
 0xa62   : > { %v7912_v54 = vsel %vm1812_vm2, %v7910_v41, %v7911_v26  ;;  %v6547_v62 = vadd.f32 %v6244_v6, %v16650_v45  ;;  %11000 = vmatmul.msk.bf16.gmra.mxu2 %vm477_vm1, %v16649_v28  ;;  %v16654_v41 = vld [vmem:[#allocation237_spill] sm:$0xff] }
 0xa63   : > { %10244 = vst [vmem:[%s14274_s11 + $0x2b8] sm:$0xff] %v10116_v42  ;;  %v8216_v8 = vadd.f32 %v7912_v54, %v7087_v19 }
 0xa64   : > { %11087 = vmatmul.msk.bf16.gmra.mxu3 %vm477_vm1, %v16649_v28  ;;  %v7088_v57 = vadd.f32 %v6886_v60, %v6547_v62 }
 0xa65   : > { %v9345_v15 = vadd.f32 %v9041_v58, %v8216_v8  ;;  %v6889_v34 = vpop.f32.mrf.mxu2 }
 0xa66   : > { %v5764_v27 = vpop.f32.mrf.mxu1  ;;  %v8563_v2 = vpop.f32.mrf.mxu0 }
 0xa67   : > { %v9477_v38 = vadd.f32 %v15190_v18, %v9345_v15  ;;  %v7432_v22 = vpop.f32.mrf.mxu3  ;;  %v6245_v1 = vrot.slane %v5764_v27, 2  ;;  %v9044_v44 = vrot.slane %v8563_v2, 2 }
 0xa68   : > { %v7913_v56 = vrot.slane %v7432_v22, 1 }
 0xa69   : > { %v9605_v55 = vmax.f32 %v9477_v38, 0.0  ;;  %v6246_v11 = vsel %vm2942_vm3, %v6243_v0, %v6245_v1  ;;  %v9045_v39 = vsel %vm2942_vm3, %v9042_v59, %v9044_v44 }
 0xa6a   : > { %v7914_v21 = vsel %vm1812_vm2, %v7911_v26, %v7913_v56  ;;  %v6548_v48 = vadd.f32 %v6246_v11, %v16651_v46  ;;  %v16655_v11 = vld [vmem:[#allocation175_spill] sm:$0xff] }
 0xa6b   : > { %v9733_v49 = vmin.f32 %v9605_v55, 0.4  ;;  %v8217_v9 = vadd.f32 %v7914_v21, %v7088_v57 }
 0xa6c   : > { %v7089_v63 = vadd.f32 %v6889_v34, %v6548_v48 }
 0xa6d   : > { %v9861_v51 = vmul.f32 2.5, %v9733_v49  ;;  %v9346_v53 = vadd.f32 %v9043_v52, %v8217_v9  ;;  %v6891_v50 = vpop.f32.mrf.mxu2  ;;  %v16656_v52 = vld [vmem:[#allocation64_spill] sm:$0xff] }
 0xa6e   : > { %v5767_v43 = vpop.f32.mrf.mxu1  ;;  %v8566_v16 = vpop.f32.mrf.mxu0 }
 0xa6f   : > { %v9989_v35 = vfloor.f32 %v9861_v51  ;;  %v9478_v14 = vadd.f32 %v15190_v18, %v9346_v53  ;;  %v7434_v20 = vpop.f32.mrf.mxu3  ;;  %v6247_v31 = vrot.slane %v5767_v43, 2  ;;  %v9046_v42 = vrot.slane %v8566_v16, 2  ;;  %v16657_v53 = vld [vmem:[#allocation238_spill] sm:$0xff] }
 0xa70   : > { %v7915_v3 = vrot.slane %v7434_v20, 1 }
 0xa71   : > { %v10117_v13 = vmul.f32 0.4, %v9989_v35  ;;  %v9606_v37 = vmax.f32 %v9478_v14, 0.0  ;;  %v6248_v12 = vsel %vm2942_vm3, %v6245_v1, %v6247_v31  ;;  %10914 = vmatmul.msk.bf16.gmra.mxu1 %vm477_vm1, %v16652_v36  ;;  %11175 = vmatmul.msk.bf16.gmra.mxu0 %vm477_vm1, %v16653_v7  ;;  %v9047_v45 = vsel %vm2942_vm3, %v9044_v44, %v9046_v42  ;;  %v16658_v36 = vld [vmem:[#allocation183_spill] sm:$0xff] }
 0xa72   : > { %v7916_v61 = vsel %vm1812_vm2, %v7913_v56, %v7915_v3  ;;  %v6549_v24 = vadd.f32 %v6248_v12, %v16654_v41  ;;  %11001 = vmatmul.msk.bf16.gmra.mxu2 %vm477_vm1, %v16653_v7 }
 0xa73   : > { %10245 = vst [vmem:[%s14274_s11 + $0x2c0] sm:$0xff] %v10117_v13  ;;  %v9734_v40 = vmin.f32 %v9606_v37, 0.4  ;;  %v8218_v10 = vadd.f32 %v7916_v61, %v7089_v63 }
 0xa74   : > { %11088 = vmatmul.msk.bf16.gmra.mxu3 %vm477_vm1, %v16653_v7  ;;  %v7090_v6 = vadd.f32 %v6891_v50, %v6549_v24 }
 0xa75   : > { %v9862_v47 = vmul.f32 2.5, %v9734_v40  ;;  %v9347_v4 = vadd.f32 %v9045_v39, %v8218_v10  ;;  %v6894_v0 = vpop.f32.mrf.mxu2 }
 0xa76   : > { %v5769_v32 = vpop.f32.mrf.mxu1  ;;  %v8568_v30 = vpop.f32.mrf.mxu0 }
 0xa77   : > { %v9990_v26 = vfloor.f32 %v9862_v47  ;;  %v9479_v60 = vadd.f32 %v15190_v18, %v9347_v4  ;;  %v7437_v17 = vpop.f32.mrf.mxu3  ;;  %v6249_v1 = vrot.slane %v5769_v32, 2  ;;  %v9048_v31 = vrot.slane %v8568_v30, 2 }
 0xa78   : > { %v7917_v19 = vrot.slane %v7437_v17, 1 }
 0xa79   : > { %v10118_v54 = vmul.f32 0.4, %v9990_v26  ;;  %v9607_v8 = vmax.f32 %v9479_v60, 0.0 }
 0xa7a   : > { %v7918_v58 = vsel %vm1812_vm2, %v7915_v3, %v7917_v19 }
 0xa7b   : > { %10246 = vst [vmem:[%s14274_s11 + $0x2c8] sm:$0xff] %v10118_v54  ;;  %v9735_v28 = vmin.f32 %v9607_v8, 0.4  ;;  %v8219_v15 = vadd.f32 %v7918_v58, %v7090_v6  ;;  %v16659_v6 = vld [vmem:[#allocation179_spill] sm:$0xff]  ;;  %v16660_v58 = vld [vmem:[#allocation74_spill] sm:$0xff] }
 0xa7d   : > { %v9863_v62 = vmul.f32 2.5, %v9735_v28  ;;  %v9348_v38 = vadd.f32 %v9047_v45, %v8219_v15  ;;  %v6895_v34 = vpop.f32.mrf.mxu2  ;;  %v16661_v45 = vld [vmem:[#allocation239_spill] sm:$0xff] }
 0xa7e   : > { %v5772_v27 = vpop.f32.mrf.mxu1  ;;  %v8571_v21 = vpop.f32.mrf.mxu0 }
 0xa7f   : > { %v9991_v22 = vfloor.f32 %v9863_v62  ;;  %v9480_v59 = vadd.f32 %v15190_v18, %v9348_v38  ;;  %v7439_v56 = vpop.f32.mrf.mxu3  ;;  %v6250_v2 = vrot.slane %v5772_v27, 2  ;;  %v9049_v20 = vrot.slane %v8571_v21, 2 }
 0xa80   : > { %v7919_v14 = vrot.slane %v7439_v56, 1 }
 0xa81   : > { %v10119_v55 = vmul.f32 0.4, %v9991_v22  ;;  %v9608_v57 = vmax.f32 %v9480_v59, 0.0  ;;  %v6251_v9 = vsel %vm2942_vm3, %v6249_v1, %v6250_v2  ;;  %10915 = vmatmul.msk.bf16.gmra.mxu1 %vm477_vm1, %v16655_v11  ;;  %11176 = vmatmul.msk.bf16.gmra.mxu0 %vm477_vm1, %v16656_v52  ;;  %v9050_v10 = vsel %vm2942_vm3, %v9048_v31, %v9049_v20 }
 0xa82   : > { %v6550_v46 = vadd.f32 %v6251_v9, %v16657_v53  ;;  %11002 = vmatmul.msk.bf16.gmra.mxu2 %vm477_vm1, %v16656_v52 }
 0xa83   : > { %10247 = vst [vmem:[%s14274_s11 + $0x2d0] sm:$0xff] %v10119_v55  ;;  %v9736_v49 = vmin.f32 %v9608_v57, 0.4 }
 0xa84   : > { %11089 = vmatmul.msk.bf16.gmra.mxu3 %vm477_vm1, %v16656_v52  ;;  %v7091_v13 = vadd.f32 %v6895_v34, %v6550_v46 }
 0xa85   : > { %v9864_v51 = vmul.f32 2.5, %v9736_v49  ;;  %v6898_v3 = vpop.f32.mrf.mxu2 }
 0xa86   : > { %v5774_v50 = vpop.f32.mrf.mxu1  ;;  %v8573_v63 = vpop.f32.mrf.mxu0 }
 0xa87   : > { %v9992_v48 = vfloor.f32 %v9864_v51  ;;  %v7442_v35 = vpop.f32.mrf.mxu3  ;;  %v6252_v37 = vrot.slane %v5774_v50, 2  ;;  %v9051_v4 = vrot.slane %v8573_v63, 2 }
 0xa88   : > { %v7920_v44 = vrot.slane %v7442_v35, 1  ;;  %v16662_v35 = vld [vmem:[#allocation190_spill] sm:$0xff] }
 0xa89   : > { %v10120_v43 = vmul.f32 0.4, %v9992_v48  ;;  %v6253_v40 = vsel %vm2942_vm3, %v6250_v2, %v6252_v37  ;;  %v9052_v30 = vsel %vm2942_vm3, %v9049_v20, %v9051_v4 }
 0xa8a   : > { %v7921_v16 = vsel %vm1812_vm2, %v7919_v14, %v7920_v44  ;;  %v6551_v39 = vadd.f32 %v6253_v40, %v16658_v36  ;;  %v16663_v36 = vld [vmem:[#allocation186_spill] sm:$0xff] }
 0xa8b   : > { %10248 = vst [vmem:[%s14274_s11 + $0x2d8] sm:$0xff] %v10120_v43  ;;  %v8220_v61 = vadd.f32 %v7921_v16, %v7091_v13 }
 0xa8c   : > { %v7092_v17 = vadd.f32 %v6898_v3, %v6551_v39 }
 0xa8d   : > { %v9349_v12 = vadd.f32 %v9050_v10, %v8220_v61  ;;  %v6900_v24 = vpop.f32.mrf.mxu2 }
 0xa8e   : > { %v5777_v26 = vpop.f32.mrf.mxu1  ;;  %v8576_v19 = vpop.f32.mrf.mxu0 }
 0xa8f   : > { %v9481_v7 = vadd.f32 %v15190_v18, %v9349_v12  ;;  %v7444_v47 = vpop.f32.mrf.mxu3  ;;  %v6254_v42 = vrot.slane %v5777_v26, 2  ;;  %v9053_v56 = vrot.slane %v8576_v19, 2 }
 0xa90   : > { %v7922_v41 = vrot.slane %v7444_v47, 1 }
 0xa91   : > { %v9609_v60 = vmax.f32 %v9481_v7, 0.0  ;;  %v6255_v8 = vsel %vm2942_vm3, %v6252_v37, %v6254_v42  ;;  %10916 = vmatmul.msk.bf16.gmra.mxu1 %vm477_vm1, %v16659_v6  ;;  %11177 = vmatmul.msk.bf16.gmra.mxu0 %vm477_vm1, %v16660_v58  ;;  %v9054_v53 = vsel %vm2942_vm3, %v9051_v4, %v9053_v56  ;;  %v16664_v7 = vld [vmem:[#allocation82_spill] sm:$0xff] }
 0xa92   : > { %v7923_v0 = vsel %vm1812_vm2, %v7920_v44, %v7922_v41  ;;  %v6552_v62 = vadd.f32 %v6255_v8, %v16661_v45  ;;  %11003 = vmatmul.msk.bf16.gmra.mxu2 %vm477_vm1, %v16660_v58 }
 0xa93   : > { %v9737_v32 = vmin.f32 %v9609_v60, 0.4  ;;  %v8221_v54 = vadd.f32 %v7923_v0, %v7092_v17 }
 0xa94   : > { %11090 = vmatmul.msk.bf16.gmra.mxu3 %vm477_vm1, %v16660_v58  ;;  %v7093_v2 = vadd.f32 %v6900_v24, %v6552_v62  ;;  %v16665_v58 = vld [vmem:[#allocation41_spill] sm:$0xff] }
 0xa95   : > { %v9865_v28 = vmul.f32 2.5, %v9737_v32  ;;  %v9350_v15 = vadd.f32 %v9052_v30, %v8221_v54  ;;  %v6903_v27 = vpop.f32.mrf.mxu2 }
 0xa96   : > { %v5779_v55 = vpop.f32.mrf.mxu1  ;;  %v8578_v49 = vpop.f32.mrf.mxu0 }
 0xa97   : > { %v9993_v38 = vfloor.f32 %v9865_v28  ;;  %v9482_v22 = vadd.f32 %v15190_v18, %v9350_v15  ;;  %v7447_v59 = vpop.f32.mrf.mxu3  ;;  %v6256_v21 = vrot.slane %v5779_v55, 2  ;;  %v9055_v50 = vrot.slane %v8578_v49, 2 }
 0xa98   : > { %v7924_v34 = vrot.slane %v7447_v59, 1 }
 0xa99   : > { %v10121_v57 = vmul.f32 0.4, %v9993_v38  ;;  %v9610_v1 = vmax.f32 %v9482_v22, 0.0  ;;  %v6257_v51 = vsel %vm2942_vm3, %v6254_v42, %v6256_v21  ;;  %v9056_v39 = vsel %vm2942_vm3, %v9053_v56, %v9055_v50 }
 0xa9a   : > { %v7925_v9 = vsel %vm1812_vm2, %v7922_v41, %v7924_v34  ;;  %v6553_v14 = vadd.f32 %v6257_v51, %v16662_v35 }
 0xa9b   : > { %10249 = vst [vmem:[%s14274_s11 + $0x2e0] sm:$0xff] %v10121_v57  ;;  %v9738_v11 = vmin.f32 %v9610_v1, 0.4  ;;  %v8222_v52 = vadd.f32 %v7925_v9, %v7093_v2  ;;  %v16666_v9 = vld [vmem:[#allocation240_spill] sm:$0xff] }
 0xa9c   : > { %v7094_v16 = vadd.f32 %v6903_v27, %v6553_v14 }
 0xa9d   : > { %v9866_v46 = vmul.f32 2.5, %v9738_v11  ;;  %v9351_v48 = vadd.f32 %v9054_v53, %v8222_v52  ;;  %v6905_v13 = vpop.f32.mrf.mxu2  ;;  %v16667_v52 = vld [vmem:[#allocation94_spill] sm:$0xff]  ;;  %v16668_v53 = vld [vmem:[#allocation241_spill] sm:$0xff] }
 0xa9e   : > { %v5782_v37 = vpop.f32.mrf.mxu1  ;;  %v8581_v61 = vpop.f32.mrf.mxu0 }
 0xa9f   : > { %v9994_v20 = vfloor.f32 %v9866_v46  ;;  %v9483_v44 = vadd.f32 %v15190_v18, %v9351_v48  ;;  %v7449_v3 = vpop.f32.mrf.mxu3  ;;  %v6258_v0 = vrot.slane %v5782_v37, 2  ;;  %v9057_v62 = vrot.slane %v8581_v61, 2 }
 0xaa0   : > { %v7926_v43 = vrot.slane %v7449_v3, 1 }
 0xaa1   : > { %v10122_v63 = vmul.f32 0.4, %v9994_v20  ;;  %v9611_v31 = vmax.f32 %v9483_v44, 0.0  ;;  %10917 = vmatmul.msk.bf16.gmra.mxu1 %vm477_vm1, %v16663_v36  ;;  %11178 = vmatmul.msk.bf16.gmra.mxu0 %vm477_vm1, %v16664_v7  ;;  %v16669_v36 = vld [vmem:[#allocation51_spill] sm:$0xff] }
 0xaa2   : > { %v7927_v40 = vsel %vm1812_vm2, %v7924_v34, %v7926_v43  ;;  %11004 = vmatmul.msk.bf16.gmra.mxu2 %vm477_vm1, %v16664_v7 }
 0xaa3   : > { %10250 = vst [vmem:[%s14274_s11 + $0x2e8] sm:$0xff] %v10122_v63  ;;  %v9739_v10 = vmin.f32 %v9611_v31, 0.4  ;;  %v8223_v12 = vadd.f32 %v7927_v40, %v7094_v16 }
 0xaa4   : > { %11091 = vmatmul.msk.bf16.gmra.mxu3 %vm477_vm1, %v16664_v7 }
 0xaa5   : > { %v9867_v47 = vmul.f32 2.5, %v9739_v10  ;;  %v9352_v4 = vadd.f32 %v9056_v39, %v8223_v12  ;;  %v6907_v60 = vpop.f32.mrf.mxu2 }
 0xaa6   : > { %v5784_v17 = vpop.f32.mrf.mxu1  ;;  %v8583_v54 = vpop.f32.mrf.mxu0 }
 0xaa7   : > { %v9995_v41 = vfloor.f32 %v9867_v47  ;;  %v9484_v24 = vadd.f32 %v15190_v18, %v9352_v4  ;;  %v7452_v26 = vpop.f32.mrf.mxu3  ;;  %v6259_v32 = vrot.slane %v5784_v17, 2  ;;  %v9058_v22 = vrot.slane %v8583_v54, 2 }
 0xaa8   : > { %v7928_v38 = vrot.slane %v7452_v26, 1 }
 0xaa9   : > { %v10123_v42 = vmul.f32 0.4, %v9995_v41  ;;  %v9612_v19 = vmax.f32 %v9484_v24, 0.0  ;;  %v6260_v6 = vsel %vm2942_vm3, %v6258_v0, %v6259_v32  ;;  %v9059_v11 = vsel %vm2942_vm3, %v9057_v62, %v9058_v22 }
 0xaaa   : > { %v6554_v28 = vadd.f32 %v6260_v6, %v16665_v58  ;;  %v16670_v58 = vld [vmem:[#allocation44_spill] sm:$0xff] }
 0xaab   : > { %10251 = vst [vmem:[%s14274_s11 + $0x2f0] sm:$0xff] %v10123_v42  ;;  %v9740_v8 = vmin.f32 %v9612_v19, 0.4 }
 0xaac   : > { %v7095_v55 = vadd.f32 %v6907_v60, %v6554_v28 }
 0xaad   : > { %v9868_v30 = vmul.f32 2.5, %v9740_v8  ;;  %v6909_v56 = vpop.f32.mrf.mxu2 }
 0xaae   : > { %v5787_v34 = vpop.f32.mrf.mxu1  ;;  %v8586_v1 = vpop.f32.mrf.mxu0 }
 0xaaf   : > { %v9996_v15 = vfloor.f32 %v9868_v30  ;;  %v7454_v45 = vpop.f32.mrf.mxu3  ;;  %v6261_v57 = vrot.slane %v5787_v34, 2  ;;  %v9060_v14 = vrot.slane %v8586_v1, 2 }
 0xab0   : > { %v7929_v59 = vrot.slane %v7454_v45, 1 }
 0xab1   : > { %v10124_v27 = vmul.f32 0.4, %v9996_v15  ;;  %v6262_v49 = vsel %vm2942_vm3, %v6259_v32, %v6261_v57  ;;  %10918 = vmatmul.msk.bf16.gmra.mxu1 %vm477_vm1, %v16666_v9  ;;  %11179 = vmatmul.msk.bf16.gmra.mxu0 %vm477_vm1, %v16667_v52  ;;  %v9061_v40 = vsel %vm2942_vm3, %v9058_v22, %v9060_v14  ;;  %v16671_v15 = vld [vmem:[#allocation104_spill] sm:$0xff] }
 0xab2   : > { %v7930_v2 = vsel %vm1812_vm2, %v7928_v38, %v7929_v59  ;;  %v6555_v46 = vadd.f32 %v6262_v49, %v16668_v53  ;;  %11005 = vmatmul.msk.bf16.gmra.mxu2 %vm477_vm1, %v16667_v52  ;;  %v16672_v38 = vld [vmem:[#allocation242_spill] sm:$0xff] }
 0xab3   : > { %10252 = vst [vmem:[%s14274_s11 + $0x2f8] sm:$0xff] %v10124_v27  ;;  %v8224_v21 = vadd.f32 %v7930_v2, %v7095_v55 }
 0xab4   : > { %11092 = vmatmul.msk.bf16.gmra.mxu3 %vm477_vm1, %v16667_v52  ;;  %v7096_v43 = vadd.f32 %v6909_v56, %v6555_v46 }
 0xab5   : > { %v9353_v51 = vadd.f32 %v9059_v11, %v8224_v21  ;;  %v6912_v44 = vpop.f32.mrf.mxu2 }
 0xab6   : > { %v5789_v3 = vpop.f32.mrf.mxu1  ;;  %v8588_v37 = vpop.f32.mrf.mxu0 }
 0xab7   : > { %v9485_v48 = vadd.f32 %v15190_v18, %v9353_v51  ;;  %v7457_v35 = vpop.f32.mrf.mxu3  ;;  %v6263_v13 = vrot.slane %v5789_v3, 2  ;;  %v9062_v41 = vrot.slane %v8588_v37, 2 }
 0xab8   : > { %v7931_v20 = vrot.slane %v7457_v35, 1 }
 0xab9   : > { %v9613_v50 = vmax.f32 %v9485_v48, 0.0  ;;  %v6264_v61 = vsel %vm2942_vm3, %v6261_v57, %v6263_v13  ;;  %v9063_v28 = vsel %vm2942_vm3, %v9060_v14, %v9062_v41 }
 0xaba   : > { %v7932_v63 = vsel %vm1812_vm2, %v7929_v59, %v7931_v20  ;;  %v6556_v39 = vadd.f32 %v6264_v61, %v16669_v36  ;;  %v16673_v61 = vld [vmem:[#allocation54_spill] sm:$0xff] }
 0xabb   : > { %v9741_v31 = vmin.f32 %v9613_v50, 0.4  ;;  %v8225_v16 = vadd.f32 %v7932_v63, %v7096_v43 }
 0xabc   : > { %v7097_v19 = vadd.f32 %v6912_v44, %v6556_v39 }
 0xabd   : > { %v9869_v10 = vmul.f32 2.5, %v9741_v31  ;;  %v9354_v12 = vadd.f32 %v9061_v40, %v8225_v16  ;;  %v6914_v26 = vpop.f32.mrf.mxu2  ;;  %v16674_v40 = vld [vmem:[#allocation115_spill] sm:$0xff] }
 0xabe   : > { %v5792_v60 = vpop.f32.mrf.mxu1  ;;  %v8591_v32 = vpop.f32.mrf.mxu0 }
 0xabf   : > { %v9997_v7 = vfloor.f32 %v9869_v10  ;;  %v9486_v47 = vadd.f32 %v15190_v18, %v9354_v12  ;;  %v7459_v4 = vpop.f32.mrf.mxu3  ;;  %v6265_v0 = vrot.slane %v5792_v60, 2  ;;  %v9064_v27 = vrot.slane %v8591_v32, 2  ;;  %v16675_v12 = vld [vmem:[#allocation243_spill] sm:$0xff] }
 0xac0   : > { %v7933_v24 = vrot.slane %v7459_v4, 1 }
 0xac1   : > { %v10125_v17 = vmul.f32 0.4, %v9997_v7  ;;  %v9614_v42 = vmax.f32 %v9486_v47, 0.0  ;;  %v6266_v30 = vsel %vm2942_vm3, %v6263_v13, %v6265_v0  ;;  %10919 = vmatmul.msk.bf16.gmra.mxu1 %vm477_vm1, %v16670_v58  ;;  %11180 = vmatmul.msk.bf16.gmra.mxu0 %vm477_vm1, %v16671_v15  ;;  %v9065_v53 = vsel %vm2942_vm3, %v9062_v41, %v9064_v27  ;;  %v16676_v58 = vld [vmem:[#allocation66_spill] sm:$0xff] }
 0xac2   : > { %v7934_v54 = vsel %vm1812_vm2, %v7931_v20, %v7933_v24  ;;  %v6557_v22 = vadd.f32 %v6266_v30, %v16672_v38  ;;  %11006 = vmatmul.msk.bf16.gmra.mxu2 %vm477_vm1, %v16671_v15 }
 0xac3   : > { %10253 = vst [vmem:[%s14274_s11 + $0x300] sm:$0xff] %v10125_v17  ;;  %v9742_v8 = vmin.f32 %v9614_v42, 0.4  ;;  %v8226_v6 = vadd.f32 %v7934_v54, %v7097_v19 }
 0xac4   : > { %11093 = vmatmul.msk.bf16.gmra.mxu3 %vm477_vm1, %v16671_v15  ;;  %v7098_v49 = vadd.f32 %v6914_v26, %v6557_v22 }
 0xac5   : > { %v9870_v45 = vmul.f32 2.5, %v9742_v8  ;;  %v9355_v62 = vadd.f32 %v9063_v28, %v8226_v6  ;;  %v6917_v57 = vpop.f32.mrf.mxu2 }
 0xac6   : > { %v5794_v1 = vpop.f32.mrf.mxu1  ;;  %v8593_v9 = vpop.f32.mrf.mxu0 }
 0xac7   : > { %v9998_v59 = vfloor.f32 %v9870_v45  ;;  %v9487_v56 = vadd.f32 %v15190_v18, %v9355_v62  ;;  %v7462_v34 = vpop.f32.mrf.mxu3  ;;  %v6267_v13 = vrot.slane %v5794_v1, 2  ;;  %v9066_v0 = vrot.slane %v8593_v9, 2 }
 0xac8   : > { %v7935_v55 = vrot.slane %v7462_v34, 1 }
 0xac9   : > { %v10126_v2 = vmul.f32 0.4, %v9998_v59  ;;  %v9615_v21 = vmax.f32 %v9487_v56, 0.0 }
 0xaca   : > { %v7936_v11 = vsel %vm1812_vm2, %v7933_v24, %v7935_v55 }
 0xacb   : > { %10254 = vst [vmem:[%s14274_s11 + $0x308] sm:$0xff] %v10126_v2  ;;  %v9743_v52 = vmin.f32 %v9615_v21, 0.4  ;;  %v8227_v51 = vadd.f32 %v7936_v11, %v7098_v49  ;;  %v16677_v49 = vld [vmem:[#allocation60_spill] sm:$0xff]  ;;  %v16678_v11 = vld [vmem:[#allocation129_spill] sm:$0xff] }
 0xacd   : > { %v9871_v46 = vmul.f32 2.5, %v9743_v52  ;;  %v9356_v48 = vadd.f32 %v9065_v53, %v8227_v51  ;;  %v6918_v44 = vpop.f32.mrf.mxu2  ;;  %v16679_v53 = vld [vmem:[#allocation244_spill] sm:$0xff] }
 0xace   : > { %v5797_v3 = vpop.f32.mrf.mxu1  ;;  %v8596_v63 = vpop.f32.mrf.mxu0 }
 0xacf   : > { %v9999_v35 = vfloor.f32 %v9871_v46  ;;  %v9488_v14 = vadd.f32 %v15190_v18, %v9356_v48  ;;  %v7464_v20 = vpop.f32.mrf.mxu3  ;;  %v6268_v37 = vrot.slane %v5797_v3, 2  ;;  %v9067_v4 = vrot.slane %v8596_v63, 2 }
 0xad0   : > { %v7937_v47 = vrot.slane %v7464_v20, 1 }
 0xad1   : > { %v10127_v50 = vmul.f32 0.4, %v9999_v35  ;;  %v9616_v43 = vmax.f32 %v9488_v14, 0.0  ;;  %v6269_v16 = vsel %vm2942_vm3, %v6267_v13, %v6268_v37  ;;  %10920 = vmatmul.msk.bf16.gmra.mxu1 %vm477_vm1, %v16673_v61  ;;  %11181 = vmatmul.msk.bf16.gmra.mxu0 %vm477_vm1, %v16674_v40  ;;  %v9068_v6 = vsel %vm2942_vm3, %v9066_v0, %v9067_v4 }
 0xad2   : > { %v6558_v36 = vadd.f32 %v6269_v16, %v16675_v12  ;;  %11007 = vmatmul.msk.bf16.gmra.mxu2 %vm477_vm1, %v16674_v40 }
 0xad3   : > { %10255 = vst [vmem:[%s14274_s11 + $0x310] sm:$0xff] %v10127_v50  ;;  %v9744_v31 = vmin.f32 %v9616_v43, 0.4 }
 0xad4   : > { %11094 = vmatmul.msk.bf16.gmra.mxu3 %vm477_vm1, %v16674_v40  ;;  %v7099_v17 = vadd.f32 %v6918_v44, %v6558_v36 }
 0xad5   : > { %v9872_v10 = vmul.f32 2.5, %v9744_v31  ;;  %v6921_v24 = vpop.f32.mrf.mxu2 }
 0xad6   : > { %v5799_v26 = vpop.f32.mrf.mxu1  ;;  %v8598_v19 = vpop.f32.mrf.mxu0 }
 0xad7   : > { %v10000_v39 = vfloor.f32 %v9872_v10  ;;  %v7467_v7 = vpop.f32.mrf.mxu3  ;;  %v6270_v42 = vrot.slane %v5799_v26, 2  ;;  %v9069_v62 = vrot.slane %v8598_v19, 2 }
 0xad8   : > { %v7938_v41 = vrot.slane %v7467_v7, 1  ;;  %v16680_v7 = vld [vmem:[#allocation76_spill] sm:$0xff] }
 0xad9   : > { %v10128_v60 = vmul.f32 0.4, %v10000_v39  ;;  %v6271_v8 = vsel %vm2942_vm3, %v6268_v37, %v6270_v42  ;;  %v9070_v9 = vsel %vm2942_vm3, %v9067_v4, %v9069_v62 }
 0xada   : > { %v7939_v32 = vsel %vm1812_vm2, %v7937_v47, %v7938_v41  ;;  %v6559_v28 = vadd.f32 %v6271_v8, %v16676_v58  ;;  %v16681_v58 = vld [vmem:[#allocation69_spill] sm:$0xff] }
 0xadb   : > { %10256 = vst [vmem:[%s14274_s11 + $0x318] sm:$0xff] %v10128_v60  ;;  %v8228_v54 = vadd.f32 %v7939_v32, %v7099_v17 }
 0xadc   : > { %v7100_v34 = vadd.f32 %v6921_v24, %v6559_v28 }
 0xadd   : > { %v9357_v30 = vadd.f32 %v9068_v6, %v8228_v54  ;;  %v6923_v22 = vpop.f32.mrf.mxu2 }
 0xade   : > { %v5802_v59 = vpop.f32.mrf.mxu1  ;;  %v8601_v55 = vpop.f32.mrf.mxu0 }
 0xadf   : > { %v9489_v15 = vadd.f32 %v15190_v18, %v9357_v30  ;;  %v7469_v45 = vpop.f32.mrf.mxu3  ;;  %v6272_v27 = vrot.slane %v5802_v59, 2  ;;  %v9071_v20 = vrot.slane %v8601_v55, 2 }
 0xae0   : > { %v7940_v38 = vrot.slane %v7469_v45, 1 }
 0xae1   : > { %v9617_v56 = vmax.f32 %v9489_v15, 0.0  ;;  %v6273_v21 = vsel %vm2942_vm3, %v6270_v42, %v6272_v27  ;;  %10921 = vmatmul.msk.bf16.gmra.mxu1 %vm477_vm1, %v16677_v49  ;;  %11182 = vmatmul.msk.bf16.gmra.mxu0 %vm477_vm1, %v16678_v11  ;;  %v9072_v12 = vsel %vm2942_vm3, %v9069_v62, %v9071_v20  ;;  %v16682_v15 = vld [vmem:[#allocation139_spill] sm:$0xff] }
 0xae2   : > { %v7941_v57 = vsel %vm1812_vm2, %v7938_v41, %v7940_v38  ;;  %v6560_v46 = vadd.f32 %v6273_v21, %v16679_v53  ;;  %11008 = vmatmul.msk.bf16.gmra.mxu2 %vm477_vm1, %v16678_v11 }
 0xae3   : > { %v9745_v1 = vmin.f32 %v9617_v56, 0.4  ;;  %v8229_v2 = vadd.f32 %v7941_v57, %v7100_v34 }
 0xae4   : > { %11095 = vmatmul.msk.bf16.gmra.mxu3 %vm477_vm1, %v16678_v11  ;;  %v7101_v37 = vadd.f32 %v6923_v22, %v6560_v46  ;;  %v16683_v11 = vld [vmem:[#allocation84_spill] sm:$0xff] }
 0xae5   : > { %v9873_v52 = vmul.f32 2.5, %v9745_v1  ;;  %v9358_v51 = vadd.f32 %v9070_v9, %v8229_v2  ;;  %v6926_v3 = vpop.f32.mrf.mxu2 }
 0xae6   : > { %v5804_v50 = vpop.f32.mrf.mxu1  ;;  %v8603_v31 = vpop.f32.mrf.mxu0 }
 0xae7   : > { %v10001_v48 = vfloor.f32 %v9873_v52  ;;  %v9490_v35 = vadd.f32 %v15190_v18, %v9358_v51  ;;  %v7472_v14 = vpop.f32.mrf.mxu3  ;;  %v6274_v63 = vrot.slane %v5804_v50, 2  ;;  %v9073_v26 = vrot.slane %v8603_v31, 2  ;;  %v16684_v31 = vld [vmem:[#allocation245_spill] sm:$0xff] }
 0xae8   : > { %v7942_v44 = vrot.slane %v7472_v14, 1 }
 0xae9   : > { %v10129_v43 = vmul.f32 0.4, %v10001_v48  ;;  %v9618_v13 = vmax.f32 %v9490_v35, 0.0  ;;  %v6275_v10 = vsel %vm2942_vm3, %v6272_v27, %v6274_v63  ;;  %v9074_v28 = vsel %vm2942_vm3, %v9071_v20, %v9073_v26 }
 0xaea   : > { %v7943_v16 = vsel %vm1812_vm2, %v7940_v38, %v7942_v44  ;;  %v6561_v47 = vadd.f32 %v6275_v10, %v16680_v7  ;;  %v16686_v10 = vld [vmem:[#allocation246_spill] sm:$0xff] }
 0xaeb   : > { %10257 = vst [vmem:[%s14274_s11 + $0x320] sm:$0xff] %v10129_v43  ;;  %v9746_v61 = vmin.f32 %v9618_v13, 0.4  ;;  %v8230_v40 = vadd.f32 %v7943_v16, %v7101_v37 }
 0xaec   : > { %v7102_v32 = vadd.f32 %v6926_v3, %v6561_v47 }
 0xaed   : > { %v9874_v36 = vmul.f32 2.5, %v9746_v61  ;;  %v9359_v39 = vadd.f32 %v9072_v12, %v8230_v40  ;;  %v6928_v17 = vpop.f32.mrf.mxu2  ;;  %v16685_v61 = vld [vmem:[#allocation149_spill] sm:$0xff] }
 0xaee   : > { %v5807_v42 = vpop.f32.mrf.mxu1  ;;  %v8606_v54 = vpop.f32.mrf.mxu0 }
 0xaef   : > { %v10002_v4 = vfloor.f32 %v9874_v36  ;;  %v9491_v41 = vadd.f32 %v15190_v18, %v9359_v39  ;;  %v7474_v24 = vpop.f32.mrf.mxu3  ;;  %v6276_v57 = vrot.slane %v5807_v42, 2  ;;  %v9075_v46 = vrot.slane %v8606_v54, 2  ;;  %v15436_v36 = vld [vmem:[%s15653_s2] ss:$0 sm:$0xff] }
 0xaf0   : > { %v7944_v60 = vrot.slane %v7474_v24, 1 }
 0xaf1   : > { %v10130_v19 = vmul.f32 0.4, %v10002_v4  ;;  %v9619_v0 = vmax.f32 %v9491_v41, 0.0  ;;  %10922 = vmatmul.msk.bf16.gmra.mxu1 %vm477_vm1, %v16681_v58  ;;  %11183 = vmatmul.msk.bf16.gmra.mxu0 %vm477_vm1, %v16682_v15  ;;  %v16687_v58 = vld [vmem:[#allocation96_spill] sm:$0xff] }
 0xaf2   : > { %v7945_v8 = vsel %vm1812_vm2, %v7942_v44, %v7944_v60  ;;  %11009 = vmatmul.msk.bf16.gmra.mxu2 %vm477_vm1, %v16682_v15 }
 0xaf3   : > { %10258 = vst [vmem:[%s14274_s11 + $0x328] sm:$0xff] %v10130_v19  ;;  %v9747_v6 = vmin.f32 %v9619_v0, 0.4  ;;  %v8231_v30 = vadd.f32 %v7945_v8, %v7102_v32 }
 0xaf4   : > { %11096 = vmatmul.msk.bf16.gmra.mxu3 %vm477_vm1, %v16682_v15 }
 0xaf5   : > { %v9875_v45 = vmul.f32 2.5, %v9747_v6  ;;  %v9360_v62 = vadd.f32 %v9074_v28, %v8231_v30  ;;  %v6930_v56 = vpop.f32.mrf.mxu2 }
 0xaf6   : > { %v5809_v34 = vpop.f32.mrf.mxu1  ;;  %v8608_v2 = vpop.f32.mrf.mxu0 }
 0xaf7   : > { %v10003_v38 = vfloor.f32 %v9875_v45  ;;  %v9492_v22 = vadd.f32 %v15190_v18, %v9360_v62  ;;  %v7477_v59 = vpop.f32.mrf.mxu3  ;;  %v6277_v1 = vrot.slane %v5809_v34, 2  ;;  %v9076_v48 = vrot.slane %v8608_v2, 2  ;;  %v11395_v34 = vld [vmem:[%s11582_s23 + $0x500] sm:$0xff] }
 0xaf8   : > { %v7946_v18 = vrot.slane %v7477_v59, 1 }
 0xaf9   : > { %v10131_v27 = vmul.f32 0.4, %v10003_v38  ;;  %v9620_v55 = vmax.f32 %v9492_v22, 0.0  ;;  %v6278_v49 = vsel %vm2942_vm3, %v6276_v57, %v6277_v1  ;;  %v9077_v16 = vsel %vm2942_vm3, %v9075_v46, %v9076_v48 }
 0xafa   : > { %v6562_v52 = vadd.f32 %v6278_v49, %v16683_v11 }
 0xafb   : > { %10259 = vst [vmem:[%s14274_s11 + $0x330] sm:$0xff] %v10131_v27  ;;  %v9748_v21 = vmin.f32 %v9620_v55, 0.4  ;;  %v11396_v27 = vld [vmem:[%s11582_s23 + $0x508] sm:$0xff] }
 0xafc   : > { %v7103_v3 = vadd.f32 %v6930_v56, %v6562_v52  ;;  %v6586_v55 = vpack.c.bf16 %v11396_v27, %v11395_v34 }
 0xafd   : > { %v9876_v9 = vmul.f32 2.5, %v9748_v21  ;;  %v6932_v14 = vpop.f32.mrf.mxu2 }
 0xafe   : > { %v5812_v20 = vpop.f32.mrf.mxu1  ;;  %v8611_v43 = vpop.f32.mrf.mxu0 }
 0xaff   : > { %v10004_v51 = vfloor.f32 %v9876_v9  ;;  %v7479_v53 = vpop.f32.mrf.mxu3  ;;  %v6279_v50 = vrot.slane %v5812_v20, 2  ;;  %v9078_v47 = vrot.slane %v8611_v43, 2 }
 0xb00   : > { %v7947_v35 = vrot.slane %v7479_v53, 1  ;;  %v16688_v53 = vld [vmem:[#allocation88_spill] sm:$0xff] }
 0xb01   : > { %v10132_v44 = vmul.f32 0.4, %v10004_v51  ;;  %v6280_v63 = vsel %vm2942_vm3, %v6277_v1, %v6279_v50  ;;  %10923 = vmatmul.msk.bf16.gmra.mxu1 %vm477_vm1, %v16684_v31  ;;  %11184 = vmatmul.msk.bf16.gmra.mxu0 %vm477_vm1, %v16685_v61  ;;  %v9079_v8 = vsel %vm2942_vm3, %v9076_v48, %v9078_v47 }
 0xb02   : > { %v7948_v13 = vsel %vm1812_vm2, %v7946_v18, %v7947_v35  ;;  %v6563_v12 = vadd.f32 %v6280_v63, %v16686_v10  ;;  %11010 = vmatmul.msk.bf16.gmra.mxu2 %vm477_vm1, %v16685_v61 }
 0xb03   : > { %10260 = vst [vmem:[%s14274_s11 + $0x338] sm:$0xff] %v10132_v44  ;;  %v8232_v37 = vadd.f32 %v7948_v13, %v7103_v3 }
 0xb04   : > { %11097 = vmatmul.msk.bf16.gmra.mxu3 %vm477_vm1, %v16685_v61  ;;  %v7104_v60 = vadd.f32 %v6932_v14, %v6563_v12 }
 0xb05   : > { %v9361_v40 = vadd.f32 %v9077_v16, %v8232_v37  ;;  %v6935_v41 = vpop.f32.mrf.mxu2 }
 0xb06   : > { %v5814_v24 = vpop.f32.mrf.mxu1  ;;  %v8613_v42 = vpop.f32.mrf.mxu0 }
 0xb07   : > { %v9493_v39 = vadd.f32 %v15436_v36, %v9361_v40  ;;  %v7482_v7 = vpop.f32.mrf.mxu3  ;;  %v6281_v17 = vrot.slane %v5814_v24, 2  ;;  %v9080_v38 = vrot.slane %v8613_v42, 2  ;;  %v11398_v42 = vld [vmem:[%s11582_s23 + $0x518] sm:$0xff] }
 0xb08   : > { %v7949_v4 = vrot.slane %v7482_v7, 1 }
 0xb09   : > { %v9621_v26 = vmax.f32 %v9493_v39, 0.0  ;;  %v6282_v54 = vsel %vm2942_vm3, %v6279_v50, %v6281_v17  ;;  %v9081_v46 = vsel %vm2942_vm3, %v9078_v47, %v9080_v38 }
 0xb0a   : > { %v7950_v19 = vsel %vm1812_vm2, %v7947_v35, %v7949_v4  ;;  %v6564_v28 = vadd.f32 %v6282_v54, %v16687_v58  ;;  %v16689_v35 = vld [vmem:[#allocation247_spill] sm:$0xff] }
 0xb0b   : > { %v9749_v0 = vmin.f32 %v9621_v26, 0.4  ;;  %v8233_v32 = vadd.f32 %v7950_v19, %v7104_v60 }
 0xb0c   : > { %v7105_v2 = vadd.f32 %v6935_v41, %v6564_v28  ;;  %v16690_v28 = vld [vmem:[#allocation100_spill] sm:$0xff] }
 0xb0d   : > { %v9877_v6 = vmul.f32 2.5, %v9749_v0  ;;  %v9362_v30 = vadd.f32 %v9079_v8, %v8233_v32  ;;  %v6937_v59 = vpop.f32.mrf.mxu2 }
 0xb0e   : > { %v5817_v56 = vpop.f32.mrf.mxu1  ;;  %v8616_v49 = vpop.f32.mrf.mxu0 }
 0xb0f   : > { %v10005_v15 = vfloor.f32 %v9877_v6  ;;  %v9494_v45 = vadd.f32 %v15436_v36, %v9362_v30  ;;  %v7484_v62 = vpop.f32.mrf.mxu3  ;;  %v6283_v21 = vrot.slane %v5817_v56, 2  ;;  %v9082_v50 = vrot.slane %v8616_v49, 2 }
 0xb10   : > { %v7951_v22 = vrot.slane %v7484_v62, 1 }
 0xb11   : > { %v10133_v57 = vmul.f32 0.4, %v10005_v15  ;;  %v9622_v1 = vmax.f32 %v9494_v45, 0.0  ;;  %v6284_v51 = vsel %vm2942_vm3, %v6281_v17, %v6283_v21  ;;  %10924 = vmatmul.msk.bf16.gmra.mxu1 %vm477_vm1, %v16688_v53  ;;  %11185 = vmatmul.msk.bf16.gmra.mxu0 %vm477_vm1, %v6586_v55  ;;  %v9083_v39 = vsel %vm2942_vm3, %v9080_v38, %v9082_v50  ;;  %v11397_v17 = vld [vmem:[%s11582_s23 + $0x510] sm:$0xff]  ;;  %v16691_v45 = vld [vmem:[#allocation248_spill] sm:$0xff] }
 0xb12   : > { %v7952_v9 = vsel %vm1812_vm2, %v7949_v4, %v7951_v22  ;;  %v6565_v14 = vadd.f32 %v6284_v51, %v16689_v35  ;;  %11011 = vmatmul.msk.bf16.gmra.mxu2 %vm477_vm1, %v6586_v55  ;;  %v6587_v19 = vpack.c.bf16 %v11398_v42, %v11397_v17 }
 0xb13   : > { %10261 = vst [vmem:[%s14274_s11 + $0x340] sm:$0xff] %v10133_v57  ;;  %v9750_v11 = vmin.f32 %v9622_v1, 0.4  ;;  %v8234_v52 = vadd.f32 %v7952_v9, %v7105_v2 }
 0xb14   : > { %11098 = vmatmul.msk.bf16.gmra.mxu3 %vm477_vm1, %v6586_v55  ;;  %v7106_v16 = vadd.f32 %v6937_v59, %v6565_v14 }
 0xb15   : > { %v9878_v18 = vmul.f32 2.5, %v9750_v11  ;;  %v9363_v48 = vadd.f32 %v9081_v46, %v8234_v52  ;;  %v6940_v13 = vpop.f32.mrf.mxu2  ;;  %v16692_v46 = vld [vmem:[#allocation117_spill] sm:$0xff] }
 0xb16   : > { %v5819_v37 = vpop.f32.mrf.mxu1  ;;  %v8618_v61 = vpop.f32.mrf.mxu0 }
 0xb17   : > { %v10006_v20 = vfloor.f32 %v9878_v18  ;;  %v9495_v44 = vadd.f32 %v15436_v36, %v9363_v48  ;;  %v7487_v3 = vpop.f32.mrf.mxu3  ;;  %v6285_v54 = vrot.slane %v5819_v37, 2  ;;  %v9084_v49 = vrot.slane %v8618_v61, 2  ;;  %v380_v48 = vld [vmem:[%s11582_s23 + $0x528] sm:$0xff] }
 0xb18   : > { %v7953_v43 = vrot.slane %v7487_v3, 1 }
 0xb19   : > { %v10134_v63 = vmul.f32 0.4, %v10006_v20  ;;  %v9623_v31 = vmax.f32 %v9495_v44, 0.0 }
 0xb1a   : > { %v7954_v40 = vsel %vm1812_vm2, %v7951_v22, %v7953_v43  ;;  %v11399_v43 = vld [vmem:[%s11582_s23 + $0x520] sm:$0xff] }
 0xb1b   : > { %10262 = vst [vmem:[%s14274_s11 + $0x348] sm:$0xff] %v10134_v63  ;;  %v9751_v10 = vmin.f32 %v9623_v31, 0.4  ;;  %v8235_v12 = vadd.f32 %v7954_v40, %v7106_v16  ;;  %v6588_v13 = vpack.c.bf16 %v380_v48, %v11399_v43 }
 0xb1d   : > { %v9879_v7 = vmul.f32 2.5, %v9751_v10  ;;  %v9364_v47 = vadd.f32 %v9083_v39, %v8235_v12  ;;  %v6941_v26 = vpop.f32.mrf.mxu2  ;;  %v16693_v39 = vld [vmem:[#allocation109_spill] sm:$0xff] }
 0xb1e   : > { %v5822_v60 = vpop.f32.mrf.mxu1  ;;  %v8621_v6 = vpop.f32.mrf.mxu0 }
 0xb1f   : > { %v10007_v4 = vfloor.f32 %v9879_v7  ;;  %v9496_v41 = vadd.f32 %v15436_v36, %v9364_v47  ;;  %v7489_v24 = vpop.f32.mrf.mxu3  ;;  %v6286_v8 = vrot.slane %v5822_v60, 2  ;;  %v9085_v56 = vrot.slane %v8621_v6, 2 }
 0xb20   : > { %v7955_v59 = vrot.slane %v7489_v24, 1 }
 0xb21   : > { %v10135_v0 = vmul.f32 0.4, %v10007_v4  ;;  %v9624_v32 = vmax.f32 %v9496_v41, 0.0  ;;  %v6287_v58 = vsel %vm2942_vm3, %v6285_v54, %v6286_v8  ;;  %10925 = vmatmul.msk.bf16.gmra.mxu1 %vm477_vm1, %v16690_v28  ;;  %11186 = vmatmul.msk.bf16.gmra.mxu0 %vm477_vm1, %v6587_v19  ;;  %v9086_v51 = vsel %vm2942_vm3, %v9084_v49, %v9085_v56  ;;  %v16694_v41 = vld [vmem:[#allocation249_spill] sm:$0xff] }
 0xb22   : > { %v6566_v62 = vadd.f32 %v6287_v58, %v16691_v45  ;;  %11012 = vmatmul.msk.bf16.gmra.mxu2 %vm477_vm1, %v6587_v19 }
 0xb23   : > { %10263 = vst [vmem:[%s14274_s11 + $0x350] sm:$0xff] %v10135_v0  ;;  %v9752_v30 = vmin.f32 %v9624_v32, 0.4 }
 0xb24   : > { %11099 = vmatmul.msk.bf16.gmra.mxu3 %vm477_vm1, %v6587_v19  ;;  %v7107_v1 = vadd.f32 %v6941_v26, %v6566_v62 }
 0xb25   : > { %v9880_v15 = vmul.f32 2.5, %v9752_v30  ;;  %v6944_v27 = vpop.f32.mrf.mxu2 }
 0xb26   : > { %v5824_v55 = vpop.f32.mrf.mxu1  ;;  %v8623_v21 = vpop.f32.mrf.mxu0 }
 0xb27   : > { %v10008_v38 = vfloor.f32 %v9880_v15  ;;  %v7492_v22 = vpop.f32.mrf.mxu3  ;;  %v6288_v2 = vrot.slane %v5824_v55, 2  ;;  %v9087_v20 = vrot.slane %v8623_v21, 2  ;;  %v382_v55 = vld [vmem:[%s11582_s23 + $0x538] sm:$0xff] }
 0xb28   : > { %v7956_v34 = vrot.slane %v7492_v22, 1 }
 0xb29   : > { %v10136_v57 = vmul.f32 0.4, %v10008_v38  ;;  %v6289_v52 = vsel %vm2942_vm3, %v6286_v8, %v6288_v2  ;;  %v9088_v7 = vsel %vm2942_vm3, %v9085_v56, %v9087_v20  ;;  %v16695_v56 = vld [vmem:[#allocation131_spill] sm:$0xff] }
 0xb2a   : > { %v7957_v9 = vsel %vm1812_vm2, %v7955_v59, %v7956_v34  ;;  %v6567_v18 = vadd.f32 %v6289_v52, %v16692_v46 }
 0xb2b   : > { %10264 = vst [vmem:[%s14274_s11 + $0x358] sm:$0xff] %v10136_v57  ;;  %v8236_v11 = vadd.f32 %v7957_v9, %v7107_v1 }
 0xb2c   : > { %v7108_v63 = vadd.f32 %v6944_v27, %v6567_v18  ;;  %v381_v27 = vld [vmem:[%s11582_s23 + $0x530] sm:$0xff] }
 0xb2d   : > { %v9365_v53 = vadd.f32 %v9086_v51, %v8236_v11  ;;  %v6946_v3 = vpop.f32.mrf.mxu2  ;;  %v6589_v52 = vpack.c.bf16 %v382_v55, %v381_v27 }
 0xb2e   : > { %v5827_v50 = vpop.f32.mrf.mxu1  ;;  %v8626_v16 = vpop.f32.mrf.mxu0 }
 0xb2f   : > { %v9497_v35 = vadd.f32 %v15436_v36, %v9365_v53  ;;  %v7494_v14 = vpop.f32.mrf.mxu3  ;;  %v6290_v31 = vrot.slane %v5827_v50, 2  ;;  %v9089_v42 = vrot.slane %v8626_v16, 2 }
 0xb30   : > { %v7958_v44 = vrot.slane %v7494_v14, 1 }
 0xb31   : > { %v9625_v37 = vmax.f32 %v9497_v35, 0.0  ;;  %v6291_v12 = vsel %vm2942_vm3, %v6288_v2, %v6290_v31  ;;  %10926 = vmatmul.msk.bf16.gmra.mxu1 %vm477_vm1, %v16693_v39  ;;  %11187 = vmatmul.msk.bf16.gmra.mxu0 %vm477_vm1, %v6588_v13  ;;  %v9090_v38 = vsel %vm2942_vm3, %v9087_v20, %v9089_v42  ;;  %v16696_v20 = vld [vmem:[#allocation123_spill] sm:$0xff] }
 0xb32   : > { %v7959_v61 = vsel %vm1812_vm2, %v7956_v34, %v7958_v44  ;;  %v6568_v24 = vadd.f32 %v6291_v12, %v16694_v41  ;;  %11013 = vmatmul.msk.bf16.gmra.mxu2 %vm477_vm1, %v6588_v13 }
 0xb33   : > { %v9753_v40 = vmin.f32 %v9625_v37, 0.4  ;;  %v8237_v10 = vadd.f32 %v7959_v61, %v7108_v63 }
 0xb34   : > { %11100 = vmatmul.msk.bf16.gmra.mxu3 %vm477_vm1, %v6588_v13  ;;  %v7109_v6 = vadd.f32 %v6946_v3, %v6568_v24  ;;  %v16697_v24 = vld [vmem:[#allocation141_spill] sm:$0xff] }
 0xb35   : > { %v9881_v47 = vmul.f32 2.5, %v9753_v40  ;;  %v9366_v4 = vadd.f32 %v9088_v7, %v8237_v10  ;;  %v6949_v0 = vpop.f32.mrf.mxu2 }
 0xb36   : > { %v5829_v32 = vpop.f32.mrf.mxu1  ;;  %v8628_v58 = vpop.f32.mrf.mxu0 }
 0xb37   : > { %v10009_v26 = vfloor.f32 %v9881_v47  ;;  %v9498_v60 = vadd.f32 %v15436_v36, %v9366_v4  ;;  %v7497_v17 = vpop.f32.mrf.mxu3  ;;  %v6292_v30 = vrot.slane %v5829_v32, 2  ;;  %v9091_v21 = vrot.slane %v8628_v58, 2  ;;  %v383_v47 = vld [vmem:[%s11582_s23 + $0x540] sm:$0xff]  ;;  %v384_v4 = vld [vmem:[%s11582_s23 + $0x548] sm:$0xff] }
 0xb38   : > { %v7960_v19 = vrot.slane %v7497_v17, 1 }
 0xb39   : > { %v10137_v54 = vmul.f32 0.4, %v10009_v26  ;;  %v9626_v8 = vmax.f32 %v9498_v60, 0.0  ;;  %v6293_v62 = vsel %vm2942_vm3, %v6290_v31, %v6292_v30 }
 0xb3a   : > { %v7961_v28 = vsel %vm1812_vm2, %v7958_v44, %v7960_v19  ;;  %v6569_v34 = vadd.f32 %v6293_v62, %v16695_v56  ;;  %v9092_v44 = vsel %vm2942_vm3, %v9089_v42, %v9091_v21  ;;  %v6590_v42 = vpack.c.bf16 %v384_v4, %v383_v47 }
 0xb3b   : > { %10265 = vst [vmem:[%s14274_s11 + $0x360] sm:$0xff] %v10137_v54  ;;  %v9754_v15 = vmin.f32 %v9626_v8, 0.4  ;;  %v8238_v45 = vadd.f32 %v7961_v28, %v7109_v6 }
 0xb3c   : > { %v7110_v46 = vadd.f32 %v6949_v0, %v6569_v34  ;;  %v16699_v34 = vld [vmem:[#allocation145_spill] sm:$0xff] }
 0xb3d   : > { %v9882_v22 = vmul.f32 2.5, %v9754_v15  ;;  %v9367_v59 = vadd.f32 %v9090_v38, %v8238_v45  ;;  %v6951_v9 = vpop.f32.mrf.mxu2 }
 0xb3e   : > { %v5832_v11 = vpop.f32.mrf.mxu1  ;;  %v8631_v18 = vpop.f32.mrf.mxu0 }
 0xb3f   : > { %v10010_v57 = vfloor.f32 %v9882_v22  ;;  %v9499_v1 = vadd.f32 %v15436_v36, %v9367_v59  ;;  %v7499_v2 = vpop.f32.mrf.mxu3  ;;  %v6294_v40 = vrot.slane %v5832_v11, 2  ;;  %v16698_v22 = vld [vmem:[#allocation250_spill] sm:$0xff] }
 0xb40   : > { %v7962_v49 = vrot.slane %v7499_v2, 1 }
 0xb41   : > { %v10138_v51 = vmul.f32 0.4, %v10010_v57  ;;  %v9627_v53 = vmax.f32 %v9499_v1, 0.0  ;;  %10927 = vmatmul.msk.bf16.gmra.mxu1 %vm477_vm1, %v16696_v20  ;;  %11188 = vmatmul.msk.bf16.gmra.mxu0 %vm477_vm1, %v6589_v52 }
 0xb42   : > { %v7963_v48 = vsel %vm1812_vm2, %v7960_v19, %v7962_v49  ;;  %11014 = vmatmul.msk.bf16.gmra.mxu2 %vm477_vm1, %v6589_v52  ;;  %v9093_v19 = vrot.slane %v8631_v18, 2 }
 0xb43   : > { %10266 = vst [vmem:[%s14274_s11 + $0x368] sm:$0xff] %v10138_v51  ;;  %v9755_v35 = vmin.f32 %v9627_v53, 0.4  ;;  %v8239_v14 = vadd.f32 %v7963_v48, %v7110_v46 }
 0xb44   : > { %11101 = vmatmul.msk.bf16.gmra.mxu3 %vm477_vm1, %v6589_v52 }
 0xb45   : > { %v9883_v3 = vmul.f32 2.5, %v9755_v35  ;;  %v9368_v50 = vadd.f32 %v9092_v44, %v8239_v14  ;;  %v6953_v63 = vpop.f32.mrf.mxu2  ;;  %v16700_v44 = vld [vmem:[#allocation151_spill] sm:$0xff] }
 0xb46   : > { %v5834_v31 = vpop.f32.mrf.mxu1  ;;  %v8633_v12 = vpop.f32.mrf.mxu0 }
 0xb47   : > { %v10011_v43 = vfloor.f32 %v9883_v3  ;;  %v9500_v13 = vadd.f32 %v15436_v36, %v9368_v50  ;;  %v7502_v37 = vpop.f32.mrf.mxu3  ;;  %v6295_v10 = vrot.slane %v5834_v31, 2  ;;  %v9094_v32 = vrot.slane %v8633_v12, 2 }
 0xb48   : > { %v7964_v0 = vrot.slane %v7502_v37, 1 }
 0xb49   : > { %v10139_v16 = vmul.f32 0.4, %v10011_v43  ;;  %v9628_v61 = vmax.f32 %v9500_v13, 0.0  ;;  %v6296_v7 = vsel %vm2942_vm3, %v6294_v40, %v6295_v10  ;;  %v9095_v59 = vsel %vm2942_vm3, %v9093_v19, %v9094_v32 }
 0xb4a   : > { %v6570_v26 = vadd.f32 %v6296_v7, %v16697_v24 }
 0xb4b   : > { %10267 = vst [vmem:[%s14274_s11 + $0x370] sm:$0xff] %v10139_v16  ;;  %v9756_v39 = vmin.f32 %v9628_v61, 0.4 }
 0xb4c   : > { %v7111_v58 = vadd.f32 %v6953_v63, %v6570_v26 }
 0xb4d   : > { %v9884_v41 = vmul.f32 2.5, %v9756_v39  ;;  %v6955_v8 = vpop.f32.mrf.mxu2 }
 0xb4e   : > { %v5837_v6 = vpop.f32.mrf.mxu1  ;;  %v8636_v15 = vpop.f32.mrf.mxu0 }
 0xb4f   : > { %v10012_v60 = vfloor.f32 %v9884_v41  ;;  %v7504_v17 = vpop.f32.mrf.mxu3  ;;  %v6297_v28 = vrot.slane %v5837_v6, 2  ;;  %v9096_v1 = vrot.slane %v8636_v15, 2 }
 0xb50   : > { %v7965_v54 = vrot.slane %v7504_v17, 1  ;;  %v16701_v17 = vld [vmem:[#allocation11_spill] sm:$0xff] }
 0xb51   : > { %v10140_v30 = vmul.f32 0.4, %v10012_v60  ;;  %v6298_v38 = vsel %vm2942_vm3, %v6295_v10, %v6297_v28  ;;  %10928 = vmatmul.msk.bf16.gmra.mxu1 %vm477_vm1, %v16698_v22  ;;  %11189 = vmatmul.msk.bf16.gmra.mxu0 %vm477_vm1, %v6590_v42  ;;  %v9097_v35 = vsel %vm2942_vm3, %v9094_v32, %v9096_v1 }
 0xb52   : > { %v7966_v45 = vsel %vm1812_vm2, %v7964_v0, %v7965_v54  ;;  %v6571_v27 = vadd.f32 %v6298_v38, %v16699_v34  ;;  %11015 = vmatmul.msk.bf16.gmra.mxu2 %vm477_vm1, %v6590_v42 }
 0xb53   : > { %10268 = vst [vmem:[%s14274_s11 + $0x378] sm:$0xff] %v10140_v30  ;;  %v8240_v62 = vadd.f32 %v7966_v45, %v7111_v58 }
 0xb54   : > { %11102 = vmatmul.msk.bf16.gmra.mxu3 %vm477_vm1, %v6590_v42  ;;  %v7112_v11 = vadd.f32 %v6955_v8, %v6571_v27 }
 0xb55   : > { %v9369_v56 = vadd.f32 %v9095_v59, %v8240_v62  ;;  %v6958_v21 = vpop.f32.mrf.mxu2 }
 0xb56   : > { %v5839_v49 = vpop.f32.mrf.mxu1  ;;  %v8638_v51 = vpop.f32.mrf.mxu0 }
 0xb57   : > { %v9501_v55 = vadd.f32 %v15436_v36, %v9369_v56  ;;  %v7507_v57 = vpop.f32.mrf.mxu3  ;;  %v6299_v52 = vrot.slane %v5839_v49, 2  ;;  %v9098_v37 = vrot.slane %v8638_v51, 2 }
 0xb58   : > { %v7967_v2 = vrot.slane %v7507_v57, 1 }
 0xb59   : > { %v9629_v9 = vmax.f32 %v9501_v55, 0.0  ;;  %v6300_v48 = vsel %vm2942_vm3, %v6297_v28, %v6299_v52  ;;  %v9099_v24 = vsel %vm2942_vm3, %v9096_v1, %v9098_v37 }
 0xb5a   : > { %v7968_v53 = vsel %vm1812_vm2, %v7965_v54, %v7967_v2  ;;  %v6572_v3 = vadd.f32 %v6300_v48, %v16700_v44 }
 0xb5b   : > { %v9757_v46 = vmin.f32 %v9629_v9, 0.4  ;;  %v8241_v18 = vadd.f32 %v7968_v53, %v7112_v11 }
 0xb5c   : > { %v7113_v10 = vadd.f32 %v6958_v21, %v6572_v3 }
 0xb5d   : > { %v9885_v14 = vmul.f32 2.5, %v9757_v46  ;;  %v9370_v20 = vadd.f32 %v9097_v35, %v8241_v18  ;;  %v6960_v31 = vpop.f32.mrf.mxu2  ;;  %v16702_v18 = vld [vmem:[#allocation23_spill] sm:$0xff] }
 0xb5e   : > { %v5842_v16 = vpop.f32.mrf.mxu1  ;;  %v8641_v39 = vpop.f32.mrf.mxu0 }
 0xb5f   : > { %v10013_v50 = vfloor.f32 %v9885_v14  ;;  %v9502_v43 = vadd.f32 %v15436_v36, %v9370_v20  ;;  %v7509_v13 = vpop.f32.mrf.mxu3  ;;  %v6301_v12 = vrot.slane %v5842_v16, 2  ;;  %v9100_v54 = vrot.slane %v8641_v39, 2 }
 0xb60   : > { %v7969_v63 = vrot.slane %v7509_v13, 1 }
 0xb61   : > { %v10141_v61 = vmul.f32 0.4, %v10013_v50  ;;  %v9630_v40 = vmax.f32 %v9502_v43, 0.0  ;;  %v6302_v41 = vsel %vm2942_vm3, %v6299_v52, %v6301_v12  ;;  %v9101_v59 = vsel %vm2942_vm3, %v9098_v37, %v9100_v54 }
 0xb62   : > { %v7970_v7 = vsel %vm1812_vm2, %v7967_v2, %v7969_v63  ;;  %v6573_v42 = vadd.f32 %v6302_v41, %v16701_v17 }
 0xb63   : > { %10269 = vst [vmem:[%s14274_s11 + $0x380] sm:$0xff] %v10141_v61  ;;  %v9758_v47 = vmin.f32 %v9630_v40, 0.4  ;;  %v8242_v4 = vadd.f32 %v7970_v7, %v7113_v10  ;;  %v16703_v7 = vld [vmem:[#allocation153_spill] sm:$0xff] }
 0xb64   : > { %v7114_v15 = vadd.f32 %v6960_v31, %v6573_v42 }
 0xb65   : > { %v9886_v26 = vmul.f32 2.5, %v9758_v47  ;;  %v9371_v60 = vadd.f32 %v9099_v24, %v8242_v4  ;;  %v6963_v6 = vpop.f32.mrf.mxu2 }
 0xb66   : > { %v5844_v30 = vpop.f32.mrf.mxu1  ;;  %v8643_v45 = vpop.f32.mrf.mxu0 }
 0xb67   : > { %v10014_v19 = vfloor.f32 %v9886_v26  ;;  %v9503_v0 = vadd.f32 %v15436_v36, %v9371_v60  ;;  %v7512_v32 = vpop.f32.mrf.mxu3  ;;  %v6303_v9 = vrot.slane %v5844_v30, 2  ;;  %v9102_v16 = vrot.slane %v8643_v45, 2  ;;  %v16704_v45 = vld [vmem:[#allocation15_spill] sm:$0xff] }
 0xb68   : > { %v7971_v8 = vrot.slane %v7512_v32, 1 }
 0xb69   : > { %v10142_v58 = vmul.f32 0.4, %v10014_v19  ;;  %v9631_v28 = vmax.f32 %v9503_v0, 0.0 }
 0xb6a   : > { %v7972_v62 = vsel %vm1812_vm2, %v7969_v63, %v7971_v8 }
 0xb6b   : > { %10270 = vst [vmem:[%s14274_s11 + $0x388] sm:$0xff] %v10142_v58  ;;  %v9759_v38 = vmin.f32 %v9631_v28, 0.4  ;;  %v8243_v22 = vadd.f32 %v7972_v62, %v7114_v15 }
 0xb6d   : > { %v9887_v56 = vmul.f32 2.5, %v9759_v38  ;;  %v9372_v34 = vadd.f32 %v9101_v59, %v8243_v22  ;;  %v6964_v1 = vpop.f32.mrf.mxu2 }
 0xb6e   : > { %v5847_v2 = vpop.f32.mrf.mxu1  ;;  %v8646_v52 = vpop.f32.mrf.mxu0 }
 0xb6f   : > { %v10015_v27 = vfloor.f32 %v9887_v56  ;;  %v9504_v55 = vadd.f32 %v15436_v36, %v9372_v34  ;;  %v7514_v57 = vpop.f32.mrf.mxu3  ;;  %v6304_v11 = vrot.slane %v5847_v2, 2  ;;  %v9103_v44 = vrot.slane %v8646_v52, 2 }
 0xb70   : > { %v7973_v20 = vrot.slane %v7514_v57, 1 }
 0xb71   : > { %v10143_v21 = vmul.f32 0.4, %v10015_v27  ;;  %v9632_v49 = vmax.f32 %v9504_v55, 0.0  ;;  %v6305_v53 = vsel %vm2942_vm3, %v6303_v9, %v6304_v11  ;;  %v9104_v12 = vsel %vm2942_vm3, %v9102_v16, %v9103_v44 }
 0xb72   : > { %v6574_v48 = vadd.f32 %v6305_v53, %v16702_v18 }
 0xb73   : > { %10271 = vst [vmem:[%s14274_s11 + $0x390] sm:$0xff] %v10143_v21  ;;  %v9760_v51 = vmin.f32 %v9632_v49, 0.4 }
 0xb74   : > { %v7115_v37 = vadd.f32 %v6964_v1, %v6574_v48  ;;  %v16705_v48 = vld [vmem:[#allocation27_spill] sm:$0xff] }
 0xb75   : > { %v9888_v46 = vmul.f32 2.5, %v9760_v51  ;;  %v6967_v50 = vpop.f32.mrf.mxu2 }
 0xb76   : > { %v5849_v43 = vpop.f32.mrf.mxu1  ;;  %v8648_v31 = vpop.f32.mrf.mxu0 }
 0xb77   : > { %v10016_v35 = vfloor.f32 %v9888_v46  ;;  %v7517_v14 = vpop.f32.mrf.mxu3  ;;  %v6306_v63 = vrot.slane %v5849_v43, 2  ;;  %v9105_v24 = vrot.slane %v8648_v31, 2 }
 0xb78   : > { %v7974_v3 = vrot.slane %v7517_v14, 1 }
 0xb79   : > { %v10144_v13 = vmul.f32 0.4, %v10016_v35  ;;  %v6307_v10 = vsel %vm2942_vm3, %v6304_v11, %v6306_v63  ;;  %v9106_v58 = vsel %vm2942_vm3, %v9103_v44, %v9105_v24 }
 0xb7a   : > { %v7975_v61 = vsel %vm1812_vm2, %v7973_v20, %v7974_v3  ;;  %v6575_v47 = vadd.f32 %v6307_v10, %v16703_v7 }
 0xb7b   : > { %10272 = vst [vmem:[%s14274_s11 + $0x398] sm:$0xff] %v10144_v13  ;;  %v8244_v40 = vadd.f32 %v7975_v61, %v7115_v37 }
 0xb7c   : > { %v7116_v19 = vadd.f32 %v6967_v50, %v6575_v47 }
 0xb7d   : > { %v9373_v39 = vadd.f32 %v9104_v12, %v8244_v40  ;;  %v6969_v60 = vpop.f32.mrf.mxu2 }
 0xb7e   : > { %v5852_v17 = vpop.f32.mrf.mxu1  ;;  %v8651_v32 = vpop.f32.mrf.mxu0 }
 0xb7f   : > { %v9505_v4 = vadd.f32 %v15436_v36, %v9373_v39  ;;  %v7519_v41 = vpop.f32.mrf.mxu3  ;;  %v6308_v0 = vrot.slane %v5852_v17, 2  ;;  %v9107_v56 = vrot.slane %v8651_v32, 2 }
 0xb80   : > { %v7976_v26 = vrot.slane %v7519_v41, 1 }
 0xb81   : > { %v9633_v42 = vmax.f32 %v9505_v4, 0.0  ;;  %v6309_v30 = vsel %vm2942_vm3, %v6306_v63, %v6308_v0  ;;  %v9108_v53 = vsel %vm2942_vm3, %v9105_v24, %v9107_v56 }
 0xb82   : > { %v7977_v54 = vsel %vm1812_vm2, %v7974_v3, %v7976_v26  ;;  %v6576_v62 = vadd.f32 %v6309_v30, %v16704_v45 }
 0xb83   : > { %v9761_v8 = vmin.f32 %v9633_v42, 0.4  ;;  %v8245_v6 = vadd.f32 %v7977_v54, %v7116_v19 }
 0xb84   : > { %v7117_v2 = vadd.f32 %v6969_v60, %v6576_v62 }
 0xb85   : > { %v9889_v28 = vmul.f32 2.5, %v9761_v8  ;;  %v9374_v15 = vadd.f32 %v9106_v58, %v8245_v6  ;;  %v6972_v27 = vpop.f32.mrf.mxu2  ;;  %v16706_v6 = vld [vmem:[#allocation155_spill] sm:$0xff] }
 0xb86   : > { %v5854_v55 = vpop.f32.mrf.mxu1  ;;  %v8653_v49 = vpop.f32.mrf.mxu0 }
 0xb87   : > { %v10017_v38 = vfloor.f32 %v9889_v28  ;;  %v9506_v22 = vadd.f32 %v15436_v36, %v9374_v15  ;;  %v7522_v59 = vpop.f32.mrf.mxu3  ;;  %v6310_v21 = vrot.slane %v5854_v55, 2  ;;  %v9109_v3 = vrot.slane %v8653_v49, 2 }
 0xb88   : > { %v7978_v34 = vrot.slane %v7522_v59, 1 }
 0xb89   : > { %v10145_v57 = vmul.f32 0.4, %v10017_v38  ;;  %v9634_v1 = vmax.f32 %v9506_v22, 0.0  ;;  %v6311_v51 = vsel %vm2942_vm3, %v6308_v0, %v6310_v21  ;;  %v9110_v12 = vsel %vm2942_vm3, %v9107_v56, %v9109_v3 }
 0xb8a   : > { %v7979_v9 = vsel %vm1812_vm2, %v7976_v26, %v7978_v34  ;;  %v6577_v35 = vadd.f32 %v6311_v51, %v16705_v48 }
 0xb8b   : > { %10273 = vst [vmem:[%s14274_s11 + $0x3a0] sm:$0xff] %v10145_v57  ;;  %v9762_v11 = vmin.f32 %v9634_v1, 0.4  ;;  %v8246_v52 = vadd.f32 %v7979_v9, %v7117_v2 }
 0xb8c   : > { %v7118_v31 = vadd.f32 %v6972_v27, %v6577_v35 }
 0xb8d   : > { %v9890_v46 = vmul.f32 2.5, %v9762_v11  ;;  %v9375_v18 = vadd.f32 %v9108_v53, %v8246_v52  ;;  %v6974_v43 = vpop.f32.mrf.mxu2 }
 0xb8e   : > { %v5857_v13 = vpop.f32.mrf.mxu1  ;;  %v8656_v16 = vpop.f32.mrf.mxu0 }
 0xb8f   : > { %v10018_v14 = vfloor.f32 %v9890_v46  ;;  %v9507_v20 = vadd.f32 %v15436_v36, %v9375_v18  ;;  %v7524_v44 = vpop.f32.mrf.mxu3  ;;  %v6312_v42 = vrot.slane %v5857_v13, 2  ;;  %v9111_v15 = vrot.slane %v8656_v16, 2 }
 0xb90   : > { %v7980_v50 = vrot.slane %v7524_v44, 1 }
 0xb91   : > { %v10146_v37 = vmul.f32 0.4, %v10018_v14  ;;  %v9635_v63 = vmax.f32 %v9507_v20, 0.0 }
 0xb92   : > { %v7981_v61 = vsel %vm1812_vm2, %v7978_v34, %v7980_v50 }
 0xb93   : > { %10274 = vst [vmem:[%s14274_s11 + $0x3a8] sm:$0xff] %v10146_v37  ;;  %v9763_v40 = vmin.f32 %v9635_v63, 0.4  ;;  %v8247_v10 = vadd.f32 %v7981_v61, %v7118_v31 }
 0xb95   : > { %v9891_v39 = vmul.f32 2.5, %v9763_v40  ;;  %v9376_v7 = vadd.f32 %v9110_v12, %v8247_v10  ;;  %v6976_v24 = vpop.f32.mrf.mxu2 }
 0xb96   : > { %v5859_v26 = vpop.f32.mrf.mxu1  ;;  %v8658_v0 = vpop.f32.mrf.mxu0 }
 0xb97   : > { %v10019_v47 = vfloor.f32 %v9891_v39  ;;  %v9508_v4 = vadd.f32 %v15436_v36, %v9376_v7  ;;  %v7527_v41 = vpop.f32.mrf.mxu3  ;;  %v6313_v19 = vrot.slane %v5859_v26, 2  ;;  %v9112_v62 = vrot.slane %v8658_v0, 2 }
 0xb98   : > { %v7982_v45 = vrot.slane %v7527_v41, 1 }
 0xb99   : > { %v10147_v60 = vmul.f32 0.4, %v10019_v47  ;;  %v9636_v17 = vmax.f32 %v9508_v4, 0.0  ;;  %v6314_v54 = vsel %vm2942_vm3, %v6312_v42, %v6313_v19  ;;  %v9113_v21 = vsel %vm2942_vm3, %v9111_v15, %v9112_v62 }
 0xb9a   : > { %v6578_v30 = vadd.f32 %v6314_v54, %v16706_v6 }
 0xb9b   : > { %10275 = vst [vmem:[%s14274_s11 + $0x3b0] sm:$0xff] %v10147_v60  ;;  %v9764_v32 = vmin.f32 %v9636_v17, 0.4 }
 0xb9c   : > { %v7119_v34 = vadd.f32 %v6976_v24, %v6578_v30 }
 0xb9d   : > { %v9892_v8 = vmul.f32 2.5, %v9764_v32  ;;  %v6978_v22 = vpop.f32.mrf.mxu2  ;;  %v16707_v32 = vld [vmem:[#allocation157_spill] sm:$0xff] }
 0xb9e   : > { %v5862_v59 = vpop.f32.mrf.mxu1  ;;  %v8661_v55 = vpop.f32.mrf.mxu0 }
 0xb9f   : > { %v10020_v58 = vfloor.f32 %v9892_v8  ;;  %v7529_v28 = vpop.f32.mrf.mxu3  ;;  %v6315_v27 = vrot.slane %v5862_v59, 2  ;;  %v9114_v51 = vrot.slane %v8661_v55, 2 }
 0xba0   : > { %v7983_v38 = vrot.slane %v7529_v28, 1 }
 0xba1   : > { %v10148_v56 = vmul.f32 0.4, %v10020_v58  ;;  %v6316_v2 = vsel %vm2942_vm3, %v6313_v19, %v6315_v27  ;;  %v9115_v13 = vsel %vm2942_vm3, %v9112_v62, %v9114_v51 }
 0xba2   : > { %v7984_v57 = vsel %vm1812_vm2, %v7982_v45, %v7983_v38  ;;  %v6579_v9 = vadd.f32 %v6316_v2, %v14177_v25 }
 0xba3   : > { %10276 = vst [vmem:[%s14274_s11 + $0x3b8] sm:$0xff] %v10148_v56  ;;  %v8248_v1 = vadd.f32 %v7984_v57, %v7119_v34 }
 0xba4   : > { %v7120_v35 = vadd.f32 %v6978_v22, %v6579_v9 }
 0xba5   : > { %v9377_v49 = vadd.f32 %v9113_v21, %v8248_v1  ;;  %v6981_v46 = vpop.f32.mrf.mxu2 }
 0xba6   : > { %v5864_v18 = vpop.f32.mrf.mxu1  ;;  %v8663_v20 = vpop.f32.mrf.mxu0 }
 0xba7   : > { %v9509_v11 = vadd.f32 %v15436_v36, %v9377_v49  ;;  %v7532_v52 = vpop.f32.mrf.mxu3  ;;  %v6317_v14 = vrot.slane %v5864_v18, 2  ;;  %v9116_v40 = vrot.slane %v8663_v20, 2 }
 0xba8   : > { %v7985_v53 = vrot.slane %v7532_v52, 1 }
 0xba9   : > { %v9637_v48 = vmax.f32 %v9509_v11, 0.0  ;;  %v6318_v43 = vsel %vm2942_vm3, %v6315_v27, %v6317_v14  ;;  %v9117_v42 = vsel %vm2942_vm3, %v9114_v51, %v9116_v40 }
 0xbaa   : > { %v7986_v44 = vsel %vm1812_vm2, %v7983_v38, %v7985_v53  ;;  %v6580_v63 = vadd.f32 %v6318_v43, %v14191_v23 }
 0xbab   : > { %v9765_v3 = vmin.f32 %v9637_v48, 0.4  ;;  %v8249_v50 = vadd.f32 %v7986_v44, %v7120_v35 }
 0xbac   : > { %v7121_v4 = vadd.f32 %v6981_v46, %v6580_v63 }
 0xbad   : > { %v9893_v25 = vmul.f32 2.5, %v9765_v3  ;;  %v9378_v37 = vadd.f32 %v9115_v13, %v8249_v50  ;;  %v6983_v12 = vpop.f32.mrf.mxu2 }
 0xbae   : > { %v5867_v39 = vpop.f32.mrf.mxu1  ;;  %v8666_v24 = vpop.f32.mrf.mxu0 }
 0xbaf   : > { %v10021_v31 = vfloor.f32 %v9893_v25  ;;  %v9510_v16 = vadd.f32 %v15436_v36, %v9378_v37  ;;  %v7534_v61 = vpop.f32.mrf.mxu3  ;;  %v6319_v41 = vrot.slane %v5867_v39, 2  ;;  %v9118_v58 = vrot.slane %v8666_v24, 2 }
 0xbb0   : > { %v7987_v10 = vrot.slane %v7534_v61, 1 }
 0xbb1   : > { %v10149_v7 = vmul.f32 0.4, %v10021_v31  ;;  %v9638_v47 = vmax.f32 %v9510_v16, 0.0  ;;  %v6320_v23 = vsel %vm2942_vm3, %v6317_v14, %v6319_v41  ;;  %v9119_v55 = vsel %vm2942_vm3, %v9116_v40, %v9118_v58 }
 0xbb2   : > { %v7988_v26 = vsel %vm1812_vm2, %v7985_v53, %v7987_v10  ;;  %v6581_v54 = vadd.f32 %v6320_v23, %v16707_v32 }
 0xbb3   : > { %10277 = vst [vmem:[%s14274_s11 + $0x3c0] sm:$0xff] %v10149_v7  ;;  %v9766_v60 = vmin.f32 %v9638_v47, 0.4  ;;  %v8250_v17 = vadd.f32 %v7988_v26, %v7121_v4  ;;  %v16708_v47 = vld [vmem:[#allocation16_spill] sm:$0xff] }
 0xbb4   : > { %v7122_v22 = vadd.f32 %v6983_v12, %v6581_v54 }
 0xbb5   : > { %v9894_v19 = vmul.f32 2.5, %v9766_v60  ;;  %v9379_v0 = vadd.f32 %v9117_v42, %v8250_v17  ;;  %v6986_v15 = vpop.f32.mrf.mxu2 }
 0xbb6   : > { %v5869_v45 = vpop.f32.mrf.mxu1  ;;  %v8668_v59 = vpop.f32.mrf.mxu0 }
 0xbb7   : > { %v10022_v8 = vfloor.f32 %v9894_v19  ;;  %v9511_v6 = vadd.f32 %v15436_v36, %v9379_v0  ;;  %v7537_v30 = vpop.f32.mrf.mxu3  ;;  %v6321_v53 = vrot.slane %v5869_v45, 2  ;;  %v9120_v40 = vrot.slane %v8668_v59, 2 }
 0xbb8   : > { %v7989_v28 = vrot.slane %v7537_v30, 1 }
 0xbb9   : > { %v10150_v62 = vmul.f32 0.4, %v10022_v8  ;;  %v9639_v38 = vmax.f32 %v9511_v6, 0.0 }
 0xbba   : > { %v7990_v56 = vsel %vm1812_vm2, %v7987_v10, %v7989_v28 }
 0xbbb   : > { %10278 = vst [vmem:[%s14274_s11 + $0x3c8] sm:$0xff] %v10150_v62  ;;  %v9767_v34 = vmin.f32 %v9639_v38, 0.4  ;;  %v8251_v27 = vadd.f32 %v7990_v56, %v7122_v22 }
 0xbbd   : > { %v9895_v57 = vmul.f32 2.5, %v9767_v34  ;;  %v9380_v1 = vadd.f32 %v9119_v55, %v8251_v27  ;;  %v6987_v9 = vpop.f32.mrf.mxu2 }
 0xbbe   : > { %v5872_v11 = vpop.f32.mrf.mxu1  ;;  %v8671_v18 = vpop.f32.mrf.mxu0 }
 0xbbf   : > { %v10023_v2 = vfloor.f32 %v9895_v57  ;;  %v9512_v21 = vadd.f32 %v15436_v36, %v9380_v1  ;;  %v7539_v49 = vpop.f32.mrf.mxu3  ;;  %v6322_v46 = vrot.slane %v5872_v11, 2  ;;  %v9121_v43 = vrot.slane %v8671_v18, 2  ;;  %v11400_v18 = vld [vmem:[%s15653_s2] ss:$0 sm:$0xff] }
 0xbc0   : > { %v7991_v50 = vrot.slane %v7539_v49, 1 }
 0xbc1   : > { %v10151_v52 = vmul.f32 0.4, %v10023_v2  ;;  %v9640_v51 = vmax.f32 %v9512_v21, 0.0  ;;  %v6323_v35 = vsel %vm2942_vm3, %v6321_v53, %v6322_v46 }
 0xbc2   : > { %v6582_v20 = vadd.f32 %v6323_v35, %v14211_v29  ;;  %v9122_v29 = vsel %vm2942_vm3, %v9120_v40, %v9121_v43 }
 0xbc3   : > { %10279 = vst [vmem:[%s14274_s11 + $0x3d0] sm:$0xff] %v10151_v52  ;;  %v9768_v48 = vmin.f32 %v9640_v51, 0.4 }
 0xbc4   : > { %v7123_v31 = vadd.f32 %v6987_v9, %v6582_v20 }
 0xbc5   : > { %v9896_v14 = vmul.f32 2.5, %v9768_v48  ;;  %v6990_v25 = vpop.f32.mrf.mxu2 }
 0xbc6   : > { %v5874_v37 = vpop.f32.mrf.mxu1  ;;  %v8673_v61 = vpop.f32.mrf.mxu0 }
 0xbc7   : > { %v10024_v44 = vfloor.f32 %v9896_v14  ;;  %v7542_v3 = vpop.f32.mrf.mxu3  ;;  %v6324_v16 = vrot.slane %v5874_v37, 2  ;;  %v9123_v26 = vrot.slane %v8673_v61, 2 }
 0xbc8   : > { %v7992_v13 = vrot.slane %v7542_v3, 1 }
 0xbc9   : > { %v10152_v63 = vmul.f32 0.4, %v10024_v44  ;;  %v6325_v39 = vsel %vm2942_vm3, %v6322_v46, %v6324_v16  ;;  %v9124_v58 = vsel %vm2942_vm3, %v9121_v43, %v9123_v26 }
 0xbca   : > { %v7993_v10 = vsel %vm1812_vm2, %v7991_v50, %v7992_v13  ;;  %v6583_v4 = vadd.f32 %v6325_v39, %v16708_v47 }
 0xbcb   : > { %10280 = vst [vmem:[%s14274_s11 + $0x3d8] sm:$0xff] %v10152_v63  ;;  %v8252_v12 = vadd.f32 %v7993_v10, %v7123_v31 }
 0xbcc   : > { %v7124_v19 = vadd.f32 %v6990_v25, %v6583_v4 }
 0xbcd   : > { %v9381_v7 = vadd.f32 %v9122_v29, %v8252_v12  ;;  %v6992_v17 = vpop.f32.mrf.mxu2 }
 0xbce   : > { %v5877_v23 = vpop.f32.mrf.mxu1  ;;  %v8676_v30 = vpop.f32.mrf.mxu0 }
 0xbcf   : > { %v9513_v41 = vadd.f32 %v15436_v36, %v9381_v7  ;;  %v7544_v24 = vpop.f32.mrf.mxu3  ;;  %v6326_v0 = vrot.slane %v5877_v23, 2  ;;  %v9125_v59 = vrot.slane %v8676_v30, 2 }
 0xbd0   : > { %v7994_v60 = vrot.slane %v7544_v24, 1 }
 0xbd1   : > { %v9641_v42 = vmax.f32 %v9513_v41, 0.0  ;;  %v6327_v6 = vsel %vm2942_vm3, %v6324_v16, %v6326_v0 }
 0xbd2   : > { %v7995_v32 = vsel %vm1812_vm2, %v7992_v13, %v7994_v60  ;;  %v6584_v45 = vadd.f32 %v6327_v6, %v14231_v33  ;;  %v9126_v33 = vsel %vm2942_vm3, %v9123_v26, %v9125_v59 }
 0xbd3   : > { %v9769_v54 = vmin.f32 %v9641_v42, 0.4  ;;  %v8253_v8 = vadd.f32 %v7995_v32, %v7124_v19 }
 0xbd4   : > { %v7125_v1 = vadd.f32 %v6992_v17, %v6584_v45 }
 0xbd5   : > { %v9897_v28 = vmul.f32 2.5, %v9769_v54  ;;  %v9382_v15 = vadd.f32 %v9124_v58, %v8253_v8  ;;  %v6995_v34 = vpop.f32.mrf.mxu2 }
 0xbd6   : > { %v5879_v27 = vpop.f32.mrf.mxu1  ;;  %v8678_v53 = vpop.f32.mrf.mxu0 }
 0xbd7   : > { %v10025_v62 = vfloor.f32 %v9897_v28  ;;  %v9514_v38 = vadd.f32 %v15436_v36, %v9382_v15  ;;  %v7547_v22 = vpop.f32.mrf.mxu3  ;;  %v6328_v2 = vrot.slane %v5879_v27, 2  ;;  %v9127_v14 = vrot.slane %v8678_v53, 2 }
 0xbd8   : > { %v7996_v56 = vrot.slane %v7547_v22, 1 }
 0xbd9   : > { %v10153_v55 = vmul.f32 0.4, %v10025_v62  ;;  %v9642_v57 = vmax.f32 %v9514_v38, 0.0  ;;  %v6329_v11 = vsel %vm2942_vm3, %v6326_v0, %v6328_v2  ;;  %v9128_v37 = vsel %vm2942_vm3, %v9125_v59, %v9127_v14 }
 0xbda   : > { %v7997_v21 = vsel %vm1812_vm2, %v7994_v60, %v7996_v56  ;;  %v6585_v51 = vadd.f32 %v6329_v11, %v14243_v5 }
 0xbdb   : > { %10281 = vst [vmem:[%s14274_s11 + $0x3e0] sm:$0xff] %v10153_v55  ;;  %v9770_v49 = vmin.f32 %v9642_v57, 0.4  ;;  %v8254_v9 = vadd.f32 %v7997_v21, %v7125_v1 }
 0xbdc   : > { %v7126_v43 = vadd.f32 %v6995_v34, %v6585_v51 }
 0xbdd   : > { %v9898_v36 = vmul.f32 2.5, %v9770_v49  ;;  %v9383_v52 = vadd.f32 %v9126_v33, %v8254_v9  ;;  %v6997_v44 = vpop.f32.mrf.mxu2 }
 0xbdf   : > { %v10026_v46 = vfloor.f32 %v9898_v36  ;;  %v9515_v48 = vadd.f32 %v11400_v18, %v9383_v52  ;;  %v7549_v35 = vpop.f32.mrf.mxu3 }
 0xbe0   : > { %v7998_v20 = vrot.slane %v7549_v35, 1 }
 0xbe1   : > { %v10154_v3 = vmul.f32 0.4, %v10026_v46  ;;  %v9643_v50 = vmax.f32 %v9515_v48, 0.0 }
 0xbe2   : > { %v7999_v13 = vsel %vm1812_vm2, %v7996_v56, %v7998_v20 }
 0xbe3   : > { %10282 = vst [vmem:[%s14274_s11 + $0x3e8] sm:$0xff] %v10154_v3  ;;  %v9771_v5 = vmin.f32 %v9643_v50, 0.4  ;;  %v8255_v25 = vadd.f32 %v7999_v13, %v7126_v43 }
 0xbe5   : > { %v9899_v63 = vmul.f32 2.5, %v9771_v5  ;;  %v9384_v31 = vadd.f32 %v9128_v37, %v8255_v25 }
 0xbe7   : > { %v10027_v16 = vfloor.f32 %v9899_v63  ;;  %v9516_v61 = vadd.f32 %v11400_v18, %v9384_v31 }
 0xbe9   : > { %v10155_v40 = vmul.f32 0.4, %v10027_v16  ;;  %v9644_v10 = vmax.f32 %v9516_v61, 0.0 }
 0xbeb   : > { %10283 = vst [vmem:[%s14274_s11 + $0x3f0] sm:$0xff] %v10155_v40  ;;  %v9772_v12 = vmin.f32 %v9644_v10, 0.4 }
 0xbed   : > { %v9900_v39 = vmul.f32 2.5, %v9772_v12 }
 0xbef   : > { %v10028_v29 = vfloor.f32 %v9900_v39 }
 0xbf1   : > { %v10156_v7 = vmul.f32 0.4, %v10028_v29 }
 0xbf3   : > { %10284 = vst [vmem:[%s14274_s11 + $0x3f8] sm:$0xff] %v10156_v7 }
 0xbf4   : > { %11428 = shalt.err (!%p11425_p5)
}
 0xbf5   : > { %s11481_s9 = smov 128   ;;  %s11482_s11 = smov 8  }
 0xbf6   : > { %11212 = dma.vmem_to_hbm [thread:$0]  (%p11543_p4), %s10300_s19, 16384, %s10302_s21, %s10286_s26, %s11481_s9, %s11481_s9, %s11482_s11  }
 0xbf7 PF: > { %p11218_p6 = scmp.ge.s32.totalorder %s11479_s17, 2  ;;  %s10316_s23 = sand.u32 1, %s11459_s12  }
 0xbf8   : > { %s10317_s6 = scalar_lea.sflag [#allocation3], %s10316_s23 }
 0xbf9   : > { %p11215_p7 = pnand %p11218_p6, %p11550_p8 }
 0xbfb   : > { %p11216_p9 = pneg %p11215_p7 }
 0xbfd   : > { %11454 = dma.done.wait (%p11216_p9), %s10317_s6, 16384  }
 0xbfe   : > { %11456 = vsyncadd (%p11216_p9), %s10317_s6, 4294950912  ;;  %s16_s17 = sadd.s32 1, %s11479_s17   ;;  %s16709_s12 = smov %s11463_s13 }
 0xbff   : > { %p13_p10 = scmp.ge.s32.totalorder %s16_s17, 4   ;;  %s16710_s13 = smov %s11467_s14 }
 0xc00   : > { %s16711_s14 = smov %s11556_s25  ;;  %s16712_s15 = smov %s11475_s16 }
 0xc01   : > { %s16713_s16 = smov %s16715_s20  ;;  %15 = sbr.rel (!%p13_p10) target bundleno = 4 (0x4), region = 81 }
 0xc06   :  { %10323 = vsyncpa [#allocation3], 1 }
 0xc07   :  { %10325 = vsyncpa [#allocation3 + $0x1], 1 }

</bundles_post_ra>
